<compile_context>
chip_gen: v5e
topology: v5e:2x2
jax: 0.10.0
libtpu: 0.0.40
codegen_flags: <defaults>
</compile_context>

<pallas_src>
import math
from functools import partial

import jax
import jax.numpy as jnp
from jax.experimental import pallas as pl
from jax.experimental.pallas import tpu as pltpu


# ----------------------------------------------------------------------------
# in-kernel helpers
# ----------------------------------------------------------------------------
_SQRT_2_OVER_PI = math.sqrt(2.0 / math.pi)


def _gelu_tanh(x):
    # tanh-approx GELU (EUP tanh); fused into kernel epilogues.
    return 0.5 * x * (1.0 + jnp.tanh(_SQRT_2_OVER_PI * (x + 0.044715 * x * x * x)))


_CUBIC = jnp.array(
    [-0.01171875, -0.03515625, 0.11328125, 0.43359375,
     0.43359375, 0.11328125, -0.03515625, -0.01171875], jnp.float32)


# ----------------------------------------------------------------------------
# Pallas kernels
# ----------------------------------------------------------------------------
def _linear_kernel(x_ref, w_ref, b_ref, o_ref, *, act):
    x = x_ref[...].astype(jnp.bfloat16)                       # bf16 into the MXU
    y = jnp.dot(x, w_ref[...], preferred_element_type=jnp.float32) + b_ref[...]
    if act == "gelu":
        y = _gelu_tanh(y)
    o_ref[...] = y


def linear_pallas(x, w, b, act=None, tm=512):
    """y = act(x @ w + b).  x: (..., K) f32, w: (K, N) bf16, b: (1, N) f32."""
    lead = x.shape[:-1]
    K = x.shape[-1]
    N = w.shape[1]
    x2 = x.reshape(-1, K)
    M = x2.shape[0]
    TM = M if M <= tm else tm                                  # tm multiple of 8
    out = pl.pallas_call(
        partial(_linear_kernel, act=act),
        grid=(pl.cdiv(M, TM),),
        in_specs=[
            pl.BlockSpec((TM, K), lambda i: (i, 0)),
            pl.BlockSpec((K, N), lambda i: (0, 0)),
            pl.BlockSpec((1, N), lambda i: (0, 0)),
        ],
        out_specs=pl.BlockSpec((TM, N), lambda i: (i, 0)),
        out_shape=jax.ShapeDtypeStruct((M, N), jnp.float32),
        compiler_params=pltpu.CompilerParams(dimension_semantics=("parallel",)),
    )(x2, w, b)
    return out.reshape(*lead, N)


def _glu_kernel(x_ref, wa_ref, wb_ref, ba_ref, bb_ref, o_ref):
    x = x_ref[...].astype(jnp.bfloat16)
    a = jnp.dot(x, wa_ref[...], preferred_element_type=jnp.float32) + ba_ref[...]
    g = jnp.dot(x, wb_ref[...], preferred_element_type=jnp.float32) + bb_ref[...]
    o_ref[...] = a * jax.nn.sigmoid(g)


def linear_glu_pallas(x, wa, wb, ba, bb, tm=512):
    """nn.Linear(d, 2d) + nn.GLU(dim=-1); halves kept as two lane-aligned dots."""
    lead = x.shape[:-1]
    K = x.shape[-1]
    N = wa.shape[1]
    x2 = x.reshape(-1, K)
    M = x2.shape[0]
    TM = M if M <= tm else tm
    out = pl.pallas_call(
        _glu_kernel,
        grid=(pl.cdiv(M, TM),),
        in_specs=[
            pl.BlockSpec((TM, K), lambda i: (i, 0)),
            pl.BlockSpec((K, N), lambda i: (0, 0)),
            pl.BlockSpec((K, N), lambda i: (0, 0)),
            pl.BlockSpec((1, N), lambda i: (0, 0)),
            pl.BlockSpec((1, N), lambda i: (0, 0)),
        ],
        out_specs=pl.BlockSpec((TM, N), lambda i: (i, 0)),
        out_shape=jax.ShapeDtypeStruct((M, N), jnp.float32),
        compiler_params=pltpu.CompilerParams(dimension_semantics=("parallel",)),
    )(x2, wa, wb, ba, bb)
    return out.reshape(*lead, N)


def _conv_gn_gelu_kernel(*refs, ksize, eps, n, has_res):
    if has_res:
        x_ref, w_ref, b_ref, gw_ref, gb_ref, r_ref, o_ref = refs
    else:
        x_ref, w_ref, b_ref, gw_ref, gb_ref, o_ref = refs
    L = o_ref.shape[1]
    C = o_ref.shape[2]
    xs = x_ref[0]                                             # (L + ksize - 1, Cin) f32
    acc = jnp.zeros((L, C), jnp.float32) + b_ref[...]
    for k in range(ksize):                                    # fused im2col: shifted MXU dots
        acc = acc + jnp.dot(xs[k:k + L, :].astype(jnp.bfloat16), w_ref[k],
                            preferred_element_type=jnp.float32)
    # GroupNorm(num_groups=1): normalize over all (L, C) of this batch element.
    mean = jnp.sum(jnp.sum(acc, axis=-1, keepdims=True), axis=0, keepdims=True) / n
    xc = acc - mean
    var = jnp.sum(jnp.sum(xc * xc, axis=-1, keepdims=True), axis=0, keepdims=True) / n
    h = _gelu_tanh(xc * jax.lax.rsqrt(var + eps) * gw_ref[...] + gb_ref[...])
    if has_res:
        h = h + r_ref[0]
    o_ref[0] = h


def conv1d_gn_gelu_pallas(x, w, b, gw, gb, residual=None, eps=1e-5):
    """'same' Conv1d(k, stride 1) + GroupNorm(1) + GELU (+ residual), fused.
    x: (B, L, Cin) f32, w: (K, Cin, Cout) bf16, b/gw/gb: (1, Cout) f32."""
    B, L, Cin = x.shape
    K, _, Cout = w.shape
    pad = K // 2
    xp = jnp.pad(x, ((0, 0), (pad, pad), (0, 0)))
    inputs = [xp, w, b, gw, gb]
    in_specs = [
        pl.BlockSpec((1, L + 2 * pad, Cin), lambda i: (i, 0, 0)),
        pl.BlockSpec((K, Cin, Cout), lambda i: (0, 0, 0)),
        pl.BlockSpec((1, Cout), lambda i: (0, 0)),
        pl.BlockSpec((1, Cout), lambda i: (0, 0)),
        pl.BlockSpec((1, Cout), lambda i: (0, 0)),
    ]
    if residual is not None:
        inputs.append(residual)
        in_specs.append(pl.BlockSpec((1, L, Cout), lambda i: (i, 0, 0)))
    return pl.pallas_call(
        partial(_conv_gn_gelu_kernel, ksize=K, eps=eps, n=float(L * Cout),
                has_res=residual is not None),
        grid=(B,),
        in_specs=in_specs,
        out_specs=pl.BlockSpec((1, L, Cout), lambda i: (i, 0, 0)),
        out_shape=jax.ShapeDtypeStruct((B, L, Cout), jnp.float32),
        compiler_params=pltpu.CompilerParams(dimension_semantics=("parallel",)),
    )(*inputs)


def _gconv_kernel(u_ref, kt_ref, o_ref):
    # u: (1, B, L) f32, kt: (1, L, L) bf16 circular-Toeplitz (D*u folded in diag).
    u = u_ref[0].astype(jnp.bfloat16)
    y = jnp.dot(u, kt_ref[0], preferred_element_type=jnp.float32)   # MXU long conv
    o_ref[0] = _gelu_tanh(y)                                        # GConv activation fused


def gconv_pallas(u, kmat_t):
    """y[b,t,h] = gelu( sum_s u[b,s,h] * kmat_t[h,s,t] ); equals the torch
    rfft/irfft(n=2L) long conv + D*u skip + GELU."""
    B, L, H = u.shape
    u_h = jnp.transpose(u, (2, 0, 1))                         # (H, B, L): L lane-dense
    y = pl.pallas_call(
        _gconv_kernel,
        grid=(H,),
        in_specs=[
            pl.BlockSpec((1, B, L), lambda h: (h, 0, 0)),
            pl.BlockSpec((1, L, L), lambda h: (h, 0, 0)),
        ],
        out_specs=pl.BlockSpec((1, B, L), lambda h: (h, 0, 0)),
        out_shape=jax.ShapeDtypeStruct((H, B, L), jnp.float32),
        compiler_params=pltpu.CompilerParams(dimension_semantics=("parallel",)),
    )(u_h, kmat_t)
    return jnp.transpose(y, (1, 2, 0))


def _ln_res_kernel(x_ref, r_ref, w_ref, b_ref, o_ref, *, eps):
    x = x_ref[...] + r_ref[...]                               # fused residual add
    mean = jnp.mean(x, axis=-1, keepdims=True)
    xc = x - mean
    var = jnp.mean(xc * xc, axis=-1, keepdims=True)
    o_ref[...] = xc * jax.lax.rsqrt(var + eps) * w_ref[...] + b_ref[...]


def layernorm_res_pallas(x, res, w, b, eps=1e-5, tm=512):
    lead = x.shape[:-1]
    D = x.shape[-1]
    x2 = x.reshape(-1, D)
    r2 = res.reshape(-1, D)
    M = x2.shape[0]
    TM = M if M <= tm else tm
    out = pl.pallas_call(
        partial(_ln_res_kernel, eps=eps),
        grid=(pl.cdiv(M, TM),),
        in_specs=[
            pl.BlockSpec((TM, D), lambda i: (i, 0)),
            pl.BlockSpec((TM, D), lambda i: (i, 0)),
            pl.BlockSpec((1, D), lambda i: (0, 0)),
            pl.BlockSpec((1, D), lambda i: (0, 0)),
        ],
        out_specs=pl.BlockSpec((TM, D), lambda i: (i, 0)),
        out_shape=jax.ShapeDtypeStruct((M, D), jnp.float32),
        compiler_params=pltpu.CompilerParams(dimension_semantics=("parallel",)),
    )(x2, r2, w, b)
    return out.reshape(*lead, D)


# ----------------------------------------------------------------------------
# FIR resampling (Downsample1d / Upsample1d, 'cubic', transpose=True) -- glue
# TODO(synk): small 8-tap FIR kept in plain JAX (negligible vs the conv/matmul path).
# ----------------------------------------------------------------------------
def fir_downsample(x):
    B, L, C = x.shape
    xp = jnp.pad(x, ((0, 0), (3, 3), (0, 0)), mode="reflect")
    idx = 2 * jnp.arange(L // 2)[:, None] + jnp.arange(8)[None, :]
    patches = xp[:, idx, :]                                   # (B, L//2, 8, C)
    return jnp.einsum("blkc,k->blc", patches, _CUBIC)


def fir_upsample(x):
    # conv_transpose1d(stride=2, padding=7) == correlate(dilate_2(pad_reflect_2(x)), flip(k*2))
    B, L, C = x.shape
    kern = _CUBIC * 2.0
    xp = jnp.pad(x, ((0, 0), (2, 2), (0, 0)), mode="reflect")
    Lp = L + 4
    xd = jnp.zeros((B, 2 * Lp - 1, C), x.dtype).at[:, ::2, :].set(xp)
    wf = kern[::-1]
    idx = jnp.arange(2 * L)[:, None] + jnp.arange(8)[None, :]
    patches = xd[:, idx, :]                                   # (B, 2L, 8, C)
    return jnp.einsum("blkc,k->blc", patches, wf)


# ----------------------------------------------------------------------------
# GConv operator construction (mode='cat_randn', bidirectional, channels=1)
# -- hoisted out of the forward (input-independent).
# ----------------------------------------------------------------------------
def _interp_linear_1d(x, scale):
    """F.interpolate(mode='linear', align_corners=False, scale_factor=scale)."""
    if scale == 1:
        return x
    N = x.shape[-1]
    M = N * scale
    j = jnp.arange(M, dtype=jnp.float32)
    real = jnp.maximum((j + 0.5) / scale - 0.5, 0.0)
    i0 = jnp.floor(real).astype(jnp.int32)
    i1 = jnp.minimum(i0 + 1, N - 1)
    lam = real - i0.astype(jnp.float32)
    return x[..., i0] * (1.0 - lam) + x[..., i1] * lam


def build_gconv_kmat_t(p, L, multiplier=2.0, init_scale=0):
    """(H, L, L) bf16 operator: kmat_t[h,s,t] = k_2L[h, (t-s) mod 2L], where
    k_2L = [k_causal, flip(k_anticausal)] / ||k||, with D*u folded into the
    (t==s) diagonal.  Exactly equivalent to rfft/irfft with n=2L."""
    kernels, D = p["kernels"], p["D"]
    num_scales = len(kernels)
    pieces = []
    for i, kp in enumerate(kernels):                          # kp: (2, H, kernel_dim)
        s = 2 ** (max(0, i - 1) + init_scale)
        pieces.append(_interp_linear_1d(kp, s) * (multiplier ** (num_scales - i - 1)))
    k = jnp.concatenate(pieces, axis=-1)                      # (2, H, T)
    knorm = jnp.sqrt(jnp.sum(k * k, axis=-1, keepdims=True))  # norm of FULL kernel
    T = k.shape[-1]
    if T > L:
        k = k[..., :L]
    elif T < L:
        k = jnp.pad(k, ((0, 0), (0, 0), (0, L - T)))
    k = k / knorm
    k0, k1 = k[0], k[1]                                       # causal / anti-causal halves
    kfull = jnp.concatenate([k0, k1[:, ::-1]], axis=-1)       # (H, 2L)
    kfull = kfull.at[:, 0].add(D[0])                          # fold the D*u skip term
    idx = (jnp.arange(L)[None, :] - jnp.arange(L)[:, None]) % (2 * L)   # idx[s, t]
    return kfull[:, idx].astype(jnp.bfloat16)                 # (H, L, L)


# ----------------------------------------------------------------------------
# blocks (forward)
# ----------------------------------------------------------------------------
def res_conv_block(x, p):
    if p["skip_w"] is not None:                               # 1x1 conv, no bias
        skip = linear_pallas(x, p["skip_w"], p["skip_b"])
    else:
        skip = x
    h = conv1d_gn_gelu_pallas(x, p["conv1_w"], p["conv1_b"], p["gn1_w"], p["gn1_b"])
    h = conv1d_gn_gelu_pallas(h, p["conv2_w"], p["conv2_b"], p["gn2_w"], p["gn2_b"],
                              residual=skip)
    return h


def sgconv_block(x, p):
    h = linear_glu_pallas(x, p["ff1_wa"], p["ff1_wb"], p["ff1_ba"], p["ff1_bb"])
    y = gconv_pallas(h, p["kmat_t"])                          # long conv + D*u + GELU
    y = linear_pallas(y, p["out_w"], p["out_b"])              # GConv output_linear
    y = linear_pallas(y, p["ff2_w"], p["ff2_b"], act="gelu")  # ff2 + GELU fused
    return layernorm_res_pallas(y, x, p["ln_w"], p["ln_b"])   # + residual, LayerNorm


def hybrid_conv_block(x, p):
    return sgconv_block(res_conv_block(x, p["res"]), p["sg"])


def hybrid_conv_unet(x, params, depth):
    outs = []
    for i in range(depth):
        x = hybrid_conv_block(x, params["down"][i])
        outs.append(x)
        x = fir_downsample(x)
    x = hybrid_conv_block(x, params["mid"])
    for i in range(depth):
        x = fir_upsample(x)
        x = jnp.concatenate([x, outs[-1 - i]], axis=-1)
        x = hybrid_conv_block(x, params["up"][i])
    return x


# ----------------------------------------------------------------------------
# deterministic parameter init (synthetic; shapes follow the module __init__)
# ----------------------------------------------------------------------------
class KeyGen:
    def __init__(self, key):
        self.key = key

    def __call__(self):
        self.key, sub = jax.random.split(self.key)
        return sub


def init_linear(kg, d_in, d_out):
    bound = 1.0 / math.sqrt(d_in)
    w = jax.random.uniform(kg(), (d_in, d_out), jnp.float32, -bound, bound)
    b = jax.random.uniform(kg(), (d_out,), jnp.float32, -bound, bound)
    return w, b


def init_conv1d(kg, c_in, c_out, k, bias=True):
    bound = 1.0 / math.sqrt(c_in * k)
    w = jax.random.uniform(kg(), (c_out, c_in, k), jnp.float32, -bound, bound)
    b = jax.random.uniform(kg(), (c_out,), jnp.float32, -bound, bound) if bias else None
    return w, b


def init_res_conv_block(kg, c_in, c_mid, c_out):
    p = {}
    w1, b1 = init_conv1d(kg, c_in, c_mid, 5)
    p["conv1_w"] = jnp.transpose(w1, (2, 1, 0)).astype(jnp.bfloat16)   # (K, Cin, Cout)
    p["conv1_b"] = b1.reshape(1, c_mid)
    p["gn1_w"] = jnp.ones((1, c_mid), jnp.float32)
    p["gn1_b"] = jnp.zeros((1, c_mid), jnp.float32)
    w2, b2 = init_conv1d(kg, c_mid, c_out, 5)
    p["conv2_w"] = jnp.transpose(w2, (2, 1, 0)).astype(jnp.bfloat16)
    p["conv2_b"] = b2.reshape(1, c_out)
    p["gn2_w"] = jnp.ones((1, c_out), jnp.float32)
    p["gn2_b"] = jnp.zeros((1, c_out), jnp.float32)
    if c_in != c_out:
        ws, _ = init_conv1d(kg, c_in, c_out, 1, bias=False)
        p["skip_w"] = ws[:, :, 0].T.astype(jnp.bfloat16)                # (Cin, Cout)
        p["skip_b"] = jnp.zeros((1, c_out), jnp.float32)
    else:
        p["skip_w"] = None
        p["skip_b"] = None
    return p


def init_sgconv_block(kg, d, l_max, channels=1, kernel_dim=64):
    assert channels == 1, "only channels=1 (HybridConvUnet default) is implemented"
    num_scales = 1 + math.ceil(math.log2(l_max / kernel_dim))
    assert num_scales >= 1, "l_max too small for kernel_dim=64"
    p = {}
    w1, b1 = init_linear(kg, d, 2 * d)                        # ff1 (Linear(d, 2d)) + GLU
    p["ff1_wa"] = w1[:, :d].astype(jnp.bfloat16)
    p["ff1_wb"] = w1[:, d:].astype(jnp.bfloat16)
    p["ff1_ba"] = b1[:d].reshape(1, d)
    p["ff1_bb"] = b1[d:].reshape(1, d)
    p["D"] = jax.random.normal(kg(), (channels, d), jnp.float32)
    # bidirectional doubles the kernel channel dim
    p["kernels"] = [jax.random.normal(kg(), (2 * channels, d, kernel_dim), jnp.float32)
                    for _ in range(num_scales)]
    wo, bo = init_linear(kg, d * channels, d)                 # GConv output_linear
    p["out_w"] = wo.astype(jnp.bfloat16)
    p["out_b"] = bo.reshape(1, d)
    w2, b2 = init_linear(kg, d, d)                            # ff2
    p["ff2_w"] = w2.astype(jnp.bfloat16)
    p["ff2_b"] = b2.reshape(1, d)
    p["ln_w"] = jnp.ones((1, d), jnp.float32)
    p["ln_b"] = jnp.zeros((1, d), jnp.float32)
    return p


def init_hybrid_block(kg, c_in, c_out, l_max):
    return {"res": init_res_conv_block(kg, c_in, c_in * 2, c_out),
            "sg": init_sgconv_block(kg, c_out, l_max)}


def init_hybrid_conv_unet(key, input_dim, depth, l_max):
    kg = KeyGen(key)
    params = {"down": [], "up": []}
    d, lm = input_dim, l_max
    for _ in range(depth):
        out_d = int(d * 1.5)
        if out_d % 2 == 1:
            out_d += 1
        params["down"].append(init_hybrid_block(kg, d, out_d, lm))
        d = out_d
        lm //= 2
        if lm < 2:
            raise ValueError("Initial l_max is too small for the given depth.")
    params["mid"] = init_hybrid_block(kg, d, d, lm)
    for _ in reversed(range(depth)):
        out_d = int(d / 1.5)
        params["up"].append(init_hybrid_block(kg, d * 2, out_d, lm))
        d = out_d
        lm *= 2
    return params


def prepare_kmats(params, seq_len, depth):
    """Hoist the input-independent GConv Toeplitz construction out of the forward."""
    lm = seq_len
    for i in range(depth):
        params["down"][i]["sg"]["kmat_t"] = build_gconv_kmat_t(params["down"][i]["sg"], lm)
        lm //= 2
    params["mid"]["sg"]["kmat_t"] = build_gconv_kmat_t(params["mid"]["sg"], lm)
    for i in range(depth):
        lm *= 2
        params["up"][i]["sg"]["kmat_t"] = build_gconv_kmat_t(params["up"][i]["sg"], lm)
    return params


# ----------------------------------------------------------------------------
if __name__ == "__main__":
    key = jax.random.PRNGKey(0)
    pkey, xkey = jax.random.split(key)

    input_dim, depth = 4, 1
    l_max = 256                    # gconv_args['l_max'] (small, test-friendly)
    B, L = 2, 32                   # sequence length must be even (down/upsample)

    params = init_hybrid_conv_unet(pkey, input_dim, depth, l_max)
    params = prepare_kmats(params, L, depth)
    x = jax.random.normal(xkey, (B, L, input_dim), jnp.float32)

    fwd = jax.jit(hybrid_conv_unet, static_argnums=(2,))
    y = fwd(x, params, depth)
    jax.block_until_ready(y)
    assert y.shape == (B, L, input_dim), y.shape
    assert bool(jnp.all(jnp.isfinite(y)))
    print("KERNEL_OK")
</pallas_src>

<mosaic_0001>
module attributes {stable_mosaic.version = 11 : i64} {
  func.func @_conv_gn_gelu_kernel(%arg0: i32, %arg1: memref<1x36x4xf32, #tpu.memory_space<vmem>>, %arg2: memref<5x4x8xbf16, #tpu.memory_space<vmem>>, %arg3: memref<1x8xf32, #tpu.memory_space<vmem>>, %arg4: memref<1x8xf32, #tpu.memory_space<vmem>>, %arg5: memref<1x8xf32, #tpu.memory_space<vmem>>, %arg6: memref<1x32x8xf32, #tpu.memory_space<vmem>>) attributes {dimension_semantics = [#tpu.dimension_semantics<parallel>], iteration_bounds = array<i64: 2>, scalar_prefetch = 0 : i64, scratch_operands = 0 : i64, tpu.core_type = #tpu.core_type<tc>, window_params = [{transform_indices = @transform_0, window_bounds = array<i64: 1, 36, 4>}, {pipeline_mode = #tpu.pipeline_mode<synchronous>, transform_indices = @transform_1, window_bounds = array<i64: 5, 4, 8>}, {pipeline_mode = #tpu.pipeline_mode<synchronous>, transform_indices = @transform_2, window_bounds = array<i64: 1, 8>}, {pipeline_mode = #tpu.pipeline_mode<synchronous>, transform_indices = @transform_3, window_bounds = array<i64: 1, 8>}, {pipeline_mode = #tpu.pipeline_mode<synchronous>, transform_indices = @transform_4, window_bounds = array<i64: 1, 8>}, {transform_indices = @transform_5, window_bounds = array<i64: 1, 32, 8>}]} {
    %c0 = arith.constant 0 : index
    %c0_0 = arith.constant 0 : index
    %c0_1 = arith.constant 0 : index
    %0 = vector.load %arg1[%c0, %c0_0, %c0_1] : memref<1x36x4xf32, #tpu.memory_space<vmem>>, vector<1x36x4xf32>
    %1 = vector.shape_cast %0 : vector<1x36x4xf32> to vector<36x4xf32>
    %cst = arith.constant 0.000000e+00 : f32
    %2 = vector.broadcast %cst : f32 to vector<32x8xf32>
    %c0_2 = arith.constant 0 : index
    %c0_3 = arith.constant 0 : index
    %3 = vector.load %arg3[%c0_2, %c0_3] : memref<1x8xf32, #tpu.memory_space<vmem>>, vector<1x8xf32>
    %4 = vector.broadcast %3 : vector<1x8xf32> to vector<32x8xf32>
    %5 = arith.addf %2, %4 : vector<32x8xf32>
    %6 = vector.extract_strided_slice %1 {offsets = [0, 0], sizes = [32, 4], strides = [1, 1]} : vector<36x4xf32> to vector<32x4xf32>
    %7 = arith.truncf %6 : vector<32x4xf32> to vector<32x4xbf16>
    %c0_4 = arith.constant 0 : index
    %c0_5 = arith.constant 0 : index
    %c0_6 = arith.constant 0 : index
    %8 = vector.load %arg2[%c0_4, %c0_5, %c0_6] : memref<5x4x8xbf16, #tpu.memory_space<vmem>>, vector<1x4x8xbf16>
    %9 = vector.shape_cast %8 : vector<1x4x8xbf16> to vector<4x8xbf16>
    %cst_7 = arith.constant dense<0.000000e+00> : vector<32x8xf32>
    %10 = tpu.matmul %7, %9, %cst_7 {dimension_numbers = #tpu.dot_dimension_numbers<[1], [0], [0], [1], [0, 0, 1, 1], [], []>} : vector<32x4xbf16>, vector<4x8xbf16>, vector<32x8xf32> -> vector<32x8xf32>
    %11 = arith.addf %5, %10 : vector<32x8xf32>
    %12 = vector.extract_strided_slice %1 {offsets = [1, 0], sizes = [32, 4], strides = [1, 1]} : vector<36x4xf32> to vector<32x4xf32>
    %13 = arith.truncf %12 : vector<32x4xf32> to vector<32x4xbf16>
    %c1 = arith.constant 1 : index
    %c0_8 = arith.constant 0 : index
    %c0_9 = arith.constant 0 : index
    %14 = vector.load %arg2[%c1, %c0_8, %c0_9] : memref<5x4x8xbf16, #tpu.memory_space<vmem>>, vector<1x4x8xbf16>
    %15 = vector.shape_cast %14 : vector<1x4x8xbf16> to vector<4x8xbf16>
    %cst_10 = arith.constant dense<0.000000e+00> : vector<32x8xf32>
    %16 = tpu.matmul %13, %15, %cst_10 {dimension_numbers = #tpu.dot_dimension_numbers<[1], [0], [0], [1], [0, 0, 1, 1], [], []>} : vector<32x4xbf16>, vector<4x8xbf16>, vector<32x8xf32> -> vector<32x8xf32>
    %17 = arith.addf %11, %16 : vector<32x8xf32>
    %18 = vector.extract_strided_slice %1 {offsets = [2, 0], sizes = [32, 4], strides = [1, 1]} : vector<36x4xf32> to vector<32x4xf32>
    %19 = arith.truncf %18 : vector<32x4xf32> to vector<32x4xbf16>
    %c2 = arith.constant 2 : index
    %c0_11 = arith.constant 0 : index
    %c0_12 = arith.constant 0 : index
    %20 = vector.load %arg2[%c2, %c0_11, %c0_12] : memref<5x4x8xbf16, #tpu.memory_space<vmem>>, vector<1x4x8xbf16>
    %21 = vector.shape_cast %20 : vector<1x4x8xbf16> to vector<4x8xbf16>
    %cst_13 = arith.constant dense<0.000000e+00> : vector<32x8xf32>
    %22 = tpu.matmul %19, %21, %cst_13 {dimension_numbers = #tpu.dot_dimension_numbers<[1], [0], [0], [1], [0, 0, 1, 1], [], []>} : vector<32x4xbf16>, vector<4x8xbf16>, vector<32x8xf32> -> vector<32x8xf32>
    %23 = arith.addf %17, %22 : vector<32x8xf32>
    %24 = vector.extract_strided_slice %1 {offsets = [3, 0], sizes = [32, 4], strides = [1, 1]} : vector<36x4xf32> to vector<32x4xf32>
    %25 = arith.truncf %24 : vector<32x4xf32> to vector<32x4xbf16>
    %c3 = arith.constant 3 : index
    %c0_14 = arith.constant 0 : index
    %c0_15 = arith.constant 0 : index
    %26 = vector.load %arg2[%c3, %c0_14, %c0_15] : memref<5x4x8xbf16, #tpu.memory_space<vmem>>, vector<1x4x8xbf16>
    %27 = vector.shape_cast %26 : vector<1x4x8xbf16> to vector<4x8xbf16>
    %cst_16 = arith.constant dense<0.000000e+00> : vector<32x8xf32>
    %28 = tpu.matmul %25, %27, %cst_16 {dimension_numbers = #tpu.dot_dimension_numbers<[1], [0], [0], [1], [0, 0, 1, 1], [], []>} : vector<32x4xbf16>, vector<4x8xbf16>, vector<32x8xf32> -> vector<32x8xf32>
    %29 = arith.addf %23, %28 : vector<32x8xf32>
    %30 = vector.extract_strided_slice %1 {offsets = [4, 0], sizes = [32, 4], strides = [1, 1]} : vector<36x4xf32> to vector<32x4xf32>
    %31 = arith.truncf %30 : vector<32x4xf32> to vector<32x4xbf16>
    %c4 = arith.constant 4 : index
    %c0_17 = arith.constant 0 : index
    %c0_18 = arith.constant 0 : index
    %32 = vector.load %arg2[%c4, %c0_17, %c0_18] : memref<5x4x8xbf16, #tpu.memory_space<vmem>>, vector<1x4x8xbf16>
    %33 = vector.shape_cast %32 : vector<1x4x8xbf16> to vector<4x8xbf16>
    %cst_19 = arith.constant dense<0.000000e+00> : vector<32x8xf32>
    %34 = tpu.matmul %31, %33, %cst_19 {dimension_numbers = #tpu.dot_dimension_numbers<[1], [0], [0], [1], [0, 0, 1, 1], [], []>} : vector<32x4xbf16>, vector<4x8xbf16>, vector<32x8xf32> -> vector<32x8xf32>
    %35 = arith.addf %29, %34 : vector<32x8xf32>
    %cst_20 = arith.constant dense<0.000000e+00> : vector<32xf32>
    %36 = vector.multi_reduction <add>, %35, %cst_20 [1] : vector<32x8xf32> to vector<32xf32>
    %37 = vector.shape_cast %36 : vector<32xf32> to vector<32x1xf32>
    %cst_21 = arith.constant dense<0.000000e+00> : vector<1xf32>
    %38 = vector.multi_reduction <add>, %37, %cst_21 [0] : vector<32x1xf32> to vector<1xf32>
    %39 = vector.shape_cast %38 : vector<1xf32> to vector<1x1xf32>
    %cst_22 = arith.constant 2.560000e+02 : f32
    %40 = vector.broadcast %cst_22 : f32 to vector<1x1xf32>
    %41 = arith.divf %39, %40 : vector<1x1xf32>
    %42 = vector.broadcast %41 : vector<1x1xf32> to vector<32x8xf32>
    %43 = arith.subf %35, %42 : vector<32x8xf32>
    %44 = arith.mulf %43, %43 : vector<32x8xf32>
    %cst_23 = arith.constant dense<0.000000e+00> : vector<32xf32>
    %45 = vector.multi_reduction <add>, %44, %cst_23 [1] : vector<32x8xf32> to vector<32xf32>
    %46 = vector.shape_cast %45 : vector<32xf32> to vector<32x1xf32>
    %cst_24 = arith.constant dense<0.000000e+00> : vector<1xf32>
    %47 = vector.multi_reduction <add>, %46, %cst_24 [0] : vector<32x1xf32> to vector<1xf32>
    %48 = vector.shape_cast %47 : vector<1xf32> to vector<1x1xf32>
    %cst_25 = arith.constant 2.560000e+02 : f32
    %49 = vector.broadcast %cst_25 : f32 to vector<1x1xf32>
    %50 = arith.divf %48, %49 : vector<1x1xf32>
    %cst_26 = arith.constant 9.99999974E-6 : f32
    %51 = vector.broadcast %cst_26 : f32 to vector<1x1xf32>
    %52 = arith.addf %50, %51 : vector<1x1xf32>
    %53 = math.rsqrt %52 : vector<1x1xf32>
    %54 = vector.broadcast %53 : vector<1x1xf32> to vector<32x8xf32>
    %55 = arith.mulf %43, %54 : vector<32x8xf32>
    %c0_27 = arith.constant 0 : index
    %c0_28 = arith.constant 0 : index
    %56 = vector.load %arg4[%c0_27, %c0_28] : memref<1x8xf32, #tpu.memory_space<vmem>>, vector<1x8xf32>
    %57 = vector.broadcast %56 : vector<1x8xf32> to vector<32x8xf32>
    %58 = arith.mulf %55, %57 : vector<32x8xf32>
    %c0_29 = arith.constant 0 : index
    %c0_30 = arith.constant 0 : index
    %59 = vector.load %arg5[%c0_29, %c0_30] : memref<1x8xf32, #tpu.memory_space<vmem>>, vector<1x8xf32>
    %60 = vector.broadcast %59 : vector<1x8xf32> to vector<32x8xf32>
    %61 = arith.addf %58, %60 : vector<32x8xf32>
    %cst_31 = arith.constant 5.000000e-01 : f32
    %62 = vector.broadcast %cst_31 : f32 to vector<32x8xf32>
    %63 = arith.mulf %62, %61 : vector<32x8xf32>
    %cst_32 = arith.constant 4.471500e-02 : f32
    %64 = vector.broadcast %cst_32 : f32 to vector<32x8xf32>
    %65 = arith.mulf %64, %61 : vector<32x8xf32>
    %66 = arith.mulf %65, %61 : vector<32x8xf32>
    %67 = arith.mulf %66, %61 : vector<32x8xf32>
    %68 = arith.addf %61, %67 : vector<32x8xf32>
    %cst_33 = arith.constant 0.797884583 : f32
    %69 = vector.broadcast %cst_33 : f32 to vector<32x8xf32>
    %70 = arith.mulf %69, %68 : vector<32x8xf32>
    %71 = math.tanh %70 : vector<32x8xf32>
    %cst_34 = arith.constant 1.000000e+00 : f32
    %72 = vector.broadcast %cst_34 : f32 to vector<32x8xf32>
    %73 = arith.addf %72, %71 : vector<32x8xf32>
    %74 = arith.mulf %63, %73 : vector<32x8xf32>
    %c0_35 = arith.constant 0 : index
    %c0_36 = arith.constant 0 : index
    %c0_37 = arith.constant 0 : index
    %75 = vector.load %arg6[%c0_35, %c0_36, %c0_37] : memref<1x32x8xf32, #tpu.memory_space<vmem>>, vector<1x32x8xf32>
    %76 = vector.shape_cast %75 : vector<1x32x8xf32> to vector<32x8xf32>
    %77 = vector.shape_cast %74 : vector<32x8xf32> to vector<1x32x8xf32>
    tpu.vector_store %arg6[%c0_35, %c0_36, %c0_37], %77 {strides = array<i32>} : memref<1x32x8xf32, #tpu.memory_space<vmem>>, vector<1x32x8xf32>,
    return
  }
  func.func @transform_0(%arg0: i32) -> (i32, i32, i32) {
    %c0_i32 = arith.constant 0 : i32
    %c0_i32_0 = arith.constant 0 : i32
    %c0_i32_1 = arith.constant 0 : i32
    return %arg0, %c0_i32, %c0_i32_0 : i32, i32, i32
  }
  func.func @transform_1(%arg0: i32) -> (i32, i32, i32) {
    %c0_i32 = arith.constant 0 : i32
    %c0_i32_0 = arith.constant 0 : i32
    %c0_i32_1 = arith.constant 0 : i32
    %c0_i32_2 = arith.constant 0 : i32
    return %c0_i32, %c0_i32_0, %c0_i32_1 : i32, i32, i32
  }
  func.func @transform_2(%arg0: i32) -> (i32, i32) {
    %c0_i32 = arith.constant 0 : i32
    %c0_i32_0 = arith.constant 0 : i32
    %c0_i32_1 = arith.constant 0 : i32
    return %c0_i32, %c0_i32_0 : i32, i32
  }
  func.func @transform_3(%arg0: i32) -> (i32, i32) {
    %c0_i32 = arith.constant 0 : i32
    %c0_i32_0 = arith.constant 0 : i32
    %c0_i32_1 = arith.constant 0 : i32
    return %c0_i32, %c0_i32_0 : i32, i32
  }
  func.func @transform_4(%arg0: i32) -> (i32, i32) {
    %c0_i32 = arith.constant 0 : i32
    %c0_i32_0 = arith.constant 0 : i32
    %c0_i32_1 = arith.constant 0 : i32
    return %c0_i32, %c0_i32_0 : i32, i32
  }
  func.func @transform_5(%arg0: i32) -> (i32, i32, i32) {
    %c0_i32 = arith.constant 0 : i32
    %c0_i32_0 = arith.constant 0 : i32
    %c0_i32_1 = arith.constant 0 : i32
    return %arg0, %c0_i32, %c0_i32_0 : i32, i32, i32
  }
}

module attributes {stable_mosaic.version = 11 : i64} {
  func.func @_conv_gn_gelu_kernel(%arg0: i32, %arg1: memref<1x36x8xf32, #tpu.memory_space<vmem>>, %arg2: memref<5x8x6xbf16, #tpu.memory_space<vmem>>, %arg3: memref<1x6xf32, #tpu.memory_space<vmem>>, %arg4: memref<1x6xf32, #tpu.memory_space<vmem>>, %arg5: memref<1x6xf32, #tpu.memory_space<vmem>>, %arg6: memref<1x32x6xf32, #tpu.memory_space<vmem>>, %arg7: memref<1x32x6xf32, #tpu.memory_space<vmem>>) attributes {dimension_semantics = [#tpu.dimension_semantics<parallel>], iteration_bounds = array<i64: 2>, scalar_prefetch = 0 : i64, scratch_operands = 0 : i64, tpu.core_type = #tpu.core_type<tc>, window_params = [{transform_indices = @transform_0, window_bounds = array<i64: 1, 36, 8>}, {pipeline_mode = #tpu.pipeline_mode<synchronous>, transform_indices = @transform_1, window_bounds = array<i64: 5, 8, 6>}, {pipeline_mode = #tpu.pipeline_mode<synchronous>, transform_indices = @transform_2, window_bounds = array<i64: 1, 6>}, {pipeline_mode = #tpu.pipeline_mode<synchronous>, transform_indices = @transform_3, window_bounds = array<i64: 1, 6>}, {pipeline_mode = #tpu.pipeline_mode<synchronous>, transform_indices = @transform_4, window_bounds = array<i64: 1, 6>}, {transform_indices = @transform_5, window_bounds = array<i64: 1, 32, 6>}, {transform_indices = @transform_6, window_bounds = array<i64: 1, 32, 6>}]} {
    %c0 = arith.constant 0 : index
    %c0_0 = arith.constant 0 : index
    %c0_1 = arith.constant 0 : index
    %0 = vector.load %arg1[%c0, %c0_0, %c0_1] : memref<1x36x8xf32, #tpu.memory_space<vmem>>, vector<1x36x8xf32>
    %1 = vector.shape_cast %0 : vector<1x36x8xf32> to vector<36x8xf32>
    %cst = arith.constant 0.000000e+00 : f32
    %2 = vector.broadcast %cst : f32 to vector<32x6xf32>
    %c0_2 = arith.constant 0 : index
    %c0_3 = arith.constant 0 : index
    %3 = vector.load %arg3[%c0_2, %c0_3] : memref<1x6xf32, #tpu.memory_space<vmem>>, vector<1x6xf32>
    %4 = vector.broadcast %3 : vector<1x6xf32> to vector<32x6xf32>
    %5 = arith.addf %2, %4 : vector<32x6xf32>
    %6 = vector.extract_strided_slice %1 {offsets = [0, 0], sizes = [32, 8], strides = [1, 1]} : vector<36x8xf32> to vector<32x8xf32>
    %7 = arith.truncf %6 : vector<32x8xf32> to vector<32x8xbf16>
    %c0_4 = arith.constant 0 : index
    %c0_5 = arith.constant 0 : index
    %c0_6 = arith.constant 0 : index
    %8 = vector.load %arg2[%c0_4, %c0_5, %c0_6] : memref<5x8x6xbf16, #tpu.memory_space<vmem>>, vector<1x8x6xbf16>
    %9 = vector.shape_cast %8 : vector<1x8x6xbf16> to vector<8x6xbf16>
    %cst_7 = arith.constant dense<0.000000e+00> : vector<32x6xf32>
    %10 = tpu.matmul %7, %9, %cst_7 {dimension_numbers = #tpu.dot_dimension_numbers<[1], [0], [0], [1], [0, 0, 1, 1], [], []>} : vector<32x8xbf16>, vector<8x6xbf16>, vector<32x6xf32> -> vector<32x6xf32>
    %11 = arith.addf %5, %10 : vector<32x6xf32>
    %12 = vector.extract_strided_slice %1 {offsets = [1, 0], sizes = [32, 8], strides = [1, 1]} : vector<36x8xf32> to vector<32x8xf32>
    %13 = arith.truncf %12 : vector<32x8xf32> to vector<32x8xbf16>
    %c1 = arith.constant 1 : index
    %c0_8 = arith.constant 0 : index
    %c0_9 = arith.constant 0 : index
    %14 = vector.load %arg2[%c1, %c0_8, %c0_9] : memref<5x8x6xbf16, #tpu.memory_space<vmem>>, vector<1x8x6xbf16>
    %15 = vector.shape_cast %14 : vector<1x8x6xbf16> to vector<8x6xbf16>
    %cst_10 = arith.constant dense<0.000000e+00> : vector<32x6xf32>
    %16 = tpu.matmul %13, %15, %cst_10 {dimension_numbers = #tpu.dot_dimension_numbers<[1], [0], [0], [1], [0, 0, 1, 1], [], []>} : vector<32x8xbf16>, vector<8x6xbf16>, vector<32x6xf32> -> vector<32x6xf32>
    %17 = arith.addf %11, %16 : vector<32x6xf32>
    %18 = vector.extract_strided_slice %1 {offsets = [2, 0], sizes = [32, 8], strides = [1, 1]} : vector<36x8xf32> to vector<32x8xf32>
    %19 = arith.truncf %18 : vector<32x8xf32> to vector<32x8xbf16>
    %c2 = arith.constant 2 : index
    %c0_11 = arith.constant 0 : index
    %c0_12 = arith.constant 0 : index
    %20 = vector.load %arg2[%c2, %c0_11, %c0_12] : memref<5x8x6xbf16, #tpu.memory_space<vmem>>, vector<1x8x6xbf16>
    %21 = vector.shape_cast %20 : vector<1x8x6xbf16> to vector<8x6xbf16>
    %cst_13 = arith.constant dense<0.000000e+00> : vector<32x6xf32>
    %22 = tpu.matmul %19, %21, %cst_13 {dimension_numbers = #tpu.dot_dimension_numbers<[1], [0], [0], [1], [0, 0, 1, 1], [], []>} : vector<32x8xbf16>, vector<8x6xbf16>, vector<32x6xf32> -> vector<32x6xf32>
    %23 = arith.addf %17, %22 : vector<32x6xf32>
    %24 = vector.extract_strided_slice %1 {offsets = [3, 0], sizes = [32, 8], strides = [1, 1]} : vector<36x8xf32> to vector<32x8xf32>
    %25 = arith.truncf %24 : vector<32x8xf32> to vector<32x8xbf16>
    %c3 = arith.constant 3 : index
    %c0_14 = arith.constant 0 : index
    %c0_15 = arith.constant 0 : index
    %26 = vector.load %arg2[%c3, %c0_14, %c0_15] : memref<5x8x6xbf16, #tpu.memory_space<vmem>>, vector<1x8x6xbf16>
    %27 = vector.shape_cast %26 : vector<1x8x6xbf16> to vector<8x6xbf16>
    %cst_16 = arith.constant dense<0.000000e+00> : vector<32x6xf32>
    %28 = tpu.matmul %25, %27, %cst_16 {dimension_numbers = #tpu.dot_dimension_numbers<[1], [0], [0], [1], [0, 0, 1, 1], [], []>} : vector<32x8xbf16>, vector<8x6xbf16>, vector<32x6xf32> -> vector<32x6xf32>
    %29 = arith.addf %23, %28 : vector<32x6xf32>
    %30 = vector.extract_strided_slice %1 {offsets = [4, 0], sizes = [32, 8], strides = [1, 1]} : vector<36x8xf32> to vector<32x8xf32>
    %31 = arith.truncf %30 : vector<32x8xf32> to vector<32x8xbf16>
    %c4 = arith.constant 4 : index
    %c0_17 = arith.constant 0 : index
    %c0_18 = arith.constant 0 : index
    %32 = vector.load %arg2[%c4, %c0_17, %c0_18] : memref<5x8x6xbf16, #tpu.memory_space<vmem>>, vector<1x8x6xbf16>
    %33 = vector.shape_cast %32 : vector<1x8x6xbf16> to vector<8x6xbf16>
    %cst_19 = arith.constant dense<0.000000e+00> : vector<32x6xf32>
    %34 = tpu.matmul %31, %33, %cst_19 {dimension_numbers = #tpu.dot_dimension_numbers<[1], [0], [0], [1], [0, 0, 1, 1], [], []>} : vector<32x8xbf16>, vector<8x6xbf16>, vector<32x6xf32> -> vector<32x6xf32>
    %35 = arith.addf %29, %34 : vector<32x6xf32>
    %cst_20 = arith.constant dense<0.000000e+00> : vector<32xf32>
    %36 = vector.multi_reduction <add>, %35, %cst_20 [1] : vector<32x6xf32> to vector<32xf32>
    %37 = vector.shape_cast %36 : vector<32xf32> to vector<32x1xf32>
    %cst_21 = arith.constant dense<0.000000e+00> : vector<1xf32>
    %38 = vector.multi_reduction <add>, %37, %cst_21 [0] : vector<32x1xf32> to vector<1xf32>
    %39 = vector.shape_cast %38 : vector<1xf32> to vector<1x1xf32>
    %cst_22 = arith.constant 1.920000e+02 : f32
    %40 = vector.broadcast %cst_22 : f32 to vector<1x1xf32>
    %41 = arith.divf %39, %40 : vector<1x1xf32>
    %42 = vector.broadcast %41 : vector<1x1xf32> to vector<32x6xf32>
    %43 = arith.subf %35, %42 : vector<32x6xf32>
    %44 = arith.mulf %43, %43 : vector<32x6xf32>
    %cst_23 = arith.constant dense<0.000000e+00> : vector<32xf32>
    %45 = vector.multi_reduction <add>, %44, %cst_23 [1] : vector<32x6xf32> to vector<32xf32>
    %46 = vector.shape_cast %45 : vector<32xf32> to vector<32x1xf32>
    %cst_24 = arith.constant dense<0.000000e+00> : vector<1xf32>
    %47 = vector.multi_reduction <add>, %46, %cst_24 [0] : vector<32x1xf32> to vector<1xf32>
    %48 = vector.shape_cast %47 : vector<1xf32> to vector<1x1xf32>
    %cst_25 = arith.constant 1.920000e+02 : f32
    %49 = vector.broadcast %cst_25 : f32 to vector<1x1xf32>
    %50 = arith.divf %48, %49 : vector<1x1xf32>
    %cst_26 = arith.constant 9.99999974E-6 : f32
    %51 = vector.broadcast %cst_26 : f32 to vector<1x1xf32>
    %52 = arith.addf %50, %51 : vector<1x1xf32>
    %53 = math.rsqrt %52 : vector<1x1xf32>
    %54 = vector.broadcast %53 : vector<1x1xf32> to vector<32x6xf32>
    %55 = arith.mulf %43, %54 : vector<32x6xf32>
    %c0_27 = arith.constant 0 : index
    %c0_28 = arith.constant 0 : index
    %56 = vector.load %arg4[%c0_27, %c0_28] : memref<1x6xf32, #tpu.memory_space<vmem>>, vector<1x6xf32>
    %57 = vector.broadcast %56 : vector<1x6xf32> to vector<32x6xf32>
    %58 = arith.mulf %55, %57 : vector<32x6xf32>
    %c0_29 = arith.constant 0 : index
    %c0_30 = arith.constant 0 : index
    %59 = vector.load %arg5[%c0_29, %c0_30] : memref<1x6xf32, #tpu.memory_space<vmem>>, vector<1x6xf32>
    %60 = vector.broadcast %59 : vector<1x6xf32> to vector<32x6xf32>
    %61 = arith.addf %58, %60 : vector<32x6xf32>
    %cst_31 = arith.constant 5.000000e-01 : f32
    %62 = vector.broadcast %cst_31 : f32 to vector<32x6xf32>
    %63 = arith.mulf %62, %61 : vector<32x6xf32>
    %cst_32 = arith.constant 4.471500e-02 : f32
    %64 = vector.broadcast %cst_32 : f32 to vector<32x6xf32>
    %65 = arith.mulf %64, %61 : vector<32x6xf32>
    %66 = arith.mulf %65, %61 : vector<32x6xf32>
    %67 = arith.mulf %66, %61 : vector<32x6xf32>
    %68 = arith.addf %61, %67 : vector<32x6xf32>
    %cst_33 = arith.constant 0.797884583 : f32
    %69 = vector.broadcast %cst_33 : f32 to vector<32x6xf32>
    %70 = arith.mulf %69, %68 : vector<32x6xf32>
    %71 = math.tanh %70 : vector<32x6xf32>
    %cst_34 = arith.constant 1.000000e+00 : f32
    %72 = vector.broadcast %cst_34 : f32 to vector<32x6xf32>
    %73 = arith.addf %72, %71 : vector<32x6xf32>
    %74 = arith.mulf %63, %73 : vector<32x6xf32>
    %c0_35 = arith.constant 0 : index
    %c0_36 = arith.constant 0 : index
    %c0_37 = arith.constant 0 : index
    %75 = vector.load %arg6[%c0_35, %c0_36, %c0_37] : memref<1x32x6xf32, #tpu.memory_space<vmem>>, vector<1x32x6xf32>
    %76 = vector.shape_cast %75 : vector<1x32x6xf32> to vector<32x6xf32>
    %77 = arith.addf %74, %76 : vector<32x6xf32>
    %c0_38 = arith.constant 0 : index
    %c0_39 = arith.constant 0 : index
    %c0_40 = arith.constant 0 : index
    %78 = vector.load %arg7[%c0_38, %c0_39, %c0_40] : memref<1x32x6xf32, #tpu.memory_space<vmem>>, vector<1x32x6xf32>
    %79 = vector.shape_cast %78 : vector<1x32x6xf32> to vector<32x6xf32>
    %80 = vector.shape_cast %77 : vector<32x6xf32> to vector<1x32x6xf32>
    tpu.vector_store %arg7[%c0_38, %c0_39, %c0_40], %80 {strides = array<i32>} : memref<1x32x6xf32, #tpu.memory_space<vmem>>, vector<1x32x6xf32>,
    return
  }
  func.func @transform_0(%arg0: i32) -> (i32, i32, i32) {
    %c0_i32 = arith.constant 0 : i32
    %c0_i32_0 = arith.constant 0 : i32
    %c0_i32_1 = arith.constant 0 : i32
    return %arg0, %c0_i32, %c0_i32_0 : i32, i32, i32
  }
  func.func @transform_1(%arg0: i32) -> (i32, i32, i32) {
    %c0_i32 = arith.constant 0 : i32
    %c0_i32_0 = arith.constant 0 : i32
    %c0_i32_1 = arith.constant 0 : i32
    %c0_i32_2 = arith.constant 0 : i32
    return %c0_i32, %c0_i32_0, %c0_i32_1 : i32, i32, i32
  }
  func.func @transform_2(%arg0: i32) -> (i32, i32) {
    %c0_i32 = arith.constant 0 : i32
    %c0_i32_0 = arith.constant 0 : i32
    %c0_i32_1 = arith.constant 0 : i32
    return %c0_i32, %c0_i32_0 : i32, i32
  }
  func.func @transform_3(%arg0: i32) -> (i32, i32) {
    %c0_i32 = arith.constant 0 : i32
    %c0_i32_0 = arith.constant 0 : i32
    %c0_i32_1 = arith.constant 0 : i32
    return %c0_i32, %c0_i32_0 : i32, i32
  }
  func.func @transform_4(%arg0: i32) -> (i32, i32) {
    %c0_i32 = arith.constant 0 : i32
    %c0_i32_0 = arith.constant 0 : i32
    %c0_i32_1 = arith.constant 0 : i32
    return %c0_i32, %c0_i32_0 : i32, i32
  }
  func.func @transform_5(%arg0: i32) -> (i32, i32, i32) {
    %c0_i32 = arith.constant 0 : i32
    %c0_i32_0 = arith.constant 0 : i32
    %c0_i32_1 = arith.constant 0 : i32
    return %arg0, %c0_i32, %c0_i32_0 : i32, i32, i32
  }
  func.func @transform_6(%arg0: i32) -> (i32, i32, i32) {
    %c0_i32 = arith.constant 0 : i32
    %c0_i32_0 = arith.constant 0 : i32
    %c0_i32_1 = arith.constant 0 : i32
    return %arg0, %c0_i32, %c0_i32_0 : i32, i32, i32
  }
}

module attributes {stable_mosaic.version = 11 : i64} {
  func.func @_glu_kernel(%arg0: i32, %arg1: memref<64x6xf32, #tpu.memory_space<vmem>>, %arg2: memref<6x6xbf16, #tpu.memory_space<vmem>>, %arg3: memref<6x6xbf16, #tpu.memory_space<vmem>>, %arg4: memref<1x6xf32, #tpu.memory_space<vmem>>, %arg5: memref<1x6xf32, #tpu.memory_space<vmem>>, %arg6: memref<64x6xf32, #tpu.memory_space<vmem>>) attributes {dimension_semantics = [#tpu.dimension_semantics<parallel>], iteration_bounds = array<i64: 1>, scalar_prefetch = 0 : i64, scratch_operands = 0 : i64, tpu.core_type = #tpu.core_type<tc>, window_params = [{transform_indices = @transform_0, window_bounds = array<i64: 64, 6>}, {pipeline_mode = #tpu.pipeline_mode<synchronous>, transform_indices = @transform_1, window_bounds = array<i64: 6, 6>}, {pipeline_mode = #tpu.pipeline_mode<synchronous>, transform_indices = @transform_2, window_bounds = array<i64: 6, 6>}, {pipeline_mode = #tpu.pipeline_mode<synchronous>, transform_indices = @transform_3, window_bounds = array<i64: 1, 6>}, {pipeline_mode = #tpu.pipeline_mode<synchronous>, transform_indices = @transform_4, window_bounds = array<i64: 1, 6>}, {transform_indices = @transform_5, window_bounds = array<i64: 64, 6>}]} {
    %c0 = arith.constant 0 : index
    %c0_0 = arith.constant 0 : index
    %0 = vector.load %arg1[%c0, %c0_0] : memref<64x6xf32, #tpu.memory_space<vmem>>, vector<64x6xf32>
    %1 = arith.truncf %0 : vector<64x6xf32> to vector<64x6xbf16>
    %c0_1 = arith.constant 0 : index
    %c0_2 = arith.constant 0 : index
    %2 = vector.load %arg2[%c0_1, %c0_2] : memref<6x6xbf16, #tpu.memory_space<vmem>>, vector<6x6xbf16>
    %cst = arith.constant dense<0.000000e+00> : vector<64x6xf32>
    %3 = tpu.matmul %1, %2, %cst {dimension_numbers = #tpu.dot_dimension_numbers<[1], [0], [0], [1], [0, 0, 1, 1], [], []>} : vector<64x6xbf16>, vector<6x6xbf16>, vector<64x6xf32> -> vector<64x6xf32>
    %c0_3 = arith.constant 0 : index
    %c0_4 = arith.constant 0 : index
    %4 = vector.load %arg4[%c0_3, %c0_4] : memref<1x6xf32, #tpu.memory_space<vmem>>, vector<1x6xf32>
    %5 = vector.broadcast %4 : vector<1x6xf32> to vector<64x6xf32>
    %6 = arith.addf %3, %5 : vector<64x6xf32>
    %c0_5 = arith.constant 0 : index
    %c0_6 = arith.constant 0 : index
    %7 = vector.load %arg3[%c0_5, %c0_6] : memref<6x6xbf16, #tpu.memory_space<vmem>>, vector<6x6xbf16>
    %cst_7 = arith.constant dense<0.000000e+00> : vector<64x6xf32>
    %8 = tpu.matmul %1, %7, %cst_7 {dimension_numbers = #tpu.dot_dimension_numbers<[1], [0], [0], [1], [0, 0, 1, 1], [], []>} : vector<64x6xbf16>, vector<6x6xbf16>, vector<64x6xf32> -> vector<64x6xf32>
    %c0_8 = arith.constant 0 : index
    %c0_9 = arith.constant 0 : index
    %9 = vector.load %arg5[%c0_8, %c0_9] : memref<1x6xf32, #tpu.memory_space<vmem>>, vector<1x6xf32>
    %10 = vector.broadcast %9 : vector<1x6xf32> to vector<64x6xf32>
    %11 = arith.addf %8, %10 : vector<64x6xf32>
    %12 = arith.negf %11 : vector<64x6xf32>
    %13 = math.exp %12 : vector<64x6xf32>
    %cst_10 = arith.constant 1.000000e+00 : f32
    %14 = vector.broadcast %cst_10 : f32 to vector<64x6xf32>
    %15 = arith.addf %14, %13 : vector<64x6xf32>
    %16 = arith.divf %14, %15 : vector<64x6xf32>
    %17 = arith.mulf %6, %16 : vector<64x6xf32>
    %c0_11 = arith.constant 0 : index
    %c0_12 = arith.constant 0 : index
    %18 = vector.load %arg6[%c0_11, %c0_12] : memref<64x6xf32, #tpu.memory_space<vmem>>, vector<64x6xf32>
    tpu.vector_store %arg6[%c0_11, %c0_12], %17 {strides = array<i32>} : memref<64x6xf32, #tpu.memory_space<vmem>>, vector<64x6xf32>,
    return
  }
  func.func @transform_0(%arg0: i32) -> (i32, i32) {
    %c0_i32 = arith.constant 0 : i32
    %c0_i32_0 = arith.constant 0 : i32
    return %arg0, %c0_i32 : i32, i32
  }
  func.func @transform_1(%arg0: i32) -> (i32, i32) {
    %c0_i32 = arith.constant 0 : i32
    %c0_i32_0 = arith.constant 0 : i32
    %c0_i32_1 = arith.constant 0 : i32
    return %c0_i32, %c0_i32_0 : i32, i32
  }
  func.func @transform_2(%arg0: i32) -> (i32, i32) {
    %c0_i32 = arith.constant 0 : i32
    %c0_i32_0 = arith.constant 0 : i32
    %c0_i32_1 = arith.constant 0 : i32
    return %c0_i32, %c0_i32_0 : i32, i32
  }
  func.func @transform_3(%arg0: i32) -> (i32, i32) {
    %c0_i32 = arith.constant 0 : i32
    %c0_i32_0 = arith.constant 0 : i32
    %c0_i32_1 = arith.constant 0 : i32
    return %c0_i32, %c0_i32_0 : i32, i32
  }
  func.func @transform_4(%arg0: i32) -> (i32, i32) {
    %c0_i32 = arith.constant 0 : i32
    %c0_i32_0 = arith.constant 0 : i32
    %c0_i32_1 = arith.constant 0 : i32
    return %c0_i32, %c0_i32_0 : i32, i32
  }
  func.func @transform_5(%arg0: i32) -> (i32, i32) {
    %c0_i32 = arith.constant 0 : i32
    %c0_i32_0 = arith.constant 0 : i32
    return %arg0, %c0_i32 : i32, i32
  }
}

module attributes {stable_mosaic.version = 11 : i64} {
  func.func @_linear_kernel(%arg0: i32, %arg1: memref<64x4xf32, #tpu.memory_space<vmem>>, %arg2: memref<4x6xbf16, #tpu.memory_space<vmem>>, %arg3: memref<1x6xf32, #tpu.memory_space<vmem>>, %arg4: memref<64x6xf32, #tpu.memory_space<vmem>>) attributes {dimension_semantics = [#tpu.dimension_semantics<parallel>], iteration_bounds = array<i64: 1>, scalar_prefetch = 0 : i64, scratch_operands = 0 : i64, tpu.core_type = #tpu.core_type<tc>, window_params = [{transform_indices = @transform_0, window_bounds = array<i64: 64, 4>}, {pipeline_mode = #tpu.pipeline_mode<synchronous>, transform_indices = @transform_1, window_bounds = array<i64: 4, 6>}, {pipeline_mode = #tpu.pipeline_mode<synchronous>, transform_indices = @transform_2, window_bounds = array<i64: 1, 6>}, {transform_indices = @transform_3, window_bounds = array<i64: 64, 6>}]} {
    %c0 = arith.constant 0 : index
    %c0_0 = arith.constant 0 : index
    %0 = vector.load %arg1[%c0, %c0_0] : memref<64x4xf32, #tpu.memory_space<vmem>>, vector<64x4xf32>
    %1 = arith.truncf %0 : vector<64x4xf32> to vector<64x4xbf16>
    %c0_1 = arith.constant 0 : index
    %c0_2 = arith.constant 0 : index
    %2 = vector.load %arg2[%c0_1, %c0_2] : memref<4x6xbf16, #tpu.memory_space<vmem>>, vector<4x6xbf16>
    %cst = arith.constant dense<0.000000e+00> : vector<64x6xf32>
    %3 = tpu.matmul %1, %2, %cst {dimension_numbers = #tpu.dot_dimension_numbers<[1], [0], [0], [1], [0, 0, 1, 1], [], []>} : vector<64x4xbf16>, vector<4x6xbf16>, vector<64x6xf32> -> vector<64x6xf32>
    %c0_3 = arith.constant 0 : index
    %c0_4 = arith.constant 0 : index
    %4 = vector.load %arg3[%c0_3, %c0_4] : memref<1x6xf32, #tpu.memory_space<vmem>>, vector<1x6xf32>
    %5 = vector.broadcast %4 : vector<1x6xf32> to vector<64x6xf32>
    %6 = arith.addf %3, %5 : vector<64x6xf32>
    %c0_5 = arith.constant 0 : index
    %c0_6 = arith.constant 0 : index
    %7 = vector.load %arg4[%c0_5, %c0_6] : memref<64x6xf32, #tpu.memory_space<vmem>>, vector<64x6xf32>
    tpu.vector_store %arg4[%c0_5, %c0_6], %6 {strides = array<i32>} : memref<64x6xf32, #tpu.memory_space<vmem>>, vector<64x6xf32>,
    return
  }
  func.func @transform_0(%arg0: i32) -> (i32, i32) {
    %c0_i32 = arith.constant 0 : i32
    %c0_i32_0 = arith.constant 0 : i32
    return %arg0, %c0_i32 : i32, i32
  }
  func.func @transform_1(%arg0: i32) -> (i32, i32) {
    %c0_i32 = arith.constant 0 : i32
    %c0_i32_0 = arith.constant 0 : i32
    %c0_i32_1 = arith.constant 0 : i32
    return %c0_i32, %c0_i32_0 : i32, i32
  }
  func.func @transform_2(%arg0: i32) -> (i32, i32) {
    %c0_i32 = arith.constant 0 : i32
    %c0_i32_0 = arith.constant 0 : i32
    %c0_i32_1 = arith.constant 0 : i32
    return %c0_i32, %c0_i32_0 : i32, i32
  }
  func.func @transform_3(%arg0: i32) -> (i32, i32) {
    %c0_i32 = arith.constant 0 : i32
    %c0_i32_0 = arith.constant 0 : i32
    return %arg0, %c0_i32 : i32, i32
  }
}

module attributes {stable_mosaic.version = 11 : i64} {
  func.func @_gconv_kernel(%arg0: i32, %arg1: memref<1x2x32xf32, #tpu.memory_space<vmem>>, %arg2: memref<1x32x32xbf16, #tpu.memory_space<vmem>>, %arg3: memref<1x2x32xf32, #tpu.memory_space<vmem>>) attributes {dimension_semantics = [#tpu.dimension_semantics<parallel>], iteration_bounds = array<i64: 6>, scalar_prefetch = 0 : i64, scratch_operands = 0 : i64, tpu.core_type = #tpu.core_type<tc>, window_params = [{transform_indices = @transform_0, window_bounds = array<i64: 1, 2, 32>}, {transform_indices = @transform_1, window_bounds = array<i64: 1, 32, 32>}, {transform_indices = @transform_2, window_bounds = array<i64: 1, 2, 32>}]} {
    %c0 = arith.constant 0 : index
    %c0_0 = arith.constant 0 : index
    %c0_1 = arith.constant 0 : index
    %0 = vector.load %arg1[%c0, %c0_0, %c0_1] : memref<1x2x32xf32, #tpu.memory_space<vmem>>, vector<1x2x32xf32>
    %1 = vector.shape_cast %0 : vector<1x2x32xf32> to vector<2x32xf32>
    %2 = arith.truncf %1 : vector<2x32xf32> to vector<2x32xbf16>
    %c0_2 = arith.constant 0 : index
    %c0_3 = arith.constant 0 : index
    %c0_4 = arith.constant 0 : index
    %3 = vector.load %arg2[%c0_2, %c0_3, %c0_4] : memref<1x32x32xbf16, #tpu.memory_space<vmem>>, vector<1x32x32xbf16>
    %4 = vector.shape_cast %3 : vector<1x32x32xbf16> to vector<32x32xbf16>
    %cst = arith.constant dense<0.000000e+00> : vector<2x32xf32>
    %5 = tpu.matmul %2, %4, %cst {dimension_numbers = #tpu.dot_dimension_numbers<[1], [0], [0], [1], [0, 0, 1, 1], [], []>} : vector<2x32xbf16>, vector<32x32xbf16>, vector<2x32xf32> -> vector<2x32xf32>
    %cst_5 = arith.constant 5.000000e-01 : f32
    %6 = vector.broadcast %cst_5 : f32 to vector<2x32xf32>
    %7 = arith.mulf %6, %5 : vector<2x32xf32>
    %cst_6 = arith.constant 4.471500e-02 : f32
    %8 = vector.broadcast %cst_6 : f32 to vector<2x32xf32>
    %9 = arith.mulf %8, %5 : vector<2x32xf32>
    %10 = arith.mulf %9, %5 : vector<2x32xf32>
    %11 = arith.mulf %10, %5 : vector<2x32xf32>
    %12 = arith.addf %5, %11 : vector<2x32xf32>
    %cst_7 = arith.constant 0.797884583 : f32
    %13 = vector.broadcast %cst_7 : f32 to vector<2x32xf32>
    %14 = arith.mulf %13, %12 : vector<2x32xf32>
    %15 = math.tanh %14 : vector<2x32xf32>
    %cst_8 = arith.constant 1.000000e+00 : f32
    %16 = vector.broadcast %cst_8 : f32 to vector<2x32xf32>
    %17 = arith.addf %16, %15 : vector<2x32xf32>
    %18 = arith.mulf %7, %17 : vector<2x32xf32>
    %c0_9 = arith.constant 0 : index
    %c0_10 = arith.constant 0 : index
    %c0_11 = arith.constant 0 : index
    %19 = vector.load %arg3[%c0_9, %c0_10, %c0_11] : memref<1x2x32xf32, #tpu.memory_space<vmem>>, vector<1x2x32xf32>
    %20 = vector.shape_cast %19 : vector<1x2x32xf32> to vector<2x32xf32>
    %21 = vector.shape_cast %18 : vector<2x32xf32> to vector<1x2x32xf32>
    tpu.vector_store %arg3[%c0_9, %c0_10, %c0_11], %21 {strides = array<i32>} : memref<1x2x32xf32, #tpu.memory_space<vmem>>, vector<1x2x32xf32>,
    return
  }
  func.func @transform_0(%arg0: i32) -> (i32, i32, i32) {
    %c0_i32 = arith.constant 0 : i32
    %c0_i32_0 = arith.constant 0 : i32
    %c0_i32_1 = arith.constant 0 : i32
    return %arg0, %c0_i32, %c0_i32_0 : i32, i32, i32
  }
  func.func @transform_1(%arg0: i32) -> (i32, i32, i32) {
    %c0_i32 = arith.constant 0 : i32
    %c0_i32_0 = arith.constant 0 : i32
    %c0_i32_1 = arith.constant 0 : i32
    return %arg0, %c0_i32, %c0_i32_0 : i32, i32, i32
  }
  func.func @transform_2(%arg0: i32) -> (i32, i32, i32) {
    %c0_i32 = arith.constant 0 : i32
    %c0_i32_0 = arith.constant 0 : i32
    %c0_i32_1 = arith.constant 0 : i32
    return %arg0, %c0_i32, %c0_i32_0 : i32, i32, i32
  }
}

module attributes {stable_mosaic.version = 11 : i64} {
  func.func @_linear_kernel(%arg0: i32, %arg1: memref<64x6xf32, #tpu.memory_space<vmem>>, %arg2: memref<6x6xbf16, #tpu.memory_space<vmem>>, %arg3: memref<1x6xf32, #tpu.memory_space<vmem>>, %arg4: memref<64x6xf32, #tpu.memory_space<vmem>>) attributes {dimension_semantics = [#tpu.dimension_semantics<parallel>], iteration_bounds = array<i64: 1>, scalar_prefetch = 0 : i64, scratch_operands = 0 : i64, tpu.core_type = #tpu.core_type<tc>, window_params = [{transform_indices = @transform_0, window_bounds = array<i64: 64, 6>}, {pipeline_mode = #tpu.pipeline_mode<synchronous>, transform_indices = @transform_1, window_bounds = array<i64: 6, 6>}, {pipeline_mode = #tpu.pipeline_mode<synchronous>, transform_indices = @transform_2, window_bounds = array<i64: 1, 6>}, {transform_indices = @transform_3, window_bounds = array<i64: 64, 6>}]} {
    %c0 = arith.constant 0 : index
    %c0_0 = arith.constant 0 : index
    %0 = vector.load %arg1[%c0, %c0_0] : memref<64x6xf32, #tpu.memory_space<vmem>>, vector<64x6xf32>
    %1 = arith.truncf %0 : vector<64x6xf32> to vector<64x6xbf16>
    %c0_1 = arith.constant 0 : index
    %c0_2 = arith.constant 0 : index
    %2 = vector.load %arg2[%c0_1, %c0_2] : memref<6x6xbf16, #tpu.memory_space<vmem>>, vector<6x6xbf16>
    %cst = arith.constant dense<0.000000e+00> : vector<64x6xf32>
    %3 = tpu.matmul %1, %2, %cst {dimension_numbers = #tpu.dot_dimension_numbers<[1], [0], [0], [1], [0, 0, 1, 1], [], []>} : vector<64x6xbf16>, vector<6x6xbf16>, vector<64x6xf32> -> vector<64x6xf32>
    %c0_3 = arith.constant 0 : index
    %c0_4 = arith.constant 0 : index
    %4 = vector.load %arg3[%c0_3, %c0_4] : memref<1x6xf32, #tpu.memory_space<vmem>>, vector<1x6xf32>
    %5 = vector.broadcast %4 : vector<1x6xf32> to vector<64x6xf32>
    %6 = arith.addf %3, %5 : vector<64x6xf32>
    %c0_5 = arith.constant 0 : index
    %c0_6 = arith.constant 0 : index
    %7 = vector.load %arg4[%c0_5, %c0_6] : memref<64x6xf32, #tpu.memory_space<vmem>>, vector<64x6xf32>
    tpu.vector_store %arg4[%c0_5, %c0_6], %6 {strides = array<i32>} : memref<64x6xf32, #tpu.memory_space<vmem>>, vector<64x6xf32>,
    return
  }
  func.func @transform_0(%arg0: i32) -> (i32, i32) {
    %c0_i32 = arith.constant 0 : i32
    %c0_i32_0 = arith.constant 0 : i32
    return %arg0, %c0_i32 : i32, i32
  }
  func.func @transform_1(%arg0: i32) -> (i32, i32) {
    %c0_i32 = arith.constant 0 : i32
    %c0_i32_0 = arith.constant 0 : i32
    %c0_i32_1 = arith.constant 0 : i32
    return %c0_i32, %c0_i32_0 : i32, i32
  }
  func.func @transform_2(%arg0: i32) -> (i32, i32) {
    %c0_i32 = arith.constant 0 : i32
    %c0_i32_0 = arith.constant 0 : i32
    %c0_i32_1 = arith.constant 0 : i32
    return %c0_i32, %c0_i32_0 : i32, i32
  }
  func.func @transform_3(%arg0: i32) -> (i32, i32) {
    %c0_i32 = arith.constant 0 : i32
    %c0_i32_0 = arith.constant 0 : i32
    return %arg0, %c0_i32 : i32, i32
  }
}

module attributes {stable_mosaic.version = 11 : i64} {
  func.func @_linear_kernel(%arg0: i32, %arg1: memref<64x6xf32, #tpu.memory_space<vmem>>, %arg2: memref<6x6xbf16, #tpu.memory_space<vmem>>, %arg3: memref<1x6xf32, #tpu.memory_space<vmem>>, %arg4: memref<64x6xf32, #tpu.memory_space<vmem>>) attributes {dimension_semantics = [#tpu.dimension_semantics<parallel>], iteration_bounds = array<i64: 1>, scalar_prefetch = 0 : i64, scratch_operands = 0 : i64, tpu.core_type = #tpu.core_type<tc>, window_params = [{transform_indices = @transform_0, window_bounds = array<i64: 64, 6>}, {pipeline_mode = #tpu.pipeline_mode<synchronous>, transform_indices = @transform_1, window_bounds = array<i64: 6, 6>}, {pipeline_mode = #tpu.pipeline_mode<synchronous>, transform_indices = @transform_2, window_bounds = array<i64: 1, 6>}, {transform_indices = @transform_3, window_bounds = array<i64: 64, 6>}]} {
    %c0 = arith.constant 0 : index
    %c0_0 = arith.constant 0 : index
    %0 = vector.load %arg1[%c0, %c0_0] : memref<64x6xf32, #tpu.memory_space<vmem>>, vector<64x6xf32>
    %1 = arith.truncf %0 : vector<64x6xf32> to vector<64x6xbf16>
    %c0_1 = arith.constant 0 : index
    %c0_2 = arith.constant 0 : index
    %2 = vector.load %arg2[%c0_1, %c0_2] : memref<6x6xbf16, #tpu.memory_space<vmem>>, vector<6x6xbf16>
    %cst = arith.constant dense<0.000000e+00> : vector<64x6xf32>
    %3 = tpu.matmul %1, %2, %cst {dimension_numbers = #tpu.dot_dimension_numbers<[1], [0], [0], [1], [0, 0, 1, 1], [], []>} : vector<64x6xbf16>, vector<6x6xbf16>, vector<64x6xf32> -> vector<64x6xf32>
    %c0_3 = arith.constant 0 : index
    %c0_4 = arith.constant 0 : index
    %4 = vector.load %arg3[%c0_3, %c0_4] : memref<1x6xf32, #tpu.memory_space<vmem>>, vector<1x6xf32>
    %5 = vector.broadcast %4 : vector<1x6xf32> to vector<64x6xf32>
    %6 = arith.addf %3, %5 : vector<64x6xf32>
    %cst_5 = arith.constant 5.000000e-01 : f32
    %7 = vector.broadcast %cst_5 : f32 to vector<64x6xf32>
    %8 = arith.mulf %7, %6 : vector<64x6xf32>
    %cst_6 = arith.constant 4.471500e-02 : f32
    %9 = vector.broadcast %cst_6 : f32 to vector<64x6xf32>
    %10 = arith.mulf %9, %6 : vector<64x6xf32>
    %11 = arith.mulf %10, %6 : vector<64x6xf32>
    %12 = arith.mulf %11, %6 : vector<64x6xf32>
    %13 = arith.addf %6, %12 : vector<64x6xf32>
    %cst_7 = arith.constant 0.797884583 : f32
    %14 = vector.broadcast %cst_7 : f32 to vector<64x6xf32>
    %15 = arith.mulf %14, %13 : vector<64x6xf32>
    %16 = math.tanh %15 : vector<64x6xf32>
    %cst_8 = arith.constant 1.000000e+00 : f32
    %17 = vector.broadcast %cst_8 : f32 to vector<64x6xf32>
    %18 = arith.addf %17, %16 : vector<64x6xf32>
    %19 = arith.mulf %8, %18 : vector<64x6xf32>
    %c0_9 = arith.constant 0 : index
    %c0_10 = arith.constant 0 : index
    %20 = vector.load %arg4[%c0_9, %c0_10] : memref<64x6xf32, #tpu.memory_space<vmem>>, vector<64x6xf32>
    tpu.vector_store %arg4[%c0_9, %c0_10], %19 {strides = array<i32>} : memref<64x6xf32, #tpu.memory_space<vmem>>, vector<64x6xf32>,
    return
  }
  func.func @transform_0(%arg0: i32) -> (i32, i32) {
    %c0_i32 = arith.constant 0 : i32
    %c0_i32_0 = arith.constant 0 : i32
    return %arg0, %c0_i32 : i32, i32
  }
  func.func @transform_1(%arg0: i32) -> (i32, i32) {
    %c0_i32 = arith.constant 0 : i32
    %c0_i32_0 = arith.constant 0 : i32
    %c0_i32_1 = arith.constant 0 : i32
    return %c0_i32, %c0_i32_0 : i32, i32
  }
  func.func @transform_2(%arg0: i32) -> (i32, i32) {
    %c0_i32 = arith.constant 0 : i32
    %c0_i32_0 = arith.constant 0 : i32
    %c0_i32_1 = arith.constant 0 : i32
    return %c0_i32, %c0_i32_0 : i32, i32
  }
  func.func @transform_3(%arg0: i32) -> (i32, i32) {
    %c0_i32 = arith.constant 0 : i32
    %c0_i32_0 = arith.constant 0 : i32
    return %arg0, %c0_i32 : i32, i32
  }
}

module attributes {stable_mosaic.version = 11 : i64} {
  func.func @_ln_res_kernel(%arg0: i32, %arg1: memref<64x6xf32, #tpu.memory_space<vmem>>, %arg2: memref<64x6xf32, #tpu.memory_space<vmem>>, %arg3: memref<1x6xf32, #tpu.memory_space<vmem>>, %arg4: memref<1x6xf32, #tpu.memory_space<vmem>>, %arg5: memref<64x6xf32, #tpu.memory_space<vmem>>) attributes {dimension_semantics = [#tpu.dimension_semantics<parallel>], iteration_bounds = array<i64: 1>, scalar_prefetch = 0 : i64, scratch_operands = 0 : i64, tpu.core_type = #tpu.core_type<tc>, window_params = [{transform_indices = @transform_0, window_bounds = array<i64: 64, 6>}, {transform_indices = @transform_1, window_bounds = array<i64: 64, 6>}, {pipeline_mode = #tpu.pipeline_mode<synchronous>, transform_indices = @transform_2, window_bounds = array<i64: 1, 6>}, {pipeline_mode = #tpu.pipeline_mode<synchronous>, transform_indices = @transform_3, window_bounds = array<i64: 1, 6>}, {transform_indices = @transform_4, window_bounds = array<i64: 64, 6>}]} {
    %c0 = arith.constant 0 : index
    %c0_0 = arith.constant 0 : index
    %0 = vector.load %arg1[%c0, %c0_0] : memref<64x6xf32, #tpu.memory_space<vmem>>, vector<64x6xf32>
    %c0_1 = arith.constant 0 : index
    %c0_2 = arith.constant 0 : index
    %1 = vector.load %arg2[%c0_1, %c0_2] : memref<64x6xf32, #tpu.memory_space<vmem>>, vector<64x6xf32>
    %2 = arith.addf %0, %1 : vector<64x6xf32>
    %cst = arith.constant dense<0.000000e+00> : vector<64xf32>
    %3 = vector.multi_reduction <add>, %2, %cst [1] : vector<64x6xf32> to vector<64xf32>
    %4 = vector.shape_cast %3 : vector<64xf32> to vector<64x1xf32>
    %cst_3 = arith.constant 6.000000e+00 : f32
    %5 = vector.broadcast %cst_3 : f32 to vector<64x1xf32>
    %6 = arith.divf %4, %5 : vector<64x1xf32>
    %7 = vector.broadcast %6 : vector<64x1xf32> to vector<64x6xf32>
    %8 = arith.subf %2, %7 : vector<64x6xf32>
    %9 = arith.mulf %8, %8 : vector<64x6xf32>
    %cst_4 = arith.constant dense<0.000000e+00> : vector<64xf32>
    %10 = vector.multi_reduction <add>, %9, %cst_4 [1] : vector<64x6xf32> to vector<64xf32>
    %11 = vector.shape_cast %10 : vector<64xf32> to vector<64x1xf32>
    %cst_5 = arith.constant 6.000000e+00 : f32
    %12 = vector.broadcast %cst_5 : f32 to vector<64x1xf32>
    %13 = arith.divf %11, %12 : vector<64x1xf32>
    %cst_6 = arith.constant 9.99999974E-6 : f32
    %14 = vector.broadcast %cst_6 : f32 to vector<64x1xf32>
    %15 = arith.addf %13, %14 : vector<64x1xf32>
    %16 = math.rsqrt %15 : vector<64x1xf32>
    %17 = vector.broadcast %16 : vector<64x1xf32> to vector<64x6xf32>
    %18 = arith.mulf %8, %17 : vector<64x6xf32>
    %c0_7 = arith.constant 0 : index
    %c0_8 = arith.constant 0 : index
    %19 = vector.load %arg3[%c0_7, %c0_8] : memref<1x6xf32, #tpu.memory_space<vmem>>, vector<1x6xf32>
    %20 = vector.broadcast %19 : vector<1x6xf32> to vector<64x6xf32>
    %21 = arith.mulf %18, %20 : vector<64x6xf32>
    %c0_9 = arith.constant 0 : index
    %c0_10 = arith.constant 0 : index
    %22 = vector.load %arg4[%c0_9, %c0_10] : memref<1x6xf32, #tpu.memory_space<vmem>>, vector<1x6xf32>
    %23 = vector.broadcast %22 : vector<1x6xf32> to vector<64x6xf32>
    %24 = arith.addf %21, %23 : vector<64x6xf32>
    %c0_11 = arith.constant 0 : index
    %c0_12 = arith.constant 0 : index
    %25 = vector.load %arg5[%c0_11, %c0_12] : memref<64x6xf32, #tpu.memory_space<vmem>>, vector<64x6xf32>
    tpu.vector_store %arg5[%c0_11, %c0_12], %24 {strides = array<i32>} : memref<64x6xf32, #tpu.memory_space<vmem>>, vector<64x6xf32>,
    return
  }
  func.func @transform_0(%arg0: i32) -> (i32, i32) {
    %c0_i32 = arith.constant 0 : i32
    %c0_i32_0 = arith.constant 0 : i32
    return %arg0, %c0_i32 : i32, i32
  }
  func.func @transform_1(%arg0: i32) -> (i32, i32) {
    %c0_i32 = arith.constant 0 : i32
    %c0_i32_0 = arith.constant 0 : i32
    return %arg0, %c0_i32 : i32, i32
  }
  func.func @transform_2(%arg0: i32) -> (i32, i32) {
    %c0_i32 = arith.constant 0 : i32
    %c0_i32_0 = arith.constant 0 : i32
    %c0_i32_1 = arith.constant 0 : i32
    return %c0_i32, %c0_i32_0 : i32, i32
  }
  func.func @transform_3(%arg0: i32) -> (i32, i32) {
    %c0_i32 = arith.constant 0 : i32
    %c0_i32_0 = arith.constant 0 : i32
    %c0_i32_1 = arith.constant 0 : i32
    return %c0_i32, %c0_i32_0 : i32, i32
  }
  func.func @transform_4(%arg0: i32) -> (i32, i32) {
    %c0_i32 = arith.constant 0 : i32
    %c0_i32_0 = arith.constant 0 : i32
    return %arg0, %c0_i32 : i32, i32
  }
}

module attributes {stable_mosaic.version = 11 : i64} {
  func.func @_conv_gn_gelu_kernel(%arg0: i32, %arg1: memref<1x20x6xf32, #tpu.memory_space<vmem>>, %arg2: memref<5x6x12xbf16, #tpu.memory_space<vmem>>, %arg3: memref<1x12xf32, #tpu.memory_space<vmem>>, %arg4: memref<1x12xf32, #tpu.memory_space<vmem>>, %arg5: memref<1x12xf32, #tpu.memory_space<vmem>>, %arg6: memref<1x16x12xf32, #tpu.memory_space<vmem>>) attributes {dimension_semantics = [#tpu.dimension_semantics<parallel>], iteration_bounds = array<i64: 2>, scalar_prefetch = 0 : i64, scratch_operands = 0 : i64, tpu.core_type = #tpu.core_type<tc>, window_params = [{transform_indices = @transform_0, window_bounds = array<i64: 1, 20, 6>}, {pipeline_mode = #tpu.pipeline_mode<synchronous>, transform_indices = @transform_1, window_bounds = array<i64: 5, 6, 12>}, {pipeline_mode = #tpu.pipeline_mode<synchronous>, transform_indices = @transform_2, window_bounds = array<i64: 1, 12>}, {pipeline_mode = #tpu.pipeline_mode<synchronous>, transform_indices = @transform_3, window_bounds = array<i64: 1, 12>}, {pipeline_mode = #tpu.pipeline_mode<synchronous>, transform_indices = @transform_4, window_bounds = array<i64: 1, 12>}, {transform_indices = @transform_5, window_bounds = array<i64: 1, 16, 12>}]} {
    %c0 = arith.constant 0 : index
    %c0_0 = arith.constant 0 : index
    %c0_1 = arith.constant 0 : index
    %0 = vector.load %arg1[%c0, %c0_0, %c0_1] : memref<1x20x6xf32, #tpu.memory_space<vmem>>, vector<1x20x6xf32>
    %1 = vector.shape_cast %0 : vector<1x20x6xf32> to vector<20x6xf32>
    %cst = arith.constant 0.000000e+00 : f32
    %2 = vector.broadcast %cst : f32 to vector<16x12xf32>
    %c0_2 = arith.constant 0 : index
    %c0_3 = arith.constant 0 : index
    %3 = vector.load %arg3[%c0_2, %c0_3] : memref<1x12xf32, #tpu.memory_space<vmem>>, vector<1x12xf32>
    %4 = vector.broadcast %3 : vector<1x12xf32> to vector<16x12xf32>
    %5 = arith.addf %2, %4 : vector<16x12xf32>
    %6 = vector.extract_strided_slice %1 {offsets = [0, 0], sizes = [16, 6], strides = [1, 1]} : vector<20x6xf32> to vector<16x6xf32>
    %7 = arith.truncf %6 : vector<16x6xf32> to vector<16x6xbf16>
    %c0_4 = arith.constant 0 : index
    %c0_5 = arith.constant 0 : index
    %c0_6 = arith.constant 0 : index
    %8 = vector.load %arg2[%c0_4, %c0_5, %c0_6] : memref<5x6x12xbf16, #tpu.memory_space<vmem>>, vector<1x6x12xbf16>
    %9 = vector.shape_cast %8 : vector<1x6x12xbf16> to vector<6x12xbf16>
    %cst_7 = arith.constant dense<0.000000e+00> : vector<16x12xf32>
    %10 = tpu.matmul %7, %9, %cst_7 {dimension_numbers = #tpu.dot_dimension_numbers<[1], [0], [0], [1], [0, 0, 1, 1], [], []>} : vector<16x6xbf16>, vector<6x12xbf16>, vector<16x12xf32> -> vector<16x12xf32>
    %11 = arith.addf %5, %10 : vector<16x12xf32>
    %12 = vector.extract_strided_slice %1 {offsets = [1, 0], sizes = [16, 6], strides = [1, 1]} : vector<20x6xf32> to vector<16x6xf32>
    %13 = arith.truncf %12 : vector<16x6xf32> to vector<16x6xbf16>
    %c1 = arith.constant 1 : index
    %c0_8 = arith.constant 0 : index
    %c0_9 = arith.constant 0 : index
    %14 = vector.load %arg2[%c1, %c0_8, %c0_9] : memref<5x6x12xbf16, #tpu.memory_space<vmem>>, vector<1x6x12xbf16>
    %15 = vector.shape_cast %14 : vector<1x6x12xbf16> to vector<6x12xbf16>
    %cst_10 = arith.constant dense<0.000000e+00> : vector<16x12xf32>
    %16 = tpu.matmul %13, %15, %cst_10 {dimension_numbers = #tpu.dot_dimension_numbers<[1], [0], [0], [1], [0, 0, 1, 1], [], []>} : vector<16x6xbf16>, vector<6x12xbf16>, vector<16x12xf32> -> vector<16x12xf32>
    %17 = arith.addf %11, %16 : vector<16x12xf32>
    %18 = vector.extract_strided_slice %1 {offsets = [2, 0], sizes = [16, 6], strides = [1, 1]} : vector<20x6xf32> to vector<16x6xf32>
    %19 = arith.truncf %18 : vector<16x6xf32> to vector<16x6xbf16>
    %c2 = arith.constant 2 : index
    %c0_11 = arith.constant 0 : index
    %c0_12 = arith.constant 0 : index
    %20 = vector.load %arg2[%c2, %c0_11, %c0_12] : memref<5x6x12xbf16, #tpu.memory_space<vmem>>, vector<1x6x12xbf16>
    %21 = vector.shape_cast %20 : vector<1x6x12xbf16> to vector<6x12xbf16>
    %cst_13 = arith.constant dense<0.000000e+00> : vector<16x12xf32>
    %22 = tpu.matmul %19, %21, %cst_13 {dimension_numbers = #tpu.dot_dimension_numbers<[1], [0], [0], [1], [0, 0, 1, 1], [], []>} : vector<16x6xbf16>, vector<6x12xbf16>, vector<16x12xf32> -> vector<16x12xf32>
    %23 = arith.addf %17, %22 : vector<16x12xf32>
    %24 = vector.extract_strided_slice %1 {offsets = [3, 0], sizes = [16, 6], strides = [1, 1]} : vector<20x6xf32> to vector<16x6xf32>
    %25 = arith.truncf %24 : vector<16x6xf32> to vector<16x6xbf16>
    %c3 = arith.constant 3 : index
    %c0_14 = arith.constant 0 : index
    %c0_15 = arith.constant 0 : index
    %26 = vector.load %arg2[%c3, %c0_14, %c0_15] : memref<5x6x12xbf16, #tpu.memory_space<vmem>>, vector<1x6x12xbf16>
    %27 = vector.shape_cast %26 : vector<1x6x12xbf16> to vector<6x12xbf16>
    %cst_16 = arith.constant dense<0.000000e+00> : vector<16x12xf32>
    %28 = tpu.matmul %25, %27, %cst_16 {dimension_numbers = #tpu.dot_dimension_numbers<[1], [0], [0], [1], [0, 0, 1, 1], [], []>} : vector<16x6xbf16>, vector<6x12xbf16>, vector<16x12xf32> -> vector<16x12xf32>
    %29 = arith.addf %23, %28 : vector<16x12xf32>
    %30 = vector.extract_strided_slice %1 {offsets = [4, 0], sizes = [16, 6], strides = [1, 1]} : vector<20x6xf32> to vector<16x6xf32>
    %31 = arith.truncf %30 : vector<16x6xf32> to vector<16x6xbf16>
    %c4 = arith.constant 4 : index
    %c0_17 = arith.constant 0 : index
    %c0_18 = arith.constant 0 : index
    %32 = vector.load %arg2[%c4, %c0_17, %c0_18] : memref<5x6x12xbf16, #tpu.memory_space<vmem>>, vector<1x6x12xbf16>
    %33 = vector.shape_cast %32 : vector<1x6x12xbf16> to vector<6x12xbf16>
    %cst_19 = arith.constant dense<0.000000e+00> : vector<16x12xf32>
    %34 = tpu.matmul %31, %33, %cst_19 {dimension_numbers = #tpu.dot_dimension_numbers<[1], [0], [0], [1], [0, 0, 1, 1], [], []>} : vector<16x6xbf16>, vector<6x12xbf16>, vector<16x12xf32> -> vector<16x12xf32>
    %35 = arith.addf %29, %34 : vector<16x12xf32>
    %cst_20 = arith.constant dense<0.000000e+00> : vector<16xf32>
    %36 = vector.multi_reduction <add>, %35, %cst_20 [1] : vector<16x12xf32> to vector<16xf32>
    %37 = vector.shape_cast %36 : vector<16xf32> to vector<16x1xf32>
    %cst_21 = arith.constant dense<0.000000e+00> : vector<1xf32>
    %38 = vector.multi_reduction <add>, %37, %cst_21 [0] : vector<16x1xf32> to vector<1xf32>
    %39 = vector.shape_cast %38 : vector<1xf32> to vector<1x1xf32>
    %cst_22 = arith.constant 1.920000e+02 : f32
    %40 = vector.broadcast %cst_22 : f32 to vector<1x1xf32>
    %41 = arith.divf %39, %40 : vector<1x1xf32>
    %42 = vector.broadcast %41 : vector<1x1xf32> to vector<16x12xf32>
    %43 = arith.subf %35, %42 : vector<16x12xf32>
    %44 = arith.mulf %43, %43 : vector<16x12xf32>
    %cst_23 = arith.constant dense<0.000000e+00> : vector<16xf32>
    %45 = vector.multi_reduction <add>, %44, %cst_23 [1] : vector<16x12xf32> to vector<16xf32>
    %46 = vector.shape_cast %45 : vector<16xf32> to vector<16x1xf32>
    %cst_24 = arith.constant dense<0.000000e+00> : vector<1xf32>
    %47 = vector.multi_reduction <add>, %46, %cst_24 [0] : vector<16x1xf32> to vector<1xf32>
    %48 = vector.shape_cast %47 : vector<1xf32> to vector<1x1xf32>
    %cst_25 = arith.constant 1.920000e+02 : f32
    %49 = vector.broadcast %cst_25 : f32 to vector<1x1xf32>
    %50 = arith.divf %48, %49 : vector<1x1xf32>
    %cst_26 = arith.constant 9.99999974E-6 : f32
    %51 = vector.broadcast %cst_26 : f32 to vector<1x1xf32>
    %52 = arith.addf %50, %51 : vector<1x1xf32>
    %53 = math.rsqrt %52 : vector<1x1xf32>
    %54 = vector.broadcast %53 : vector<1x1xf32> to vector<16x12xf32>
    %55 = arith.mulf %43, %54 : vector<16x12xf32>
    %c0_27 = arith.constant 0 : index
    %c0_28 = arith.constant 0 : index
    %56 = vector.load %arg4[%c0_27, %c0_28] : memref<1x12xf32, #tpu.memory_space<vmem>>, vector<1x12xf32>
    %57 = vector.broadcast %56 : vector<1x12xf32> to vector<16x12xf32>
    %58 = arith.mulf %55, %57 : vector<16x12xf32>
    %c0_29 = arith.constant 0 : index
    %c0_30 = arith.constant 0 : index
    %59 = vector.load %arg5[%c0_29, %c0_30] : memref<1x12xf32, #tpu.memory_space<vmem>>, vector<1x12xf32>
    %60 = vector.broadcast %59 : vector<1x12xf32> to vector<16x12xf32>
    %61 = arith.addf %58, %60 : vector<16x12xf32>
    %cst_31 = arith.constant 5.000000e-01 : f32
    %62 = vector.broadcast %cst_31 : f32 to vector<16x12xf32>
    %63 = arith.mulf %62, %61 : vector<16x12xf32>
    %cst_32 = arith.constant 4.471500e-02 : f32
    %64 = vector.broadcast %cst_32 : f32 to vector<16x12xf32>
    %65 = arith.mulf %64, %61 : vector<16x12xf32>
    %66 = arith.mulf %65, %61 : vector<16x12xf32>
    %67 = arith.mulf %66, %61 : vector<16x12xf32>
    %68 = arith.addf %61, %67 : vector<16x12xf32>
    %cst_33 = arith.constant 0.797884583 : f32
    %69 = vector.broadcast %cst_33 : f32 to vector<16x12xf32>
    %70 = arith.mulf %69, %68 : vector<16x12xf32>
    %71 = math.tanh %70 : vector<16x12xf32>
    %cst_34 = arith.constant 1.000000e+00 : f32
    %72 = vector.broadcast %cst_34 : f32 to vector<16x12xf32>
    %73 = arith.addf %72, %71 : vector<16x12xf32>
    %74 = arith.mulf %63, %73 : vector<16x12xf32>
    %c0_35 = arith.constant 0 : index
    %c0_36 = arith.constant 0 : index
    %c0_37 = arith.constant 0 : index
    %75 = vector.load %arg6[%c0_35, %c0_36, %c0_37] : memref<1x16x12xf32, #tpu.memory_space<vmem>>, vector<1x16x12xf32>
    %76 = vector.shape_cast %75 : vector<1x16x12xf32> to vector<16x12xf32>
    %77 = vector.shape_cast %74 : vector<16x12xf32> to vector<1x16x12xf32>
    tpu.vector_store %arg6[%c0_35, %c0_36, %c0_37], %77 {strides = array<i32>} : memref<1x16x12xf32, #tpu.memory_space<vmem>>, vector<1x16x12xf32>,
    return
  }
  func.func @transform_0(%arg0: i32) -> (i32, i32, i32) {
    %c0_i32 = arith.constant 0 : i32
    %c0_i32_0 = arith.constant 0 : i32
    %c0_i32_1 = arith.constant 0 : i32
    return %arg0, %c0_i32, %c0_i32_0 : i32, i32, i32
  }
  func.func @transform_1(%arg0: i32) -> (i32, i32, i32) {
    %c0_i32 = arith.constant 0 : i32
    %c0_i32_0 = arith.constant 0 : i32
    %c0_i32_1 = arith.constant 0 : i32
    %c0_i32_2 = arith.constant 0 : i32
    return %c0_i32, %c0_i32_0, %c0_i32_1 : i32, i32, i32
  }
  func.func @transform_2(%arg0: i32) -> (i32, i32) {
    %c0_i32 = arith.constant 0 : i32
    %c0_i32_0 = arith.constant 0 : i32
    %c0_i32_1 = arith.constant 0 : i32
    return %c0_i32, %c0_i32_0 : i32, i32
  }
  func.func @transform_3(%arg0: i32) -> (i32, i32) {
    %c0_i32 = arith.constant 0 : i32
    %c0_i32_0 = arith.constant 0 : i32
    %c0_i32_1 = arith.constant 0 : i32
    return %c0_i32, %c0_i32_0 : i32, i32
  }
  func.func @transform_4(%arg0: i32) -> (i32, i32) {
    %c0_i32 = arith.constant 0 : i32
    %c0_i32_0 = arith.constant 0 : i32
    %c0_i32_1 = arith.constant 0 : i32
    return %c0_i32, %c0_i32_0 : i32, i32
  }
  func.func @transform_5(%arg0: i32) -> (i32, i32, i32) {
    %c0_i32 = arith.constant 0 : i32
    %c0_i32_0 = arith.constant 0 : i32
    %c0_i32_1 = arith.constant 0 : i32
    return %arg0, %c0_i32, %c0_i32_0 : i32, i32, i32
  }
}

module attributes {stable_mosaic.version = 11 : i64} {
  func.func @_conv_gn_gelu_kernel(%arg0: i32, %arg1: memref<1x20x12xf32, #tpu.memory_space<vmem>>, %arg2: memref<5x12x6xbf16, #tpu.memory_space<vmem>>, %arg3: memref<1x6xf32, #tpu.memory_space<vmem>>, %arg4: memref<1x6xf32, #tpu.memory_space<vmem>>, %arg5: memref<1x6xf32, #tpu.memory_space<vmem>>, %arg6: memref<1x16x6xf32, #tpu.memory_space<vmem>>, %arg7: memref<1x16x6xf32, #tpu.memory_space<vmem>>) attributes {dimension_semantics = [#tpu.dimension_semantics<parallel>], iteration_bounds = array<i64: 2>, scalar_prefetch = 0 : i64, scratch_operands = 0 : i64, tpu.core_type = #tpu.core_type<tc>, window_params = [{transform_indices = @transform_0, window_bounds = array<i64: 1, 20, 12>}, {pipeline_mode = #tpu.pipeline_mode<synchronous>, transform_indices = @transform_1, window_bounds = array<i64: 5, 12, 6>}, {pipeline_mode = #tpu.pipeline_mode<synchronous>, transform_indices = @transform_2, window_bounds = array<i64: 1, 6>}, {pipeline_mode = #tpu.pipeline_mode<synchronous>, transform_indices = @transform_3, window_bounds = array<i64: 1, 6>}, {pipeline_mode = #tpu.pipeline_mode<synchronous>, transform_indices = @transform_4, window_bounds = array<i64: 1, 6>}, {transform_indices = @transform_5, window_bounds = array<i64: 1, 16, 6>}, {transform_indices = @transform_6, window_bounds = array<i64: 1, 16, 6>}]} {
    %c0 = arith.constant 0 : index
    %c0_0 = arith.constant 0 : index
    %c0_1 = arith.constant 0 : index
    %0 = vector.load %arg1[%c0, %c0_0, %c0_1] : memref<1x20x12xf32, #tpu.memory_space<vmem>>, vector<1x20x12xf32>
    %1 = vector.shape_cast %0 : vector<1x20x12xf32> to vector<20x12xf32>
    %cst = arith.constant 0.000000e+00 : f32
    %2 = vector.broadcast %cst : f32 to vector<16x6xf32>
    %c0_2 = arith.constant 0 : index
    %c0_3 = arith.constant 0 : index
    %3 = vector.load %arg3[%c0_2, %c0_3] : memref<1x6xf32, #tpu.memory_space<vmem>>, vector<1x6xf32>
    %4 = vector.broadcast %3 : vector<1x6xf32> to vector<16x6xf32>
    %5 = arith.addf %2, %4 : vector<16x6xf32>
    %6 = vector.extract_strided_slice %1 {offsets = [0, 0], sizes = [16, 12], strides = [1, 1]} : vector<20x12xf32> to vector<16x12xf32>
    %7 = arith.truncf %6 : vector<16x12xf32> to vector<16x12xbf16>
    %c0_4 = arith.constant 0 : index
    %c0_5 = arith.constant 0 : index
    %c0_6 = arith.constant 0 : index
    %8 = vector.load %arg2[%c0_4, %c0_5, %c0_6] : memref<5x12x6xbf16, #tpu.memory_space<vmem>>, vector<1x12x6xbf16>
    %9 = vector.shape_cast %8 : vector<1x12x6xbf16> to vector<12x6xbf16>
    %cst_7 = arith.constant dense<0.000000e+00> : vector<16x6xf32>
    %10 = tpu.matmul %7, %9, %cst_7 {dimension_numbers = #tpu.dot_dimension_numbers<[1], [0], [0], [1], [0, 0, 1, 1], [], []>} : vector<16x12xbf16>, vector<12x6xbf16>, vector<16x6xf32> -> vector<16x6xf32>
    %11 = arith.addf %5, %10 : vector<16x6xf32>
    %12 = vector.extract_strided_slice %1 {offsets = [1, 0], sizes = [16, 12], strides = [1, 1]} : vector<20x12xf32> to vector<16x12xf32>
    %13 = arith.truncf %12 : vector<16x12xf32> to vector<16x12xbf16>
    %c1 = arith.constant 1 : index
    %c0_8 = arith.constant 0 : index
    %c0_9 = arith.constant 0 : index
    %14 = vector.load %arg2[%c1, %c0_8, %c0_9] : memref<5x12x6xbf16, #tpu.memory_space<vmem>>, vector<1x12x6xbf16>
    %15 = vector.shape_cast %14 : vector<1x12x6xbf16> to vector<12x6xbf16>
    %cst_10 = arith.constant dense<0.000000e+00> : vector<16x6xf32>
    %16 = tpu.matmul %13, %15, %cst_10 {dimension_numbers = #tpu.dot_dimension_numbers<[1], [0], [0], [1], [0, 0, 1, 1], [], []>} : vector<16x12xbf16>, vector<12x6xbf16>, vector<16x6xf32> -> vector<16x6xf32>
    %17 = arith.addf %11, %16 : vector<16x6xf32>
    %18 = vector.extract_strided_slice %1 {offsets = [2, 0], sizes = [16, 12], strides = [1, 1]} : vector<20x12xf32> to vector<16x12xf32>
    %19 = arith.truncf %18 : vector<16x12xf32> to vector<16x12xbf16>
    %c2 = arith.constant 2 : index
    %c0_11 = arith.constant 0 : index
    %c0_12 = arith.constant 0 : index
    %20 = vector.load %arg2[%c2, %c0_11, %c0_12] : memref<5x12x6xbf16, #tpu.memory_space<vmem>>, vector<1x12x6xbf16>
    %21 = vector.shape_cast %20 : vector<1x12x6xbf16> to vector<12x6xbf16>
    %cst_13 = arith.constant dense<0.000000e+00> : vector<16x6xf32>
    %22 = tpu.matmul %19, %21, %cst_13 {dimension_numbers = #tpu.dot_dimension_numbers<[1], [0], [0], [1], [0, 0, 1, 1], [], []>} : vector<16x12xbf16>, vector<12x6xbf16>, vector<16x6xf32> -> vector<16x6xf32>
    %23 = arith.addf %17, %22 : vector<16x6xf32>
    %24 = vector.extract_strided_slice %1 {offsets = [3, 0], sizes = [16, 12], strides = [1, 1]} : vector<20x12xf32> to vector<16x12xf32>
    %25 = arith.truncf %24 : vector<16x12xf32> to vector<16x12xbf16>
    %c3 = arith.constant 3 : index
    %c0_14 = arith.constant 0 : index
    %c0_15 = arith.constant 0 : index
    %26 = vector.load %arg2[%c3, %c0_14, %c0_15] : memref<5x12x6xbf16, #tpu.memory_space<vmem>>, vector<1x12x6xbf16>
    %27 = vector.shape_cast %26 : vector<1x12x6xbf16> to vector<12x6xbf16>
    %cst_16 = arith.constant dense<0.000000e+00> : vector<16x6xf32>
    %28 = tpu.matmul %25, %27, %cst_16 {dimension_numbers = #tpu.dot_dimension_numbers<[1], [0], [0], [1], [0, 0, 1, 1], [], []>} : vector<16x12xbf16>, vector<12x6xbf16>, vector<16x6xf32> -> vector<16x6xf32>
    %29 = arith.addf %23, %28 : vector<16x6xf32>
    %30 = vector.extract_strided_slice %1 {offsets = [4, 0], sizes = [16, 12], strides = [1, 1]} : vector<20x12xf32> to vector<16x12xf32>
    %31 = arith.truncf %30 : vector<16x12xf32> to vector<16x12xbf16>
    %c4 = arith.constant 4 : index
    %c0_17 = arith.constant 0 : index
    %c0_18 = arith.constant 0 : index
    %32 = vector.load %arg2[%c4, %c0_17, %c0_18] : memref<5x12x6xbf16, #tpu.memory_space<vmem>>, vector<1x12x6xbf16>
    %33 = vector.shape_cast %32 : vector<1x12x6xbf16> to vector<12x6xbf16>
    %cst_19 = arith.constant dense<0.000000e+00> : vector<16x6xf32>
    %34 = tpu.matmul %31, %33, %cst_19 {dimension_numbers = #tpu.dot_dimension_numbers<[1], [0], [0], [1], [0, 0, 1, 1], [], []>} : vector<16x12xbf16>, vector<12x6xbf16>, vector<16x6xf32> -> vector<16x6xf32>
    %35 = arith.addf %29, %34 : vector<16x6xf32>
    %cst_20 = arith.constant dense<0.000000e+00> : vector<16xf32>
    %36 = vector.multi_reduction <add>, %35, %cst_20 [1] : vector<16x6xf32> to vector<16xf32>
    %37 = vector.shape_cast %36 : vector<16xf32> to vector<16x1xf32>
    %cst_21 = arith.constant dense<0.000000e+00> : vector<1xf32>
    %38 = vector.multi_reduction <add>, %37, %cst_21 [0] : vector<16x1xf32> to vector<1xf32>
    %39 = vector.shape_cast %38 : vector<1xf32> to vector<1x1xf32>
    %cst_22 = arith.constant 9.600000e+01 : f32
    %40 = vector.broadcast %cst_22 : f32 to vector<1x1xf32>
    %41 = arith.divf %39, %40 : vector<1x1xf32>
    %42 = vector.broadcast %41 : vector<1x1xf32> to vector<16x6xf32>
    %43 = arith.subf %35, %42 : vector<16x6xf32>
    %44 = arith.mulf %43, %43 : vector<16x6xf32>
    %cst_23 = arith.constant dense<0.000000e+00> : vector<16xf32>
    %45 = vector.multi_reduction <add>, %44, %cst_23 [1] : vector<16x6xf32> to vector<16xf32>
    %46 = vector.shape_cast %45 : vector<16xf32> to vector<16x1xf32>
    %cst_24 = arith.constant dense<0.000000e+00> : vector<1xf32>
    %47 = vector.multi_reduction <add>, %46, %cst_24 [0] : vector<16x1xf32> to vector<1xf32>
    %48 = vector.shape_cast %47 : vector<1xf32> to vector<1x1xf32>
    %cst_25 = arith.constant 9.600000e+01 : f32
    %49 = vector.broadcast %cst_25 : f32 to vector<1x1xf32>
    %50 = arith.divf %48, %49 : vector<1x1xf32>
    %cst_26 = arith.constant 9.99999974E-6 : f32
    %51 = vector.broadcast %cst_26 : f32 to vector<1x1xf32>
    %52 = arith.addf %50, %51 : vector<1x1xf32>
    %53 = math.rsqrt %52 : vector<1x1xf32>
    %54 = vector.broadcast %53 : vector<1x1xf32> to vector<16x6xf32>
    %55 = arith.mulf %43, %54 : vector<16x6xf32>
    %c0_27 = arith.constant 0 : index
    %c0_28 = arith.constant 0 : index
    %56 = vector.load %arg4[%c0_27, %c0_28] : memref<1x6xf32, #tpu.memory_space<vmem>>, vector<1x6xf32>
    %57 = vector.broadcast %56 : vector<1x6xf32> to vector<16x6xf32>
    %58 = arith.mulf %55, %57 : vector<16x6xf32>
    %c0_29 = arith.constant 0 : index
    %c0_30 = arith.constant 0 : index
    %59 = vector.load %arg5[%c0_29, %c0_30] : memref<1x6xf32, #tpu.memory_space<vmem>>, vector<1x6xf32>
    %60 = vector.broadcast %59 : vector<1x6xf32> to vector<16x6xf32>
    %61 = arith.addf %58, %60 : vector<16x6xf32>
    %cst_31 = arith.constant 5.000000e-01 : f32
    %62 = vector.broadcast %cst_31 : f32 to vector<16x6xf32>
    %63 = arith.mulf %62, %61 : vector<16x6xf32>
    %cst_32 = arith.constant 4.471500e-02 : f32
    %64 = vector.broadcast %cst_32 : f32 to vector<16x6xf32>
    %65 = arith.mulf %64, %61 : vector<16x6xf32>
    %66 = arith.mulf %65, %61 : vector<16x6xf32>
    %67 = arith.mulf %66, %61 : vector<16x6xf32>
    %68 = arith.addf %61, %67 : vector<16x6xf32>
    %cst_33 = arith.constant 0.797884583 : f32
    %69 = vector.broadcast %cst_33 : f32 to vector<16x6xf32>
    %70 = arith.mulf %69, %68 : vector<16x6xf32>
    %71 = math.tanh %70 : vector<16x6xf32>
    %cst_34 = arith.constant 1.000000e+00 : f32
    %72 = vector.broadcast %cst_34 : f32 to vector<16x6xf32>
    %73 = arith.addf %72, %71 : vector<16x6xf32>
    %74 = arith.mulf %63, %73 : vector<16x6xf32>
    %c0_35 = arith.constant 0 : index
    %c0_36 = arith.constant 0 : index
    %c0_37 = arith.constant 0 : index
    %75 = vector.load %arg6[%c0_35, %c0_36, %c0_37] : memref<1x16x6xf32, #tpu.memory_space<vmem>>, vector<1x16x6xf32>
    %76 = vector.shape_cast %75 : vector<1x16x6xf32> to vector<16x6xf32>
    %77 = arith.addf %74, %76 : vector<16x6xf32>
    %c0_38 = arith.constant 0 : index
    %c0_39 = arith.constant 0 : index
    %c0_40 = arith.constant 0 : index
    %78 = vector.load %arg7[%c0_38, %c0_39, %c0_40] : memref<1x16x6xf32, #tpu.memory_space<vmem>>, vector<1x16x6xf32>
    %79 = vector.shape_cast %78 : vector<1x16x6xf32> to vector<16x6xf32>
    %80 = vector.shape_cast %77 : vector<16x6xf32> to vector<1x16x6xf32>
    tpu.vector_store %arg7[%c0_38, %c0_39, %c0_40], %80 {strides = array<i32>} : memref<1x16x6xf32, #tpu.memory_space<vmem>>, vector<1x16x6xf32>,
    return
  }
  func.func @transform_0(%arg0: i32) -> (i32, i32, i32) {
    %c0_i32 = arith.constant 0 : i32
    %c0_i32_0 = arith.constant 0 : i32
    %c0_i32_1 = arith.constant 0 : i32
    return %arg0, %c0_i32, %c0_i32_0 : i32, i32, i32
  }
  func.func @transform_1(%arg0: i32) -> (i32, i32, i32) {
    %c0_i32 = arith.constant 0 : i32
    %c0_i32_0 = arith.constant 0 : i32
    %c0_i32_1 = arith.constant 0 : i32
    %c0_i32_2 = arith.constant 0 : i32
    return %c0_i32, %c0_i32_0, %c0_i32_1 : i32, i32, i32
  }
  func.func @transform_2(%arg0: i32) -> (i32, i32) {
    %c0_i32 = arith.constant 0 : i32
    %c0_i32_0 = arith.constant 0 : i32
    %c0_i32_1 = arith.constant 0 : i32
    return %c0_i32, %c0_i32_0 : i32, i32
  }
  func.func @transform_3(%arg0: i32) -> (i32, i32) {
    %c0_i32 = arith.constant 0 : i32
    %c0_i32_0 = arith.constant 0 : i32
    %c0_i32_1 = arith.constant 0 : i32
    return %c0_i32, %c0_i32_0 : i32, i32
  }
  func.func @transform_4(%arg0: i32) -> (i32, i32) {
    %c0_i32 = arith.constant 0 : i32
    %c0_i32_0 = arith.constant 0 : i32
    %c0_i32_1 = arith.constant 0 : i32
    return %c0_i32, %c0_i32_0 : i32, i32
  }
  func.func @transform_5(%arg0: i32) -> (i32, i32, i32) {
    %c0_i32 = arith.constant 0 : i32
    %c0_i32_0 = arith.constant 0 : i32
    %c0_i32_1 = arith.constant 0 : i32
    return %arg0, %c0_i32, %c0_i32_0 : i32, i32, i32
  }
  func.func @transform_6(%arg0: i32) -> (i32, i32, i32) {
    %c0_i32 = arith.constant 0 : i32
    %c0_i32_0 = arith.constant 0 : i32
    %c0_i32_1 = arith.constant 0 : i32
    return %arg0, %c0_i32, %c0_i32_0 : i32, i32, i32
  }
}

module attributes {stable_mosaic.version = 11 : i64} {
  func.func @_glu_kernel(%arg0: i32, %arg1: memref<32x6xf32, #tpu.memory_space<vmem>>, %arg2: memref<6x6xbf16, #tpu.memory_space<vmem>>, %arg3: memref<6x6xbf16, #tpu.memory_space<vmem>>, %arg4: memref<1x6xf32, #tpu.memory_space<vmem>>, %arg5: memref<1x6xf32, #tpu.memory_space<vmem>>, %arg6: memref<32x6xf32, #tpu.memory_space<vmem>>) attributes {dimension_semantics = [#tpu.dimension_semantics<parallel>], iteration_bounds = array<i64: 1>, scalar_prefetch = 0 : i64, scratch_operands = 0 : i64, tpu.core_type = #tpu.core_type<tc>, window_params = [{transform_indices = @transform_0, window_bounds = array<i64: 32, 6>}, {pipeline_mode = #tpu.pipeline_mode<synchronous>, transform_indices = @transform_1, window_bounds = array<i64: 6, 6>}, {pipeline_mode = #tpu.pipeline_mode<synchronous>, transform_indices = @transform_2, window_bounds = array<i64: 6, 6>}, {pipeline_mode = #tpu.pipeline_mode<synchronous>, transform_indices = @transform_3, window_bounds = array<i64: 1, 6>}, {pipeline_mode = #tpu.pipeline_mode<synchronous>, transform_indices = @transform_4, window_bounds = array<i64: 1, 6>}, {transform_indices = @transform_5, window_bounds = array<i64: 32, 6>}]} {
    %c0 = arith.constant 0 : index
    %c0_0 = arith.constant 0 : index
    %0 = vector.load %arg1[%c0, %c0_0] : memref<32x6xf32, #tpu.memory_space<vmem>>, vector<32x6xf32>
    %1 = arith.truncf %0 : vector<32x6xf32> to vector<32x6xbf16>
    %c0_1 = arith.constant 0 : index
    %c0_2 = arith.constant 0 : index
    %2 = vector.load %arg2[%c0_1, %c0_2] : memref<6x6xbf16, #tpu.memory_space<vmem>>, vector<6x6xbf16>
    %cst = arith.constant dense<0.000000e+00> : vector<32x6xf32>
    %3 = tpu.matmul %1, %2, %cst {dimension_numbers = #tpu.dot_dimension_numbers<[1], [0], [0], [1], [0, 0, 1, 1], [], []>} : vector<32x6xbf16>, vector<6x6xbf16>, vector<32x6xf32> -> vector<32x6xf32>
    %c0_3 = arith.constant 0 : index
    %c0_4 = arith.constant 0 : index
    %4 = vector.load %arg4[%c0_3, %c0_4] : memref<1x6xf32, #tpu.memory_space<vmem>>, vector<1x6xf32>
    %5 = vector.broadcast %4 : vector<1x6xf32> to vector<32x6xf32>
    %6 = arith.addf %3, %5 : vector<32x6xf32>
    %c0_5 = arith.constant 0 : index
    %c0_6 = arith.constant 0 : index
    %7 = vector.load %arg3[%c0_5, %c0_6] : memref<6x6xbf16, #tpu.memory_space<vmem>>, vector<6x6xbf16>
    %cst_7 = arith.constant dense<0.000000e+00> : vector<32x6xf32>
    %8 = tpu.matmul %1, %7, %cst_7 {dimension_numbers = #tpu.dot_dimension_numbers<[1], [0], [0], [1], [0, 0, 1, 1], [], []>} : vector<32x6xbf16>, vector<6x6xbf16>, vector<32x6xf32> -> vector<32x6xf32>
    %c0_8 = arith.constant 0 : index
    %c0_9 = arith.constant 0 : index
    %9 = vector.load %arg5[%c0_8, %c0_9] : memref<1x6xf32, #tpu.memory_space<vmem>>, vector<1x6xf32>
    %10 = vector.broadcast %9 : vector<1x6xf32> to vector<32x6xf32>
    %11 = arith.addf %8, %10 : vector<32x6xf32>
    %12 = arith.negf %11 : vector<32x6xf32>
    %13 = math.exp %12 : vector<32x6xf32>
    %cst_10 = arith.constant 1.000000e+00 : f32
    %14 = vector.broadcast %cst_10 : f32 to vector<32x6xf32>
    %15 = arith.addf %14, %13 : vector<32x6xf32>
    %16 = arith.divf %14, %15 : vector<32x6xf32>
    %17 = arith.mulf %6, %16 : vector<32x6xf32>
    %c0_11 = arith.constant 0 : index
    %c0_12 = arith.constant 0 : index
    %18 = vector.load %arg6[%c0_11, %c0_12] : memref<32x6xf32, #tpu.memory_space<vmem>>, vector<32x6xf32>
    tpu.vector_store %arg6[%c0_11, %c0_12], %17 {strides = array<i32>} : memref<32x6xf32, #tpu.memory_space<vmem>>, vector<32x6xf32>,
    return
  }
  func.func @transform_0(%arg0: i32) -> (i32, i32) {
    %c0_i32 = arith.constant 0 : i32
    %c0_i32_0 = arith.constant 0 : i32
    return %arg0, %c0_i32 : i32, i32
  }
  func.func @transform_1(%arg0: i32) -> (i32, i32) {
    %c0_i32 = arith.constant 0 : i32
    %c0_i32_0 = arith.constant 0 : i32
    %c0_i32_1 = arith.constant 0 : i32
    return %c0_i32, %c0_i32_0 : i32, i32
  }
  func.func @transform_2(%arg0: i32) -> (i32, i32) {
    %c0_i32 = arith.constant 0 : i32
    %c0_i32_0 = arith.constant 0 : i32
    %c0_i32_1 = arith.constant 0 : i32
    return %c0_i32, %c0_i32_0 : i32, i32
  }
  func.func @transform_3(%arg0: i32) -> (i32, i32) {
    %c0_i32 = arith.constant 0 : i32
    %c0_i32_0 = arith.constant 0 : i32
    %c0_i32_1 = arith.constant 0 : i32
    return %c0_i32, %c0_i32_0 : i32, i32
  }
  func.func @transform_4(%arg0: i32) -> (i32, i32) {
    %c0_i32 = arith.constant 0 : i32
    %c0_i32_0 = arith.constant 0 : i32
    %c0_i32_1 = arith.constant 0 : i32
    return %c0_i32, %c0_i32_0 : i32, i32
  }
  func.func @transform_5(%arg0: i32) -> (i32, i32) {
    %c0_i32 = arith.constant 0 : i32
    %c0_i32_0 = arith.constant 0 : i32
    return %arg0, %c0_i32 : i32, i32
  }
}

module attributes {stable_mosaic.version = 11 : i64} {
  func.func @_gconv_kernel(%arg0: i32, %arg1: memref<1x2x16xf32, #tpu.memory_space<vmem>>, %arg2: memref<1x16x16xbf16, #tpu.memory_space<vmem>>, %arg3: memref<1x2x16xf32, #tpu.memory_space<vmem>>) attributes {dimension_semantics = [#tpu.dimension_semantics<parallel>], iteration_bounds = array<i64: 6>, scalar_prefetch = 0 : i64, scratch_operands = 0 : i64, tpu.core_type = #tpu.core_type<tc>, window_params = [{transform_indices = @transform_0, window_bounds = array<i64: 1, 2, 16>}, {transform_indices = @transform_1, window_bounds = array<i64: 1, 16, 16>}, {transform_indices = @transform_2, window_bounds = array<i64: 1, 2, 16>}]} {
    %c0 = arith.constant 0 : index
    %c0_0 = arith.constant 0 : index
    %c0_1 = arith.constant 0 : index
    %0 = vector.load %arg1[%c0, %c0_0, %c0_1] : memref<1x2x16xf32, #tpu.memory_space<vmem>>, vector<1x2x16xf32>
    %1 = vector.shape_cast %0 : vector<1x2x16xf32> to vector<2x16xf32>
    %2 = arith.truncf %1 : vector<2x16xf32> to vector<2x16xbf16>
    %c0_2 = arith.constant 0 : index
    %c0_3 = arith.constant 0 : index
    %c0_4 = arith.constant 0 : index
    %3 = vector.load %arg2[%c0_2, %c0_3, %c0_4] : memref<1x16x16xbf16, #tpu.memory_space<vmem>>, vector<1x16x16xbf16>
    %4 = vector.shape_cast %3 : vector<1x16x16xbf16> to vector<16x16xbf16>
    %cst = arith.constant dense<0.000000e+00> : vector<2x16xf32>
    %5 = tpu.matmul %2, %4, %cst {dimension_numbers = #tpu.dot_dimension_numbers<[1], [0], [0], [1], [0, 0, 1, 1], [], []>} : vector<2x16xbf16>, vector<16x16xbf16>, vector<2x16xf32> -> vector<2x16xf32>
    %cst_5 = arith.constant 5.000000e-01 : f32
    %6 = vector.broadcast %cst_5 : f32 to vector<2x16xf32>
    %7 = arith.mulf %6, %5 : vector<2x16xf32>
    %cst_6 = arith.constant 4.471500e-02 : f32
    %8 = vector.broadcast %cst_6 : f32 to vector<2x16xf32>
    %9 = arith.mulf %8, %5 : vector<2x16xf32>
    %10 = arith.mulf %9, %5 : vector<2x16xf32>
    %11 = arith.mulf %10, %5 : vector<2x16xf32>
    %12 = arith.addf %5, %11 : vector<2x16xf32>
    %cst_7 = arith.constant 0.797884583 : f32
    %13 = vector.broadcast %cst_7 : f32 to vector<2x16xf32>
    %14 = arith.mulf %13, %12 : vector<2x16xf32>
    %15 = math.tanh %14 : vector<2x16xf32>
    %cst_8 = arith.constant 1.000000e+00 : f32
    %16 = vector.broadcast %cst_8 : f32 to vector<2x16xf32>
    %17 = arith.addf %16, %15 : vector<2x16xf32>
    %18 = arith.mulf %7, %17 : vector<2x16xf32>
    %c0_9 = arith.constant 0 : index
    %c0_10 = arith.constant 0 : index
    %c0_11 = arith.constant 0 : index
    %19 = vector.load %arg3[%c0_9, %c0_10, %c0_11] : memref<1x2x16xf32, #tpu.memory_space<vmem>>, vector<1x2x16xf32>
    %20 = vector.shape_cast %19 : vector<1x2x16xf32> to vector<2x16xf32>
    %21 = vector.shape_cast %18 : vector<2x16xf32> to vector<1x2x16xf32>
    tpu.vector_store %arg3[%c0_9, %c0_10, %c0_11], %21 {strides = array<i32>} : memref<1x2x16xf32, #tpu.memory_space<vmem>>, vector<1x2x16xf32>,
    return
  }
  func.func @transform_0(%arg0: i32) -> (i32, i32, i32) {
    %c0_i32 = arith.constant 0 : i32
    %c0_i32_0 = arith.constant 0 : i32
    %c0_i32_1 = arith.constant 0 : i32
    return %arg0, %c0_i32, %c0_i32_0 : i32, i32, i32
  }
  func.func @transform_1(%arg0: i32) -> (i32, i32, i32) {
    %c0_i32 = arith.constant 0 : i32
    %c0_i32_0 = arith.constant 0 : i32
    %c0_i32_1 = arith.constant 0 : i32
    return %arg0, %c0_i32, %c0_i32_0 : i32, i32, i32
  }
  func.func @transform_2(%arg0: i32) -> (i32, i32, i32) {
    %c0_i32 = arith.constant 0 : i32
    %c0_i32_0 = arith.constant 0 : i32
    %c0_i32_1 = arith.constant 0 : i32
    return %arg0, %c0_i32, %c0_i32_0 : i32, i32, i32
  }
}

module attributes {stable_mosaic.version = 11 : i64} {
  func.func @_linear_kernel(%arg0: i32, %arg1: memref<32x6xf32, #tpu.memory_space<vmem>>, %arg2: memref<6x6xbf16, #tpu.memory_space<vmem>>, %arg3: memref<1x6xf32, #tpu.memory_space<vmem>>, %arg4: memref<32x6xf32, #tpu.memory_space<vmem>>) attributes {dimension_semantics = [#tpu.dimension_semantics<parallel>], iteration_bounds = array<i64: 1>, scalar_prefetch = 0 : i64, scratch_operands = 0 : i64, tpu.core_type = #tpu.core_type<tc>, window_params = [{transform_indices = @transform_0, window_bounds = array<i64: 32, 6>}, {pipeline_mode = #tpu.pipeline_mode<synchronous>, transform_indices = @transform_1, window_bounds = array<i64: 6, 6>}, {pipeline_mode = #tpu.pipeline_mode<synchronous>, transform_indices = @transform_2, window_bounds = array<i64: 1, 6>}, {transform_indices = @transform_3, window_bounds = array<i64: 32, 6>}]} {
    %c0 = arith.constant 0 : index
    %c0_0 = arith.constant 0 : index
    %0 = vector.load %arg1[%c0, %c0_0] : memref<32x6xf32, #tpu.memory_space<vmem>>, vector<32x6xf32>
    %1 = arith.truncf %0 : vector<32x6xf32> to vector<32x6xbf16>
    %c0_1 = arith.constant 0 : index
    %c0_2 = arith.constant 0 : index
    %2 = vector.load %arg2[%c0_1, %c0_2] : memref<6x6xbf16, #tpu.memory_space<vmem>>, vector<6x6xbf16>
    %cst = arith.constant dense<0.000000e+00> : vector<32x6xf32>
    %3 = tpu.matmul %1, %2, %cst {dimension_numbers = #tpu.dot_dimension_numbers<[1], [0], [0], [1], [0, 0, 1, 1], [], []>} : vector<32x6xbf16>, vector<6x6xbf16>, vector<32x6xf32> -> vector<32x6xf32>
    %c0_3 = arith.constant 0 : index
    %c0_4 = arith.constant 0 : index
    %4 = vector.load %arg3[%c0_3, %c0_4] : memref<1x6xf32, #tpu.memory_space<vmem>>, vector<1x6xf32>
    %5 = vector.broadcast %4 : vector<1x6xf32> to vector<32x6xf32>
    %6 = arith.addf %3, %5 : vector<32x6xf32>
    %cst_5 = arith.constant 5.000000e-01 : f32
    %7 = vector.broadcast %cst_5 : f32 to vector<32x6xf32>
    %8 = arith.mulf %7, %6 : vector<32x6xf32>
    %cst_6 = arith.constant 4.471500e-02 : f32
    %9 = vector.broadcast %cst_6 : f32 to vector<32x6xf32>
    %10 = arith.mulf %9, %6 : vector<32x6xf32>
    %11 = arith.mulf %10, %6 : vector<32x6xf32>
    %12 = arith.mulf %11, %6 : vector<32x6xf32>
    %13 = arith.addf %6, %12 : vector<32x6xf32>
    %cst_7 = arith.constant 0.797884583 : f32
    %14 = vector.broadcast %cst_7 : f32 to vector<32x6xf32>
    %15 = arith.mulf %14, %13 : vector<32x6xf32>
    %16 = math.tanh %15 : vector<32x6xf32>
    %cst_8 = arith.constant 1.000000e+00 : f32
    %17 = vector.broadcast %cst_8 : f32 to vector<32x6xf32>
    %18 = arith.addf %17, %16 : vector<32x6xf32>
    %19 = arith.mulf %8, %18 : vector<32x6xf32>
    %c0_9 = arith.constant 0 : index
    %c0_10 = arith.constant 0 : index
    %20 = vector.load %arg4[%c0_9, %c0_10] : memref<32x6xf32, #tpu.memory_space<vmem>>, vector<32x6xf32>
    tpu.vector_store %arg4[%c0_9, %c0_10], %19 {strides = array<i32>} : memref<32x6xf32, #tpu.memory_space<vmem>>, vector<32x6xf32>,
    return
  }
  func.func @transform_0(%arg0: i32) -> (i32, i32) {
    %c0_i32 = arith.constant 0 : i32
    %c0_i32_0 = arith.constant 0 : i32
    return %arg0, %c0_i32 : i32, i32
  }
  func.func @transform_1(%arg0: i32) -> (i32, i32) {
    %c0_i32 = arith.constant 0 : i32
    %c0_i32_0 = arith.constant 0 : i32
    %c0_i32_1 = arith.constant 0 : i32
    return %c0_i32, %c0_i32_0 : i32, i32
  }
  func.func @transform_2(%arg0: i32) -> (i32, i32) {
    %c0_i32 = arith.constant 0 : i32
    %c0_i32_0 = arith.constant 0 : i32
    %c0_i32_1 = arith.constant 0 : i32
    return %c0_i32, %c0_i32_0 : i32, i32
  }
  func.func @transform_3(%arg0: i32) -> (i32, i32) {
    %c0_i32 = arith.constant 0 : i32
    %c0_i32_0 = arith.constant 0 : i32
    return %arg0, %c0_i32 : i32, i32
  }
}

module attributes {stable_mosaic.version = 11 : i64} {
  func.func @_linear_kernel(%arg0: i32, %arg1: memref<32x6xf32, #tpu.memory_space<vmem>>, %arg2: memref<6x6xbf16, #tpu.memory_space<vmem>>, %arg3: memref<1x6xf32, #tpu.memory_space<vmem>>, %arg4: memref<32x6xf32, #tpu.memory_space<vmem>>) attributes {dimension_semantics = [#tpu.dimension_semantics<parallel>], iteration_bounds = array<i64: 1>, scalar_prefetch = 0 : i64, scratch_operands = 0 : i64, tpu.core_type = #tpu.core_type<tc>, window_params = [{transform_indices = @transform_0, window_bounds = array<i64: 32, 6>}, {pipeline_mode = #tpu.pipeline_mode<synchronous>, transform_indices = @transform_1, window_bounds = array<i64: 6, 6>}, {pipeline_mode = #tpu.pipeline_mode<synchronous>, transform_indices = @transform_2, window_bounds = array<i64: 1, 6>}, {transform_indices = @transform_3, window_bounds = array<i64: 32, 6>}]} {
    %c0 = arith.constant 0 : index
    %c0_0 = arith.constant 0 : index
    %0 = vector.load %arg1[%c0, %c0_0] : memref<32x6xf32, #tpu.memory_space<vmem>>, vector<32x6xf32>
    %1 = arith.truncf %0 : vector<32x6xf32> to vector<32x6xbf16>
    %c0_1 = arith.constant 0 : index
    %c0_2 = arith.constant 0 : index
    %2 = vector.load %arg2[%c0_1, %c0_2] : memref<6x6xbf16, #tpu.memory_space<vmem>>, vector<6x6xbf16>
    %cst = arith.constant dense<0.000000e+00> : vector<32x6xf32>
    %3 = tpu.matmul %1, %2, %cst {dimension_numbers = #tpu.dot_dimension_numbers<[1], [0], [0], [1], [0, 0, 1, 1], [], []>} : vector<32x6xbf16>, vector<6x6xbf16>, vector<32x6xf32> -> vector<32x6xf32>
    %c0_3 = arith.constant 0 : index
    %c0_4 = arith.constant 0 : index
    %4 = vector.load %arg3[%c0_3, %c0_4] : memref<1x6xf32, #tpu.memory_space<vmem>>, vector<1x6xf32>
    %5 = vector.broadcast %4 : vector<1x6xf32> to vector<32x6xf32>
    %6 = arith.addf %3, %5 : vector<32x6xf32>
    %c0_5 = arith.constant 0 : index
    %c0_6 = arith.constant 0 : index
    %7 = vector.load %arg4[%c0_5, %c0_6] : memref<32x6xf32, #tpu.memory_space<vmem>>, vector<32x6xf32>
    tpu.vector_store %arg4[%c0_5, %c0_6], %6 {strides = array<i32>} : memref<32x6xf32, #tpu.memory_space<vmem>>, vector<32x6xf32>,
    return
  }
  func.func @transform_0(%arg0: i32) -> (i32, i32) {
    %c0_i32 = arith.constant 0 : i32
    %c0_i32_0 = arith.constant 0 : i32
    return %arg0, %c0_i32 : i32, i32
  }
  func.func @transform_1(%arg0: i32) -> (i32, i32) {
    %c0_i32 = arith.constant 0 : i32
    %c0_i32_0 = arith.constant 0 : i32
    %c0_i32_1 = arith.constant 0 : i32
    return %c0_i32, %c0_i32_0 : i32, i32
  }
  func.func @transform_2(%arg0: i32) -> (i32, i32) {
    %c0_i32 = arith.constant 0 : i32
    %c0_i32_0 = arith.constant 0 : i32
    %c0_i32_1 = arith.constant 0 : i32
    return %c0_i32, %c0_i32_0 : i32, i32
  }
  func.func @transform_3(%arg0: i32) -> (i32, i32) {
    %c0_i32 = arith.constant 0 : i32
    %c0_i32_0 = arith.constant 0 : i32
    return %arg0, %c0_i32 : i32, i32
  }
}

module attributes {stable_mosaic.version = 11 : i64} {
  func.func @_ln_res_kernel(%arg0: i32, %arg1: memref<32x6xf32, #tpu.memory_space<vmem>>, %arg2: memref<32x6xf32, #tpu.memory_space<vmem>>, %arg3: memref<1x6xf32, #tpu.memory_space<vmem>>, %arg4: memref<1x6xf32, #tpu.memory_space<vmem>>, %arg5: memref<32x6xf32, #tpu.memory_space<vmem>>) attributes {dimension_semantics = [#tpu.dimension_semantics<parallel>], iteration_bounds = array<i64: 1>, scalar_prefetch = 0 : i64, scratch_operands = 0 : i64, tpu.core_type = #tpu.core_type<tc>, window_params = [{transform_indices = @transform_0, window_bounds = array<i64: 32, 6>}, {transform_indices = @transform_1, window_bounds = array<i64: 32, 6>}, {pipeline_mode = #tpu.pipeline_mode<synchronous>, transform_indices = @transform_2, window_bounds = array<i64: 1, 6>}, {pipeline_mode = #tpu.pipeline_mode<synchronous>, transform_indices = @transform_3, window_bounds = array<i64: 1, 6>}, {transform_indices = @transform_4, window_bounds = array<i64: 32, 6>}]} {
    %c0 = arith.constant 0 : index
    %c0_0 = arith.constant 0 : index
    %0 = vector.load %arg1[%c0, %c0_0] : memref<32x6xf32, #tpu.memory_space<vmem>>, vector<32x6xf32>
    %c0_1 = arith.constant 0 : index
    %c0_2 = arith.constant 0 : index
    %1 = vector.load %arg2[%c0_1, %c0_2] : memref<32x6xf32, #tpu.memory_space<vmem>>, vector<32x6xf32>
    %2 = arith.addf %0, %1 : vector<32x6xf32>
    %cst = arith.constant dense<0.000000e+00> : vector<32xf32>
    %3 = vector.multi_reduction <add>, %2, %cst [1] : vector<32x6xf32> to vector<32xf32>
    %4 = vector.shape_cast %3 : vector<32xf32> to vector<32x1xf32>
    %cst_3 = arith.constant 6.000000e+00 : f32
    %5 = vector.broadcast %cst_3 : f32 to vector<32x1xf32>
    %6 = arith.divf %4, %5 : vector<32x1xf32>
    %7 = vector.broadcast %6 : vector<32x1xf32> to vector<32x6xf32>
    %8 = arith.subf %2, %7 : vector<32x6xf32>
    %9 = arith.mulf %8, %8 : vector<32x6xf32>
    %cst_4 = arith.constant dense<0.000000e+00> : vector<32xf32>
    %10 = vector.multi_reduction <add>, %9, %cst_4 [1] : vector<32x6xf32> to vector<32xf32>
    %11 = vector.shape_cast %10 : vector<32xf32> to vector<32x1xf32>
    %cst_5 = arith.constant 6.000000e+00 : f32
    %12 = vector.broadcast %cst_5 : f32 to vector<32x1xf32>
    %13 = arith.divf %11, %12 : vector<32x1xf32>
    %cst_6 = arith.constant 9.99999974E-6 : f32
    %14 = vector.broadcast %cst_6 : f32 to vector<32x1xf32>
    %15 = arith.addf %13, %14 : vector<32x1xf32>
    %16 = math.rsqrt %15 : vector<32x1xf32>
    %17 = vector.broadcast %16 : vector<32x1xf32> to vector<32x6xf32>
    %18 = arith.mulf %8, %17 : vector<32x6xf32>
    %c0_7 = arith.constant 0 : index
    %c0_8 = arith.constant 0 : index
    %19 = vector.load %arg3[%c0_7, %c0_8] : memref<1x6xf32, #tpu.memory_space<vmem>>, vector<1x6xf32>
    %20 = vector.broadcast %19 : vector<1x6xf32> to vector<32x6xf32>
    %21 = arith.mulf %18, %20 : vector<32x6xf32>
    %c0_9 = arith.constant 0 : index
    %c0_10 = arith.constant 0 : index
    %22 = vector.load %arg4[%c0_9, %c0_10] : memref<1x6xf32, #tpu.memory_space<vmem>>, vector<1x6xf32>
    %23 = vector.broadcast %22 : vector<1x6xf32> to vector<32x6xf32>
    %24 = arith.addf %21, %23 : vector<32x6xf32>
    %c0_11 = arith.constant 0 : index
    %c0_12 = arith.constant 0 : index
    %25 = vector.load %arg5[%c0_11, %c0_12] : memref<32x6xf32, #tpu.memory_space<vmem>>, vector<32x6xf32>
    tpu.vector_store %arg5[%c0_11, %c0_12], %24 {strides = array<i32>} : memref<32x6xf32, #tpu.memory_space<vmem>>, vector<32x6xf32>,
    return
  }
  func.func @transform_0(%arg0: i32) -> (i32, i32) {
    %c0_i32 = arith.constant 0 : i32
    %c0_i32_0 = arith.constant 0 : i32
    return %arg0, %c0_i32 : i32, i32
  }
  func.func @transform_1(%arg0: i32) -> (i32, i32) {
    %c0_i32 = arith.constant 0 : i32
    %c0_i32_0 = arith.constant 0 : i32
    return %arg0, %c0_i32 : i32, i32
  }
  func.func @transform_2(%arg0: i32) -> (i32, i32) {
    %c0_i32 = arith.constant 0 : i32
    %c0_i32_0 = arith.constant 0 : i32
    %c0_i32_1 = arith.constant 0 : i32
    return %c0_i32, %c0_i32_0 : i32, i32
  }
  func.func @transform_3(%arg0: i32) -> (i32, i32) {
    %c0_i32 = arith.constant 0 : i32
    %c0_i32_0 = arith.constant 0 : i32
    %c0_i32_1 = arith.constant 0 : i32
    return %c0_i32, %c0_i32_0 : i32, i32
  }
  func.func @transform_4(%arg0: i32) -> (i32, i32) {
    %c0_i32 = arith.constant 0 : i32
    %c0_i32_0 = arith.constant 0 : i32
    return %arg0, %c0_i32 : i32, i32
  }
}

module attributes {stable_mosaic.version = 11 : i64} {
  func.func @_linear_kernel(%arg0: i32, %arg1: memref<64x12xf32, #tpu.memory_space<vmem>>, %arg2: memref<12x4xbf16, #tpu.memory_space<vmem>>, %arg3: memref<1x4xf32, #tpu.memory_space<vmem>>, %arg4: memref<64x4xf32, #tpu.memory_space<vmem>>) attributes {dimension_semantics = [#tpu.dimension_semantics<parallel>], iteration_bounds = array<i64: 1>, scalar_prefetch = 0 : i64, scratch_operands = 0 : i64, tpu.core_type = #tpu.core_type<tc>, window_params = [{transform_indices = @transform_0, window_bounds = array<i64: 64, 12>}, {pipeline_mode = #tpu.pipeline_mode<synchronous>, transform_indices = @transform_1, window_bounds = array<i64: 12, 4>}, {pipeline_mode = #tpu.pipeline_mode<synchronous>, transform_indices = @transform_2, window_bounds = array<i64: 1, 4>}, {transform_indices = @transform_3, window_bounds = array<i64: 64, 4>}]} {
    %c0 = arith.constant 0 : index
    %c0_0 = arith.constant 0 : index
    %0 = vector.load %arg1[%c0, %c0_0] : memref<64x12xf32, #tpu.memory_space<vmem>>, vector<64x12xf32>
    %1 = arith.truncf %0 : vector<64x12xf32> to vector<64x12xbf16>
    %c0_1 = arith.constant 0 : index
    %c0_2 = arith.constant 0 : index
    %2 = vector.load %arg2[%c0_1, %c0_2] : memref<12x4xbf16, #tpu.memory_space<vmem>>, vector<12x4xbf16>
    %cst = arith.constant dense<0.000000e+00> : vector<64x4xf32>
    %3 = tpu.matmul %1, %2, %cst {dimension_numbers = #tpu.dot_dimension_numbers<[1], [0], [0], [1], [0, 0, 1, 1], [], []>} : vector<64x12xbf16>, vector<12x4xbf16>, vector<64x4xf32> -> vector<64x4xf32>
    %c0_3 = arith.constant 0 : index
    %c0_4 = arith.constant 0 : index
    %4 = vector.load %arg3[%c0_3, %c0_4] : memref<1x4xf32, #tpu.memory_space<vmem>>, vector<1x4xf32>
    %5 = vector.broadcast %4 : vector<1x4xf32> to vector<64x4xf32>
    %6 = arith.addf %3, %5 : vector<64x4xf32>
    %c0_5 = arith.constant 0 : index
    %c0_6 = arith.constant 0 : index
    %7 = vector.load %arg4[%c0_5, %c0_6] : memref<64x4xf32, #tpu.memory_space<vmem>>, vector<64x4xf32>
    tpu.vector_store %arg4[%c0_5, %c0_6], %6 {strides = array<i32>} : memref<64x4xf32, #tpu.memory_space<vmem>>, vector<64x4xf32>,
    return
  }
  func.func @transform_0(%arg0: i32) -> (i32, i32) {
    %c0_i32 = arith.constant 0 : i32
    %c0_i32_0 = arith.constant 0 : i32
    return %arg0, %c0_i32 : i32, i32
  }
  func.func @transform_1(%arg0: i32) -> (i32, i32) {
    %c0_i32 = arith.constant 0 : i32
    %c0_i32_0 = arith.constant 0 : i32
    %c0_i32_1 = arith.constant 0 : i32
    return %c0_i32, %c0_i32_0 : i32, i32
  }
  func.func @transform_2(%arg0: i32) -> (i32, i32) {
    %c0_i32 = arith.constant 0 : i32
    %c0_i32_0 = arith.constant 0 : i32
    %c0_i32_1 = arith.constant 0 : i32
    return %c0_i32, %c0_i32_0 : i32, i32
  }
  func.func @transform_3(%arg0: i32) -> (i32, i32) {
    %c0_i32 = arith.constant 0 : i32
    %c0_i32_0 = arith.constant 0 : i32
    return %arg0, %c0_i32 : i32, i32
  }
}

module attributes {stable_mosaic.version = 11 : i64} {
  func.func @_conv_gn_gelu_kernel(%arg0: i32, %arg1: memref<1x36x12xf32, #tpu.memory_space<vmem>>, %arg2: memref<5x12x24xbf16, #tpu.memory_space<vmem>>, %arg3: memref<1x24xf32, #tpu.memory_space<vmem>>, %arg4: memref<1x24xf32, #tpu.memory_space<vmem>>, %arg5: memref<1x24xf32, #tpu.memory_space<vmem>>, %arg6: memref<1x32x24xf32, #tpu.memory_space<vmem>>) attributes {dimension_semantics = [#tpu.dimension_semantics<parallel>], iteration_bounds = array<i64: 2>, scalar_prefetch = 0 : i64, scratch_operands = 0 : i64, tpu.core_type = #tpu.core_type<tc>, window_params = [{transform_indices = @transform_0, window_bounds = array<i64: 1, 36, 12>}, {pipeline_mode = #tpu.pipeline_mode<synchronous>, transform_indices = @transform_1, window_bounds = array<i64: 5, 12, 24>}, {pipeline_mode = #tpu.pipeline_mode<synchronous>, transform_indices = @transform_2, window_bounds = array<i64: 1, 24>}, {pipeline_mode = #tpu.pipeline_mode<synchronous>, transform_indices = @transform_3, window_bounds = array<i64: 1, 24>}, {pipeline_mode = #tpu.pipeline_mode<synchronous>, transform_indices = @transform_4, window_bounds = array<i64: 1, 24>}, {transform_indices = @transform_5, window_bounds = array<i64: 1, 32, 24>}]} {
    %c0 = arith.constant 0 : index
    %c0_0 = arith.constant 0 : index
    %c0_1 = arith.constant 0 : index
    %0 = vector.load %arg1[%c0, %c0_0, %c0_1] : memref<1x36x12xf32, #tpu.memory_space<vmem>>, vector<1x36x12xf32>
    %1 = vector.shape_cast %0 : vector<1x36x12xf32> to vector<36x12xf32>
    %cst = arith.constant 0.000000e+00 : f32
    %2 = vector.broadcast %cst : f32 to vector<32x24xf32>
    %c0_2 = arith.constant 0 : index
    %c0_3 = arith.constant 0 : index
    %3 = vector.load %arg3[%c0_2, %c0_3] : memref<1x24xf32, #tpu.memory_space<vmem>>, vector<1x24xf32>
    %4 = vector.broadcast %3 : vector<1x24xf32> to vector<32x24xf32>
    %5 = arith.addf %2, %4 : vector<32x24xf32>
    %6 = vector.extract_strided_slice %1 {offsets = [0, 0], sizes = [32, 12], strides = [1, 1]} : vector<36x12xf32> to vector<32x12xf32>
    %7 = arith.truncf %6 : vector<32x12xf32> to vector<32x12xbf16>
    %c0_4 = arith.constant 0 : index
    %c0_5 = arith.constant 0 : index
    %c0_6 = arith.constant 0 : index
    %8 = vector.load %arg2[%c0_4, %c0_5, %c0_6] : memref<5x12x24xbf16, #tpu.memory_space<vmem>>, vector<1x12x24xbf16>
    %9 = vector.shape_cast %8 : vector<1x12x24xbf16> to vector<12x24xbf16>
    %cst_7 = arith.constant dense<0.000000e+00> : vector<32x24xf32>
    %10 = tpu.matmul %7, %9, %cst_7 {dimension_numbers = #tpu.dot_dimension_numbers<[1], [0], [0], [1], [0, 0, 1, 1], [], []>} : vector<32x12xbf16>, vector<12x24xbf16>, vector<32x24xf32> -> vector<32x24xf32>
    %11 = arith.addf %5, %10 : vector<32x24xf32>
    %12 = vector.extract_strided_slice %1 {offsets = [1, 0], sizes = [32, 12], strides = [1, 1]} : vector<36x12xf32> to vector<32x12xf32>
    %13 = arith.truncf %12 : vector<32x12xf32> to vector<32x12xbf16>
    %c1 = arith.constant 1 : index
    %c0_8 = arith.constant 0 : index
    %c0_9 = arith.constant 0 : index
    %14 = vector.load %arg2[%c1, %c0_8, %c0_9] : memref<5x12x24xbf16, #tpu.memory_space<vmem>>, vector<1x12x24xbf16>
    %15 = vector.shape_cast %14 : vector<1x12x24xbf16> to vector<12x24xbf16>
    %cst_10 = arith.constant dense<0.000000e+00> : vector<32x24xf32>
    %16 = tpu.matmul %13, %15, %cst_10 {dimension_numbers = #tpu.dot_dimension_numbers<[1], [0], [0], [1], [0, 0, 1, 1], [], []>} : vector<32x12xbf16>, vector<12x24xbf16>, vector<32x24xf32> -> vector<32x24xf32>
    %17 = arith.addf %11, %16 : vector<32x24xf32>
    %18 = vector.extract_strided_slice %1 {offsets = [2, 0], sizes = [32, 12], strides = [1, 1]} : vector<36x12xf32> to vector<32x12xf32>
    %19 = arith.truncf %18 : vector<32x12xf32> to vector<32x12xbf16>
    %c2 = arith.constant 2 : index
    %c0_11 = arith.constant 0 : index
    %c0_12 = arith.constant 0 : index
    %20 = vector.load %arg2[%c2, %c0_11, %c0_12] : memref<5x12x24xbf16, #tpu.memory_space<vmem>>, vector<1x12x24xbf16>
    %21 = vector.shape_cast %20 : vector<1x12x24xbf16> to vector<12x24xbf16>
    %cst_13 = arith.constant dense<0.000000e+00> : vector<32x24xf32>
    %22 = tpu.matmul %19, %21, %cst_13 {dimension_numbers = #tpu.dot_dimension_numbers<[1], [0], [0], [1], [0, 0, 1, 1], [], []>} : vector<32x12xbf16>, vector<12x24xbf16>, vector<32x24xf32> -> vector<32x24xf32>
    %23 = arith.addf %17, %22 : vector<32x24xf32>
    %24 = vector.extract_strided_slice %1 {offsets = [3, 0], sizes = [32, 12], strides = [1, 1]} : vector<36x12xf32> to vector<32x12xf32>
    %25 = arith.truncf %24 : vector<32x12xf32> to vector<32x12xbf16>
    %c3 = arith.constant 3 : index
    %c0_14 = arith.constant 0 : index
    %c0_15 = arith.constant 0 : index
    %26 = vector.load %arg2[%c3, %c0_14, %c0_15] : memref<5x12x24xbf16, #tpu.memory_space<vmem>>, vector<1x12x24xbf16>
    %27 = vector.shape_cast %26 : vector<1x12x24xbf16> to vector<12x24xbf16>
    %cst_16 = arith.constant dense<0.000000e+00> : vector<32x24xf32>
    %28 = tpu.matmul %25, %27, %cst_16 {dimension_numbers = #tpu.dot_dimension_numbers<[1], [0], [0], [1], [0, 0, 1, 1], [], []>} : vector<32x12xbf16>, vector<12x24xbf16>, vector<32x24xf32> -> vector<32x24xf32>
    %29 = arith.addf %23, %28 : vector<32x24xf32>
    %30 = vector.extract_strided_slice %1 {offsets = [4, 0], sizes = [32, 12], strides = [1, 1]} : vector<36x12xf32> to vector<32x12xf32>
    %31 = arith.truncf %30 : vector<32x12xf32> to vector<32x12xbf16>
    %c4 = arith.constant 4 : index
    %c0_17 = arith.constant 0 : index
    %c0_18 = arith.constant 0 : index
    %32 = vector.load %arg2[%c4, %c0_17, %c0_18] : memref<5x12x24xbf16, #tpu.memory_space<vmem>>, vector<1x12x24xbf16>
    %33 = vector.shape_cast %32 : vector<1x12x24xbf16> to vector<12x24xbf16>
    %cst_19 = arith.constant dense<0.000000e+00> : vector<32x24xf32>
    %34 = tpu.matmul %31, %33, %cst_19 {dimension_numbers = #tpu.dot_dimension_numbers<[1], [0], [0], [1], [0, 0, 1, 1], [], []>} : vector<32x12xbf16>, vector<12x24xbf16>, vector<32x24xf32> -> vector<32x24xf32>
    %35 = arith.addf %29, %34 : vector<32x24xf32>
    %cst_20 = arith.constant dense<0.000000e+00> : vector<32xf32>
    %36 = vector.multi_reduction <add>, %35, %cst_20 [1] : vector<32x24xf32> to vector<32xf32>
    %37 = vector.shape_cast %36 : vector<32xf32> to vector<32x1xf32>
    %cst_21 = arith.constant dense<0.000000e+00> : vector<1xf32>
    %38 = vector.multi_reduction <add>, %37, %cst_21 [0] : vector<32x1xf32> to vector<1xf32>
    %39 = vector.shape_cast %38 : vector<1xf32> to vector<1x1xf32>
    %cst_22 = arith.constant 7.680000e+02 : f32
    %40 = vector.broadcast %cst_22 : f32 to vector<1x1xf32>
    %41 = arith.divf %39, %40 : vector<1x1xf32>
    %42 = vector.broadcast %41 : vector<1x1xf32> to vector<32x24xf32>
    %43 = arith.subf %35, %42 : vector<32x24xf32>
    %44 = arith.mulf %43, %43 : vector<32x24xf32>
    %cst_23 = arith.constant dense<0.000000e+00> : vector<32xf32>
    %45 = vector.multi_reduction <add>, %44, %cst_23 [1] : vector<32x24xf32> to vector<32xf32>
    %46 = vector.shape_cast %45 : vector<32xf32> to vector<32x1xf32>
    %cst_24 = arith.constant dense<0.000000e+00> : vector<1xf32>
    %47 = vector.multi_reduction <add>, %46, %cst_24 [0] : vector<32x1xf32> to vector<1xf32>
    %48 = vector.shape_cast %47 : vector<1xf32> to vector<1x1xf32>
    %cst_25 = arith.constant 7.680000e+02 : f32
    %49 = vector.broadcast %cst_25 : f32 to vector<1x1xf32>
    %50 = arith.divf %48, %49 : vector<1x1xf32>
    %cst_26 = arith.constant 9.99999974E-6 : f32
    %51 = vector.broadcast %cst_26 : f32 to vector<1x1xf32>
    %52 = arith.addf %50, %51 : vector<1x1xf32>
    %53 = math.rsqrt %52 : vector<1x1xf32>
    %54 = vector.broadcast %53 : vector<1x1xf32> to vector<32x24xf32>
    %55 = arith.mulf %43, %54 : vector<32x24xf32>
    %c0_27 = arith.constant 0 : index
    %c0_28 = arith.constant 0 : index
    %56 = vector.load %arg4[%c0_27, %c0_28] : memref<1x24xf32, #tpu.memory_space<vmem>>, vector<1x24xf32>
    %57 = vector.broadcast %56 : vector<1x24xf32> to vector<32x24xf32>
    %58 = arith.mulf %55, %57 : vector<32x24xf32>
    %c0_29 = arith.constant 0 : index
    %c0_30 = arith.constant 0 : index
    %59 = vector.load %arg5[%c0_29, %c0_30] : memref<1x24xf32, #tpu.memory_space<vmem>>, vector<1x24xf32>
    %60 = vector.broadcast %59 : vector<1x24xf32> to vector<32x24xf32>
    %61 = arith.addf %58, %60 : vector<32x24xf32>
    %cst_31 = arith.constant 5.000000e-01 : f32
    %62 = vector.broadcast %cst_31 : f32 to vector<32x24xf32>
    %63 = arith.mulf %62, %61 : vector<32x24xf32>
    %cst_32 = arith.constant 4.471500e-02 : f32
    %64 = vector.broadcast %cst_32 : f32 to vector<32x24xf32>
    %65 = arith.mulf %64, %61 : vector<32x24xf32>
    %66 = arith.mulf %65, %61 : vector<32x24xf32>
    %67 = arith.mulf %66, %61 : vector<32x24xf32>
    %68 = arith.addf %61, %67 : vector<32x24xf32>
    %cst_33 = arith.constant 0.797884583 : f32
    %69 = vector.broadcast %cst_33 : f32 to vector<32x24xf32>
    %70 = arith.mulf %69, %68 : vector<32x24xf32>
    %71 = math.tanh %70 : vector<32x24xf32>
    %cst_34 = arith.constant 1.000000e+00 : f32
    %72 = vector.broadcast %cst_34 : f32 to vector<32x24xf32>
    %73 = arith.addf %72, %71 : vector<32x24xf32>
    %74 = arith.mulf %63, %73 : vector<32x24xf32>
    %c0_35 = arith.constant 0 : index
    %c0_36 = arith.constant 0 : index
    %c0_37 = arith.constant 0 : index
    %75 = vector.load %arg6[%c0_35, %c0_36, %c0_37] : memref<1x32x24xf32, #tpu.memory_space<vmem>>, vector<1x32x24xf32>
    %76 = vector.shape_cast %75 : vector<1x32x24xf32> to vector<32x24xf32>
    %77 = vector.shape_cast %74 : vector<32x24xf32> to vector<1x32x24xf32>
    tpu.vector_store %arg6[%c0_35, %c0_36, %c0_37], %77 {strides = array<i32>} : memref<1x32x24xf32, #tpu.memory_space<vmem>>, vector<1x32x24xf32>,
    return
  }
  func.func @transform_0(%arg0: i32) -> (i32, i32, i32) {
    %c0_i32 = arith.constant 0 : i32
    %c0_i32_0 = arith.constant 0 : i32
    %c0_i32_1 = arith.constant 0 : i32
    return %arg0, %c0_i32, %c0_i32_0 : i32, i32, i32
  }
  func.func @transform_1(%arg0: i32) -> (i32, i32, i32) {
    %c0_i32 = arith.constant 0 : i32
    %c0_i32_0 = arith.constant 0 : i32
    %c0_i32_1 = arith.constant 0 : i32
    %c0_i32_2 = arith.constant 0 : i32
    return %c0_i32, %c0_i32_0, %c0_i32_1 : i32, i32, i32
  }
  func.func @transform_2(%arg0: i32) -> (i32, i32) {
    %c0_i32 = arith.constant 0 : i32
    %c0_i32_0 = arith.constant 0 : i32
    %c0_i32_1 = arith.constant 0 : i32
    return %c0_i32, %c0_i32_0 : i32, i32
  }
  func.func @transform_3(%arg0: i32) -> (i32, i32) {
    %c0_i32 = arith.constant 0 : i32
    %c0_i32_0 = arith.constant 0 : i32
    %c0_i32_1 = arith.constant 0 : i32
    return %c0_i32, %c0_i32_0 : i32, i32
  }
  func.func @transform_4(%arg0: i32) -> (i32, i32) {
    %c0_i32 = arith.constant 0 : i32
    %c0_i32_0 = arith.constant 0 : i32
    %c0_i32_1 = arith.constant 0 : i32
    return %c0_i32, %c0_i32_0 : i32, i32
  }
  func.func @transform_5(%arg0: i32) -> (i32, i32, i32) {
    %c0_i32 = arith.constant 0 : i32
    %c0_i32_0 = arith.constant 0 : i32
    %c0_i32_1 = arith.constant 0 : i32
    return %arg0, %c0_i32, %c0_i32_0 : i32, i32, i32
  }
}

module attributes {stable_mosaic.version = 11 : i64} {
  func.func @_glu_kernel(%arg0: i32, %arg1: memref<64x4xf32, #tpu.memory_space<vmem>>, %arg2: memref<4x4xbf16, #tpu.memory_space<vmem>>, %arg3: memref<4x4xbf16, #tpu.memory_space<vmem>>, %arg4: memref<1x4xf32, #tpu.memory_space<vmem>>, %arg5: memref<1x4xf32, #tpu.memory_space<vmem>>, %arg6: memref<64x4xf32, #tpu.memory_space<vmem>>) attributes {dimension_semantics = [#tpu.dimension_semantics<parallel>], iteration_bounds = array<i64: 1>, scalar_prefetch = 0 : i64, scratch_operands = 0 : i64, tpu.core_type = #tpu.core_type<tc>, window_params = [{transform_indices = @transform_0, window_bounds = array<i64: 64, 4>}, {pipeline_mode = #tpu.pipeline_mode<synchronous>, transform_indices = @transform_1, window_bounds = array<i64: 4, 4>}, {pipeline_mode = #tpu.pipeline_mode<synchronous>, transform_indices = @transform_2, window_bounds = array<i64: 4, 4>}, {pipeline_mode = #tpu.pipeline_mode<synchronous>, transform_indices = @transform_3, window_bounds = array<i64: 1, 4>}, {pipeline_mode = #tpu.pipeline_mode<synchronous>, transform_indices = @transform_4, window_bounds = array<i64: 1, 4>}, {transform_indices = @transform_5, window_bounds = array<i64: 64, 4>}]} {
    %c0 = arith.constant 0 : index
    %c0_0 = arith.constant 0 : index
    %0 = vector.load %arg1[%c0, %c0_0] : memref<64x4xf32, #tpu.memory_space<vmem>>, vector<64x4xf32>
    %1 = arith.truncf %0 : vector<64x4xf32> to vector<64x4xbf16>
    %c0_1 = arith.constant 0 : index
    %c0_2 = arith.constant 0 : index
    %2 = vector.load %arg2[%c0_1, %c0_2] : memref<4x4xbf16, #tpu.memory_space<vmem>>, vector<4x4xbf16>
    %cst = arith.constant dense<0.000000e+00> : vector<64x4xf32>
    %3 = tpu.matmul %1, %2, %cst {dimension_numbers = #tpu.dot_dimension_numbers<[1], [0], [0], [1], [0, 0, 1, 1], [], []>} : vector<64x4xbf16>, vector<4x4xbf16>, vector<64x4xf32> -> vector<64x4xf32>
    %c0_3 = arith.constant 0 : index
    %c0_4 = arith.constant 0 : index
    %4 = vector.load %arg4[%c0_3, %c0_4] : memref<1x4xf32, #tpu.memory_space<vmem>>, vector<1x4xf32>
    %5 = vector.broadcast %4 : vector<1x4xf32> to vector<64x4xf32>
    %6 = arith.addf %3, %5 : vector<64x4xf32>
    %c0_5 = arith.constant 0 : index
    %c0_6 = arith.constant 0 : index
    %7 = vector.load %arg3[%c0_5, %c0_6] : memref<4x4xbf16, #tpu.memory_space<vmem>>, vector<4x4xbf16>
    %cst_7 = arith.constant dense<0.000000e+00> : vector<64x4xf32>
    %8 = tpu.matmul %1, %7, %cst_7 {dimension_numbers = #tpu.dot_dimension_numbers<[1], [0], [0], [1], [0, 0, 1, 1], [], []>} : vector<64x4xbf16>, vector<4x4xbf16>, vector<64x4xf32> -> vector<64x4xf32>
    %c0_8 = arith.constant 0 : index
    %c0_9 = arith.constant 0 : index
    %9 = vector.load %arg5[%c0_8, %c0_9] : memref<1x4xf32, #tpu.memory_space<vmem>>, vector<1x4xf32>
    %10 = vector.broadcast %9 : vector<1x4xf32> to vector<64x4xf32>
    %11 = arith.addf %8, %10 : vector<64x4xf32>
    %12 = arith.negf %11 : vector<64x4xf32>
    %13 = math.exp %12 : vector<64x4xf32>
    %cst_10 = arith.constant 1.000000e+00 : f32
    %14 = vector.broadcast %cst_10 : f32 to vector<64x4xf32>
    %15 = arith.addf %14, %13 : vector<64x4xf32>
    %16 = arith.divf %14, %15 : vector<64x4xf32>
    %17 = arith.mulf %6, %16 : vector<64x4xf32>
    %c0_11 = arith.constant 0 : index
    %c0_12 = arith.constant 0 : index
    %18 = vector.load %arg6[%c0_11, %c0_12] : memref<64x4xf32, #tpu.memory_space<vmem>>, vector<64x4xf32>
    tpu.vector_store %arg6[%c0_11, %c0_12], %17 {strides = array<i32>} : memref<64x4xf32, #tpu.memory_space<vmem>>, vector<64x4xf32>,
    return
  }
  func.func @transform_0(%arg0: i32) -> (i32, i32) {
    %c0_i32 = arith.constant 0 : i32
    %c0_i32_0 = arith.constant 0 : i32
    return %arg0, %c0_i32 : i32, i32
  }
  func.func @transform_1(%arg0: i32) -> (i32, i32) {
    %c0_i32 = arith.constant 0 : i32
    %c0_i32_0 = arith.constant 0 : i32
    %c0_i32_1 = arith.constant 0 : i32
    return %c0_i32, %c0_i32_0 : i32, i32
  }
  func.func @transform_2(%arg0: i32) -> (i32, i32) {
    %c0_i32 = arith.constant 0 : i32
    %c0_i32_0 = arith.constant 0 : i32
    %c0_i32_1 = arith.constant 0 : i32
    return %c0_i32, %c0_i32_0 : i32, i32
  }
  func.func @transform_3(%arg0: i32) -> (i32, i32) {
    %c0_i32 = arith.constant 0 : i32
    %c0_i32_0 = arith.constant 0 : i32
    %c0_i32_1 = arith.constant 0 : i32
    return %c0_i32, %c0_i32_0 : i32, i32
  }
  func.func @transform_4(%arg0: i32) -> (i32, i32) {
    %c0_i32 = arith.constant 0 : i32
    %c0_i32_0 = arith.constant 0 : i32
    %c0_i32_1 = arith.constant 0 : i32
    return %c0_i32, %c0_i32_0 : i32, i32
  }
  func.func @transform_5(%arg0: i32) -> (i32, i32) {
    %c0_i32 = arith.constant 0 : i32
    %c0_i32_0 = arith.constant 0 : i32
    return %arg0, %c0_i32 : i32, i32
  }
}

module attributes {stable_mosaic.version = 11 : i64} {
  func.func @_conv_gn_gelu_kernel(%arg0: i32, %arg1: memref<1x36x24xf32, #tpu.memory_space<vmem>>, %arg2: memref<5x24x4xbf16, #tpu.memory_space<vmem>>, %arg3: memref<1x4xf32, #tpu.memory_space<vmem>>, %arg4: memref<1x4xf32, #tpu.memory_space<vmem>>, %arg5: memref<1x4xf32, #tpu.memory_space<vmem>>, %arg6: memref<1x32x4xf32, #tpu.memory_space<vmem>>, %arg7: memref<1x32x4xf32, #tpu.memory_space<vmem>>) attributes {dimension_semantics = [#tpu.dimension_semantics<parallel>], iteration_bounds = array<i64: 2>, scalar_prefetch = 0 : i64, scratch_operands = 0 : i64, tpu.core_type = #tpu.core_type<tc>, window_params = [{transform_indices = @transform_0, window_bounds = array<i64: 1, 36, 24>}, {pipeline_mode = #tpu.pipeline_mode<synchronous>, transform_indices = @transform_1, window_bounds = array<i64: 5, 24, 4>}, {pipeline_mode = #tpu.pipeline_mode<synchronous>, transform_indices = @transform_2, window_bounds = array<i64: 1, 4>}, {pipeline_mode = #tpu.pipeline_mode<synchronous>, transform_indices = @transform_3, window_bounds = array<i64: 1, 4>}, {pipeline_mode = #tpu.pipeline_mode<synchronous>, transform_indices = @transform_4, window_bounds = array<i64: 1, 4>}, {transform_indices = @transform_5, window_bounds = array<i64: 1, 32, 4>}, {transform_indices = @transform_6, window_bounds = array<i64: 1, 32, 4>}]} {
    %c0 = arith.constant 0 : index
    %c0_0 = arith.constant 0 : index
    %c0_1 = arith.constant 0 : index
    %0 = vector.load %arg1[%c0, %c0_0, %c0_1] : memref<1x36x24xf32, #tpu.memory_space<vmem>>, vector<1x36x24xf32>
    %1 = vector.shape_cast %0 : vector<1x36x24xf32> to vector<36x24xf32>
    %cst = arith.constant 0.000000e+00 : f32
    %2 = vector.broadcast %cst : f32 to vector<32x4xf32>
    %c0_2 = arith.constant 0 : index
    %c0_3 = arith.constant 0 : index
    %3 = vector.load %arg3[%c0_2, %c0_3] : memref<1x4xf32, #tpu.memory_space<vmem>>, vector<1x4xf32>
    %4 = vector.broadcast %3 : vector<1x4xf32> to vector<32x4xf32>
    %5 = arith.addf %2, %4 : vector<32x4xf32>
    %6 = vector.extract_strided_slice %1 {offsets = [0, 0], sizes = [32, 24], strides = [1, 1]} : vector<36x24xf32> to vector<32x24xf32>
    %7 = arith.truncf %6 : vector<32x24xf32> to vector<32x24xbf16>
    %c0_4 = arith.constant 0 : index
    %c0_5 = arith.constant 0 : index
    %c0_6 = arith.constant 0 : index
    %8 = vector.load %arg2[%c0_4, %c0_5, %c0_6] : memref<5x24x4xbf16, #tpu.memory_space<vmem>>, vector<1x24x4xbf16>
    %9 = vector.shape_cast %8 : vector<1x24x4xbf16> to vector<24x4xbf16>
    %cst_7 = arith.constant dense<0.000000e+00> : vector<32x4xf32>
    %10 = tpu.matmul %7, %9, %cst_7 {dimension_numbers = #tpu.dot_dimension_numbers<[1], [0], [0], [1], [0, 0, 1, 1], [], []>} : vector<32x24xbf16>, vector<24x4xbf16>, vector<32x4xf32> -> vector<32x4xf32>
    %11 = arith.addf %5, %10 : vector<32x4xf32>
    %12 = vector.extract_strided_slice %1 {offsets = [1, 0], sizes = [32, 24], strides = [1, 1]} : vector<36x24xf32> to vector<32x24xf32>
    %13 = arith.truncf %12 : vector<32x24xf32> to vector<32x24xbf16>
    %c1 = arith.constant 1 : index
    %c0_8 = arith.constant 0 : index
    %c0_9 = arith.constant 0 : index
    %14 = vector.load %arg2[%c1, %c0_8, %c0_9] : memref<5x24x4xbf16, #tpu.memory_space<vmem>>, vector<1x24x4xbf16>
    %15 = vector.shape_cast %14 : vector<1x24x4xbf16> to vector<24x4xbf16>
    %cst_10 = arith.constant dense<0.000000e+00> : vector<32x4xf32>
    %16 = tpu.matmul %13, %15, %cst_10 {dimension_numbers = #tpu.dot_dimension_numbers<[1], [0], [0], [1], [0, 0, 1, 1], [], []>} : vector<32x24xbf16>, vector<24x4xbf16>, vector<32x4xf32> -> vector<32x4xf32>
    %17 = arith.addf %11, %16 : vector<32x4xf32>
    %18 = vector.extract_strided_slice %1 {offsets = [2, 0], sizes = [32, 24], strides = [1, 1]} : vector<36x24xf32> to vector<32x24xf32>
    %19 = arith.truncf %18 : vector<32x24xf32> to vector<32x24xbf16>
    %c2 = arith.constant 2 : index
    %c0_11 = arith.constant 0 : index
    %c0_12 = arith.constant 0 : index
    %20 = vector.load %arg2[%c2, %c0_11, %c0_12] : memref<5x24x4xbf16, #tpu.memory_space<vmem>>, vector<1x24x4xbf16>
    %21 = vector.shape_cast %20 : vector<1x24x4xbf16> to vector<24x4xbf16>
    %cst_13 = arith.constant dense<0.000000e+00> : vector<32x4xf32>
    %22 = tpu.matmul %19, %21, %cst_13 {dimension_numbers = #tpu.dot_dimension_numbers<[1], [0], [0], [1], [0, 0, 1, 1], [], []>} : vector<32x24xbf16>, vector<24x4xbf16>, vector<32x4xf32> -> vector<32x4xf32>
    %23 = arith.addf %17, %22 : vector<32x4xf32>
    %24 = vector.extract_strided_slice %1 {offsets = [3, 0], sizes = [32, 24], strides = [1, 1]} : vector<36x24xf32> to vector<32x24xf32>
    %25 = arith.truncf %24 : vector<32x24xf32> to vector<32x24xbf16>
    %c3 = arith.constant 3 : index
    %c0_14 = arith.constant 0 : index
    %c0_15 = arith.constant 0 : index
    %26 = vector.load %arg2[%c3, %c0_14, %c0_15] : memref<5x24x4xbf16, #tpu.memory_space<vmem>>, vector<1x24x4xbf16>
    %27 = vector.shape_cast %26 : vector<1x24x4xbf16> to vector<24x4xbf16>
    %cst_16 = arith.constant dense<0.000000e+00> : vector<32x4xf32>
    %28 = tpu.matmul %25, %27, %cst_16 {dimension_numbers = #tpu.dot_dimension_numbers<[1], [0], [0], [1], [0, 0, 1, 1], [], []>} : vector<32x24xbf16>, vector<24x4xbf16>, vector<32x4xf32> -> vector<32x4xf32>
    %29 = arith.addf %23, %28 : vector<32x4xf32>
    %30 = vector.extract_strided_slice %1 {offsets = [4, 0], sizes = [32, 24], strides = [1, 1]} : vector<36x24xf32> to vector<32x24xf32>
    %31 = arith.truncf %30 : vector<32x24xf32> to vector<32x24xbf16>
    %c4 = arith.constant 4 : index
    %c0_17 = arith.constant 0 : index
    %c0_18 = arith.constant 0 : index
    %32 = vector.load %arg2[%c4, %c0_17, %c0_18] : memref<5x24x4xbf16, #tpu.memory_space<vmem>>, vector<1x24x4xbf16>
    %33 = vector.shape_cast %32 : vector<1x24x4xbf16> to vector<24x4xbf16>
    %cst_19 = arith.constant dense<0.000000e+00> : vector<32x4xf32>
    %34 = tpu.matmul %31, %33, %cst_19 {dimension_numbers = #tpu.dot_dimension_numbers<[1], [0], [0], [1], [0, 0, 1, 1], [], []>} : vector<32x24xbf16>, vector<24x4xbf16>, vector<32x4xf32> -> vector<32x4xf32>
    %35 = arith.addf %29, %34 : vector<32x4xf32>
    %cst_20 = arith.constant dense<0.000000e+00> : vector<32xf32>
    %36 = vector.multi_reduction <add>, %35, %cst_20 [1] : vector<32x4xf32> to vector<32xf32>
    %37 = vector.shape_cast %36 : vector<32xf32> to vector<32x1xf32>
    %cst_21 = arith.constant dense<0.000000e+00> : vector<1xf32>
    %38 = vector.multi_reduction <add>, %37, %cst_21 [0] : vector<32x1xf32> to vector<1xf32>
    %39 = vector.shape_cast %38 : vector<1xf32> to vector<1x1xf32>
    %cst_22 = arith.constant 1.280000e+02 : f32
    %40 = vector.broadcast %cst_22 : f32 to vector<1x1xf32>
    %41 = arith.divf %39, %40 : vector<1x1xf32>
    %42 = vector.broadcast %41 : vector<1x1xf32> to vector<32x4xf32>
    %43 = arith.subf %35, %42 : vector<32x4xf32>
    %44 = arith.mulf %43, %43 : vector<32x4xf32>
    %cst_23 = arith.constant dense<0.000000e+00> : vector<32xf32>
    %45 = vector.multi_reduction <add>, %44, %cst_23 [1] : vector<32x4xf32> to vector<32xf32>
    %46 = vector.shape_cast %45 : vector<32xf32> to vector<32x1xf32>
    %cst_24 = arith.constant dense<0.000000e+00> : vector<1xf32>
    %47 = vector.multi_reduction <add>, %46, %cst_24 [0] : vector<32x1xf32> to vector<1xf32>
    %48 = vector.shape_cast %47 : vector<1xf32> to vector<1x1xf32>
    %cst_25 = arith.constant 1.280000e+02 : f32
    %49 = vector.broadcast %cst_25 : f32 to vector<1x1xf32>
    %50 = arith.divf %48, %49 : vector<1x1xf32>
    %cst_26 = arith.constant 9.99999974E-6 : f32
    %51 = vector.broadcast %cst_26 : f32 to vector<1x1xf32>
    %52 = arith.addf %50, %51 : vector<1x1xf32>
    %53 = math.rsqrt %52 : vector<1x1xf32>
    %54 = vector.broadcast %53 : vector<1x1xf32> to vector<32x4xf32>
    %55 = arith.mulf %43, %54 : vector<32x4xf32>
    %c0_27 = arith.constant 0 : index
    %c0_28 = arith.constant 0 : index
    %56 = vector.load %arg4[%c0_27, %c0_28] : memref<1x4xf32, #tpu.memory_space<vmem>>, vector<1x4xf32>
    %57 = vector.broadcast %56 : vector<1x4xf32> to vector<32x4xf32>
    %58 = arith.mulf %55, %57 : vector<32x4xf32>
    %c0_29 = arith.constant 0 : index
    %c0_30 = arith.constant 0 : index
    %59 = vector.load %arg5[%c0_29, %c0_30] : memref<1x4xf32, #tpu.memory_space<vmem>>, vector<1x4xf32>
    %60 = vector.broadcast %59 : vector<1x4xf32> to vector<32x4xf32>
    %61 = arith.addf %58, %60 : vector<32x4xf32>
    %cst_31 = arith.constant 5.000000e-01 : f32
    %62 = vector.broadcast %cst_31 : f32 to vector<32x4xf32>
    %63 = arith.mulf %62, %61 : vector<32x4xf32>
    %cst_32 = arith.constant 4.471500e-02 : f32
    %64 = vector.broadcast %cst_32 : f32 to vector<32x4xf32>
    %65 = arith.mulf %64, %61 : vector<32x4xf32>
    %66 = arith.mulf %65, %61 : vector<32x4xf32>
    %67 = arith.mulf %66, %61 : vector<32x4xf32>
    %68 = arith.addf %61, %67 : vector<32x4xf32>
    %cst_33 = arith.constant 0.797884583 : f32
    %69 = vector.broadcast %cst_33 : f32 to vector<32x4xf32>
    %70 = arith.mulf %69, %68 : vector<32x4xf32>
    %71 = math.tanh %70 : vector<32x4xf32>
    %cst_34 = arith.constant 1.000000e+00 : f32
    %72 = vector.broadcast %cst_34 : f32 to vector<32x4xf32>
    %73 = arith.addf %72, %71 : vector<32x4xf32>
    %74 = arith.mulf %63, %73 : vector<32x4xf32>
    %c0_35 = arith.constant 0 : index
    %c0_36 = arith.constant 0 : index
    %c0_37 = arith.constant 0 : index
    %75 = vector.load %arg6[%c0_35, %c0_36, %c0_37] : memref<1x32x4xf32, #tpu.memory_space<vmem>>, vector<1x32x4xf32>
    %76 = vector.shape_cast %75 : vector<1x32x4xf32> to vector<32x4xf32>
    %77 = arith.addf %74, %76 : vector<32x4xf32>
    %c0_38 = arith.constant 0 : index
    %c0_39 = arith.constant 0 : index
    %c0_40 = arith.constant 0 : index
    %78 = vector.load %arg7[%c0_38, %c0_39, %c0_40] : memref<1x32x4xf32, #tpu.memory_space<vmem>>, vector<1x32x4xf32>
    %79 = vector.shape_cast %78 : vector<1x32x4xf32> to vector<32x4xf32>
    %80 = vector.shape_cast %77 : vector<32x4xf32> to vector<1x32x4xf32>
    tpu.vector_store %arg7[%c0_38, %c0_39, %c0_40], %80 {strides = array<i32>} : memref<1x32x4xf32, #tpu.memory_space<vmem>>, vector<1x32x4xf32>,
    return
  }
  func.func @transform_0(%arg0: i32) -> (i32, i32, i32) {
    %c0_i32 = arith.constant 0 : i32
    %c0_i32_0 = arith.constant 0 : i32
    %c0_i32_1 = arith.constant 0 : i32
    return %arg0, %c0_i32, %c0_i32_0 : i32, i32, i32
  }
  func.func @transform_1(%arg0: i32) -> (i32, i32, i32) {
    %c0_i32 = arith.constant 0 : i32
    %c0_i32_0 = arith.constant 0 : i32
    %c0_i32_1 = arith.constant 0 : i32
    %c0_i32_2 = arith.constant 0 : i32
    return %c0_i32, %c0_i32_0, %c0_i32_1 : i32, i32, i32
  }
  func.func @transform_2(%arg0: i32) -> (i32, i32) {
    %c0_i32 = arith.constant 0 : i32
    %c0_i32_0 = arith.constant 0 : i32
    %c0_i32_1 = arith.constant 0 : i32
    return %c0_i32, %c0_i32_0 : i32, i32
  }
  func.func @transform_3(%arg0: i32) -> (i32, i32) {
    %c0_i32 = arith.constant 0 : i32
    %c0_i32_0 = arith.constant 0 : i32
    %c0_i32_1 = arith.constant 0 : i32
    return %c0_i32, %c0_i32_0 : i32, i32
  }
  func.func @transform_4(%arg0: i32) -> (i32, i32) {
    %c0_i32 = arith.constant 0 : i32
    %c0_i32_0 = arith.constant 0 : i32
    %c0_i32_1 = arith.constant 0 : i32
    return %c0_i32, %c0_i32_0 : i32, i32
  }
  func.func @transform_5(%arg0: i32) -> (i32, i32, i32) {
    %c0_i32 = arith.constant 0 : i32
    %c0_i32_0 = arith.constant 0 : i32
    %c0_i32_1 = arith.constant 0 : i32
    return %arg0, %c0_i32, %c0_i32_0 : i32, i32, i32
  }
  func.func @transform_6(%arg0: i32) -> (i32, i32, i32) {
    %c0_i32 = arith.constant 0 : i32
    %c0_i32_0 = arith.constant 0 : i32
    %c0_i32_1 = arith.constant 0 : i32
    return %arg0, %c0_i32, %c0_i32_0 : i32, i32, i32
  }
}

module attributes {stable_mosaic.version = 11 : i64} {
  func.func @_gconv_kernel(%arg0: i32, %arg1: memref<1x2x32xf32, #tpu.memory_space<vmem>>, %arg2: memref<1x32x32xbf16, #tpu.memory_space<vmem>>, %arg3: memref<1x2x32xf32, #tpu.memory_space<vmem>>) attributes {dimension_semantics = [#tpu.dimension_semantics<parallel>], iteration_bounds = array<i64: 4>, scalar_prefetch = 0 : i64, scratch_operands = 0 : i64, tpu.core_type = #tpu.core_type<tc>, window_params = [{transform_indices = @transform_0, window_bounds = array<i64: 1, 2, 32>}, {transform_indices = @transform_1, window_bounds = array<i64: 1, 32, 32>}, {transform_indices = @transform_2, window_bounds = array<i64: 1, 2, 32>}]} {
    %c0 = arith.constant 0 : index
    %c0_0 = arith.constant 0 : index
    %c0_1 = arith.constant 0 : index
    %0 = vector.load %arg1[%c0, %c0_0, %c0_1] : memref<1x2x32xf32, #tpu.memory_space<vmem>>, vector<1x2x32xf32>
    %1 = vector.shape_cast %0 : vector<1x2x32xf32> to vector<2x32xf32>
    %2 = arith.truncf %1 : vector<2x32xf32> to vector<2x32xbf16>
    %c0_2 = arith.constant 0 : index
    %c0_3 = arith.constant 0 : index
    %c0_4 = arith.constant 0 : index
    %3 = vector.load %arg2[%c0_2, %c0_3, %c0_4] : memref<1x32x32xbf16, #tpu.memory_space<vmem>>, vector<1x32x32xbf16>
    %4 = vector.shape_cast %3 : vector<1x32x32xbf16> to vector<32x32xbf16>
    %cst = arith.constant dense<0.000000e+00> : vector<2x32xf32>
    %5 = tpu.matmul %2, %4, %cst {dimension_numbers = #tpu.dot_dimension_numbers<[1], [0], [0], [1], [0, 0, 1, 1], [], []>} : vector<2x32xbf16>, vector<32x32xbf16>, vector<2x32xf32> -> vector<2x32xf32>
    %cst_5 = arith.constant 5.000000e-01 : f32
    %6 = vector.broadcast %cst_5 : f32 to vector<2x32xf32>
    %7 = arith.mulf %6, %5 : vector<2x32xf32>
    %cst_6 = arith.constant 4.471500e-02 : f32
    %8 = vector.broadcast %cst_6 : f32 to vector<2x32xf32>
    %9 = arith.mulf %8, %5 : vector<2x32xf32>
    %10 = arith.mulf %9, %5 : vector<2x32xf32>
    %11 = arith.mulf %10, %5 : vector<2x32xf32>
    %12 = arith.addf %5, %11 : vector<2x32xf32>
    %cst_7 = arith.constant 0.797884583 : f32
    %13 = vector.broadcast %cst_7 : f32 to vector<2x32xf32>
    %14 = arith.mulf %13, %12 : vector<2x32xf32>
    %15 = math.tanh %14 : vector<2x32xf32>
    %cst_8 = arith.constant 1.000000e+00 : f32
    %16 = vector.broadcast %cst_8 : f32 to vector<2x32xf32>
    %17 = arith.addf %16, %15 : vector<2x32xf32>
    %18 = arith.mulf %7, %17 : vector<2x32xf32>
    %c0_9 = arith.constant 0 : index
    %c0_10 = arith.constant 0 : index
    %c0_11 = arith.constant 0 : index
    %19 = vector.load %arg3[%c0_9, %c0_10, %c0_11] : memref<1x2x32xf32, #tpu.memory_space<vmem>>, vector<1x2x32xf32>
    %20 = vector.shape_cast %19 : vector<1x2x32xf32> to vector<2x32xf32>
    %21 = vector.shape_cast %18 : vector<2x32xf32> to vector<1x2x32xf32>
    tpu.vector_store %arg3[%c0_9, %c0_10, %c0_11], %21 {strides = array<i32>} : memref<1x2x32xf32, #tpu.memory_space<vmem>>, vector<1x2x32xf32>,
    return
  }
  func.func @transform_0(%arg0: i32) -> (i32, i32, i32) {
    %c0_i32 = arith.constant 0 : i32
    %c0_i32_0 = arith.constant 0 : i32
    %c0_i32_1 = arith.constant 0 : i32
    return %arg0, %c0_i32, %c0_i32_0 : i32, i32, i32
  }
  func.func @transform_1(%arg0: i32) -> (i32, i32, i32) {
    %c0_i32 = arith.constant 0 : i32
    %c0_i32_0 = arith.constant 0 : i32
    %c0_i32_1 = arith.constant 0 : i32
    return %arg0, %c0_i32, %c0_i32_0 : i32, i32, i32
  }
  func.func @transform_2(%arg0: i32) -> (i32, i32, i32) {
    %c0_i32 = arith.constant 0 : i32
    %c0_i32_0 = arith.constant 0 : i32
    %c0_i32_1 = arith.constant 0 : i32
    return %arg0, %c0_i32, %c0_i32_0 : i32, i32, i32
  }
}

module attributes {stable_mosaic.version = 11 : i64} {
  func.func @_linear_kernel(%arg0: i32, %arg1: memref<64x4xf32, #tpu.memory_space<vmem>>, %arg2: memref<4x4xbf16, #tpu.memory_space<vmem>>, %arg3: memref<1x4xf32, #tpu.memory_space<vmem>>, %arg4: memref<64x4xf32, #tpu.memory_space<vmem>>) attributes {dimension_semantics = [#tpu.dimension_semantics<parallel>], iteration_bounds = array<i64: 1>, scalar_prefetch = 0 : i64, scratch_operands = 0 : i64, tpu.core_type = #tpu.core_type<tc>, window_params = [{transform_indices = @transform_0, window_bounds = array<i64: 64, 4>}, {pipeline_mode = #tpu.pipeline_mode<synchronous>, transform_indices = @transform_1, window_bounds = array<i64: 4, 4>}, {pipeline_mode = #tpu.pipeline_mode<synchronous>, transform_indices = @transform_2, window_bounds = array<i64: 1, 4>}, {transform_indices = @transform_3, window_bounds = array<i64: 64, 4>}]} {
    %c0 = arith.constant 0 : index
    %c0_0 = arith.constant 0 : index
    %0 = vector.load %arg1[%c0, %c0_0] : memref<64x4xf32, #tpu.memory_space<vmem>>, vector<64x4xf32>
    %1 = arith.truncf %0 : vector<64x4xf32> to vector<64x4xbf16>
    %c0_1 = arith.constant 0 : index
    %c0_2 = arith.constant 0 : index
    %2 = vector.load %arg2[%c0_1, %c0_2] : memref<4x4xbf16, #tpu.memory_space<vmem>>, vector<4x4xbf16>
    %cst = arith.constant dense<0.000000e+00> : vector<64x4xf32>
    %3 = tpu.matmul %1, %2, %cst {dimension_numbers = #tpu.dot_dimension_numbers<[1], [0], [0], [1], [0, 0, 1, 1], [], []>} : vector<64x4xbf16>, vector<4x4xbf16>, vector<64x4xf32> -> vector<64x4xf32>
    %c0_3 = arith.constant 0 : index
    %c0_4 = arith.constant 0 : index
    %4 = vector.load %arg3[%c0_3, %c0_4] : memref<1x4xf32, #tpu.memory_space<vmem>>, vector<1x4xf32>
    %5 = vector.broadcast %4 : vector<1x4xf32> to vector<64x4xf32>
    %6 = arith.addf %3, %5 : vector<64x4xf32>
    %c0_5 = arith.constant 0 : index
    %c0_6 = arith.constant 0 : index
    %7 = vector.load %arg4[%c0_5, %c0_6] : memref<64x4xf32, #tpu.memory_space<vmem>>, vector<64x4xf32>
    tpu.vector_store %arg4[%c0_5, %c0_6], %6 {strides = array<i32>} : memref<64x4xf32, #tpu.memory_space<vmem>>, vector<64x4xf32>,
    return
  }
  func.func @transform_0(%arg0: i32) -> (i32, i32) {
    %c0_i32 = arith.constant 0 : i32
    %c0_i32_0 = arith.constant 0 : i32
    return %arg0, %c0_i32 : i32, i32
  }
  func.func @transform_1(%arg0: i32) -> (i32, i32) {
    %c0_i32 = arith.constant 0 : i32
    %c0_i32_0 = arith.constant 0 : i32
    %c0_i32_1 = arith.constant 0 : i32
    return %c0_i32, %c0_i32_0 : i32, i32
  }
  func.func @transform_2(%arg0: i32) -> (i32, i32) {
    %c0_i32 = arith.constant 0 : i32
    %c0_i32_0 = arith.constant 0 : i32
    %c0_i32_1 = arith.constant 0 : i32
    return %c0_i32, %c0_i32_0 : i32, i32
  }
  func.func @transform_3(%arg0: i32) -> (i32, i32) {
    %c0_i32 = arith.constant 0 : i32
    %c0_i32_0 = arith.constant 0 : i32
    return %arg0, %c0_i32 : i32, i32
  }
}

module attributes {stable_mosaic.version = 11 : i64} {
  func.func @_linear_kernel(%arg0: i32, %arg1: memref<64x4xf32, #tpu.memory_space<vmem>>, %arg2: memref<4x4xbf16, #tpu.memory_space<vmem>>, %arg3: memref<1x4xf32, #tpu.memory_space<vmem>>, %arg4: memref<64x4xf32, #tpu.memory_space<vmem>>) attributes {dimension_semantics = [#tpu.dimension_semantics<parallel>], iteration_bounds = array<i64: 1>, scalar_prefetch = 0 : i64, scratch_operands = 0 : i64, tpu.core_type = #tpu.core_type<tc>, window_params = [{transform_indices = @transform_0, window_bounds = array<i64: 64, 4>}, {pipeline_mode = #tpu.pipeline_mode<synchronous>, transform_indices = @transform_1, window_bounds = array<i64: 4, 4>}, {pipeline_mode = #tpu.pipeline_mode<synchronous>, transform_indices = @transform_2, window_bounds = array<i64: 1, 4>}, {transform_indices = @transform_3, window_bounds = array<i64: 64, 4>}]} {
    %c0 = arith.constant 0 : index
    %c0_0 = arith.constant 0 : index
    %0 = vector.load %arg1[%c0, %c0_0] : memref<64x4xf32, #tpu.memory_space<vmem>>, vector<64x4xf32>
    %1 = arith.truncf %0 : vector<64x4xf32> to vector<64x4xbf16>
    %c0_1 = arith.constant 0 : index
    %c0_2 = arith.constant 0 : index
    %2 = vector.load %arg2[%c0_1, %c0_2] : memref<4x4xbf16, #tpu.memory_space<vmem>>, vector<4x4xbf16>
    %cst = arith.constant dense<0.000000e+00> : vector<64x4xf32>
    %3 = tpu.matmul %1, %2, %cst {dimension_numbers = #tpu.dot_dimension_numbers<[1], [0], [0], [1], [0, 0, 1, 1], [], []>} : vector<64x4xbf16>, vector<4x4xbf16>, vector<64x4xf32> -> vector<64x4xf32>
    %c0_3 = arith.constant 0 : index
    %c0_4 = arith.constant 0 : index
    %4 = vector.load %arg3[%c0_3, %c0_4] : memref<1x4xf32, #tpu.memory_space<vmem>>, vector<1x4xf32>
    %5 = vector.broadcast %4 : vector<1x4xf32> to vector<64x4xf32>
    %6 = arith.addf %3, %5 : vector<64x4xf32>
    %cst_5 = arith.constant 5.000000e-01 : f32
    %7 = vector.broadcast %cst_5 : f32 to vector<64x4xf32>
    %8 = arith.mulf %7, %6 : vector<64x4xf32>
    %cst_6 = arith.constant 4.471500e-02 : f32
    %9 = vector.broadcast %cst_6 : f32 to vector<64x4xf32>
    %10 = arith.mulf %9, %6 : vector<64x4xf32>
    %11 = arith.mulf %10, %6 : vector<64x4xf32>
    %12 = arith.mulf %11, %6 : vector<64x4xf32>
    %13 = arith.addf %6, %12 : vector<64x4xf32>
    %cst_7 = arith.constant 0.797884583 : f32
    %14 = vector.broadcast %cst_7 : f32 to vector<64x4xf32>
    %15 = arith.mulf %14, %13 : vector<64x4xf32>
    %16 = math.tanh %15 : vector<64x4xf32>
    %cst_8 = arith.constant 1.000000e+00 : f32
    %17 = vector.broadcast %cst_8 : f32 to vector<64x4xf32>
    %18 = arith.addf %17, %16 : vector<64x4xf32>
    %19 = arith.mulf %8, %18 : vector<64x4xf32>
    %c0_9 = arith.constant 0 : index
    %c0_10 = arith.constant 0 : index
    %20 = vector.load %arg4[%c0_9, %c0_10] : memref<64x4xf32, #tpu.memory_space<vmem>>, vector<64x4xf32>
    tpu.vector_store %arg4[%c0_9, %c0_10], %19 {strides = array<i32>} : memref<64x4xf32, #tpu.memory_space<vmem>>, vector<64x4xf32>,
    return
  }
  func.func @transform_0(%arg0: i32) -> (i32, i32) {
    %c0_i32 = arith.constant 0 : i32
    %c0_i32_0 = arith.constant 0 : i32
    return %arg0, %c0_i32 : i32, i32
  }
  func.func @transform_1(%arg0: i32) -> (i32, i32) {
    %c0_i32 = arith.constant 0 : i32
    %c0_i32_0 = arith.constant 0 : i32
    %c0_i32_1 = arith.constant 0 : i32
    return %c0_i32, %c0_i32_0 : i32, i32
  }
  func.func @transform_2(%arg0: i32) -> (i32, i32) {
    %c0_i32 = arith.constant 0 : i32
    %c0_i32_0 = arith.constant 0 : i32
    %c0_i32_1 = arith.constant 0 : i32
    return %c0_i32, %c0_i32_0 : i32, i32
  }
  func.func @transform_3(%arg0: i32) -> (i32, i32) {
    %c0_i32 = arith.constant 0 : i32
    %c0_i32_0 = arith.constant 0 : i32
    return %arg0, %c0_i32 : i32, i32
  }
}

module attributes {stable_mosaic.version = 11 : i64} {
  func.func @_ln_res_kernel(%arg0: i32, %arg1: memref<64x4xf32, #tpu.memory_space<vmem>>, %arg2: memref<64x4xf32, #tpu.memory_space<vmem>>, %arg3: memref<1x4xf32, #tpu.memory_space<vmem>>, %arg4: memref<1x4xf32, #tpu.memory_space<vmem>>, %arg5: memref<64x4xf32, #tpu.memory_space<vmem>>) attributes {dimension_semantics = [#tpu.dimension_semantics<parallel>], iteration_bounds = array<i64: 1>, scalar_prefetch = 0 : i64, scratch_operands = 0 : i64, tpu.core_type = #tpu.core_type<tc>, window_params = [{transform_indices = @transform_0, window_bounds = array<i64: 64, 4>}, {transform_indices = @transform_1, window_bounds = array<i64: 64, 4>}, {pipeline_mode = #tpu.pipeline_mode<synchronous>, transform_indices = @transform_2, window_bounds = array<i64: 1, 4>}, {pipeline_mode = #tpu.pipeline_mode<synchronous>, transform_indices = @transform_3, window_bounds = array<i64: 1, 4>}, {transform_indices = @transform_4, window_bounds = array<i64: 64, 4>}]} {
    %c0 = arith.constant 0 : index
    %c0_0 = arith.constant 0 : index
    %0 = vector.load %arg1[%c0, %c0_0] : memref<64x4xf32, #tpu.memory_space<vmem>>, vector<64x4xf32>
    %c0_1 = arith.constant 0 : index
    %c0_2 = arith.constant 0 : index
    %1 = vector.load %arg2[%c0_1, %c0_2] : memref<64x4xf32, #tpu.memory_space<vmem>>, vector<64x4xf32>
    %2 = arith.addf %0, %1 : vector<64x4xf32>
    %cst = arith.constant dense<0.000000e+00> : vector<64xf32>
    %3 = vector.multi_reduction <add>, %2, %cst [1] : vector<64x4xf32> to vector<64xf32>
    %4 = vector.shape_cast %3 : vector<64xf32> to vector<64x1xf32>
    %cst_3 = arith.constant 4.000000e+00 : f32
    %5 = vector.broadcast %cst_3 : f32 to vector<64x1xf32>
    %6 = arith.divf %4, %5 : vector<64x1xf32>
    %7 = vector.broadcast %6 : vector<64x1xf32> to vector<64x4xf32>
    %8 = arith.subf %2, %7 : vector<64x4xf32>
    %9 = arith.mulf %8, %8 : vector<64x4xf32>
    %cst_4 = arith.constant dense<0.000000e+00> : vector<64xf32>
    %10 = vector.multi_reduction <add>, %9, %cst_4 [1] : vector<64x4xf32> to vector<64xf32>
    %11 = vector.shape_cast %10 : vector<64xf32> to vector<64x1xf32>
    %cst_5 = arith.constant 4.000000e+00 : f32
    %12 = vector.broadcast %cst_5 : f32 to vector<64x1xf32>
    %13 = arith.divf %11, %12 : vector<64x1xf32>
    %cst_6 = arith.constant 9.99999974E-6 : f32
    %14 = vector.broadcast %cst_6 : f32 to vector<64x1xf32>
    %15 = arith.addf %13, %14 : vector<64x1xf32>
    %16 = math.rsqrt %15 : vector<64x1xf32>
    %17 = vector.broadcast %16 : vector<64x1xf32> to vector<64x4xf32>
    %18 = arith.mulf %8, %17 : vector<64x4xf32>
    %c0_7 = arith.constant 0 : index
    %c0_8 = arith.constant 0 : index
    %19 = vector.load %arg3[%c0_7, %c0_8] : memref<1x4xf32, #tpu.memory_space<vmem>>, vector<1x4xf32>
    %20 = vector.broadcast %19 : vector<1x4xf32> to vector<64x4xf32>
    %21 = arith.mulf %18, %20 : vector<64x4xf32>
    %c0_9 = arith.constant 0 : index
    %c0_10 = arith.constant 0 : index
    %22 = vector.load %arg4[%c0_9, %c0_10] : memref<1x4xf32, #tpu.memory_space<vmem>>, vector<1x4xf32>
    %23 = vector.broadcast %22 : vector<1x4xf32> to vector<64x4xf32>
    %24 = arith.addf %21, %23 : vector<64x4xf32>
    %c0_11 = arith.constant 0 : index
    %c0_12 = arith.constant 0 : index
    %25 = vector.load %arg5[%c0_11, %c0_12] : memref<64x4xf32, #tpu.memory_space<vmem>>, vector<64x4xf32>
    tpu.vector_store %arg5[%c0_11, %c0_12], %24 {strides = array<i32>} : memref<64x4xf32, #tpu.memory_space<vmem>>, vector<64x4xf32>,
    return
  }
  func.func @transform_0(%arg0: i32) -> (i32, i32) {
    %c0_i32 = arith.constant 0 : i32
    %c0_i32_0 = arith.constant 0 : i32
    return %arg0, %c0_i32 : i32, i32
  }
  func.func @transform_1(%arg0: i32) -> (i32, i32) {
    %c0_i32 = arith.constant 0 : i32
    %c0_i32_0 = arith.constant 0 : i32
    return %arg0, %c0_i32 : i32, i32
  }
  func.func @transform_2(%arg0: i32) -> (i32, i32) {
    %c0_i32 = arith.constant 0 : i32
    %c0_i32_0 = arith.constant 0 : i32
    %c0_i32_1 = arith.constant 0 : i32
    return %c0_i32, %c0_i32_0 : i32, i32
  }
  func.func @transform_3(%arg0: i32) -> (i32, i32) {
    %c0_i32 = arith.constant 0 : i32
    %c0_i32_0 = arith.constant 0 : i32
    %c0_i32_1 = arith.constant 0 : i32
    return %c0_i32, %c0_i32_0 : i32, i32
  }
  func.func @transform_4(%arg0: i32) -> (i32, i32) {
    %c0_i32 = arith.constant 0 : i32
    %c0_i32_0 = arith.constant 0 : i32
    return %arg0, %c0_i32 : i32, i32
  }
}

</mosaic_0001>

<bundles_post_ra>
// kernel: hybrid_conv_unet.26
= control target key start
LH: loop header
LB: loop body
LE: loop exit
PB: predicated region body
PF: predicated region fallthrough
CT: control target
= control target key end

     0   :  { %vm51_vm0 = vcmask 1042432   ;;  %vm38_vm1 = vcmask 48128   ;;  %s547_s2 = inlined_call_operand.vmem [shape: bf16[6,6], index: 2, kind: input, shape index: {}]   ;;  %s548_s0 = inlined_call_operand.vmem [shape: f32[64,6], index: 0, kind: input, shape index: {}]   ;;  %s549_s1 = inlined_call_operand.vmem [shape: bf16[6,6], index: 1, kind: input, shape index: {}]   ;;  %s550_s4 = inlined_call_operand.vmem [shape: f32[1,6], index: 4, kind: input, shape index: {}]   ;;  %s551_s3 = inlined_call_operand.vmem [shape: f32[1,6], index: 3, kind: input, shape index: {}]   ;;  %s552_s5 = inlined_call_operand.vmem [shape: f32[64,6], index: 5, kind: output, shape index: {}]  }
   0x1   :  { %v84_v0 = vld [vmem:[%s547_s2] sm:$0x7]  ;;  %v22_v2 = vld [vmem:[%s548_s0 + $0x8] sm:$0xff]  ;;  %v23_v10 = vld [vmem:[%s548_s0 + $0x10] sm:$0xff] }
   0x2   :  { %v21_v1 = vld [vmem:[%s548_s0] sm:$0xff]  ;;  %v90_v3 = vsel %vm51_vm0, %v84_v0, 0  ;;  %v26_v6 = vld [vmem:[%s548_s0 + $0x28] sm:$0xff]  ;;  %v24_v11 = vld [vmem:[%s548_s0 + $0x18] sm:$0xff] }
   0x3   :  { %v29_v4 = vpack.c.bf16 %v22_v2, %v21_v1  ;;  %v25_v5 = vld [vmem:[%s548_s0 + $0x20] sm:$0xff]  ;;  %99 = vmatpush.bf16.msra.mxu1 %v90_v3  ;;  %310 = vmatpush.bf16.msra.mxu3 %v90_v3  ;;  %v27_v12 = vld [vmem:[%s548_s0 + $0x30] sm:$0xff]  ;;  %v28_v13 = vld [vmem:[%s548_s0 + $0x38] sm:$0xff]  ;;  %v30_v14 = vpack.c.bf16 %v24_v11, %v23_v10 }
   0x4   :  { %v31_v7 = vpack.c.bf16 %v26_v6, %v25_v5  ;;  %v33_v8 = vld [vmem:[%s549_s1] sm:$0x7]  ;;  %v32_v15 = vpack.c.bf16 %v28_v13, %v27_v12 }
   0x5   :  { %v53_v9 = vsel %vm51_vm0, %v33_v8, 0  ;;  %v418_v16 = vld [vmem:[%s550_s4] ss:$0 sm:$0xff] }
   0x6   :  { %297 = vmatmul.msk.bf16.vlgmr.msra.gmra.mxu1 %vm38_vm1, %v29_v4  ;;  %299 = vmatmul.msk.bf16.vlgmr.msra.gmra.mxu3 %vm38_vm1, %v31_v7  ;;  %v433_v40 = vld [vmem:[%s551_s3] ss:$0 sm:$0xff] }
   0x7   :  { %309 = vmatpush.bf16.msra.mxu2 %v53_v9  ;;  %62 = vmatpush.bf16.msra.mxu0 %v53_v9 }
   0xa   :  { %295 = vmatmul.msk.bf16.vlgmr.msra.gmra.mxu2 %vm38_vm1, %v31_v7  ;;  %293 = vmatmul.msk.bf16.vlgmr.msra.gmra.mxu0 %vm38_vm1, %v29_v4 }
  0x16   :  { %298 = vmatmul.msk.bf16.gmra.mxu1 %vm38_vm1, %v30_v14  ;;  %300 = vmatmul.msk.bf16.gmra.mxu3 %vm38_vm1, %v32_v15 }
  0x1a   :  { %296 = vmatmul.msk.bf16.gmra.mxu2 %vm38_vm1, %v32_v15  ;;  %294 = vmatmul.msk.bf16.gmra.mxu0 %vm38_vm1, %v30_v14 }
  0x83   :  { %v101_v17 = vpop.f32.mrf.mxu1 }
  0x84   :  { %v102_v18 = vadd.f32 %v418_v16, %v101_v17 }
  0x86   :  { %v301_v19 = vmul.f32 -1.442695, %v102_v18 }
  0x87   :  { %v64_v37 = vpop.f32.mrf.mxu0 }
  0x88   :  { %313 = vpow2.f32 %v301_v19  ;;  %v65_v48 = vadd.f32 %v433_v40, %v64_v37 }
  0x89   :  { %v111_v20 = vpop.f32.mrf.mxu3 }
  0x8a   :  { %v112_v21 = vadd.f32 %v418_v16, %v111_v20 }
  0x8b   :  { %v103_v22 = vpop.f32.mrf.mxu1 }
  0x8c   :  { %v305_v23 = vmul.f32 -1.442695, %v112_v21  ;;  %v104_v24 = vadd.f32 %v418_v16, %v103_v22 }
  0x8d   :  { %v74_v53 = vpop.f32.mrf.mxu2 }
  0x8e   :  { %v314_v25 = vpop.eup %313  ;;  %315 = vpow2.f32 %v305_v23  ;;  %v302_v26 = vmul.f32 -1.442695, %v104_v24  ;;  %v75_v58 = vadd.f32 %v433_v40, %v74_v53 }
  0x8f   :  { %v145_v27 = vadd.f32 1.0, %v314_v25  ;;  %v66_v5 = vpop.f32.mrf.mxu0 }
  0x90   :  { %317 = vpow2.f32 %v302_v26  ;;  %v67_v15 = vadd.f32 %v433_v40, %v66_v5 }
  0x91   :  { %319 = vrcp.f32 %v145_v27  ;;  %v113_v28 = vpop.f32.mrf.mxu3  ;;  %v162_v43 = vand.u32 2147483647, %v145_v27  ;;  %v164_v44 = vand.u32 2147483648, %v145_v27  ;;  %vm158_vm2 = vweird.f32 %v145_v27 }
  0x92   :  { %v114_v29 = vadd.f32 %v418_v16, %v113_v28 }
  0x93   :  { %v106_v30 = vpop.f32.mrf.mxu1  ;;  %vm441_vm4 = vcmp.eq.f32.partialorder %v162_v43, 8.507059e+37  ;;  %v165_v57 = vor.u32 1.1754944e-38, %v164_v44 }
  0x94   :  { %v316_v31 = vpop.eup %315  ;;  %v306_v32 = vmul.f32 -1.442695, %v114_v29  ;;  %v107_v33 = vadd.f32 %v418_v16, %v106_v30 }
  0x95   :  { %v425_v34 = vadd.f32 1.0, %v316_v31 }
  0x96   :  { %v318_v35 = vpop.eup %317  ;;  %321 = vpow2.f32 %v306_v32  ;;  %v303_v36 = vmul.f32 -1.442695, %v107_v33  ;;  %v76_v33 = vpop.f32.mrf.mxu2 }
  0x97   :  { %v320_v38 = vpop.eup %319  ;;  %323 = vrcp.f32 %v425_v34  ;;  %v428_v39 = vadd.f32 1.0, %v318_v35  ;;  %v222_v1 = vand.u32 2147483647, %v425_v34  ;;  %v224_v2 = vand.u32 2147483648, %v425_v34  ;;  %v69_v44 = vpop.f32.mrf.mxu0 }
  0x98   :  { %325 = vpow2.f32 %v303_v36  ;;  %v154_v41 = vmul.f32 %v320_v38, %v145_v27  ;;  %vm159_vm3 = vweird.f32 %v320_v38  ;;  %vm218_vm7 = vweird.f32 %v425_v34 }
  0x99   :  { %327 = vrcp.f32 %v428_v39  ;;  %v116_v42 = vpop.f32.mrf.mxu3  ;;  %vm160_vm5 = vmor %vm158_vm2, %vm159_vm3  ;;  %v177_v9 = vand.u32 2147483647, %v428_v39  ;;  %vm461_vm8 = vcmp.eq.f32.partialorder %v222_v1, 8.507059e+37  ;;  %v179_v17 = vand.u32 2147483648, %v428_v39 }
  0x9a   :  { %v117_v45 = vadd.f32 %v418_v16, %v116_v42  ;;  %v155_v46 = vsub.f32 1.0, %v154_v41  ;;  %v225_v23 = vor.u32 1.1754944e-38, %v224_v2  ;;  %vm173_vm11 = vweird.f32 %v428_v39 }
  0x9b   :  { %v108_v47 = vpop.f32.mrf.mxu1  ;;  %vm475_vm12 = vcmp.eq.f32.partialorder %v177_v9, 8.507059e+37  ;;  %v180_v32 = vor.u32 1.1754944e-38, %v179_v17  ;;  %v77_v53 = vadd.f32 %v433_v40, %v76_v33 }
  0x9c   :  { %v322_v49 = vpop.eup %321  ;;  %v307_v50 = vmul.f32 -1.442695, %v117_v45  ;;  %v109_v51 = vadd.f32 %v418_v16, %v108_v47  ;;  %v156_v52 = vmul.f32 %v320_v38, %v155_v46 }
  0x9d   :  { %v324_v54 = vpop.eup %323  ;;  %v439_v55 = vadd.f32 1.0, %v322_v49 }
  0x9e   :  { %v326_v59 = vpop.eup %325  ;;  %329 = vpow2.f32 %v307_v50  ;;  %v304_v60 = vmul.f32 -1.442695, %v109_v51  ;;  %v157_v61 = vadd.f32 %v320_v38, %v156_v52  ;;  %v214_v62 = vmul.f32 %v324_v54, %v425_v34 }
  0x9f   :  { %v328_v63 = vpop.eup %327  ;;  %331 = vrcp.f32 %v439_v55  ;;  %v448_v0 = vadd.f32 1.0, %v326_v59  ;;  %vm219_vm6 = vweird.f32 %v324_v54  ;;  %v239_v41 = vand.u32 2147483648, %v439_v55 }
  0xa0   :  { %333 = vpow2.f32 %v304_v60  ;;  %v161_v3 = vsel %vm160_vm5, %v320_v38, %v157_v61  ;;  %v215_v4 = vsub.f32 1.0, %v214_v62  ;;  %v169_v6 = vmul.f32 %v328_v63, %v428_v39  ;;  %vm220_vm10 = vmor %vm218_vm7, %vm219_vm6 }
  0xa1   :  { %335 = vrcp.f32 %v448_v0  ;;  %v166_v7 = vsel %vm441_vm4, %v165_v57, %v161_v3  ;;  %v118_v8 = vpop.f32.mrf.mxu3  ;;  %vm174_vm9 = vweird.f32 %v328_v63  ;;  %v237_v39 = vand.u32 2147483647, %v439_v55 }
  0xa2   :  { %v273_v10 = vmul.f32 %v166_v7, %v65_v48  ;;  %v216_v11 = vmul.f32 %v324_v54, %v215_v4  ;;  %v119_v12 = vadd.f32 %v418_v16, %v118_v8  ;;  %v170_v13 = vsub.f32 1.0, %v169_v6  ;;  %vm175_vm13 = vmor %vm173_vm11, %vm174_vm9  ;;  %v79_v4 = vpop.f32.mrf.mxu2 }
  0xa3   :  { %vm233_vm15 = vweird.f32 %v439_v55  ;;  %v192_v46 = vand.u32 2147483647, %v448_v0  ;;  %v194_v47 = vand.u32 2147483648, %v448_v0  ;;  %vm188_vm0 = vweird.f32 %v448_v0 }
  0xa4   :  { %v330_v18 = vpop.eup %329  ;;  %281 = vst.msk [vmem:[%s552_s5] sm:$0xff] %vm38_vm1, %v273_v10  ;;  %v217_v19 = vadd.f32 %v324_v54, %v216_v11  ;;  %v308_v20 = vmul.f32 -1.442695, %v119_v12  ;;  %v171_v16 = vmul.f32 %v328_v63, %v170_v13  ;;  %vm238_vm4 = vcmp.eq.f32.partialorder %v237_v39, 8.507059e+37  ;;  %v71_v12 = vpop.f32.mrf.mxu0 }
  0xa5   :  { %v332_v21 = vpop.eup %331  ;;  %v471_v22 = vadd.f32 1.0, %v330_v18  ;;  %vm193_vm6 = vcmp.eq.f32.partialorder %v192_v46, 8.507059e+37  ;;  %v195_v61 = vor.u32 1.1754944e-38, %v194_v47  ;;  %v80_v9 = vadd.f32 %v433_v40, %v79_v4 }
  0xa6   :  { %v334_v25 = vpop.eup %333  ;;  %v221_v26 = vsel %vm220_vm10, %v324_v54, %v217_v19  ;;  %337 = vpow2.f32 %v308_v20  ;;  %v172_v27 = vadd.f32 %v328_v63, %v171_v16  ;;  %v229_v28 = vmul.f32 %v332_v21, %v439_v55 }
  0xa7   :  { %v336_v29 = vpop.eup %335  ;;  %339 = vrcp.f32 %v471_v22  ;;  %v481_v30 = vadd.f32 1.0, %v334_v25  ;;  %v226_v31 = vsel %vm461_vm8, %v225_v23, %v221_v26  ;;  %vm234_vm14 = vweird.f32 %v332_v21 }
  0xa8   :  { %v277_v34 = vmul.f32 %v226_v31, %v75_v58  ;;  %v176_v35 = vsel %vm175_vm13, %v328_v63, %v172_v27  ;;  %v230_v36 = vsub.f32 1.0, %v229_v28  ;;  %v184_v37 = vmul.f32 %v336_v29, %v448_v0  ;;  %vm235_vm3 = vmor %vm233_vm15, %vm234_vm14 }
  0xa9   :  { %341 = vrcp.f32 %v481_v30  ;;  %v181_v38 = vsel %vm475_vm12, %v180_v32, %v176_v35  ;;  %vm189_vm2 = vweird.f32 %v336_v29  ;;  %v240_v54 = vor.u32 1.1754944e-38, %v239_v41 }
  0xaa   :  { %285 = vst.msk [vmem:[%s552_s5 + $0x20] sm:$0xff] %vm38_vm1, %v277_v34  ;;  %v274_v42 = vmul.f32 %v181_v38, %v67_v15  ;;  %v231_v43 = vmul.f32 %v332_v21, %v230_v36  ;;  %v185_v45 = vsub.f32 1.0, %v184_v37  ;;  %v70_v55 = vadd.f32 %v433_v40, %v69_v44  ;;  %vm190_vm5 = vmor %vm188_vm0, %vm189_vm2  ;;  %v81_v31 = vpop.f32.mrf.mxu2 }
  0xab   :  { %v252_v5 = vand.u32 2147483647, %v471_v22  ;;  %v254_v6 = vand.u32 2147483648, %v471_v22  ;;  %vm248_vm8 = vweird.f32 %v471_v22  ;;  %v209_v10 = vand.u32 2147483648, %v481_v30 }
  0xac   :  { %v338_v48 = vpop.eup %337  ;;  %282 = vst.msk [vmem:[%s552_s5 + $0x8] sm:$0xff] %vm38_vm1, %v274_v42  ;;  %v232_v49 = vadd.f32 %v332_v21, %v231_v43  ;;  %v186_v50 = vmul.f32 %v336_v29, %v185_v45  ;;  %v207_v14 = vand.u32 2147483647, %v481_v30  ;;  %vm203_vm11 = vweird.f32 %v481_v30 }
  0xad   :  { %v340_v51 = vpop.eup %339  ;;  %v504_v52 = vadd.f32 1.0, %v338_v48  ;;  %v255_v17 = vor.u32 1.1754944e-38, %v254_v6  ;;  %vm253_vm12 = vcmp.eq.f32.partialorder %v252_v5, 8.507059e+37  ;;  %v82_v34 = vadd.f32 %v433_v40, %v81_v31 }
  0xae   :  { %v236_v56 = vsel %vm235_vm3, %v332_v21, %v232_v49  ;;  %v187_v57 = vadd.f32 %v336_v29, %v186_v50  ;;  %v244_v58 = vmul.f32 %v340_v51, %v471_v22  ;;  %vm249_vm7 = vweird.f32 %v340_v51 }
  0xaf   :  { %v342_v59 = vpop.eup %341  ;;  %343 = vrcp.f32 %v504_v52  ;;  %v241_v60 = vsel %vm238_vm4, %v240_v54, %v236_v56  ;;  %vm250_vm10 = vmor %vm248_vm8, %vm249_vm7  ;;  %v72_v21 = vadd.f32 %v433_v40, %v71_v12  ;;  %v210_v22 = vor.u32 1.1754944e-38, %v209_v10 }
  0xb0   :  { %v278_v62 = vmul.f32 %v241_v60, %v77_v53  ;;  %v191_v63 = vsel %vm190_vm5, %v336_v29, %v187_v57  ;;  %v245_v1 = vsub.f32 1.0, %v244_v58  ;;  %v199_v2 = vmul.f32 %v342_v59, %v481_v30 }
  0xb1   :  { %v196_v3 = vsel %vm193_vm6, %v195_v61, %v191_v63  ;;  %vm204_vm9 = vweird.f32 %v342_v59  ;;  %vm208_vm14 = vcmp.eq.f32.partialorder %v207_v14, 8.507059e+37  ;;  %v269_v27 = vand.u32 2147483648, %v504_v52 }
  0xb2   :  { %286 = vst.msk [vmem:[%s552_s5 + $0x28] sm:$0xff] %vm38_vm1, %v278_v62  ;;  %v275_v0 = vmul.f32 %v196_v3, %v70_v55  ;;  %v246_v7 = vmul.f32 %v340_v51, %v245_v1  ;;  %v200_v8 = vsub.f32 1.0, %v199_v2  ;;  %vm205_vm13 = vmor %vm203_vm11, %vm204_vm9  ;;  %v267_v30 = vand.u32 2147483647, %v504_v52 }
  0xb3   :  { %vm263_vm0 = vweird.f32 %v504_v52  ;;  %v270_v33 = vor.u32 1.1754944e-38, %v269_v27 }
  0xb4   :  { %283 = vst.msk [vmem:[%s552_s5 + $0x10] sm:$0xff] %vm38_vm1, %v275_v0  ;;  %v247_v11 = vadd.f32 %v340_v51, %v246_v7  ;;  %v201_v13 = vmul.f32 %v342_v59, %v200_v8  ;;  %vm268_vm3 = vcmp.eq.f32.partialorder %v267_v30, 8.507059e+37 }
  0xb5   :  { %v344_v15 = vpop.eup %343 }
  0xb6   :  { %v251_v18 = vsel %vm250_vm10, %v340_v51, %v247_v11  ;;  %v202_v19 = vadd.f32 %v342_v59, %v201_v13  ;;  %v259_v20 = vmul.f32 %v344_v15, %v504_v52  ;;  %vm264_vm15 = vweird.f32 %v344_v15 }
  0xb7   :  { %v256_v16 = vsel %vm253_vm12, %v255_v17, %v251_v18  ;;  %vm265_vm2 = vmor %vm263_vm0, %vm264_vm15 }
  0xb8   :  { %v279_v23 = vmul.f32 %v256_v16, %v80_v9  ;;  %v206_v24 = vsel %vm205_vm13, %v342_v59, %v202_v19  ;;  %v260_v25 = vsub.f32 1.0, %v259_v20 }
  0xb9   :  { %v211_v26 = vsel %vm208_vm14, %v210_v22, %v206_v24 }
  0xba   :  { %287 = vst.msk [vmem:[%s552_s5 + $0x30] sm:$0xff] %vm38_vm1, %v279_v23  ;;  %v276_v28 = vmul.f32 %v211_v26, %v72_v21  ;;  %v261_v29 = vmul.f32 %v344_v15, %v260_v25 }
  0xbc   :  { %284 = vst.msk [vmem:[%s552_s5 + $0x18] sm:$0xff] %vm38_vm1, %v276_v28  ;;  %v262_v32 = vadd.f32 %v344_v15, %v261_v29 }
  0xbe   :  { %v266_v35 = vsel %vm265_vm2, %v344_v15, %v262_v32 }
  0xbf   :  { %v271_v36 = vsel %vm268_vm3, %v270_v33, %v266_v35 }
  0xc0   :  { %v280_v37 = vmul.f32 %v271_v36, %v82_v34 }
  0xc2   :  { %288 = vst.msk [vmem:[%s552_s5 + $0x38] sm:$0xff] %vm38_vm1, %v280_v37 }

// kernel: hybrid_conv_unet.23
= control target key start
LH: loop header
LB: loop body
LE: loop exit
PB: predicated region body
PF: predicated region fallthrough
CT: control target
= control target key end

     0   :  { %vm45_vm0 = vcmask 1041408   ;;  %vm32_vm1 = vcmask 31744   ;;  %vm78_vm2 = vcmask 48128   ;;  %s181_s1 = inlined_call_operand.vmem [shape: bf16[4,6], index: 1, kind: input, shape index: {}]   ;;  %s182_s0 = inlined_call_operand.vmem [shape: f32[64,4], index: 0, kind: input, shape index: {}]   ;;  %s183_s2 = inlined_call_operand.vmem [shape: f32[1,6], index: 2, kind: input, shape index: {}]   ;;  %s184_s3 = inlined_call_operand.vmem [shape: f32[64,6], index: 3, kind: output, shape index: {}]  }
   0x1   :  { %v27_v0 = vld [vmem:[%s181_s1] sm:$0x3]  ;;  %v16_v2 = vld [vmem:[%s182_s0 + $0x8] sm:$0xff]  ;;  %v17_v5 = vld [vmem:[%s182_s0 + $0x10] sm:$0xff] }
   0x2   :  { %v15_v1 = vld [vmem:[%s182_s0] sm:$0xff]  ;;  %v47_v3 = vsel %vm45_vm0, %v27_v0, 0  ;;  %v18_v6 = vld [vmem:[%s182_s0 + $0x18] sm:$0xff]  ;;  %v20_v9 = vld [vmem:[%s182_s0 + $0x28] sm:$0xff] }
   0x3   :  { %v23_v4 = vpack.c.bf16 %v16_v2, %v15_v1  ;;  %v19_v7 = vld [vmem:[%s182_s0 + $0x20] sm:$0xff]  ;;  %56 = vmatpush.bf16.msra.mxu0 %v47_v3  ;;  %95 = vmatpush.bf16.msra.mxu1 %v47_v3  ;;  %v24_v8 = vpack.c.bf16 %v18_v6, %v17_v5  ;;  %v21_v10 = vld [vmem:[%s182_s0 + $0x30] sm:$0xff]  ;;  %v22_v11 = vld [vmem:[%s182_s0 + $0x38] sm:$0xff] }
   0x4   :  { %96 = vmatpush.bf16.msra.mxu2 %v47_v3  ;;  %97 = vmatpush.bf16.msra.mxu3 %v47_v3  ;;  %v25_v12 = vpack.c.bf16 %v20_v9, %v19_v7  ;;  %v26_v13 = vpack.c.bf16 %v22_v11, %v21_v10  ;;  %v98_v14 = vld [vmem:[%s183_s2] ss:$0 sm:$0xff] }
   0x6   :  { %91 = vmatmul.msk.bf16.vlgmr.msra.gmra.mxu0 %vm32_vm1, %v23_v4  ;;  %92 = vmatmul.msk.bf16.vlgmr.msra.gmra.mxu1 %vm32_vm1, %v24_v8 }
   0x7   :  { %93 = vmatmul.msk.bf16.vlgmr.msra.gmra.mxu2 %vm32_vm1, %v25_v12  ;;  %94 = vmatmul.msk.bf16.vlgmr.msra.gmra.mxu3 %vm32_vm1, %v26_v13 }
  0x83   :  { %v58_v15 = vpop.f32.mrf.mxu0  ;;  %v63_v16 = vpop.f32.mrf.mxu1 }
  0x84   :  { %v59_v17 = vadd.f32 %v98_v14, %v58_v15  ;;  %v64_v18 = vadd.f32 %v98_v14, %v63_v16 }
  0x86   :  { %79 = vst.msk [vmem:[%s184_s3] sm:$0xff] %vm78_vm2, %v59_v17 }
  0x87   :  { %81 = vst.msk [vmem:[%s184_s3 + $0x10] sm:$0xff] %vm78_vm2, %v64_v18 }
  0x8a   :  { %v68_v19 = vpop.f32.mrf.mxu2  ;;  %v73_v20 = vpop.f32.mrf.mxu3 }
  0x8b   :  { %v69_v21 = vadd.f32 %v98_v14, %v68_v19  ;;  %v74_v22 = vadd.f32 %v98_v14, %v73_v20  ;;  %v60_v23 = vpop.f32.mrf.mxu0  ;;  %v65_v24 = vpop.f32.mrf.mxu1 }
  0x8c   :  { %v61_v25 = vadd.f32 %v98_v14, %v60_v23  ;;  %v66_v26 = vadd.f32 %v98_v14, %v65_v24 }
  0x8d   :  { %83 = vst.msk [vmem:[%s184_s3 + $0x20] sm:$0xff] %vm78_vm2, %v69_v21 }
  0x8e   :  { %85 = vst.msk [vmem:[%s184_s3 + $0x30] sm:$0xff] %vm78_vm2, %v74_v22 }
  0x8f   :  { %80 = vst.msk [vmem:[%s184_s3 + $0x8] sm:$0xff] %vm78_vm2, %v61_v25 }
  0x90   :  { %82 = vst.msk [vmem:[%s184_s3 + $0x18] sm:$0xff] %vm78_vm2, %v66_v26 }
  0x92   :  { %v70_v27 = vpop.f32.mrf.mxu2  ;;  %v75_v28 = vpop.f32.mrf.mxu3 }
  0x93   :  { %v71_v29 = vadd.f32 %v98_v14, %v70_v27  ;;  %v76_v30 = vadd.f32 %v98_v14, %v75_v28 }
  0x95   :  { %84 = vst.msk [vmem:[%s184_s3 + $0x28] sm:$0xff] %vm78_vm2, %v71_v29 }
  0x96   :  { %86 = vst.msk [vmem:[%s184_s3 + $0x38] sm:$0xff] %vm78_vm2, %v76_v30 }

// kernel: hybrid_conv_unet.25
= control target key start
LH: loop header
LB: loop body
LE: loop exit
PB: predicated region body
PF: predicated region fallthrough
CT: control target
= control target key end

     0   :  { %s809_s21 = smov 0   ;;  %s892_s0 = inlined_call_operand.vmem [shape: f32[2,36,8], index: 0, kind: input, shape index: {}]   ;;  %s893_s1 = inlined_call_operand.vmem [shape: bf16[5,8,6], index: 1, kind: input, shape index: {}]   ;;  %s894_s2 = inlined_call_operand.vmem [shape: f32[1,6], index: 2, kind: input, shape index: {}]   ;;  %s895_s3 = inlined_call_operand.vmem [shape: f32[1,6], index: 3, kind: input, shape index: {}]   ;;  %s896_s4 = inlined_call_operand.vmem [shape: f32[1,6], index: 4, kind: input, shape index: {}]   ;;  %s897_s5 = inlined_call_operand.vmem [shape: f32[2,32,6], index: 5, kind: input, shape index: {}]   ;;  %s898_s6 = inlined_call_operand.vmem [shape: f32[2,32,6], index: 6, kind: output, shape index: {}]  }
   0x1 LB: > { %s711_s22 = sadd.s32 4294967295, %s771_s21   ;;  %p715_p0 = scmp.ge.s32.totalorder %s771_s21, 1  ;;  %s771_s21 = sphi %s809_s21, %s16_s21  }
   0x2   : > { %p222_p1 = scmp.lt.s32.totalorder %s771_s21, 3 }
   0x4   : > { %p223_p2 = pnand %p715_p0, %p222_p1 }
   0x5   : > { %p257_p3 = scmp.lt.s32.totalorder (!%p223_p2), %s711_s22, 1 }
   0x6   : > { %226 = sbr.rel (%p223_p2) target bundleno = 530 (0x212), region = 44 }
   0xb   : > { %v285_v0 = vld [vmem:[%s893_s1] sm:$0xf]  ;;  %vm293_vm0 = vcmask 1043456   ;;  %v723_v2 = vld [vmem:[%s893_s1 + $0x4] sm:$0xf]  ;;  %s900_s22 = smov (!%p257_p3, %s711_s22), 1 }
   0xc   : > { %v295_v1 = vsel %vm293_vm0, %v285_v0, 0  ;;  %v726_v3 = vld [vmem:[%s893_s1 + $0x8] sm:$0xf]  ;;  %v349_v4 = vsel %vm293_vm0, %v723_v2, 0  ;;  %v729_v6 = vld [vmem:[%s893_s1 + $0xc] sm:$0xf] }
   0xd   : > { %304 = vmatpush.bf16.msra.mxu0 %v295_v1  ;;  %739 = vmatpush.bf16.msra.mxu1 %v295_v1  ;;  %v392_v5 = vsel %vm293_vm0, %v726_v3, 0  ;;  %v440_v7 = vsel %vm293_vm0, %v729_v6, 0  ;;  %v732_v8 = vld [vmem:[%s893_s1 + $0x10] sm:$0xf]  ;;  %s740_s9 = smul.u32 40, %s900_s22  ;;  %vm286_vm1 = vcmask 64512  }
   0xe   : > { %401 = vmatpush.bf16.msra.mxu2 %v392_v5  ;;  %449 = vmatpush.bf16.msra.mxu3 %v440_v7  ;;  %v480_v9 = vsel %vm293_vm0, %v732_v8, 0  ;;  %vm379_vm2 = vcmask 1046528   ;;  %vm419_vm3 = vsmask.f32 6400  ;;  %vm467_vm4 = vcmask 1045504   ;;  %s737_s19 = sshll.u32 %s900_s22, 5 }
   0xf   : > { %s261_s12 = scalar_lea.vmem %s892_s0, %s740_s9  ;;  %vm323_vm5 = vsmask.f32 7424  ;;  %v750_v57 = vld [vmem:[%s894_s2] ss:$0 sm:$0xff]  ;;  %vm505_vm6 = vcmask 48128   ;;  %s266_s24 = scalar_lea.vmem %s897_s5, %s737_s19 }
  0x10   : > { %v273_v10 = vld [vmem:[%s261_s12] sm:$0xff]  ;;  %v274_v11 = vld [vmem:[%s261_s12 + $0x8] sm:$0xff]  ;;  %v275_v13 = vld [vmem:[%s261_s12 + $0x10] sm:$0xff]  ;;  %s271_s26 = scalar_lea.vmem %s898_s6, %s737_s19 }
  0x11   : > { %358 = vmatpush.bf16.msrb.mxu1 %v349_v4  ;;  %489 = vmatpush.bf16.msrb.mxu0 %v480_v9  ;;  %v283_v12 = vpack.c.bf16 %v274_v11, %v273_v10  ;;  %v276_v14 = vld [vmem:[%s261_s12 + $0x18] sm:$0xff]  ;;  %v277_v24 = vld [vmem:[%s261_s12 + $0x20] sm:$0xf] }
  0x12   : > { %v284_v15 = vpack.c.bf16 %v276_v14, %v275_v13  ;;  %v320_v30 = vpack.c.bf16 %v277_v24, %v277_v24 }
  0x13   : > { %721 = vmatmul.msk.bf16.vlgmr.msra.gmra.mxu0 %vm286_vm1, %v283_v12  ;;  %v380_v16 = vrot.slane %v283_v12, 1  ;;  %v324_v17 = vshrl.u32 %v283_v12, 16  ;;  %v326_v18 = vshll.u32 %v283_v12, 16  ;;  %v468_v33 = vrot.slane %v283_v12, 2 }
  0x14   : > { %722 = vmatmul.msk.bf16.vlgmr.msra.gmra.mxu1 %vm286_vm1, %v284_v15  ;;  %v381_v19 = vrot.slane %v284_v15, 1  ;;  %v330_v20 = vshll.u32 %v284_v15, 16  ;;  %v334_v21 = vshrl.u32 %v284_v15, 16  ;;  %v469_v34 = vrot.slane %v284_v15, 2 }
  0x15   : > { %v420_v22 = vrot.slane %v324_v17, 1  ;;  %v421_v23 = vrot.slane %v326_v18, 2  ;;  %v328_v31 = vrot.slane %v326_v18, 1  ;;  %v338_v35 = vshll.u32 %v320_v30, 16 }
  0x16   : > { %v382_v25 = vsel %vm379_vm2, %v380_v16, %v381_v19  ;;  %v423_v26 = vrot.slane %v334_v21, 1  ;;  %v424_v27 = vrot.slane %v330_v20, 2  ;;  %v427_v36 = vshrl.u32 %v320_v30, 16 }
  0x17   : > { %727 = vmatmul.msk.bf16.vlgmr.msra.gmra.mxu2 %vm286_vm1, %v382_v25  ;;  %v422_v28 = vor.u32 %v421_v23, %v420_v22  ;;  %v329_v37 = vor.u32 %v328_v31, %v324_v17  ;;  %v332_v38 = vrot.slane %v330_v20, 1  ;;  %v470_v39 = vsel %vm467_vm4, %v468_v33, %v469_v34 }
  0x18   : > { %v425_v29 = vor.u32 %v424_v27, %v423_v26  ;;  %v383_v40 = vrot.slane %v320_v30, 1  ;;  %v429_v41 = vrot.slane %v427_v36, 1  ;;  %v430_v42 = vrot.slane %v338_v35, 2 }
  0x19   : > { %v333_v43 = vsel %vm323_vm5, %v329_v37, %v332_v38  ;;  %v471_v47 = vrot.slane %v320_v30, 2  ;;  %v336_v48 = vor.u32 %v334_v21, %v332_v38  ;;  %v340_v49 = vrot.slane %v338_v35, 1 }
  0x1a   : > { %v426_v32 = vsel %vm419_vm3, %v422_v28, %v425_v29  ;;  %v384_v44 = vsel %vm379_vm2, %v381_v19, %v383_v40  ;;  %v431_v45 = vor.u32 %v430_v42, %v429_v41 }
  0x1b   : > { %730 = vmatmul.msk.bf16.vlgmr.msra.gmra.mxu3 %vm286_vm1, %v426_v32  ;;  %v472_v50 = vsel %vm467_vm4, %v469_v34, %v471_v47  ;;  %v341_v51 = vsel %vm323_vm5, %v336_v48, %v340_v49  ;;  %v773_v34 = vmov 192.0  }
  0x1c   : > { %v432_v46 = vsel %vm419_vm3, %v425_v29, %v431_v45  ;;  %753 = vrcp.f32 %v773_v34 }
  0x22   : > { %v754_v36 = vpop.eup %753 }
  0x23   : > { %733 = vmatmul.msk.bf16.vlgmr.msrb.gmra.mxu0 %vm286_vm1, %v470_v39  ;;  %v528_v38 = vmul.f32 192.0, %v754_v36  ;;  %vm532_vm7 = vweird.f32 %v754_v36 }
  0x24   : > { %724 = vmatmul.msk.bf16.vlgmr.msrb.gmra.mxu1 %vm286_vm1, %v333_v43 }
  0x25   : > { %v529_v41 = vsub.f32 1.0, %v528_v38 }
  0x27   : > { %728 = vmatmul.msk.bf16.gmra.mxu2 %vm286_vm1, %v384_v44  ;;  %v530_v45 = vmul.f32 %v754_v36, %v529_v41 }
  0x29   : > { %v531_v48 = vadd.f32 %v754_v36, %v530_v45 }
  0x2b   : > { %731 = vmatmul.msk.bf16.gmra.mxu3 %vm286_vm1, %v432_v46 }
  0x33   : > { %734 = vmatmul.msk.bf16.gmra.mxu0 %vm286_vm1, %v472_v50 }
  0x34   : > { %725 = vmatmul.msk.bf16.gmra.mxu1 %vm286_vm1, %v341_v51  ;;  %v533_v51 = vsel %vm532_vm7, %v754_v36, %v531_v48 }
  0x90   : > { %v306_v52 = vpop.f32.mrf.mxu0 }
  0x91   : > { %v311_v53 = vpop.f32.mrf.mxu1  ;;  %v316_v59 = vadd.f32 %v750_v57, %v306_v52 }
  0x92   : > { %v318_v11 = vadd.f32 %v750_v57, %v311_v53 }
  0x98   : > { %v308_v54 = vpop.f32.mrf.mxu0 }
  0x99   : > { %v313_v55 = vpop.f32.mrf.mxu1  ;;  %v317_v2 = vadd.f32 %v750_v57, %v308_v54 }
  0x9a   : > { %v403_v56 = vpop.f32.mrf.mxu2  ;;  %v319_v21 = vadd.f32 %v750_v57, %v313_v55 }
  0x9e   : > { %v451_v58 = vpop.f32.mrf.mxu3 }
  0xa0   : > { %v491_v61 = vpop.f32.mrf.mxu0 }
  0xa1   : > { %v360_v60 = vpop.f32.mrf.mxu1 }
  0xa2   : > { %v370_v62 = vadd.f32 %v360_v60, %v316_v59  ;;  %v405_v1 = vpop.f32.mrf.mxu2 }
  0xa4   : > { %v413_v63 = vadd.f32 %v403_v56, %v370_v62 }
  0xa6   : > { %v461_v0 = vadd.f32 %v451_v58, %v413_v63  ;;  %v453_v4 = vpop.f32.mrf.mxu3 }
  0xa8   : > { %v501_v3 = vadd.f32 %v491_v61, %v461_v0  ;;  %v493_v8 = vpop.f32.mrf.mxu0 }
  0xa9   : > { %v362_v5 = vpop.f32.mrf.mxu1 }
  0xaa   : > { %v371_v6 = vadd.f32 %v362_v5, %v317_v2  ;;  %v506_v7 = vsel %vm505_vm6, %v501_v3, 0.0  ;;  %v408_v13 = vpop.f32.mrf.mxu2 }
  0xab   : > { %507 = vadd.xlane.f32.xlu0 %v506_v7 }
  0xac   : > { %v414_v9 = vadd.f32 %v405_v1, %v371_v6 }
  0xae   : > { %v462_v10 = vadd.f32 %v453_v4, %v414_v9  ;;  %v456_v17 = vpop.f32.mrf.mxu3 }
  0xb0   : > { %v502_v12 = vadd.f32 %v493_v8, %v462_v10  ;;  %v496_v19 = vpop.f32.mrf.mxu0 }
  0xb1   : > { %v365_v14 = vpop.f32.mrf.mxu1 }
  0xb2   : > { %v372_v15 = vadd.f32 %v365_v14, %v318_v11  ;;  %v509_v16 = vsel %vm505_vm6, %v502_v12, 0.0  ;;  %v410_v26 = vpop.f32.mrf.mxu2 }
  0xb3   : > { %510 = vadd.xlane.f32.xlu0 %v509_v16 }
  0xb4   : > { %v415_v18 = vadd.f32 %v408_v13, %v372_v15 }
  0xb6   : > { %v463_v20 = vadd.f32 %v456_v17, %v415_v18  ;;  %v458_v28 = vpop.f32.mrf.mxu3 }
  0xb8   : > { %v503_v22 = vadd.f32 %v496_v19, %v463_v20  ;;  %v498_v30 = vpop.f32.mrf.mxu0 }
  0xb9   : > { %v367_v23 = vpop.f32.mrf.mxu1 }
  0xba   : > { %v373_v24 = vadd.f32 %v367_v23, %v319_v21  ;;  %v512_v25 = vsel %vm505_vm6, %v503_v22, 0.0  ;;  %v751_v23 = vld [vmem:[%s895_s3] ss:$0 sm:$0xff] }
  0xbb   : > { %513 = vadd.xlane.f32.xlu1 %v512_v25  ;;  %v752_v25 = vld [vmem:[%s896_s4] ss:$0 sm:$0xff] }
  0xbc   : > { %v416_v27 = vadd.f32 %v410_v26, %v373_v24 }
  0xbe   : > { %v464_v29 = vadd.f32 %v458_v28, %v416_v27 }
  0xc0   : > { %v504_v31 = vadd.f32 %v498_v30, %v464_v29 }
  0xc2   : > { %v515_v32 = vsel %vm505_vm6, %v504_v31, 0.0 }
  0xc3   : > { %516 = vadd.xlane.f32.xlu1 %v515_v32 }
 0x11e   : > { %v508_v33 = vpop.xlane.xlu0 %507 }
 0x126   : > { %v511_v37 = vpop.xlane.xlu0 %510 }
 0x127   : > { %v518_v39 = vadd.f32 %v511_v37, %v508_v33 }
 0x12e   : > { %v514_v35 = vpop.xlane.xlu1 %513 }
 0x12f   : > { %v519_v40 = vadd.f32 %v518_v39, %v514_v35 }
 0x136   : > { %v517_v42 = vpop.xlane.xlu1 %516 }
 0x137   : > { %v520_v43 = vadd.f32 %v519_v40, %v517_v42 }
 0x139   : > { %v521_v44 = vrot.slane %v520_v43, 4 }
 0x13b   : > { %v522_v46 = vadd.f32 %v521_v44, %v520_v43 }
 0x13d   : > { %v523_v47 = vrot.slane %v522_v46, 2 }
 0x13f   : > { %v524_v49 = vadd.f32 %v523_v47, %v522_v46 }
 0x141   : > { %v525_v50 = vrot.slane %v524_v49, 1 }
 0x143   : > { %v526_v52 = vadd.f32 %v525_v50, %v524_v49 }
 0x145   : > { %v534_v53 = vmul.f32 %v533_v51, %v526_v52 }
 0x147   : > { %v538_v54 = vsub.f32 %v504_v31, %v534_v53  ;;  %v537_v55 = vsub.f32 %v503_v22, %v534_v53  ;;  %v535_v56 = vsub.f32 %v501_v3, %v534_v53  ;;  %v536_v63 = vsub.f32 %v502_v12, %v534_v53 }
 0x149   : > { %v542_v57 = vmul.f32 %v538_v54, %v538_v54  ;;  %v541_v58 = vmul.f32 %v537_v55, %v537_v55  ;;  %v539_v59 = vmul.f32 %v535_v56, %v535_v56  ;;  %v540_v0 = vmul.f32 %v536_v63, %v536_v63 }
 0x14b   : > { %v552_v60 = vsel %vm505_vm6, %v542_v57, 0.0  ;;  %v549_v61 = vsel %vm505_vm6, %v541_v58, 0.0  ;;  %v543_v62 = vsel %vm505_vm6, %v539_v59, 0.0  ;;  %v546_v1 = vsel %vm505_vm6, %v540_v0, 0.0 }
 0x14c   : > { %553 = vadd.xlane.f32.xlu1 %v552_v60  ;;  %550 = vadd.xlane.f32.xlu0 %v549_v61 }
 0x14d   : > { %544 = vadd.xlane.f32.xlu2 %v543_v62 }
 0x155   : > { %547 = vadd.xlane.f32.xlu2 %v546_v1 }
 0x1bf   : > { %v551_v5 = vpop.xlane.xlu0 %550  ;;  %v554_v7 = vpop.xlane.xlu1 %553 }
 0x1c0   : > { %v545_v2 = vpop.xlane.xlu2 %544 }
 0x1c8   : > { %v548_v4 = vpop.xlane.xlu2 %547 }
 0x1c9   : > { %v555_v3 = vadd.f32 %v548_v4, %v545_v2  ;;  %v633_v4 = vld [vmem:[%s266_s24 + $0x8] sm:$0xff] }
 0x1cb   : > { %v556_v6 = vadd.f32 %v555_v3, %v551_v5 }
 0x1cd   : > { %v557_v8 = vadd.f32 %v556_v6, %v554_v7  ;;  %v634_v7 = vld [vmem:[%s266_s24 + $0x10] sm:$0xff] }
 0x1cf   : > { %v558_v9 = vrot.slane %v557_v8, 4 }
 0x1d1   : > { %v559_v10 = vadd.f32 %v558_v9, %v557_v8 }
 0x1d3   : > { %v560_v11 = vrot.slane %v559_v10, 2 }
 0x1d5   : > { %v561_v13 = vadd.f32 %v560_v11, %v559_v10  ;;  %v635_v11 = vld [vmem:[%s266_s24 + $0x18] sm:$0xff] }
 0x1d7   : > { %v562_v14 = vrot.slane %v561_v13, 1 }
 0x1d9   : > { %v563_v15 = vadd.f32 %v562_v14, %v561_v13 }
 0x1db   : > { %v564_v16 = vmul.f32 %v563_v15, %v533_v51 }
 0x1dd   : > { %v565_v12 = vadd.f32 1e-05, %v564_v16 }
 0x1df   : > { %755 = vrsqrt.f32 %v565_v12  ;;  %vm572_vm9 = vweird.f32 %v565_v12 }
 0x1e5   : > { %v756_v17 = vpop.eup %755 }
 0x1e6   : > { %v567_v18 = vmul.f32 %v756_v17, %v565_v12  ;;  %vm573_vm8 = vweird.f32 %v756_v17 }
 0x1e7   : > { %vm574_vm10 = vmor %vm572_vm9, %vm573_vm8 }
 0x1e8   : > { %v568_v19 = vmul.f32 %v756_v17, %v567_v18 }
 0x1ea   : > { %v569_v20 = vmul.f32 0.5, %v568_v19 }
 0x1ec   : > { %v570_v21 = vsub.f32 1.5, %v569_v20 }
 0x1ee   : > { %v571_v22 = vmul.f32 %v756_v17, %v570_v21 }
 0x1f0   : > { %v575_v24 = vsel %vm574_vm10, %v756_v17, %v571_v22 }
 0x1f1   : > { %v576_v26 = vmul.f32 %v575_v24, %v535_v56  ;;  %v577_v27 = vmul.f32 %v575_v24, %v536_v63  ;;  %v578_v28 = vmul.f32 %v575_v24, %v537_v55  ;;  %v579_v29 = vmul.f32 %v575_v24, %v538_v54  ;;  %v632_v63 = vld [vmem:[%s266_s24] sm:$0xff] }
 0x1f3   : > { %v584_v30 = vmul.f32 %v751_v23, %v576_v26  ;;  %v585_v31 = vmul.f32 %v751_v23, %v577_v27  ;;  %v586_v32 = vmul.f32 %v751_v23, %v578_v28  ;;  %v587_v33 = vmul.f32 %v751_v23, %v579_v29 }
 0x1f5   : > { %v592_v34 = vadd.f32 %v752_v25, %v584_v30  ;;  %v593_v35 = vadd.f32 %v752_v25, %v585_v31  ;;  %v594_v36 = vadd.f32 %v752_v25, %v586_v32  ;;  %v595_v37 = vadd.f32 %v752_v25, %v587_v33 }
 0x1f7   : > { %v600_v38 = vmul.f32 0.044715, %v592_v34  ;;  %v601_v39 = vmul.f32 0.044715, %v593_v35  ;;  %v602_v40 = vmul.f32 0.044715, %v594_v36 }
 0x1f8   : > { %v603_v41 = vmul.f32 0.044715, %v595_v37  ;;  %v596_v60 = vmul.f32 0.5, %v592_v34  ;;  %v597_v0 = vmul.f32 0.5, %v593_v35  ;;  %v598_v3 = vmul.f32 0.5, %v594_v36 }
 0x1f9   : > { %v604_v42 = vmul.f32 %v600_v38, %v592_v34  ;;  %v605_v43 = vmul.f32 %v601_v39, %v593_v35  ;;  %v606_v44 = vmul.f32 %v602_v40, %v594_v36  ;;  %v599_v8 = vmul.f32 0.5, %v595_v37 }
 0x1fa   : > { %v607_v45 = vmul.f32 %v603_v41, %v595_v37 }
 0x1fb   : > { %v608_v46 = vmul.f32 %v604_v42, %v592_v34  ;;  %v609_v47 = vmul.f32 %v605_v43, %v593_v35  ;;  %v610_v48 = vmul.f32 %v606_v44, %v594_v36 }
 0x1fc   : > { %v611_v49 = vmul.f32 %v607_v45, %v595_v37 }
 0x1fd   : > { %v612_v50 = vadd.f32 %v608_v46, %v592_v34  ;;  %v613_v51 = vadd.f32 %v609_v47, %v593_v35  ;;  %v614_v52 = vadd.f32 %v610_v48, %v594_v36 }
 0x1fe   : > { %v615_v53 = vadd.f32 %v611_v49, %v595_v37 }
 0x1ff   : > { %v616_v54 = vmul.f32 0.7978846, %v612_v50  ;;  %v617_v55 = vmul.f32 0.7978846, %v613_v51  ;;  %v618_v56 = vmul.f32 0.7978846, %v614_v52 }
 0x200   : > { %v619_v57 = vmul.f32 0.7978846, %v615_v53 }
 0x201   : > { %757 = vtanh.f32 %v616_v54 }
 0x202   : > { %759 = vtanh.f32 %v617_v55 }
 0x203   : > { %761 = vtanh.f32 %v618_v56 }
 0x204   : > { %763 = vtanh.f32 %v619_v57 }
 0x207   : > { %v758_v58 = vpop.eup %757 }
 0x208   : > { %v760_v59 = vpop.eup %759  ;;  %v624_v61 = vadd.f32 1.0, %v758_v58 }
 0x209   : > { %v762_v62 = vpop.eup %761  ;;  %v625_v1 = vadd.f32 1.0, %v760_v59 }
 0x20a   : > { %v764_v2 = vpop.eup %763  ;;  %v626_v5 = vadd.f32 1.0, %v762_v62  ;;  %v628_v6 = vmul.f32 %v624_v61, %v596_v60 }
 0x20b   : > { %v627_v9 = vadd.f32 1.0, %v764_v2  ;;  %v629_v10 = vmul.f32 %v625_v1, %v597_v0 }
 0x20c   : > { %v630_v13 = vmul.f32 %v626_v5, %v598_v3  ;;  %v636_v14 = vadd.f32 %v632_v63, %v628_v6 }
 0x20d   : > { %v631_v15 = vmul.f32 %v627_v9, %v599_v8  ;;  %v637_v16 = vadd.f32 %v633_v4, %v629_v10 }
 0x20e   : > { %v638_v12 = vadd.f32 %v634_v7, %v630_v13  ;;  %640 = vst.msk [vmem:[%s271_s26] sm:$0xff] %vm505_vm6, %v636_v14 }
 0x20f   : > { %v639_v17 = vadd.f32 %v635_v11, %v631_v15  ;;  %641 = vst.msk [vmem:[%s271_s26 + $0x8] sm:$0xff] %vm505_vm6, %v637_v16 }
 0x210   : > { %642 = vst.msk [vmem:[%s271_s26 + $0x10] sm:$0xff] %vm505_vm6, %v638_v12 }
 0x211   : > { %643 = vst.msk [vmem:[%s271_s26 + $0x18] sm:$0xff] %vm505_vm6, %v639_v17 }
 0x212 PF: > { %s16_s21 = sadd.s32 1, %s771_s21  }
 0x213   : > { %p13_p4 = scmp.ge.s32.totalorder %s16_s21, 4  }
 0x215   :  { %15 = sbr.rel (!%p13_p4) target bundleno = 1 (0x1), region = 81 }

// kernel: hybrid_conv_unet.24
= control target key start
LH: loop header
LB: loop body
LE: loop exit
PB: predicated region body
PF: predicated region fallthrough
CT: control target
= control target key end

     0   :  { %s734_s18 = smov 0   ;;  %s814_s0 = inlined_call_operand.vmem [shape: f32[2,36,4], index: 0, kind: input, shape index: {}]   ;;  %s815_s1 = inlined_call_operand.vmem [shape: bf16[5,4,8], index: 1, kind: input, shape index: {}]   ;;  %s816_s2 = inlined_call_operand.vmem [shape: f32[1,8], index: 2, kind: input, shape index: {}]   ;;  %s817_s3 = inlined_call_operand.vmem [shape: f32[1,8], index: 3, kind: input, shape index: {}]   ;;  %s818_s4 = inlined_call_operand.vmem [shape: f32[1,8], index: 4, kind: input, shape index: {}]   ;;  %s819_s5 = inlined_call_operand.vmem [shape: f32[2,32,8], index: 5, kind: output, shape index: {}]  }
   0x1 LB: > { %s644_s19 = sadd.s32 4294967295, %s701_s18   ;;  %p648_p0 = scmp.ge.s32.totalorder %s701_s18, 1  ;;  %s701_s18 = sphi %s734_s18, %s15_s18  }
   0x2   : > { %p187_p1 = scmp.lt.s32.totalorder %s701_s18, 3 }
   0x4   : > { %p188_p2 = pnand %p648_p0, %p187_p1 }
   0x5   : > { %p215_p3 = scmp.lt.s32.totalorder (!%p188_p2), %s644_s19, 1 }
   0x6   : > { %191 = sbr.rel (%p188_p2) target bundleno = 528 (0x210), region = 40 }
   0xb   : > { %v238_v0 = vld [vmem:[%s815_s1] sm:$0x3]  ;;  %vm246_vm0 = vcmask 1041408   ;;  %v654_v2 = vld [vmem:[%s815_s1 + $0x2] sm:$0x3]  ;;  %s821_s19 = smov (!%p215_p3, %s644_s19), 1 }
   0xc   : > { %v248_v1 = vsel %vm246_vm0, %v238_v0, 0  ;;  %v657_v3 = vld [vmem:[%s815_s1 + $0x4] sm:$0x3]  ;;  %v302_v4 = vsel %vm246_vm0, %v654_v2, 0  ;;  %v660_v6 = vld [vmem:[%s815_s1 + $0x6] sm:$0x3] }
   0xd   : > { %257 = vmatpush.bf16.msra.mxu0 %v248_v1  ;;  %669 = vmatpush.bf16.msra.mxu1 %v248_v1  ;;  %v345_v5 = vsel %vm246_vm0, %v657_v3, 0  ;;  %v393_v7 = vsel %vm246_vm0, %v660_v6, 0  ;;  %v663_v8 = vld [vmem:[%s815_s1 + $0x8] sm:$0x3]  ;;  %s670_s30 = smul.u32 40, %s821_s19  ;;  %vm239_vm1 = vcmask 31744  }
   0xe   : > { %354 = vmatpush.bf16.msra.mxu2 %v345_v5  ;;  %402 = vmatpush.bf16.msra.mxu3 %v393_v7  ;;  %v433_v9 = vsel %vm246_vm0, %v663_v8, 0  ;;  %vm332_vm2 = vcmask 1046528   ;;  %vm372_vm3 = vsmask.f32 6400  ;;  %vm420_vm4 = vcmask 1045504   ;;  %s668_s15 = sshll.u32 %s821_s19, 5 }
   0xf   : > { %s219_s8 = scalar_lea.vmem %s814_s0, %s670_s30  ;;  %vm276_vm5 = vsmask.f32 7424  ;;  %v680_v57 = vld [vmem:[%s816_s2] ss:$0 sm:$0xff]  ;;  %vm458_vm6 = vcmask 64512   ;;  %s224_s20 = scalar_lea.vmem %s819_s5, %s668_s15 }
  0x10   : > { %v226_v10 = vld [vmem:[%s219_s8] sm:$0xff]  ;;  %v227_v11 = vld [vmem:[%s219_s8 + $0x8] sm:$0xff]  ;;  %v228_v12 = vld [vmem:[%s219_s8 + $0x10] sm:$0xff] }
  0x11   : > { %311 = vmatpush.bf16.msrb.mxu1 %v302_v4  ;;  %442 = vmatpush.bf16.msrb.mxu0 %v433_v9  ;;  %v236_v13 = vpack.c.bf16 %v227_v11, %v226_v10  ;;  %v229_v14 = vld [vmem:[%s219_s8 + $0x18] sm:$0xff]  ;;  %v230_v24 = vld [vmem:[%s219_s8 + $0x20] sm:$0xf] }
  0x12   : > { %v237_v15 = vpack.c.bf16 %v229_v14, %v228_v12  ;;  %v273_v30 = vpack.c.bf16 %v230_v24, %v230_v24 }
  0x13   : > { %652 = vmatmul.msk.bf16.vlgmr.msra.gmra.mxu0 %vm239_vm1, %v236_v13  ;;  %v333_v16 = vrot.slane %v236_v13, 1  ;;  %v277_v17 = vshrl.u32 %v236_v13, 16  ;;  %v279_v18 = vshll.u32 %v236_v13, 16  ;;  %v421_v33 = vrot.slane %v236_v13, 2 }
  0x14   : > { %653 = vmatmul.msk.bf16.vlgmr.msra.gmra.mxu1 %vm239_vm1, %v237_v15  ;;  %v334_v19 = vrot.slane %v237_v15, 1  ;;  %v283_v20 = vshll.u32 %v237_v15, 16  ;;  %v287_v21 = vshrl.u32 %v237_v15, 16  ;;  %v422_v34 = vrot.slane %v237_v15, 2 }
  0x15   : > { %v373_v22 = vrot.slane %v277_v17, 1  ;;  %v374_v23 = vrot.slane %v279_v18, 2  ;;  %v281_v31 = vrot.slane %v279_v18, 1  ;;  %v291_v35 = vshll.u32 %v273_v30, 16 }
  0x16   : > { %v335_v25 = vsel %vm332_vm2, %v333_v16, %v334_v19  ;;  %v376_v26 = vrot.slane %v287_v21, 1  ;;  %v377_v27 = vrot.slane %v283_v20, 2  ;;  %v380_v36 = vshrl.u32 %v273_v30, 16 }
  0x17   : > { %658 = vmatmul.msk.bf16.vlgmr.msra.gmra.mxu2 %vm239_vm1, %v335_v25  ;;  %v375_v28 = vor.u32 %v374_v23, %v373_v22  ;;  %v282_v37 = vor.u32 %v281_v31, %v277_v17  ;;  %v285_v38 = vrot.slane %v283_v20, 1  ;;  %v423_v39 = vsel %vm420_vm4, %v421_v33, %v422_v34 }
  0x18   : > { %v378_v29 = vor.u32 %v377_v27, %v376_v26  ;;  %v336_v40 = vrot.slane %v273_v30, 1  ;;  %v382_v41 = vrot.slane %v380_v36, 1  ;;  %v383_v42 = vrot.slane %v291_v35, 2 }
  0x19   : > { %v286_v43 = vsel %vm276_vm5, %v282_v37, %v285_v38  ;;  %v424_v47 = vrot.slane %v273_v30, 2  ;;  %v289_v48 = vor.u32 %v287_v21, %v285_v38  ;;  %v293_v49 = vrot.slane %v291_v35, 1 }
  0x1a   : > { %v379_v32 = vsel %vm372_vm3, %v375_v28, %v378_v29  ;;  %v337_v44 = vsel %vm332_vm2, %v334_v19, %v336_v40  ;;  %v384_v45 = vor.u32 %v383_v42, %v382_v41 }
  0x1b   : > { %661 = vmatmul.msk.bf16.vlgmr.msra.gmra.mxu3 %vm239_vm1, %v379_v32  ;;  %v425_v50 = vsel %vm420_vm4, %v422_v34, %v424_v47  ;;  %v294_v51 = vsel %vm276_vm5, %v289_v48, %v293_v49  ;;  %v703_v34 = vmov 256.0  }
  0x1c   : > { %v385_v46 = vsel %vm372_vm3, %v378_v29, %v384_v45  ;;  %683 = vrcp.f32 %v703_v34 }
  0x22   : > { %v684_v36 = vpop.eup %683 }
  0x23   : > { %664 = vmatmul.msk.bf16.vlgmr.msrb.gmra.mxu0 %vm239_vm1, %v423_v39  ;;  %v481_v38 = vmul.f32 256.0, %v684_v36  ;;  %vm485_vm7 = vweird.f32 %v684_v36 }
  0x24   : > { %655 = vmatmul.msk.bf16.vlgmr.msrb.gmra.mxu1 %vm239_vm1, %v286_v43 }
  0x25   : > { %v482_v41 = vsub.f32 1.0, %v481_v38 }
  0x27   : > { %659 = vmatmul.msk.bf16.gmra.mxu2 %vm239_vm1, %v337_v44  ;;  %v483_v45 = vmul.f32 %v684_v36, %v482_v41 }
  0x29   : > { %v484_v48 = vadd.f32 %v684_v36, %v483_v45 }
  0x2b   : > { %662 = vmatmul.msk.bf16.gmra.mxu3 %vm239_vm1, %v385_v46 }
  0x33   : > { %665 = vmatmul.msk.bf16.gmra.mxu0 %vm239_vm1, %v425_v50 }
  0x34   : > { %656 = vmatmul.msk.bf16.gmra.mxu1 %vm239_vm1, %v294_v51  ;;  %v486_v51 = vsel %vm485_vm7, %v684_v36, %v484_v48 }
  0x90   : > { %v259_v52 = vpop.f32.mrf.mxu0 }
  0x91   : > { %v264_v53 = vpop.f32.mrf.mxu1  ;;  %v269_v59 = vadd.f32 %v680_v57, %v259_v52 }
  0x92   : > { %v271_v11 = vadd.f32 %v680_v57, %v264_v53 }
  0x98   : > { %v261_v54 = vpop.f32.mrf.mxu0 }
  0x99   : > { %v266_v55 = vpop.f32.mrf.mxu1  ;;  %v270_v2 = vadd.f32 %v680_v57, %v261_v54 }
  0x9a   : > { %v356_v56 = vpop.f32.mrf.mxu2  ;;  %v272_v21 = vadd.f32 %v680_v57, %v266_v55 }
  0x9e   : > { %v404_v58 = vpop.f32.mrf.mxu3 }
  0xa0   : > { %v444_v61 = vpop.f32.mrf.mxu0 }
  0xa1   : > { %v313_v60 = vpop.f32.mrf.mxu1 }
  0xa2   : > { %v323_v62 = vadd.f32 %v313_v60, %v269_v59  ;;  %v358_v1 = vpop.f32.mrf.mxu2 }
  0xa4   : > { %v366_v63 = vadd.f32 %v356_v56, %v323_v62 }
  0xa6   : > { %v414_v0 = vadd.f32 %v404_v58, %v366_v63  ;;  %v406_v4 = vpop.f32.mrf.mxu3 }
  0xa8   : > { %v454_v3 = vadd.f32 %v444_v61, %v414_v0  ;;  %v446_v8 = vpop.f32.mrf.mxu0 }
  0xa9   : > { %v315_v5 = vpop.f32.mrf.mxu1 }
  0xaa   : > { %v324_v6 = vadd.f32 %v315_v5, %v270_v2  ;;  %v459_v7 = vsel %vm458_vm6, %v454_v3, 0.0  ;;  %v361_v13 = vpop.f32.mrf.mxu2 }
  0xab   : > { %460 = vadd.xlane.f32.xlu0 %v459_v7 }
  0xac   : > { %v367_v9 = vadd.f32 %v358_v1, %v324_v6 }
  0xae   : > { %v415_v10 = vadd.f32 %v406_v4, %v367_v9  ;;  %v409_v17 = vpop.f32.mrf.mxu3 }
  0xb0   : > { %v455_v12 = vadd.f32 %v446_v8, %v415_v10  ;;  %v449_v19 = vpop.f32.mrf.mxu0 }
  0xb1   : > { %v318_v14 = vpop.f32.mrf.mxu1 }
  0xb2   : > { %v325_v15 = vadd.f32 %v318_v14, %v271_v11  ;;  %v462_v16 = vsel %vm458_vm6, %v455_v12, 0.0  ;;  %v363_v26 = vpop.f32.mrf.mxu2 }
  0xb3   : > { %463 = vadd.xlane.f32.xlu0 %v462_v16 }
  0xb4   : > { %v368_v18 = vadd.f32 %v361_v13, %v325_v15 }
  0xb6   : > { %v416_v20 = vadd.f32 %v409_v17, %v368_v18  ;;  %v411_v28 = vpop.f32.mrf.mxu3 }
  0xb8   : > { %v456_v22 = vadd.f32 %v449_v19, %v416_v20  ;;  %v451_v30 = vpop.f32.mrf.mxu0 }
  0xb9   : > { %v320_v23 = vpop.f32.mrf.mxu1 }
  0xba   : > { %v326_v24 = vadd.f32 %v320_v23, %v272_v21  ;;  %v465_v25 = vsel %vm458_vm6, %v456_v22, 0.0  ;;  %v681_v23 = vld [vmem:[%s817_s3] ss:$0 sm:$0xff] }
  0xbb   : > { %466 = vadd.xlane.f32.xlu1 %v465_v25  ;;  %v682_v25 = vld [vmem:[%s818_s4] ss:$0 sm:$0xff] }
  0xbc   : > { %v369_v27 = vadd.f32 %v363_v26, %v326_v24 }
  0xbe   : > { %v417_v29 = vadd.f32 %v411_v28, %v369_v27 }
  0xc0   : > { %v457_v31 = vadd.f32 %v451_v30, %v417_v29 }
  0xc2   : > { %v468_v32 = vsel %vm458_vm6, %v457_v31, 0.0 }
  0xc3   : > { %469 = vadd.xlane.f32.xlu1 %v468_v32 }
 0x11e   : > { %v461_v33 = vpop.xlane.xlu0 %460 }
 0x126   : > { %v464_v37 = vpop.xlane.xlu0 %463 }
 0x127   : > { %v471_v39 = vadd.f32 %v464_v37, %v461_v33 }
 0x12e   : > { %v467_v35 = vpop.xlane.xlu1 %466 }
 0x12f   : > { %v472_v40 = vadd.f32 %v471_v39, %v467_v35 }
 0x136   : > { %v470_v42 = vpop.xlane.xlu1 %469 }
 0x137   : > { %v473_v43 = vadd.f32 %v472_v40, %v470_v42 }
 0x139   : > { %v474_v44 = vrot.slane %v473_v43, 4 }
 0x13b   : > { %v475_v46 = vadd.f32 %v474_v44, %v473_v43 }
 0x13d   : > { %v476_v47 = vrot.slane %v475_v46, 2 }
 0x13f   : > { %v477_v49 = vadd.f32 %v476_v47, %v475_v46 }
 0x141   : > { %v478_v50 = vrot.slane %v477_v49, 1 }
 0x143   : > { %v479_v52 = vadd.f32 %v478_v50, %v477_v49 }
 0x145   : > { %v487_v53 = vmul.f32 %v486_v51, %v479_v52 }
 0x147   : > { %v491_v54 = vsub.f32 %v457_v31, %v487_v53  ;;  %v490_v55 = vsub.f32 %v456_v22, %v487_v53  ;;  %v488_v56 = vsub.f32 %v454_v3, %v487_v53  ;;  %v489_v63 = vsub.f32 %v455_v12, %v487_v53 }
 0x149   : > { %v495_v57 = vmul.f32 %v491_v54, %v491_v54  ;;  %v494_v58 = vmul.f32 %v490_v55, %v490_v55  ;;  %v492_v59 = vmul.f32 %v488_v56, %v488_v56  ;;  %v493_v0 = vmul.f32 %v489_v63, %v489_v63 }
 0x14b   : > { %v505_v60 = vsel %vm458_vm6, %v495_v57, 0.0  ;;  %v502_v61 = vsel %vm458_vm6, %v494_v58, 0.0  ;;  %v496_v62 = vsel %vm458_vm6, %v492_v59, 0.0  ;;  %v499_v1 = vsel %vm458_vm6, %v493_v0, 0.0 }
 0x14c   : > { %506 = vadd.xlane.f32.xlu1 %v505_v60  ;;  %503 = vadd.xlane.f32.xlu0 %v502_v61 }
 0x14d   : > { %497 = vadd.xlane.f32.xlu2 %v496_v62 }
 0x155   : > { %500 = vadd.xlane.f32.xlu2 %v499_v1 }
 0x1bf   : > { %v504_v5 = vpop.xlane.xlu0 %503  ;;  %v507_v7 = vpop.xlane.xlu1 %506 }
 0x1c0   : > { %v498_v2 = vpop.xlane.xlu2 %497 }
 0x1c8   : > { %v501_v4 = vpop.xlane.xlu2 %500 }
 0x1c9   : > { %v508_v3 = vadd.f32 %v501_v4, %v498_v2 }
 0x1cb   : > { %v509_v6 = vadd.f32 %v508_v3, %v504_v5 }
 0x1cd   : > { %v510_v8 = vadd.f32 %v509_v6, %v507_v7 }
 0x1cf   : > { %v511_v9 = vrot.slane %v510_v8, 4 }
 0x1d1   : > { %v512_v10 = vadd.f32 %v511_v9, %v510_v8 }
 0x1d3   : > { %v513_v11 = vrot.slane %v512_v10, 2 }
 0x1d5   : > { %v514_v13 = vadd.f32 %v513_v11, %v512_v10 }
 0x1d7   : > { %v515_v14 = vrot.slane %v514_v13, 1 }
 0x1d9   : > { %v516_v15 = vadd.f32 %v515_v14, %v514_v13 }
 0x1db   : > { %v517_v16 = vmul.f32 %v516_v15, %v486_v51 }
 0x1dd   : > { %v518_v12 = vadd.f32 1e-05, %v517_v16 }
 0x1df   : > { %685 = vrsqrt.f32 %v518_v12  ;;  %vm525_vm9 = vweird.f32 %v518_v12 }
 0x1e5   : > { %v686_v17 = vpop.eup %685 }
 0x1e6   : > { %v520_v18 = vmul.f32 %v686_v17, %v518_v12  ;;  %vm526_vm8 = vweird.f32 %v686_v17 }
 0x1e7   : > { %vm527_vm10 = vmor %vm525_vm9, %vm526_vm8 }
 0x1e8   : > { %v521_v19 = vmul.f32 %v686_v17, %v520_v18 }
 0x1ea   : > { %v522_v20 = vmul.f32 0.5, %v521_v19 }
 0x1ec   : > { %v523_v21 = vsub.f32 1.5, %v522_v20 }
 0x1ee   : > { %v524_v22 = vmul.f32 %v686_v17, %v523_v21 }
 0x1f0   : > { %v528_v24 = vsel %vm527_vm10, %v686_v17, %v524_v22 }
 0x1f1   : > { %v529_v26 = vmul.f32 %v528_v24, %v488_v56  ;;  %v530_v27 = vmul.f32 %v528_v24, %v489_v63  ;;  %v531_v28 = vmul.f32 %v528_v24, %v490_v55  ;;  %v532_v29 = vmul.f32 %v528_v24, %v491_v54 }
 0x1f3   : > { %v537_v30 = vmul.f32 %v681_v23, %v529_v26  ;;  %v538_v31 = vmul.f32 %v681_v23, %v530_v27  ;;  %v539_v32 = vmul.f32 %v681_v23, %v531_v28  ;;  %v540_v33 = vmul.f32 %v681_v23, %v532_v29 }
 0x1f5   : > { %v545_v34 = vadd.f32 %v682_v25, %v537_v30  ;;  %v546_v35 = vadd.f32 %v682_v25, %v538_v31  ;;  %v547_v36 = vadd.f32 %v682_v25, %v539_v32  ;;  %v548_v37 = vadd.f32 %v682_v25, %v540_v33 }
 0x1f7   : > { %v553_v38 = vmul.f32 0.044715, %v545_v34  ;;  %v554_v39 = vmul.f32 0.044715, %v546_v35  ;;  %v555_v40 = vmul.f32 0.044715, %v547_v36 }
 0x1f8   : > { %v556_v41 = vmul.f32 0.044715, %v548_v37  ;;  %v549_v60 = vmul.f32 0.5, %v545_v34  ;;  %v550_v63 = vmul.f32 0.5, %v546_v35  ;;  %v551_v2 = vmul.f32 0.5, %v547_v36 }
 0x1f9   : > { %v557_v42 = vmul.f32 %v553_v38, %v545_v34  ;;  %v558_v43 = vmul.f32 %v554_v39, %v546_v35  ;;  %v559_v44 = vmul.f32 %v555_v40, %v547_v36  ;;  %v552_v5 = vmul.f32 0.5, %v548_v37 }
 0x1fa   : > { %v560_v45 = vmul.f32 %v556_v41, %v548_v37 }
 0x1fb   : > { %v561_v46 = vmul.f32 %v557_v42, %v545_v34  ;;  %v562_v47 = vmul.f32 %v558_v43, %v546_v35  ;;  %v563_v48 = vmul.f32 %v559_v44, %v547_v36 }
 0x1fc   : > { %v564_v49 = vmul.f32 %v560_v45, %v548_v37 }
 0x1fd   : > { %v565_v50 = vadd.f32 %v561_v46, %v545_v34  ;;  %v566_v51 = vadd.f32 %v562_v47, %v546_v35  ;;  %v567_v52 = vadd.f32 %v563_v48, %v547_v36 }
 0x1fe   : > { %v568_v53 = vadd.f32 %v564_v49, %v548_v37 }
 0x1ff   : > { %v569_v54 = vmul.f32 0.7978846, %v565_v50  ;;  %v570_v55 = vmul.f32 0.7978846, %v566_v51  ;;  %v571_v56 = vmul.f32 0.7978846, %v567_v52 }
 0x200   : > { %v572_v57 = vmul.f32 0.7978846, %v568_v53 }
 0x201   : > { %687 = vtanh.f32 %v569_v54 }
 0x202   : > { %689 = vtanh.f32 %v570_v55 }
 0x203   : > { %691 = vtanh.f32 %v571_v56 }
 0x204   : > { %693 = vtanh.f32 %v572_v57 }
 0x207   : > { %v688_v58 = vpop.eup %687 }
 0x208   : > { %v690_v59 = vpop.eup %689  ;;  %v577_v61 = vadd.f32 1.0, %v688_v58 }
 0x209   : > { %v692_v62 = vpop.eup %691  ;;  %v578_v0 = vadd.f32 1.0, %v690_v59 }
 0x20a   : > { %v694_v1 = vpop.eup %693  ;;  %v579_v4 = vadd.f32 1.0, %v692_v62  ;;  %v581_v3 = vmul.f32 %v577_v61, %v549_v60 }
 0x20b   : > { %v580_v6 = vadd.f32 1.0, %v694_v1  ;;  %v582_v7 = vmul.f32 %v578_v0, %v550_v63 }
 0x20c   : > { %v583_v8 = vmul.f32 %v579_v4, %v551_v2  ;;  %585 = vst.msk [vmem:[%s224_s20] sm:$0xff] %vm458_vm6, %v581_v3 }
 0x20d   : > { %v584_v9 = vmul.f32 %v580_v6, %v552_v5  ;;  %586 = vst.msk [vmem:[%s224_s20 + $0x8] sm:$0xff] %vm458_vm6, %v582_v7 }
 0x20e   : > { %587 = vst.msk [vmem:[%s224_s20 + $0x10] sm:$0xff] %vm458_vm6, %v583_v8 }
 0x20f   : > { %588 = vst.msk [vmem:[%s224_s20 + $0x18] sm:$0xff] %vm458_vm6, %v584_v9 }
 0x210 PF: > { %s15_s18 = sadd.s32 1, %s701_s18  }
 0x211   : > { %p12_p4 = scmp.ge.s32.totalorder %s15_s18, 4  }
 0x213   :  { %14 = sbr.rel (!%p12_p4) target bundleno = 1 (0x1), region = 74 }

// kernel: hybrid_conv_unet.27
= control target key start
LH: loop header
LB: loop body
LE: loop exit
PB: predicated region body
PF: predicated region fallthrough
CT: control target
= control target key end

     0   :  { %s327_s9 = smov 0   ;;  %s347_s0 = inlined_call_operand.vmem [shape: f32[6,2,32], index: 0, kind: input, shape index: {}]   ;;  %s348_s1 = inlined_call_operand.vmem [shape: bf16[6,32,32], index: 1, kind: input, shape index: {}]   ;;  %s349_s2 = inlined_call_operand.vmem [shape: f32[6,2,32], index: 2, kind: output, shape index: {}]  }
   0x1 LB: > { %s271_s10 = sadd.s32 4294967295, %s310_s9   ;;  %p275_p0 = scmp.ge.s32.totalorder %s310_s9, 1  ;;  %s310_s9 = sphi %s327_s9, %s12_s9  }
   0x2   : > { %p121_p1 = scmp.lt.s32.totalorder %s310_s9, 7 }
   0x4   : > { %p122_p2 = pnand %p275_p0, %p121_p1 }
   0x5   : > { %p146_p3 = scmp.lt.s32.totalorder (!%p122_p2), %s271_s10, 5 }
   0x6   : > { %125 = sbr.rel (%p122_p2) target bundleno = 170 (0xaa), region = 28 }
   0xb   : > { %s351_s10 = smov (!%p146_p3, %s271_s10), 5  ;;  %vm178_vm0 = vcmask 261120   ;;  %vm204_vm1 = vcmask 254976  }
   0xc   : > { %s291_s11 = sshll.u32 %s351_s10, 4  ;;  %s276_s12 = sshll.u32 %s351_s10, 1 }
   0xd   : > { %s154_s15 = scalar_lea.vmem %s348_s1, %s291_s11  ;;  %s149_s18 = scalar_lea.vmem %s347_s0, %s276_s12 }
   0xe   : > { %v293_v0 = vld [vmem:[%s154_s15 + $0x8] sm:$0xff]  ;;  %v292_v1 = vld [vmem:[%s154_s15] sm:$0xff]  ;;  %s158_s21 = scalar_lea.vmem %s349_s2, %s276_s12 }
   0xf   : > { %188 = vmatpush.bf16.msra.mxu0 %v293_v0  ;;  %v160_v2 = vld [vmem:[%s149_s18] sm:$0x3] }
  0x10   : > { %v161_v3 = vpack.c.bf16 %v160_v2, %v160_v2 }
  0x13   : > { %189 = vmatpush.bf16.msra.mxu0 %v292_v1 }
  0x16   : > { %288 = vmatmul.msk.bf16.vlgmr.msra.gmra.mxu0 %vm178_vm0, %v161_v3 }
  0x93   : > { %v191_v4 = vpop.f32.mrf.mxu0 }
  0x94   : > { %v196_v5 = vmul.f32 0.044715, %v191_v4  ;;  %v195_v12 = vmul.f32 0.5, %v191_v4 }
  0x96   : > { %v197_v6 = vmul.f32 %v196_v5, %v191_v4 }
  0x98   : > { %v198_v7 = vmul.f32 %v197_v6, %v191_v4 }
  0x9a   : > { %v199_v8 = vadd.f32 %v198_v7, %v191_v4 }
  0x9b   : > { %v193_v9 = vpop.f32.mrf.mxu0 }
  0x9c   : > { %v200_v10 = vmul.f32 0.7978846, %v199_v8 }
  0x9e   : > { %302 = vtanh.f32 %v200_v10 }
  0xa4   : > { %v303_v11 = vpop.eup %302 }
  0xa5   : > { %v202_v13 = vadd.f32 1.0, %v303_v11 }
  0xa7   : > { %v203_v14 = vmul.f32 %v202_v13, %v195_v12 }
  0xa9   : > { %205 = vst.msk [vmem:[%s158_s21] sm:$0x3] %vm204_vm1, %v203_v14 }
  0xaa PF: > { %s12_s9 = sadd.s32 1, %s310_s9  }
  0xab   : > { %p9_p4 = scmp.ge.s32.totalorder %s12_s9, 8  }
  0xad   :  { %11 = sbr.rel (!%p9_p4) target bundleno = 1 (0x1), region = 61 }

// kernel: hybrid_conv_unet.28
= control target key start
LH: loop header
LB: loop body
LE: loop exit
PB: predicated region body
PF: predicated region fallthrough
CT: control target
= control target key end

     0   :  { %vm45_vm0 = vcmask 1042432   ;;  %vm32_vm1 = vcmask 48128   ;;  %s184_s1 = inlined_call_operand.vmem [shape: bf16[6,6], index: 1, kind: input, shape index: {}]   ;;  %s185_s0 = inlined_call_operand.vmem [shape: f32[64,6], index: 0, kind: input, shape index: {}]   ;;  %s186_s2 = inlined_call_operand.vmem [shape: f32[1,6], index: 2, kind: input, shape index: {}]   ;;  %s187_s3 = inlined_call_operand.vmem [shape: f32[64,6], index: 3, kind: output, shape index: {}]  }
   0x1   :  { %v27_v0 = vld [vmem:[%s184_s1] sm:$0x7]  ;;  %v16_v2 = vld [vmem:[%s185_s0 + $0x8] sm:$0xff]  ;;  %v17_v5 = vld [vmem:[%s185_s0 + $0x10] sm:$0xff] }
   0x2   :  { %v15_v1 = vld [vmem:[%s185_s0] sm:$0xff]  ;;  %v47_v3 = vsel %vm45_vm0, %v27_v0, 0  ;;  %v18_v6 = vld [vmem:[%s185_s0 + $0x18] sm:$0xff]  ;;  %v20_v9 = vld [vmem:[%s185_s0 + $0x28] sm:$0xff] }
   0x3   :  { %v23_v4 = vpack.c.bf16 %v16_v2, %v15_v1  ;;  %v19_v7 = vld [vmem:[%s185_s0 + $0x20] sm:$0xff]  ;;  %56 = vmatpush.bf16.msra.mxu0 %v47_v3  ;;  %94 = vmatpush.bf16.msra.mxu1 %v47_v3  ;;  %v24_v8 = vpack.c.bf16 %v18_v6, %v17_v5  ;;  %v21_v10 = vld [vmem:[%s185_s0 + $0x30] sm:$0xff]  ;;  %v22_v11 = vld [vmem:[%s185_s0 + $0x38] sm:$0xff] }
   0x4   :  { %95 = vmatpush.bf16.msra.mxu2 %v47_v3  ;;  %96 = vmatpush.bf16.msra.mxu3 %v47_v3  ;;  %v25_v12 = vpack.c.bf16 %v20_v9, %v19_v7  ;;  %v26_v13 = vpack.c.bf16 %v22_v11, %v21_v10  ;;  %v97_v14 = vld [vmem:[%s186_s2] ss:$0 sm:$0xff] }
   0x6   :  { %90 = vmatmul.msk.bf16.vlgmr.msra.gmra.mxu0 %vm32_vm1, %v23_v4  ;;  %91 = vmatmul.msk.bf16.vlgmr.msra.gmra.mxu1 %vm32_vm1, %v24_v8 }
   0x7   :  { %92 = vmatmul.msk.bf16.vlgmr.msra.gmra.mxu2 %vm32_vm1, %v25_v12  ;;  %93 = vmatmul.msk.bf16.vlgmr.msra.gmra.mxu3 %vm32_vm1, %v26_v13 }
  0x83   :  { %v58_v15 = vpop.f32.mrf.mxu0  ;;  %v63_v16 = vpop.f32.mrf.mxu1 }
  0x84   :  { %v59_v17 = vadd.f32 %v97_v14, %v58_v15  ;;  %v64_v18 = vadd.f32 %v97_v14, %v63_v16 }
  0x86   :  { %78 = vst.msk [vmem:[%s187_s3] sm:$0xff] %vm32_vm1, %v59_v17 }
  0x87   :  { %80 = vst.msk [vmem:[%s187_s3 + $0x10] sm:$0xff] %vm32_vm1, %v64_v18 }
  0x8a   :  { %v68_v19 = vpop.f32.mrf.mxu2  ;;  %v73_v20 = vpop.f32.mrf.mxu3 }
  0x8b   :  { %v69_v21 = vadd.f32 %v97_v14, %v68_v19  ;;  %v74_v22 = vadd.f32 %v97_v14, %v73_v20  ;;  %v60_v23 = vpop.f32.mrf.mxu0  ;;  %v65_v24 = vpop.f32.mrf.mxu1 }
  0x8c   :  { %v61_v25 = vadd.f32 %v97_v14, %v60_v23  ;;  %v66_v26 = vadd.f32 %v97_v14, %v65_v24 }
  0x8d   :  { %82 = vst.msk [vmem:[%s187_s3 + $0x20] sm:$0xff] %vm32_vm1, %v69_v21 }
  0x8e   :  { %84 = vst.msk [vmem:[%s187_s3 + $0x30] sm:$0xff] %vm32_vm1, %v74_v22 }
  0x8f   :  { %79 = vst.msk [vmem:[%s187_s3 + $0x8] sm:$0xff] %vm32_vm1, %v61_v25 }
  0x90   :  { %81 = vst.msk [vmem:[%s187_s3 + $0x18] sm:$0xff] %vm32_vm1, %v66_v26 }
  0x92   :  { %v70_v27 = vpop.f32.mrf.mxu2  ;;  %v75_v28 = vpop.f32.mrf.mxu3 }
  0x93   :  { %v71_v29 = vadd.f32 %v97_v14, %v70_v27  ;;  %v76_v30 = vadd.f32 %v97_v14, %v75_v28 }
  0x95   :  { %83 = vst.msk [vmem:[%s187_s3 + $0x28] sm:$0xff] %vm32_vm1, %v71_v29 }
  0x96   :  { %85 = vst.msk [vmem:[%s187_s3 + $0x38] sm:$0xff] %vm32_vm1, %v76_v30 }

// kernel: hybrid_conv_unet.29
= control target key start
LH: loop header
LB: loop body
LE: loop exit
PB: predicated region body
PF: predicated region fallthrough
CT: control target
= control target key end

     0   :  { %vm45_vm0 = vcmask 1042432   ;;  %vm32_vm1 = vcmask 48128   ;;  %s293_s1 = inlined_call_operand.vmem [shape: bf16[6,6], index: 1, kind: input, shape index: {}]   ;;  %s294_s0 = inlined_call_operand.vmem [shape: f32[64,6], index: 0, kind: input, shape index: {}]   ;;  %s295_s2 = inlined_call_operand.vmem [shape: f32[1,6], index: 2, kind: input, shape index: {}]   ;;  %s296_s3 = inlined_call_operand.vmem [shape: f32[64,6], index: 3, kind: output, shape index: {}]  }
   0x1   :  { %v27_v0 = vld [vmem:[%s293_s1] sm:$0x7]  ;;  %v16_v2 = vld [vmem:[%s294_s0 + $0x8] sm:$0xff]  ;;  %v17_v5 = vld [vmem:[%s294_s0 + $0x10] sm:$0xff] }
   0x2   :  { %v15_v1 = vld [vmem:[%s294_s0] sm:$0xff]  ;;  %v47_v3 = vsel %vm45_vm0, %v27_v0, 0  ;;  %v18_v6 = vld [vmem:[%s294_s0 + $0x18] sm:$0xff]  ;;  %v20_v9 = vld [vmem:[%s294_s0 + $0x28] sm:$0xff] }
   0x3   :  { %v23_v4 = vpack.c.bf16 %v16_v2, %v15_v1  ;;  %v19_v7 = vld [vmem:[%s294_s0 + $0x20] sm:$0xff]  ;;  %56 = vmatpush.bf16.msra.mxu0 %v47_v3  ;;  %166 = vmatpush.bf16.msra.mxu1 %v47_v3  ;;  %v24_v8 = vpack.c.bf16 %v18_v6, %v17_v5  ;;  %v21_v10 = vld [vmem:[%s294_s0 + $0x30] sm:$0xff]  ;;  %v22_v11 = vld [vmem:[%s294_s0 + $0x38] sm:$0xff] }
   0x4   :  { %167 = vmatpush.bf16.msra.mxu2 %v47_v3  ;;  %168 = vmatpush.bf16.msra.mxu3 %v47_v3  ;;  %v25_v12 = vpack.c.bf16 %v20_v9, %v19_v7  ;;  %v26_v13 = vpack.c.bf16 %v22_v11, %v21_v10  ;;  %v169_v14 = vld [vmem:[%s295_s2] ss:$0 sm:$0xff] }
   0x6   :  { %162 = vmatmul.msk.bf16.vlgmr.msra.gmra.mxu0 %vm32_vm1, %v23_v4  ;;  %163 = vmatmul.msk.bf16.vlgmr.msra.gmra.mxu1 %vm32_vm1, %v24_v8 }
   0x7   :  { %164 = vmatmul.msk.bf16.vlgmr.msra.gmra.mxu2 %vm32_vm1, %v25_v12  ;;  %165 = vmatmul.msk.bf16.vlgmr.msra.gmra.mxu3 %vm32_vm1, %v26_v13 }
  0x83   :  { %v58_v15 = vpop.f32.mrf.mxu0  ;;  %v63_v16 = vpop.f32.mrf.mxu1 }
  0x84   :  { %v59_v17 = vadd.f32 %v169_v14, %v58_v15  ;;  %v64_v18 = vadd.f32 %v169_v14, %v63_v16 }
  0x86   :  { %v86_v19 = vmul.f32 0.044715, %v59_v17  ;;  %v88_v20 = vmul.f32 0.044715, %v64_v18  ;;  %v78_v59 = vmul.f32 0.5, %v59_v17  ;;  %v80_v1 = vmul.f32 0.5, %v64_v18 }
  0x88   :  { %v94_v21 = vmul.f32 %v86_v19, %v59_v17  ;;  %v96_v22 = vmul.f32 %v88_v20, %v64_v18 }
  0x8a   :  { %v102_v23 = vmul.f32 %v94_v21, %v59_v17  ;;  %v104_v24 = vmul.f32 %v96_v22, %v64_v18  ;;  %v68_v25 = vpop.f32.mrf.mxu2  ;;  %v73_v26 = vpop.f32.mrf.mxu3 }
  0x8b   :  { %v69_v27 = vadd.f32 %v169_v14, %v68_v25  ;;  %v240_v28 = vadd.f32 %v169_v14, %v73_v26  ;;  %v60_v29 = vpop.f32.mrf.mxu0  ;;  %v65_v30 = vpop.f32.mrf.mxu1 }
  0x8c   :  { %v110_v31 = vadd.f32 %v102_v23, %v59_v17  ;;  %v112_v32 = vadd.f32 %v104_v24, %v64_v18  ;;  %v242_v33 = vadd.f32 %v169_v14, %v60_v29  ;;  %v244_v34 = vadd.f32 %v169_v14, %v65_v30 }
  0x8d   :  { %v90_v35 = vmul.f32 0.044715, %v69_v27  ;;  %v92_v36 = vmul.f32 0.044715, %v240_v28  ;;  %v82_v15 = vmul.f32 0.5, %v69_v27  ;;  %v84_v19 = vmul.f32 0.5, %v240_v28 }
  0x8e   :  { %v118_v37 = vmul.f32 0.7978846, %v110_v31  ;;  %v120_v38 = vmul.f32 0.7978846, %v112_v32  ;;  %v87_v41 = vmul.f32 0.044715, %v242_v33 }
  0x8f   :  { %v98_v39 = vmul.f32 %v90_v35, %v69_v27  ;;  %v100_v40 = vmul.f32 %v92_v36, %v240_v28  ;;  %v89_v42 = vmul.f32 0.044715, %v244_v34  ;;  %v79_v24 = vmul.f32 0.5, %v242_v33 }
  0x90   :  { %170 = vtanh.f32 %v118_v37  ;;  %v95_v45 = vmul.f32 %v87_v41, %v242_v33  ;;  %v81_v29 = vmul.f32 0.5, %v244_v34 }
  0x91   :  { %172 = vtanh.f32 %v120_v38  ;;  %v106_v43 = vmul.f32 %v98_v39, %v69_v27  ;;  %v108_v44 = vmul.f32 %v100_v40, %v240_v28  ;;  %v97_v46 = vmul.f32 %v89_v42, %v244_v34 }
  0x92   :  { %v70_v47 = vpop.f32.mrf.mxu2  ;;  %v75_v48 = vpop.f32.mrf.mxu3  ;;  %v103_v51 = vmul.f32 %v95_v45, %v242_v33 }
  0x93   :  { %v114_v49 = vadd.f32 %v106_v43, %v69_v27  ;;  %v116_v50 = vadd.f32 %v108_v44, %v240_v28  ;;  %v71_v52 = vadd.f32 %v169_v14, %v70_v47  ;;  %v105_v53 = vmul.f32 %v97_v46, %v244_v34 }
  0x94   :  { %v76_v54 = vadd.f32 %v169_v14, %v75_v48  ;;  %v111_v57 = vadd.f32 %v103_v51, %v242_v33 }
  0x95   :  { %v122_v55 = vmul.f32 0.7978846, %v114_v49  ;;  %v124_v56 = vmul.f32 0.7978846, %v116_v50  ;;  %v113_v60 = vadd.f32 %v105_v53, %v244_v34  ;;  %v91_v61 = vmul.f32 0.044715, %v71_v52 }
  0x96   :  { %v171_v58 = vpop.eup %170  ;;  %v93_v62 = vmul.f32 0.044715, %v76_v54  ;;  %v119_v2 = vmul.f32 0.7978846, %v111_v57  ;;  %v83_v33 = vmul.f32 0.5, %v71_v52  ;;  %v85_v35 = vmul.f32 0.5, %v76_v54 }
  0x97   :  { %v173_v63 = vpop.eup %172  ;;  %v134_v0 = vadd.f32 1.0, %v171_v58  ;;  %174 = vtanh.f32 %v122_v55  ;;  %v121_v4 = vmul.f32 0.7978846, %v113_v60  ;;  %v99_v5 = vmul.f32 %v91_v61, %v71_v52 }
  0x98   :  { %v136_v3 = vadd.f32 1.0, %v173_v63  ;;  %176 = vtanh.f32 %v124_v56  ;;  %v101_v7 = vmul.f32 %v93_v62, %v76_v54 }
  0x99   :  { %v142_v6 = vmul.f32 %v134_v0, %v78_v59  ;;  %178 = vtanh.f32 %v119_v2  ;;  %v107_v9 = vmul.f32 %v99_v5, %v71_v52 }
  0x9a   :  { %v144_v8 = vmul.f32 %v136_v3, %v80_v1  ;;  %180 = vtanh.f32 %v121_v4  ;;  %v109_v10 = vmul.f32 %v101_v7, %v76_v54 }
  0x9b   :  { %150 = vst.msk [vmem:[%s296_s3] sm:$0xff] %vm32_vm1, %v142_v6  ;;  %v115_v11 = vadd.f32 %v107_v9, %v71_v52 }
  0x9c   :  { %152 = vst.msk [vmem:[%s296_s3 + $0x10] sm:$0xff] %vm32_vm1, %v144_v8  ;;  %v117_v13 = vadd.f32 %v109_v10, %v76_v54 }
  0x9d   :  { %v175_v12 = vpop.eup %174  ;;  %v123_v17 = vmul.f32 0.7978846, %v115_v11 }
  0x9e   :  { %v177_v14 = vpop.eup %176  ;;  %v138_v16 = vadd.f32 1.0, %v175_v12  ;;  %v125_v21 = vmul.f32 0.7978846, %v117_v13 }
  0x9f   :  { %v179_v18 = vpop.eup %178  ;;  %v140_v20 = vadd.f32 1.0, %v177_v14  ;;  %182 = vtanh.f32 %v123_v17 }
  0xa0   :  { %v181_v22 = vpop.eup %180  ;;  %v146_v23 = vmul.f32 %v138_v16, %v82_v15  ;;  %v135_v25 = vadd.f32 1.0, %v179_v18  ;;  %184 = vtanh.f32 %v125_v21 }
  0xa1   :  { %v148_v26 = vmul.f32 %v140_v20, %v84_v19  ;;  %v137_v30 = vadd.f32 1.0, %v181_v22 }
  0xa2   :  { %154 = vst.msk [vmem:[%s296_s3 + $0x20] sm:$0xff] %vm32_vm1, %v146_v23  ;;  %v143_v27 = vmul.f32 %v135_v25, %v79_v24 }
  0xa3   :  { %156 = vst.msk [vmem:[%s296_s3 + $0x30] sm:$0xff] %vm32_vm1, %v148_v26  ;;  %v145_v28 = vmul.f32 %v137_v30, %v81_v29 }
  0xa4   :  { %151 = vst.msk [vmem:[%s296_s3 + $0x8] sm:$0xff] %vm32_vm1, %v143_v27 }
  0xa5   :  { %153 = vst.msk [vmem:[%s296_s3 + $0x18] sm:$0xff] %vm32_vm1, %v145_v28  ;;  %v183_v31 = vpop.eup %182 }
  0xa6   :  { %v185_v32 = vpop.eup %184  ;;  %v139_v34 = vadd.f32 1.0, %v183_v31 }
  0xa7   :  { %v141_v36 = vadd.f32 1.0, %v185_v32 }
  0xa8   :  { %v147_v37 = vmul.f32 %v139_v34, %v83_v33 }
  0xa9   :  { %v149_v38 = vmul.f32 %v141_v36, %v85_v35 }
  0xaa   :  { %155 = vst.msk [vmem:[%s296_s3 + $0x28] sm:$0xff] %vm32_vm1, %v147_v37 }
  0xab   :  { %157 = vst.msk [vmem:[%s296_s3 + $0x38] sm:$0xff] %vm32_vm1, %v149_v38 }

// kernel: hybrid_conv_unet.30
= control target key start
LH: loop header
LB: loop body
LE: loop exit
PB: predicated region body
PF: predicated region fallthrough
CT: control target
= control target key end

     0   :  { %vm41_vm0 = vcmask 48128   ;;  %v282_v32 = vmov 6.0   ;;  %s523_s0 = inlined_call_operand.vmem [shape: f32[64,6], index: 0, kind: input, shape index: {}]   ;;  %s524_s1 = inlined_call_operand.vmem [shape: f32[64,6], index: 1, kind: input, shape index: {}]   ;;  %s525_s2 = inlined_call_operand.vmem [shape: f32[1,6], index: 2, kind: input, shape index: {}]   ;;  %s526_s3 = inlined_call_operand.vmem [shape: f32[1,6], index: 3, kind: input, shape index: {}]   ;;  %s527_s4 = inlined_call_operand.vmem [shape: f32[64,6], index: 4, kind: output, shape index: {}]  }
   0x1   :  { %v21_v0 = vld [vmem:[%s523_s0 + $0x20] sm:$0xff]  ;;  %v19_v2 = vld [vmem:[%s523_s0 + $0x10] sm:$0xff]  ;;  %v22_v9 = vld [vmem:[%s523_s0 + $0x28] sm:$0xff]  ;;  %264 = vrcp.f32 %v282_v32 }
   0x2   :  { %v29_v1 = vld [vmem:[%s524_s1 + $0x20] sm:$0xff]  ;;  %v27_v4 = vld [vmem:[%s524_s1 + $0x10] sm:$0xff]  ;;  %v30_v10 = vld [vmem:[%s524_s1 + $0x28] sm:$0xff] }
   0x3   :  { %v317_v3 = vadd.f32 %v29_v1, %v21_v0  ;;  %v17_v5 = vld [vmem:[%s523_s0] sm:$0xff]  ;;  %v35_v7 = vadd.f32 %v27_v4, %v19_v2  ;;  %v20_v11 = vld [vmem:[%s523_s0 + $0x18] sm:$0xff]  ;;  %v18_v14 = vld [vmem:[%s523_s0 + $0x8] sm:$0xff]  ;;  %v38_v18 = vadd.f32 %v30_v10, %v22_v9 }
   0x4   :  { %v25_v6 = vld [vmem:[%s524_s1] sm:$0xff]  ;;  %v28_v13 = vld [vmem:[%s524_s1 + $0x18] sm:$0xff]  ;;  %v26_v15 = vld [vmem:[%s524_s1 + $0x8] sm:$0xff] }
   0x5   :  { %v33_v8 = vadd.f32 %v25_v6, %v17_v5  ;;  %v54_v12 = vsel %vm41_vm0, %v317_v3, 0.0  ;;  %v48_v16 = vsel %vm41_vm0, %v35_v7, 0.0  ;;  %v36_v19 = vadd.f32 %v28_v13, %v20_v11  ;;  %v23_v24 = vld [vmem:[%s523_s0 + $0x30] sm:$0xff]  ;;  %v24_v26 = vld [vmem:[%s523_s0 + $0x38] sm:$0xff] }
   0x6   :  { %55 = vadd.xlane.f32.xlu2 %v54_v12  ;;  %49 = vadd.xlane.f32.xlu1 %v48_v16  ;;  %v34_v20 = vadd.f32 %v26_v15, %v18_v14  ;;  %v57_v21 = vsel %vm41_vm0, %v38_v18, 0.0  ;;  %v31_v25 = vld [vmem:[%s524_s1 + $0x30] sm:$0xff]  ;;  %v32_v27 = vld [vmem:[%s524_s1 + $0x38] sm:$0xff] }
   0x7   :  { %v42_v17 = vsel %vm41_vm0, %v33_v8, 0.0  ;;  %v51_v22 = vsel %vm41_vm0, %v36_v19, 0.0  ;;  %v39_v28 = vadd.f32 %v31_v25, %v23_v24  ;;  %v40_v29 = vadd.f32 %v32_v27, %v24_v26  ;;  %v265_v33 = vpop.eup %264 }
   0x8   :  { %43 = vadd.xlane.f32.xlu0 %v42_v17  ;;  %v45_v23 = vsel %vm41_vm0, %v34_v20, 0.0  ;;  %v67_v34 = vmul.f32 6.0, %v265_v33  ;;  %vm71_vm1 = vweird.f32 %v265_v33 }
   0x9   :  { %v60_v30 = vsel %vm41_vm0, %v39_v28, 0.0  ;;  %v63_v31 = vsel %vm41_vm0, %v40_v29, 0.0 }
   0xa   :  { %v68_v35 = vsub.f32 1.0, %v67_v34 }
   0xc   :  { %v69_v36 = vmul.f32 %v265_v33, %v68_v35 }
   0xe   :  { %58 = vadd.xlane.f32.xlu2 %v57_v21  ;;  %52 = vadd.xlane.f32.xlu1 %v51_v22  ;;  %v70_v37 = vadd.f32 %v265_v33, %v69_v36 }
  0x10   :  { %46 = vadd.xlane.f32.xlu0 %v45_v23  ;;  %v367_v38 = vsel %vm71_vm1, %v265_v33, %v70_v37 }
  0x16   :  { %64 = vadd.xlane.f32.xlu1 %v63_v31 }
  0x18   :  { %61 = vadd.xlane.f32.xlu0 %v60_v30 }
  0x79   :  { %v56_v39 = vpop.xlane.xlu2 %55  ;;  %v50_v40 = vpop.xlane.xlu1 %49 }
  0x7a   :  { %v75_v42 = vmul.f32 %v367_v38, %v50_v40  ;;  %v77_v56 = vmul.f32 %v367_v38, %v56_v39 }
  0x7b   :  { %v44_v41 = vpop.xlane.xlu0 %43 }
  0x7c   :  { %v73_v43 = vmul.f32 %v367_v38, %v44_v41  ;;  %v371_v44 = vsub.f32 %v35_v7, %v75_v42  ;;  %v398_v63 = vsub.f32 %v317_v3, %v77_v56 }
  0x7e   :  { %v373_v45 = vsub.f32 %v33_v8, %v73_v43  ;;  %v91_v46 = vmul.f32 %v371_v44, %v371_v44  ;;  %v93_v8 = vmul.f32 %v398_v63, %v398_v63 }
  0x80   :  { %v89_v47 = vmul.f32 %v373_v45, %v373_v45  ;;  %v103_v49 = vsel %vm41_vm0, %v91_v46, 0.0  ;;  %v109_v11 = vsel %vm41_vm0, %v93_v8, 0.0 }
  0x81   :  { %v59_v48 = vpop.xlane.xlu2 %58  ;;  %104 = vadd.xlane.f32.xlu1 %v103_v49  ;;  %v53_v52 = vpop.xlane.xlu1 %52 }
  0x82   :  { %v97_v50 = vsel %vm41_vm0, %v89_v47, 0.0  ;;  %v78_v51 = vmul.f32 %v367_v38, %v59_v48  ;;  %v76_v54 = vmul.f32 %v367_v38, %v53_v52 }
  0x83   :  { %98 = vadd.xlane.f32.xlu2 %v97_v50  ;;  %v47_v53 = vpop.xlane.xlu0 %46 }
  0x84   :  { %v74_v55 = vmul.f32 %v367_v38, %v47_v53  ;;  %v385_v57 = vsub.f32 %v38_v18, %v78_v51  ;;  %v387_v58 = vsub.f32 %v36_v19, %v76_v54  ;;  %v438_v54 = vld [vmem:[%s525_s2] ss:$0 sm:$0xff] }
  0x86   :  { %v389_v59 = vsub.f32 %v34_v20, %v74_v55  ;;  %v94_v60 = vmul.f32 %v385_v57, %v385_v57  ;;  %v92_v61 = vmul.f32 %v387_v58, %v387_v58 }
  0x88   :  { %v90_v62 = vmul.f32 %v389_v59, %v389_v59  ;;  %v112_v0 = vsel %vm41_vm0, %v94_v60, 0.0  ;;  %v106_v1 = vsel %vm41_vm0, %v92_v61, 0.0 }
  0x89   :  { %113 = vadd.xlane.f32.xlu1 %v112_v0  ;;  %v65_v5 = vpop.xlane.xlu1 %64  ;;  %v446_v0 = vld [vmem:[%s526_s3] ss:$0 sm:$0xff] }
  0x8a   :  { %v100_v2 = vsel %vm41_vm0, %v90_v62, 0.0  ;;  %v80_v7 = vmul.f32 %v367_v38, %v65_v5 }
  0x8b   :  { %107 = vadd.xlane.f32.xlu2 %v106_v1  ;;  %v62_v4 = vpop.xlane.xlu0 %61  ;;  %101 = vadd.xlane.f32.xlu0 %v100_v2 }
  0x8c   :  { %v79_v6 = vmul.f32 %v367_v38, %v62_v4  ;;  %v411_v10 = vsub.f32 %v40_v29, %v80_v7 }
  0x8e   :  { %v407_v3 = vsub.f32 %v39_v28, %v79_v6  ;;  %v96_v13 = vmul.f32 %v411_v10, %v411_v10 }
  0x90   :  { %v95_v9 = vmul.f32 %v407_v3, %v407_v3  ;;  %v118_v14 = vsel %vm41_vm0, %v96_v13, 0.0 }
  0x92   :  { %v115_v12 = vsel %vm41_vm0, %v95_v9, 0.0 }
  0x93   :  { %116 = vadd.xlane.f32.xlu2 %v115_v12  ;;  %110 = vadd.xlane.f32.xlu0 %v109_v11 }
  0x9b   :  { %119 = vadd.xlane.f32.xlu0 %v118_v14 }
  0xf4   :  { %v105_v15 = vpop.xlane.xlu1 %104 }
  0xf5   :  { %v123_v17 = vmul.f32 %v105_v15, %v367_v38 }
  0xf6   :  { %v99_v16 = vpop.xlane.xlu2 %98 }
  0xf7   :  { %v121_v18 = vmul.f32 %v99_v16, %v367_v38  ;;  %v131_v19 = vadd.f32 1e-05, %v123_v17 }
  0xf9   :  { %v129_v20 = vadd.f32 1e-05, %v121_v18  ;;  %266 = vrsqrt.f32 %v131_v19  ;;  %vm163_vm2 = vweird.f32 %v131_v19 }
  0xfb   :  { %268 = vrsqrt.f32 %v129_v20  ;;  %vm143_vm6 = vweird.f32 %v129_v20 }
  0xfc   :  { %v114_v21 = vpop.xlane.xlu1 %113 }
  0xfd   :  { %v126_v23 = vmul.f32 %v114_v21, %v367_v38 }
  0xfe   :  { %v108_v22 = vpop.xlane.xlu2 %107  ;;  %v102_v25 = vpop.xlane.xlu0 %101 }
  0xff   :  { %v124_v24 = vmul.f32 %v108_v22, %v367_v38  ;;  %v122_v26 = vmul.f32 %v102_v25, %v367_v38  ;;  %v267_v27 = vpop.eup %266  ;;  %v134_v28 = vadd.f32 1e-05, %v126_v23 }
 0x100   :  { %v158_v31 = vmul.f32 %v267_v27, %v131_v19  ;;  %vm164_vm3 = vweird.f32 %v267_v27 }
 0x101   :  { %v423_v29 = vadd.f32 1e-05, %v124_v24  ;;  %v269_v30 = vpop.eup %268  ;;  %v425_v32 = vadd.f32 1e-05, %v122_v26  ;;  %270 = vrsqrt.f32 %v134_v28  ;;  %vm165_vm5 = vmor %vm163_vm2, %vm164_vm3  ;;  %vm193_vm8 = vweird.f32 %v134_v28 }
 0x102   :  { %v138_v33 = vmul.f32 %v269_v30, %v129_v20  ;;  %v159_v34 = vmul.f32 %v267_v27, %v158_v31  ;;  %vm144_vm4 = vweird.f32 %v269_v30 }
 0x103   :  { %272 = vrsqrt.f32 %v423_v29  ;;  %vm145_vm7 = vmor %vm143_vm6, %vm144_vm4  ;;  %vm173_vm10 = vweird.f32 %v423_v29  ;;  %vm153_vm15 = vweird.f32 %v425_v32 }
 0x104   :  { %v139_v35 = vmul.f32 %v269_v30, %v138_v33  ;;  %274 = vrsqrt.f32 %v425_v32  ;;  %v160_v36 = vmul.f32 0.5, %v159_v34 }
 0x106   :  { %v117_v37 = vpop.xlane.xlu2 %116  ;;  %v140_v39 = vmul.f32 0.5, %v139_v35  ;;  %v111_v41 = vpop.xlane.xlu0 %110  ;;  %v161_v42 = vsub.f32 1.5, %v160_v36 }
 0x107   :  { %v127_v40 = vmul.f32 %v117_v37, %v367_v38  ;;  %v125_v43 = vmul.f32 %v111_v41, %v367_v38  ;;  %v271_v46 = vpop.eup %270 }
 0x108   :  { %v141_v47 = vsub.f32 1.5, %v140_v39  ;;  %v162_v50 = vmul.f32 %v267_v27, %v161_v42  ;;  %v188_v51 = vmul.f32 %v271_v46, %v134_v28  ;;  %vm194_vm9 = vweird.f32 %v271_v46 }
 0x109   :  { %v431_v48 = vadd.f32 1e-05, %v127_v40  ;;  %v273_v49 = vpop.eup %272  ;;  %v433_v52 = vadd.f32 1e-05, %v125_v43  ;;  %vm458_vm11 = vmor %vm193_vm8, %vm194_vm9 }
 0x10a   :  { %v275_v53 = vpop.eup %274  ;;  %v142_v55 = vmul.f32 %v269_v30, %v141_v47  ;;  %v168_v56 = vmul.f32 %v273_v49, %v423_v29  ;;  %v166_v60 = vsel %vm165_vm5, %v267_v27, %v162_v50  ;;  %v189_v61 = vmul.f32 %v271_v46, %v188_v51 }
 0x10b   :  { %276 = vrsqrt.f32 %v431_v48  ;;  %v148_v62 = vmul.f32 %v275_v53, %v425_v32  ;;  %v219_v1 = vmul.f32 %v166_v60, %v371_v44  ;;  %vm174_vm12 = vweird.f32 %v273_v49 }
 0x10c   :  { %v146_v2 = vsel %vm145_vm7, %v269_v30, %v142_v55  ;;  %v169_v4 = vmul.f32 %v273_v49, %v168_v56  ;;  %v190_v6 = vmul.f32 0.5, %v189_v61  ;;  %278 = vrsqrt.f32 %v433_v52  ;;  %vm175_vm14 = vmor %vm173_vm10, %vm174_vm12 }
 0x10d   :  { %v217_v5 = vmul.f32 %v146_v2, %v373_v45  ;;  %v149_v7 = vmul.f32 %v275_v53, %v148_v62  ;;  %v231_v8 = vmul.f32 %v438_v54, %v219_v1  ;;  %vm154_vm13 = vweird.f32 %v275_v53 }
 0x10e   :  { %v170_v9 = vmul.f32 0.5, %v169_v4  ;;  %v120_v11 = vpop.xlane.xlu0 %119  ;;  %v191_v13 = vsub.f32 1.5, %v190_v6  ;;  %vm155_vm1 = vmor %vm153_vm15, %vm154_vm13  ;;  %vm203_vm2 = vweird.f32 %v431_v48  ;;  %vm183_vm6 = vweird.f32 %v433_v52 }
 0x10f   :  { %v229_v12 = vmul.f32 %v438_v54, %v217_v5  ;;  %v150_v14 = vmul.f32 0.5, %v149_v7  ;;  %v128_v44 = vmul.f32 %v120_v11, %v367_v38  ;;  %v243_v16 = vadd.f32 %v446_v0, %v231_v8 }
 0x110   :  { %v171_v17 = vsub.f32 1.5, %v170_v9  ;;  %v192_v19 = vmul.f32 %v271_v46, %v191_v13 }
 0x111   :  { %v277_v15 = vpop.eup %276  ;;  %v241_v18 = vadd.f32 %v446_v0, %v229_v12  ;;  %v151_v20 = vsub.f32 1.5, %v150_v14  ;;  %251 = vst.msk [vmem:[%s527_s4 + $0x10] sm:$0xff] %vm41_vm0, %v243_v16  ;;  %v136_v22 = vadd.f32 1e-05, %v128_v44 }
 0x112   :  { %v198_v21 = vmul.f32 %v277_v15, %v431_v48  ;;  %v172_v38 = vmul.f32 %v273_v49, %v171_v17  ;;  %v279_v23 = vpop.eup %278  ;;  %v196_v24 = vsel %vm458_vm11, %v271_v46, %v192_v19  ;;  %vm204_vm3 = vweird.f32 %v277_v15 }
 0x113   :  { %249 = vst.msk [vmem:[%s527_s4] sm:$0xff] %vm41_vm0, %v241_v18  ;;  %v152_v25 = vmul.f32 %v275_v53, %v151_v20  ;;  %v222_v27 = vmul.f32 %v196_v24, %v385_v57  ;;  %v178_v30 = vmul.f32 %v279_v23, %v433_v52  ;;  %280 = vrsqrt.f32 %v136_v22  ;;  %vm205_vm4 = vmor %vm203_vm2, %vm204_vm3 }
 0x114   :  { %v199_v26 = vmul.f32 %v277_v15, %v198_v21  ;;  %v176_v28 = vsel %vm175_vm14, %v273_v49, %v172_v38  ;;  %vm184_vm5 = vweird.f32 %v279_v23  ;;  %vm213_vm9 = vweird.f32 %v136_v22 }
 0x115   :  { %v220_v31 = vmul.f32 %v176_v28, %v387_v58  ;;  %v156_v33 = vsel %vm155_vm1, %v275_v53, %v152_v25  ;;  %v234_v35 = vmul.f32 %v438_v54, %v222_v27  ;;  %v179_v36 = vmul.f32 %v279_v23, %v178_v30  ;;  %vm185_vm7 = vmor %vm183_vm6, %vm184_vm5 }
 0x116   :  { %v200_v34 = vmul.f32 0.5, %v199_v26  ;;  %v218_v29 = vmul.f32 %v156_v33, %v389_v59 }
 0x117   :  { %v232_v32 = vmul.f32 %v438_v54, %v220_v31  ;;  %v246_v57 = vadd.f32 %v446_v0, %v234_v35  ;;  %v180_v40 = vmul.f32 0.5, %v179_v36 }
 0x118   :  { %v201_v37 = vsub.f32 1.5, %v200_v34  ;;  %v230_v39 = vmul.f32 %v438_v54, %v218_v29 }
 0x119   :  { %v244_v58 = vadd.f32 %v446_v0, %v232_v32  ;;  %254 = vst.msk [vmem:[%s527_s4 + $0x28] sm:$0xff] %vm41_vm0, %v246_v57  ;;  %v181_v42 = vsub.f32 1.5, %v180_v40  ;;  %v281_v43 = vpop.eup %280 }
 0x11a   :  { %v202_v41 = vmul.f32 %v277_v15, %v201_v37  ;;  %v242_v59 = vadd.f32 %v446_v0, %v230_v39  ;;  %v208_v49 = vmul.f32 %v281_v43, %v136_v22  ;;  %vm214_vm8 = vweird.f32 %v281_v43 }
 0x11b   :  { %252 = vst.msk [vmem:[%s527_s4 + $0x18] sm:$0xff] %vm41_vm0, %v244_v58  ;;  %v182_v48 = vmul.f32 %v279_v23, %v181_v42  ;;  %vm215_vm10 = vmor %vm213_vm9, %vm214_vm8 }
 0x11c   :  { %v206_v46 = vsel %vm205_vm4, %v277_v15, %v202_v41  ;;  %250 = vst.msk [vmem:[%s527_s4 + $0x8] sm:$0xff] %vm41_vm0, %v242_v59  ;;  %v209_v53 = vmul.f32 %v281_v43, %v208_v49 }
 0x11d   :  { %v223_v47 = vmul.f32 %v206_v46, %v407_v3  ;;  %v186_v51 = vsel %vm185_vm7, %v279_v23, %v182_v48 }
 0x11e   :  { %v221_v55 = vmul.f32 %v186_v51, %v398_v63  ;;  %v210_v60 = vmul.f32 0.5, %v209_v53 }
 0x11f   :  { %v235_v50 = vmul.f32 %v438_v54, %v223_v47 }
 0x120   :  { %v233_v61 = vmul.f32 %v438_v54, %v221_v55  ;;  %v211_v3 = vsub.f32 1.5, %v210_v60 }
 0x121   :  { %v247_v56 = vadd.f32 %v446_v0, %v235_v50 }
 0x122   :  { %v245_v52 = vadd.f32 %v446_v0, %v233_v61  ;;  %v212_v62 = vmul.f32 %v281_v43, %v211_v3 }
 0x123   :  { %255 = vst.msk [vmem:[%s527_s4 + $0x30] sm:$0xff] %vm41_vm0, %v247_v56 }
 0x124   :  { %253 = vst.msk [vmem:[%s527_s4 + $0x20] sm:$0xff] %vm41_vm0, %v245_v52  ;;  %v216_v63 = vsel %vm215_vm10, %v281_v43, %v212_v62 }
 0x125   :  { %v224_v1 = vmul.f32 %v216_v63, %v411_v10 }
 0x127   :  { %v236_v2 = vmul.f32 %v438_v54, %v224_v1 }
 0x129   :  { %v248_v4 = vadd.f32 %v446_v0, %v236_v2 }
 0x12b   :  { %256 = vst.msk [vmem:[%s527_s4 + $0x38] sm:$0xff] %vm41_vm0, %v248_v4 }

// kernel: hybrid_conv_unet.31
= control target key start
LH: loop header
LB: loop body
LE: loop exit
PB: predicated region body
PF: predicated region fallthrough
CT: control target
= control target key end

     0   :  { %s609_s18 = smov 0   ;;  %s670_s0 = inlined_call_operand.vmem [shape: f32[2,20,6], index: 0, kind: input, shape index: {}]   ;;  %s671_s1 = inlined_call_operand.vmem [shape: bf16[5,6,12], index: 1, kind: input, shape index: {}]   ;;  %s672_s2 = inlined_call_operand.vmem [shape: f32[1,12], index: 2, kind: input, shape index: {}]   ;;  %s673_s3 = inlined_call_operand.vmem [shape: f32[1,12], index: 3, kind: input, shape index: {}]   ;;  %s674_s4 = inlined_call_operand.vmem [shape: f32[1,12], index: 4, kind: input, shape index: {}]   ;;  %s675_s5 = inlined_call_operand.vmem [shape: f32[2,16,12], index: 5, kind: output, shape index: {}]  }
   0x1 LB: > { %s529_s19 = sadd.s32 4294967295, %s576_s18   ;;  %p533_p0 = scmp.ge.s32.totalorder %s576_s18, 1  ;;  %s576_s18 = sphi %s609_s18, %s15_s18  }
   0x2   : > { %p187_p1 = scmp.lt.s32.totalorder %s576_s18, 3 }
   0x4   : > { %p188_p2 = pnand %p533_p0, %p187_p1 }
   0x5   : > { %p215_p3 = scmp.lt.s32.totalorder (!%p188_p2), %s529_s19, 1 }
   0x6   : > { %191 = sbr.rel (%p188_p2) target bundleno = 498 (0x1f2), region = 40 }
   0xb   : > { %v235_v0 = vld [vmem:[%s671_s1] sm:$0x7]  ;;  %vm240_vm0 = vcmask 1042432   ;;  %v540_v2 = vld [vmem:[%s671_s1 + $0x8] sm:$0x7]  ;;  %s677_s19 = smov (!%p215_p3, %s529_s19), 1 }
   0xc   : > { %v242_v1 = vsel %vm240_vm0, %v235_v0, 0  ;;  %v544_v3 = vld [vmem:[%s671_s1 + $0x10] sm:$0x7]  ;;  %v309_v4 = vsel %vm240_vm0, %v540_v2, 0  ;;  %v538_v6 = vld [vmem:[%s671_s1 + $0x4] sm:$0x7] }
   0xd   : > { %251 = vmatpush.bf16.msra.mxu0 %v242_v1  ;;  %v371_v5 = vsel %vm240_vm0, %v544_v3, 0  ;;  %318 = vmatpush.bf16.msra.mxu2 %v309_v4  ;;  %v279_v7 = vsel %vm240_vm0, %v538_v6, 0  ;;  %v542_v8 = vld [vmem:[%s671_s1 + $0xc] sm:$0x7]  ;;  %s549_s30 = smul.u32 24, %s677_s19  ;;  %vm236_vm1 = vcmask 48128  }
   0xe   : > { %288 = vmatpush.bf16.msra.mxu1 %v279_v7  ;;  %v343_v9 = vsel %vm240_vm0, %v542_v8, 0  ;;  %vm301_vm2 = vcmask 1046528   ;;  %vm263_vm3 = vsmask.f32 7424  ;;  %vm329_vm4 = vsmask.f32 6400 }
   0xf   : > { %352 = vmatpush.bf16.msra.mxu3 %v343_v9  ;;  %s219_s8 = scalar_lea.vmem %s670_s0, %s549_s30  ;;  %vm363_vm5 = vcmask 1045504   ;;  %v559_v37 = vld [vmem:[%s672_s2] ss:$0 sm:$0xff]  ;;  %vm389_vm6 = vcmask 97280   ;;  %v578_v59 = vmov 192.0   ;;  %s548_s15 = sshll.u32 %s677_s19, 4 }
  0x10   : > { %v226_v10 = vld [vmem:[%s219_s8] sm:$0xff]  ;;  %v227_v11 = vld [vmem:[%s219_s8 + $0x8] sm:$0xff]  ;;  %v228_v12 = vld [vmem:[%s219_s8 + $0x10] sm:$0xf]  ;;  %562 = vrcp.f32 %v578_v59  ;;  %s224_s20 = scalar_lea.vmem %s675_s5, %s548_s15 }
  0x11   : > { %380 = vmatpush.bf16.msrb.mxu0 %v371_v5  ;;  %v234_v13 = vpack.c.bf16 %v227_v11, %v226_v10  ;;  %v260_v14 = vpack.c.bf16 %v228_v12, %v228_v12 }
  0x13   : > { %537 = vmatmul.msk.bf16.vlgmr.msra.gmra.mxu0 %vm236_vm1, %v234_v13  ;;  %v302_v15 = vrot.slane %v234_v13, 1  ;;  %v303_v16 = vrot.slane %v260_v14, 1  ;;  %v264_v17 = vshrl.u32 %v234_v13, 16  ;;  %v266_v18 = vshll.u32 %v234_v13, 16 }
  0x14   : > { %v271_v19 = vshll.u32 %v260_v14, 16  ;;  %v333_v20 = vshrl.u32 %v260_v14, 16  ;;  %v364_v33 = vrot.slane %v234_v13, 2  ;;  %v365_v34 = vrot.slane %v260_v14, 2 }
  0x15   : > { %v304_v21 = vsel %vm301_vm2, %v302_v15, %v303_v16  ;;  %v268_v22 = vrot.slane %v266_v18, 1  ;;  %v330_v23 = vrot.slane %v264_v17, 1  ;;  %v331_v24 = vrot.slane %v266_v18, 2 }
  0x16   : > { %541 = vmatmul.msk.bf16.vlgmr.msra.gmra.mxu2 %vm236_vm1, %v304_v21  ;;  %v273_v25 = vrot.slane %v271_v19, 1  ;;  %v335_v26 = vrot.slane %v333_v20, 1  ;;  %v336_v27 = vrot.slane %v271_v19, 2  ;;  %v366_v35 = vsel %vm363_vm5, %v364_v33, %v365_v34  ;;  %v563_v61 = vpop.eup %562 }
  0x17   : > { %v269_v28 = vor.u32 %v268_v22, %v264_v17  ;;  %v332_v29 = vor.u32 %v331_v24, %v330_v23  ;;  %v404_v62 = vmul.f32 192.0, %v563_v61  ;;  %vm408_vm7 = vweird.f32 %v563_v61 }
  0x18   : > { %v337_v30 = vor.u32 %v336_v27, %v335_v26 }
  0x19   : > { %v274_v31 = vsel %vm263_vm3, %v269_v28, %v273_v25  ;;  %v405_v0 = vsub.f32 1.0, %v404_v62 }
  0x1a   : > { %539 = vmatmul.msk.bf16.vlgmr.msra.gmra.mxu1 %vm236_vm1, %v274_v31  ;;  %v338_v32 = vsel %vm329_vm4, %v332_v29, %v337_v30 }
  0x1b   : > { %543 = vmatmul.msk.bf16.vlgmr.msra.gmra.mxu3 %vm236_vm1, %v338_v32  ;;  %v406_v3 = vmul.f32 %v563_v61, %v405_v0 }
  0x1d   : > { %v407_v6 = vadd.f32 %v563_v61, %v406_v3 }
  0x1f   : > { %v409_v9 = vsel %vm408_vm7, %v563_v61, %v407_v6 }
  0x23   : > { %545 = vmatmul.msk.bf16.vlgmr.msrb.gmra.mxu0 %vm236_vm1, %v366_v35  ;;  %v560_v35 = vld [vmem:[%s673_s3] ss:$0 sm:$0xff] }
  0x90   : > { %v253_v36 = vpop.f32.mrf.mxu0 }
  0x91   : > { %v258_v38 = vadd.f32 %v559_v37, %v253_v36 }
  0x97   : > { %v290_v39 = vpop.f32.mrf.mxu1 }
  0x98   : > { %v255_v40 = vpop.f32.mrf.mxu0  ;;  %v295_v41 = vadd.f32 %v290_v39, %v258_v38 }
  0x99   : > { %v320_v42 = vpop.f32.mrf.mxu2  ;;  %v259_v45 = vadd.f32 %v559_v37, %v255_v40  ;;  %v561_v37 = vld [vmem:[%s674_s4] ss:$0 sm:$0xff] }
  0x9a   : > { %v325_v43 = vadd.f32 %v320_v42, %v295_v41 }
  0x9e   : > { %v354_v44 = vpop.f32.mrf.mxu3 }
  0x9f   : > { %v359_v46 = vadd.f32 %v354_v44, %v325_v43  ;;  %v292_v47 = vpop.f32.mrf.mxu1 }
  0xa0   : > { %v382_v48 = vpop.f32.mrf.mxu0  ;;  %v296_v49 = vadd.f32 %v292_v47, %v259_v45 }
  0xa1   : > { %v387_v50 = vadd.f32 %v382_v48, %v359_v46  ;;  %v322_v51 = vpop.f32.mrf.mxu2 }
  0xa2   : > { %v326_v53 = vadd.f32 %v322_v51, %v296_v49 }
  0xa3   : > { %v390_v52 = vsel %vm389_vm6, %v387_v50, 0.0 }
  0xa4   : > { %391 = vadd.xlane.f32.xlu0 %v390_v52 }
  0xa6   : > { %v356_v54 = vpop.f32.mrf.mxu3 }
  0xa7   : > { %v360_v55 = vadd.f32 %v356_v54, %v326_v53 }
  0xa8   : > { %v384_v56 = vpop.f32.mrf.mxu0 }
  0xa9   : > { %v388_v57 = vadd.f32 %v384_v56, %v360_v55 }
  0xab   : > { %v393_v58 = vsel %vm389_vm6, %v388_v57, 0.0 }
  0xac   : > { %394 = vadd.xlane.f32.xlu0 %v393_v58 }
 0x117   : > { %v392_v60 = vpop.xlane.xlu0 %391 }
 0x11f   : > { %v395_v63 = vpop.xlane.xlu0 %394 }
 0x120   : > { %v396_v1 = vadd.f32 %v395_v63, %v392_v60 }
 0x122   : > { %v397_v2 = vrot.slane %v396_v1, 4 }
 0x124   : > { %v398_v4 = vadd.f32 %v397_v2, %v396_v1 }
 0x126   : > { %v399_v5 = vrot.slane %v398_v4, 2 }
 0x128   : > { %v400_v7 = vadd.f32 %v399_v5, %v398_v4 }
 0x12a   : > { %v401_v8 = vrot.slane %v400_v7, 1 }
 0x12c   : > { %v402_v10 = vadd.f32 %v401_v8, %v400_v7 }
 0x12e   : > { %v410_v11 = vmul.f32 %v409_v9, %v402_v10 }
 0x130   : > { %v411_v12 = vsub.f32 %v387_v50, %v410_v11  ;;  %v412_v15 = vsub.f32 %v388_v57, %v410_v11 }
 0x132   : > { %v413_v13 = vmul.f32 %v411_v12, %v411_v12  ;;  %v414_v16 = vmul.f32 %v412_v15, %v412_v15 }
 0x134   : > { %v415_v14 = vsel %vm389_vm6, %v413_v13, 0.0  ;;  %v418_v17 = vsel %vm389_vm6, %v414_v16, 0.0 }
 0x135   : > { %416 = vadd.xlane.f32.xlu1 %v415_v14 }
 0x13d   : > { %419 = vadd.xlane.f32.xlu1 %v418_v17 }
 0x1a8   : > { %v417_v18 = vpop.xlane.xlu1 %416 }
 0x1b0   : > { %v420_v19 = vpop.xlane.xlu1 %419 }
 0x1b1   : > { %v421_v20 = vadd.f32 %v420_v19, %v417_v18 }
 0x1b3   : > { %v422_v21 = vrot.slane %v421_v20, 4 }
 0x1b5   : > { %v423_v22 = vadd.f32 %v422_v21, %v421_v20 }
 0x1b7   : > { %v424_v23 = vrot.slane %v423_v22, 2 }
 0x1b9   : > { %v425_v24 = vadd.f32 %v424_v23, %v423_v22 }
 0x1bb   : > { %v426_v25 = vrot.slane %v425_v24, 1 }
 0x1bd   : > { %v427_v26 = vadd.f32 %v426_v25, %v425_v24 }
 0x1bf   : > { %v428_v27 = vmul.f32 %v427_v26, %v409_v9 }
 0x1c1   : > { %v429_v28 = vadd.f32 1e-05, %v428_v27 }
 0x1c3   : > { %564 = vrsqrt.f32 %v429_v28  ;;  %vm436_vm9 = vweird.f32 %v429_v28 }
 0x1c9   : > { %v565_v29 = vpop.eup %564 }
 0x1ca   : > { %v431_v30 = vmul.f32 %v565_v29, %v429_v28  ;;  %vm437_vm8 = vweird.f32 %v565_v29 }
 0x1cb   : > { %vm438_vm10 = vmor %vm436_vm9, %vm437_vm8 }
 0x1cc   : > { %v432_v31 = vmul.f32 %v565_v29, %v431_v30 }
 0x1ce   : > { %v433_v32 = vmul.f32 0.5, %v432_v31 }
 0x1d0   : > { %v434_v33 = vsub.f32 1.5, %v433_v32 }
 0x1d2   : > { %v435_v34 = vmul.f32 %v565_v29, %v434_v33 }
 0x1d4   : > { %v439_v36 = vsel %vm438_vm10, %v565_v29, %v435_v34 }
 0x1d5   : > { %v440_v38 = vmul.f32 %v439_v36, %v411_v12  ;;  %v441_v39 = vmul.f32 %v439_v36, %v412_v15 }
 0x1d7   : > { %v446_v40 = vmul.f32 %v560_v35, %v440_v38  ;;  %v447_v41 = vmul.f32 %v560_v35, %v441_v39 }
 0x1d9   : > { %v452_v42 = vadd.f32 %v561_v37, %v446_v40  ;;  %v453_v43 = vadd.f32 %v561_v37, %v447_v41 }
 0x1db   : > { %v456_v44 = vmul.f32 0.044715, %v452_v42  ;;  %v457_v45 = vmul.f32 0.044715, %v453_v43  ;;  %v454_v56 = vmul.f32 0.5, %v452_v42  ;;  %v455_v58 = vmul.f32 0.5, %v453_v43 }
 0x1dd   : > { %v458_v46 = vmul.f32 %v456_v44, %v452_v42  ;;  %v459_v47 = vmul.f32 %v457_v45, %v453_v43 }
 0x1df   : > { %v460_v48 = vmul.f32 %v458_v46, %v452_v42  ;;  %v461_v49 = vmul.f32 %v459_v47, %v453_v43 }
 0x1e1   : > { %v462_v50 = vadd.f32 %v460_v48, %v452_v42  ;;  %v463_v51 = vadd.f32 %v461_v49, %v453_v43 }
 0x1e3   : > { %v464_v52 = vmul.f32 0.7978846, %v462_v50  ;;  %v465_v53 = vmul.f32 0.7978846, %v463_v51 }
 0x1e5   : > { %566 = vtanh.f32 %v464_v52 }
 0x1e6   : > { %568 = vtanh.f32 %v465_v53 }
 0x1eb   : > { %v567_v54 = vpop.eup %566 }
 0x1ec   : > { %v569_v55 = vpop.eup %568  ;;  %v468_v57 = vadd.f32 1.0, %v567_v54 }
 0x1ed   : > { %v469_v59 = vadd.f32 1.0, %v569_v55 }
 0x1ee   : > { %v470_v60 = vmul.f32 %v468_v57, %v454_v56 }
 0x1ef   : > { %v471_v61 = vmul.f32 %v469_v59, %v455_v58 }
 0x1f0   : > { %472 = vst.msk [vmem:[%s224_s20] sm:$0xff] %vm389_vm6, %v470_v60 }
 0x1f1   : > { %473 = vst.msk [vmem:[%s224_s20 + $0x8] sm:$0xff] %vm389_vm6, %v471_v61 }
 0x1f2 PF: > { %s15_s18 = sadd.s32 1, %s576_s18  }
 0x1f3   : > { %p12_p4 = scmp.ge.s32.totalorder %s15_s18, 4  }
 0x1f5   :  { %14 = sbr.rel (!%p12_p4) target bundleno = 1 (0x1), region = 74 }

// kernel: hybrid_conv_unet.33
= control target key start
LH: loop header
LB: loop body
LE: loop exit
PB: predicated region body
PF: predicated region fallthrough
CT: control target
= control target key end

     0   :  { %vm39_vm0 = vcmask 1042432   ;;  %vm32_vm1 = vcmask 48128   ;;  %s287_s2 = inlined_call_operand.vmem [shape: bf16[6,6], index: 2, kind: input, shape index: {}]   ;;  %s288_s0 = inlined_call_operand.vmem [shape: f32[32,6], index: 0, kind: input, shape index: {}]   ;;  %s289_s1 = inlined_call_operand.vmem [shape: bf16[6,6], index: 1, kind: input, shape index: {}]   ;;  %s290_s4 = inlined_call_operand.vmem [shape: f32[1,6], index: 4, kind: input, shape index: {}]   ;;  %s291_s3 = inlined_call_operand.vmem [shape: f32[1,6], index: 3, kind: input, shape index: {}]   ;;  %s292_s5 = inlined_call_operand.vmem [shape: f32[32,6], index: 5, kind: output, shape index: {}]  }
   0x1   :  { %v62_v0 = vld [vmem:[%s287_s2] sm:$0x7]  ;;  %v22_v2 = vld [vmem:[%s288_s0 + $0x8] sm:$0xff]  ;;  %v23_v5 = vld [vmem:[%s288_s0 + $0x10] sm:$0xff] }
   0x2   :  { %v21_v1 = vld [vmem:[%s288_s0] sm:$0xff]  ;;  %v68_v3 = vsel %vm39_vm0, %v62_v0, 0  ;;  %v24_v6 = vld [vmem:[%s288_s0 + $0x18] sm:$0xff] }
   0x3   :  { %v25_v4 = vpack.c.bf16 %v22_v2, %v21_v1  ;;  %v27_v7 = vld [vmem:[%s289_s1] sm:$0x7]  ;;  %77 = vmatpush.bf16.msra.mxu1 %v68_v3  ;;  %186 = vmatpush.bf16.msra.mxu3 %v68_v3  ;;  %v26_v8 = vpack.c.bf16 %v24_v6, %v23_v5 }
   0x4   :  { %v41_v9 = vsel %vm39_vm0, %v27_v7, 0  ;;  %v187_v10 = vld [vmem:[%s290_s4] ss:$0 sm:$0xff] }
   0x5   :  { %185 = vmatpush.bf16.msra.mxu2 %v41_v9  ;;  %50 = vmatpush.bf16.msra.mxu0 %v41_v9  ;;  %v265_v31 = vld [vmem:[%s291_s3] ss:$0 sm:$0xff] }
   0x6   :  { %179 = vmatmul.msk.bf16.vlgmr.msra.gmra.mxu1 %vm32_vm1, %v25_v4  ;;  %180 = vmatmul.msk.bf16.vlgmr.msra.gmra.mxu3 %vm32_vm1, %v26_v8 }
   0x8   :  { %178 = vmatmul.msk.bf16.vlgmr.msra.gmra.mxu2 %vm32_vm1, %v26_v8  ;;  %177 = vmatmul.msk.bf16.vlgmr.msra.gmra.mxu0 %vm32_vm1, %v25_v4 }
  0x83   :  { %v79_v11 = vpop.f32.mrf.mxu1 }
  0x84   :  { %v80_v12 = vadd.f32 %v187_v10, %v79_v11 }
  0x85   :  { %v52_v32 = vpop.f32.mrf.mxu0 }
  0x86   :  { %v181_v13 = vmul.f32 -1.442695, %v80_v12  ;;  %v53_v40 = vadd.f32 %v265_v31, %v52_v32 }
  0x88   :  { %189 = vpow2.f32 %v181_v13 }
  0x89   :  { %v84_v14 = vpop.f32.mrf.mxu3 }
  0x8a   :  { %v85_v15 = vadd.f32 %v187_v10, %v84_v14 }
  0x8b   :  { %v81_v16 = vpop.f32.mrf.mxu1  ;;  %v57_v49 = vpop.f32.mrf.mxu2 }
  0x8c   :  { %v183_v17 = vmul.f32 -1.442695, %v85_v15  ;;  %v82_v18 = vadd.f32 %v187_v10, %v81_v16  ;;  %v58_v55 = vadd.f32 %v265_v31, %v57_v49 }
  0x8d   :  { %v54_v58 = vpop.f32.mrf.mxu0 }
  0x8e   :  { %v190_v19 = vpop.eup %189  ;;  %191 = vpow2.f32 %v183_v17  ;;  %v182_v20 = vmul.f32 -1.442695, %v82_v18  ;;  %v55_v3 = vadd.f32 %v265_v31, %v54_v58 }
  0x8f   :  { %v101_v21 = vadd.f32 1.0, %v190_v19 }
  0x90   :  { %193 = vpow2.f32 %v182_v20 }
  0x91   :  { %195 = vrcp.f32 %v101_v21  ;;  %v86_v22 = vpop.f32.mrf.mxu3  ;;  %v116_v34 = vand.u32 2147483648, %v101_v21  ;;  %vm110_vm2 = vweird.f32 %v101_v21  ;;  %v114_v37 = vand.u32 2147483647, %v101_v21 }
  0x92   :  { %v87_v23 = vadd.f32 %v187_v10, %v86_v22 }
  0x93   :  { %v117_v44 = vor.u32 1.1754944e-38, %v116_v34  ;;  %vm115_vm5 = vcmp.eq.f32.partialorder %v114_v37, 8.507059e+37  ;;  %v59_v13 = vpop.f32.mrf.mxu2 }
  0x94   :  { %v192_v24 = vpop.eup %191  ;;  %v184_v25 = vmul.f32 -1.442695, %v87_v23  ;;  %v60_v16 = vadd.f32 %v265_v31, %v59_v13 }
  0x95   :  { %v103_v26 = vadd.f32 1.0, %v192_v24 }
  0x96   :  { %v194_v27 = vpop.eup %193  ;;  %197 = vpow2.f32 %v184_v25 }
  0x97   :  { %v196_v28 = vpop.eup %195  ;;  %199 = vrcp.f32 %v103_v26  ;;  %v102_v29 = vadd.f32 1.0, %v194_v27  ;;  %v144_v50 = vand.u32 2147483647, %v103_v26  ;;  %v146_v51 = vand.u32 2147483648, %v103_v26 }
  0x98   :  { %v106_v30 = vmul.f32 %v196_v28, %v101_v21  ;;  %vm111_vm3 = vweird.f32 %v196_v28  ;;  %vm140_vm7 = vweird.f32 %v103_v26 }
  0x99   :  { %201 = vrcp.f32 %v102_v29  ;;  %vm112_vm4 = vmor %vm110_vm2, %vm111_vm3  ;;  %v131_v56 = vand.u32 2147483648, %v102_v29  ;;  %v129_v60 = vand.u32 2147483647, %v102_v29  ;;  %vm145_vm10 = vcmp.eq.f32.partialorder %v144_v50, 8.507059e+37 }
  0x9a   :  { %v107_v33 = vsub.f32 1.0, %v106_v30  ;;  %v147_v62 = vor.u32 1.1754944e-38, %v146_v51  ;;  %vm125_vm11 = vweird.f32 %v102_v29 }
  0x9b   :  { %v132_v4 = vor.u32 1.1754944e-38, %v131_v56  ;;  %vm130_vm13 = vcmp.eq.f32.partialorder %v129_v60, 8.507059e+37 }
  0x9c   :  { %v198_v35 = vpop.eup %197  ;;  %v108_v36 = vmul.f32 %v196_v28, %v107_v33 }
  0x9d   :  { %v200_v38 = vpop.eup %199  ;;  %v104_v39 = vadd.f32 1.0, %v198_v35 }
  0x9e   :  { %v109_v41 = vadd.f32 %v196_v28, %v108_v36  ;;  %v136_v42 = vmul.f32 %v200_v38, %v103_v26  ;;  %vm141_vm6 = vweird.f32 %v200_v38 }
  0x9f   :  { %v202_v43 = vpop.eup %201  ;;  %203 = vrcp.f32 %v104_v39  ;;  %vm142_vm9 = vmor %vm140_vm7, %vm141_vm6  ;;  %v161_v9 = vand.u32 2147483648, %v104_v39  ;;  %v159_v12 = vand.u32 2147483647, %v104_v39  ;;  %vm155_vm15 = vweird.f32 %v104_v39 }
  0xa0   :  { %v113_v45 = vsel %vm112_vm4, %v196_v28, %v109_v41  ;;  %v137_v46 = vsub.f32 1.0, %v136_v42  ;;  %v121_v47 = vmul.f32 %v202_v43, %v102_v29  ;;  %vm126_vm8 = vweird.f32 %v202_v43 }
  0xa1   :  { %v118_v48 = vsel %vm115_vm5, %v117_v44, %v113_v45  ;;  %vm127_vm12 = vmor %vm125_vm11, %vm126_vm8  ;;  %v162_v15 = vor.u32 1.1754944e-38, %v161_v9  ;;  %vm160_vm2 = vcmp.eq.f32.partialorder %v159_v12, 8.507059e+37 }
  0xa2   :  { %v165_v52 = vmul.f32 %v118_v48, %v53_v40  ;;  %v138_v53 = vmul.f32 %v200_v38, %v137_v46  ;;  %v122_v54 = vsub.f32 1.0, %v121_v47 }
  0xa4   :  { %169 = vst.msk [vmem:[%s292_s5] sm:$0xff] %vm32_vm1, %v165_v52  ;;  %v139_v57 = vadd.f32 %v200_v38, %v138_v53  ;;  %v123_v59 = vmul.f32 %v202_v43, %v122_v54 }
  0xa5   :  { %v204_v61 = vpop.eup %203 }
  0xa6   :  { %v143_v63 = vsel %vm142_vm9, %v200_v38, %v139_v57  ;;  %v124_v0 = vadd.f32 %v202_v43, %v123_v59  ;;  %v151_v1 = vmul.f32 %v204_v61, %v104_v39  ;;  %vm156_vm14 = vweird.f32 %v204_v61 }
  0xa7   :  { %v148_v2 = vsel %vm145_vm10, %v147_v62, %v143_v63  ;;  %vm157_vm0 = vmor %vm155_vm15, %vm156_vm14 }
  0xa8   :  { %v167_v5 = vmul.f32 %v148_v2, %v58_v55  ;;  %v128_v6 = vsel %vm127_vm12, %v202_v43, %v124_v0  ;;  %v152_v7 = vsub.f32 1.0, %v151_v1 }
  0xa9   :  { %v133_v8 = vsel %vm130_vm13, %v132_v4, %v128_v6 }
  0xaa   :  { %171 = vst.msk [vmem:[%s292_s5 + $0x10] sm:$0xff] %vm32_vm1, %v167_v5  ;;  %v166_v10 = vmul.f32 %v133_v8, %v55_v3  ;;  %v153_v11 = vmul.f32 %v204_v61, %v152_v7 }
  0xac   :  { %170 = vst.msk [vmem:[%s292_s5 + $0x8] sm:$0xff] %vm32_vm1, %v166_v10  ;;  %v154_v14 = vadd.f32 %v204_v61, %v153_v11 }
  0xae   :  { %v158_v17 = vsel %vm157_vm0, %v204_v61, %v154_v14 }
  0xaf   :  { %v163_v18 = vsel %vm160_vm2, %v162_v15, %v158_v17 }
  0xb0   :  { %v168_v19 = vmul.f32 %v163_v18, %v60_v16 }
  0xb2   :  { %172 = vst.msk [vmem:[%s292_s5 + $0x18] sm:$0xff] %vm32_vm1, %v168_v19 }

// kernel: hybrid_conv_unet.32
= control target key start
LH: loop header
LB: loop body
LE: loop exit
PB: predicated region body
PF: predicated region fallthrough
CT: control target
= control target key end

     0   :  { %s739_s21 = smov 0   ;;  %s819_s0 = inlined_call_operand.vmem [shape: f32[2,20,12], index: 0, kind: input, shape index: {}]   ;;  %s820_s1 = inlined_call_operand.vmem [shape: bf16[5,12,6], index: 1, kind: input, shape index: {}]   ;;  %s821_s2 = inlined_call_operand.vmem [shape: f32[1,6], index: 2, kind: input, shape index: {}]   ;;  %s822_s3 = inlined_call_operand.vmem [shape: f32[1,6], index: 3, kind: input, shape index: {}]   ;;  %s823_s4 = inlined_call_operand.vmem [shape: f32[1,6], index: 4, kind: input, shape index: {}]   ;;  %s824_s5 = inlined_call_operand.vmem [shape: f32[2,16,6], index: 5, kind: input, shape index: {}]   ;;  %s825_s6 = inlined_call_operand.vmem [shape: f32[2,16,6], index: 6, kind: output, shape index: {}]  }
   0x1 LB: > { %s622_s22 = sadd.s32 4294967295, %s701_s21   ;;  %p626_p0 = scmp.ge.s32.totalorder %s701_s21, 1  ;;  %s701_s21 = sphi %s739_s21, %s16_s21  }
   0x2   : > { %p222_p1 = scmp.lt.s32.totalorder %s701_s21, 3 }
   0x4   : > { %p223_p2 = pnand %p626_p0, %p222_p1 }
   0x5   : > { %p257_p3 = scmp.lt.s32.totalorder (!%p223_p2), %s622_s22, 1 }
   0x6   : > { %226 = sbr.rel (%p223_p2) target bundleno = 501 (0x1f5), region = 44 }
   0xb   : > { %v634_v0 = vld [vmem:[%s820_s1] sm:$0xf]  ;;  %v669_v1 = vld [vmem:[%s820_s1] sm:$0x30]  ;;  %vm293_vm0 = vcmask 1045504   ;;  %s827_s22 = smov (!%p257_p3, %s622_s22), 1 }
   0xc   : > { %v635_v2 = vor.u32 %v669_v1, %v634_v0  ;;  %v648_v3 = vld [vmem:[%s820_s1 + $0x10] sm:$0xf]  ;;  %v671_v4 = vld [vmem:[%s820_s1 + $0x10] sm:$0x30]  ;;  %v662_v6 = vld [vmem:[%s820_s1 + $0x20] sm:$0xf] }
   0xd   : > { %v649_v5 = vor.u32 %v671_v4, %v648_v3  ;;  %v673_v7 = vld [vmem:[%s820_s1 + $0x20] sm:$0x30]  ;;  %v641_v10 = vld [vmem:[%s820_s1 + $0x8] sm:$0xf]  ;;  %v670_v11 = vld [vmem:[%s820_s1 + $0x8] sm:$0x30] }
   0xe   : > { %v295_v8 = vsel %vm293_vm0, %v635_v2, 0  ;;  %v663_v9 = vor.u32 %v673_v7, %v662_v6  ;;  %s674_s15 = smul.u32 24, %s827_s22  ;;  %v642_v13 = vor.u32 %v670_v11, %v641_v10  ;;  %v655_v14 = vld [vmem:[%s820_s1 + $0x18] sm:$0xf]  ;;  %v672_v16 = vld [vmem:[%s820_s1 + $0x18] sm:$0x30] }
   0xf   : > { %304 = vmatpush.bf16.msra.mxu0 %v295_v8  ;;  %v374_v12 = vsel %vm293_vm0, %v649_v5, 0  ;;  %v656_v18 = vor.u32 %v672_v16, %v655_v14  ;;  %vm289_vm1 = vcmask 97280   ;;  %vm361_vm2 = vcmask 1046528   ;;  %v684_v47 = vld [vmem:[%s821_s2] ss:$0 sm:$0xff]  ;;  %s667_s7 = sshll.u32 %s827_s22, 4 }
  0x10   : > { %383 = vmatpush.bf16.msra.mxu2 %v374_v12  ;;  %v448_v15 = vsel %vm293_vm0, %v663_v9, 0  ;;  %s261_s24 = scalar_lea.vmem %s819_s0, %s674_s15  ;;  %v338_v17 = vsel %vm293_vm0, %v642_v13, 0  ;;  %vm317_vm3 = vsmask.f32 7424  ;;  %vm395_vm4 = vsmask.f32 6400  ;;  %s266_s10 = scalar_lea.vmem %s824_s5, %s667_s7 }
  0x11   : > { %v273_v19 = vld [vmem:[%s261_s24] sm:$0xff]  ;;  %v274_v20 = vld [vmem:[%s261_s24 + $0x8] sm:$0xff]  ;;  %v275_v21 = vld [vmem:[%s261_s24 + $0x10] sm:$0xf]  ;;  %347 = vmatpush.bf16.msra.mxu1 %v338_v17  ;;  %v414_v24 = vsel %vm293_vm0, %v656_v18, 0  ;;  %vm466_vm5 = vcmask 48128   ;;  %s271_s13 = scalar_lea.vmem %s825_s6, %s667_s7 }
  0x12   : > { %v281_v22 = vpack.c.bf16 %v274_v20, %v273_v19  ;;  %v313_v23 = vpack.c.bf16 %v275_v21, %v275_v21  ;;  %423 = vmatpush.bf16.msra.mxu3 %v414_v24  ;;  %v703_v5 = vmov 96.0  }
  0x13   : > { %457 = vmatpush.bf16.msrb.mxu0 %v448_v15  ;;  %687 = vrcp.f32 %v703_v5 }
  0x14   : > { %636 = vmatmul.msk.bf16.vlgmr.msra.gmra.mxu0 %vm289_vm1, %v281_v22  ;;  %v362_v25 = vrot.slane %v281_v22, 1  ;;  %v363_v26 = vrot.slane %v313_v23, 1  ;;  %v318_v27 = vshrl.u32 %v281_v22, 16  ;;  %v320_v28 = vshll.u32 %v281_v22, 16 }
  0x15   : > { %v325_v29 = vshll.u32 %v313_v23, 16  ;;  %v399_v30 = vshrl.u32 %v313_v23, 16  ;;  %v436_v43 = vrot.slane %v281_v22, 2  ;;  %v437_v44 = vrot.slane %v313_v23, 2 }
  0x16   : > { %v364_v31 = vsel %vm361_vm2, %v362_v25, %v363_v26  ;;  %v322_v32 = vrot.slane %v320_v28, 1  ;;  %v396_v33 = vrot.slane %v318_v27, 1  ;;  %v397_v34 = vrot.slane %v320_v28, 2 }
  0x17   : > { %650 = vmatmul.msk.bf16.vlgmr.msra.gmra.mxu2 %vm289_vm1, %v364_v31  ;;  %v327_v35 = vrot.slane %v325_v29, 1  ;;  %v401_v36 = vrot.slane %v399_v30, 1  ;;  %v402_v37 = vrot.slane %v325_v29, 2  ;;  %v438_v45 = vsel %vm293_vm0, %v436_v43, %v437_v44 }
  0x18   : > { %v323_v38 = vor.u32 %v322_v32, %v318_v27  ;;  %v398_v39 = vor.u32 %v397_v34, %v396_v33 }
  0x19   : > { %v403_v40 = vor.u32 %v402_v37, %v401_v36  ;;  %v688_v7 = vpop.eup %687 }
  0x1a   : > { %v328_v41 = vsel %vm317_vm3, %v323_v38, %v327_v35  ;;  %v481_v8 = vmul.f32 96.0, %v688_v7  ;;  %vm485_vm6 = vweird.f32 %v688_v7 }
  0x1b   : > { %643 = vmatmul.msk.bf16.vlgmr.msra.gmra.mxu1 %vm289_vm1, %v328_v41  ;;  %v404_v42 = vsel %vm395_vm4, %v398_v39, %v403_v40 }
  0x1c   : > { %657 = vmatmul.msk.bf16.vlgmr.msra.gmra.mxu3 %vm289_vm1, %v404_v42  ;;  %v482_v10 = vsub.f32 1.0, %v481_v8 }
  0x1e   : > { %v483_v13 = vmul.f32 %v688_v7, %v482_v10 }
  0x20   : > { %v484_v16 = vadd.f32 %v688_v7, %v483_v13 }
  0x22   : > { %v486_v19 = vsel %vm485_vm6, %v688_v7, %v484_v16  ;;  %v550_v7 = vld [vmem:[%s266_s10 + $0x8] sm:$0xff] }
  0x24   : > { %664 = vmatmul.msk.bf16.vlgmr.msrb.gmra.mxu0 %vm289_vm1, %v438_v45  ;;  %v685_v45 = vld [vmem:[%s822_s3] ss:$0 sm:$0xff] }
  0x91   : > { %v306_v46 = vpop.f32.mrf.mxu0 }
  0x92   : > { %v311_v48 = vadd.f32 %v684_v47, %v306_v46 }
  0x98   : > { %v349_v49 = vpop.f32.mrf.mxu1 }
  0x99   : > { %v308_v50 = vpop.f32.mrf.mxu0  ;;  %v354_v51 = vadd.f32 %v349_v49, %v311_v48 }
  0x9a   : > { %v385_v52 = vpop.f32.mrf.mxu2  ;;  %v312_v55 = vadd.f32 %v684_v47, %v308_v50  ;;  %v686_v47 = vld [vmem:[%s823_s4] ss:$0 sm:$0xff] }
  0x9b   : > { %v390_v53 = vadd.f32 %v385_v52, %v354_v51 }
  0x9f   : > { %v425_v54 = vpop.f32.mrf.mxu3 }
  0xa0   : > { %v430_v56 = vadd.f32 %v425_v54, %v390_v53  ;;  %v351_v57 = vpop.f32.mrf.mxu1 }
  0xa1   : > { %v459_v58 = vpop.f32.mrf.mxu0  ;;  %v355_v59 = vadd.f32 %v351_v57, %v312_v55 }
  0xa2   : > { %v464_v60 = vadd.f32 %v459_v58, %v430_v56  ;;  %v387_v61 = vpop.f32.mrf.mxu2 }
  0xa3   : > { %v391_v63 = vadd.f32 %v387_v61, %v355_v59 }
  0xa4   : > { %v467_v62 = vsel %vm466_vm5, %v464_v60, 0.0 }
  0xa5   : > { %468 = vadd.xlane.f32.xlu0 %v467_v62 }
  0xa7   : > { %v427_v0 = vpop.f32.mrf.mxu3 }
  0xa8   : > { %v431_v1 = vadd.f32 %v427_v0, %v391_v63 }
  0xa9   : > { %v461_v2 = vpop.f32.mrf.mxu0 }
  0xaa   : > { %v465_v3 = vadd.f32 %v461_v2, %v431_v1 }
  0xac   : > { %v470_v4 = vsel %vm466_vm5, %v465_v3, 0.0 }
  0xad   : > { %471 = vadd.xlane.f32.xlu0 %v470_v4  ;;  %v549_v4 = vld [vmem:[%s266_s10] sm:$0xff] }
 0x118   : > { %v469_v6 = vpop.xlane.xlu0 %468 }
 0x120   : > { %v472_v9 = vpop.xlane.xlu0 %471 }
 0x121   : > { %v473_v11 = vadd.f32 %v472_v9, %v469_v6 }
 0x123   : > { %v474_v12 = vrot.slane %v473_v11, 4 }
 0x125   : > { %v475_v14 = vadd.f32 %v474_v12, %v473_v11 }
 0x127   : > { %v476_v15 = vrot.slane %v475_v14, 2 }
 0x129   : > { %v477_v17 = vadd.f32 %v476_v15, %v475_v14 }
 0x12b   : > { %v478_v18 = vrot.slane %v477_v17, 1 }
 0x12d   : > { %v479_v20 = vadd.f32 %v478_v18, %v477_v17 }
 0x12f   : > { %v487_v21 = vmul.f32 %v486_v19, %v479_v20 }
 0x131   : > { %v488_v22 = vsub.f32 %v464_v60, %v487_v21  ;;  %v489_v25 = vsub.f32 %v465_v3, %v487_v21 }
 0x133   : > { %v490_v23 = vmul.f32 %v488_v22, %v488_v22  ;;  %v491_v26 = vmul.f32 %v489_v25, %v489_v25 }
 0x135   : > { %v492_v24 = vsel %vm466_vm5, %v490_v23, 0.0  ;;  %v495_v27 = vsel %vm466_vm5, %v491_v26, 0.0 }
 0x136   : > { %493 = vadd.xlane.f32.xlu1 %v492_v24 }
 0x13e   : > { %496 = vadd.xlane.f32.xlu1 %v495_v27 }
 0x1a9   : > { %v494_v28 = vpop.xlane.xlu1 %493 }
 0x1b1   : > { %v497_v29 = vpop.xlane.xlu1 %496 }
 0x1b2   : > { %v498_v30 = vadd.f32 %v497_v29, %v494_v28 }
 0x1b4   : > { %v499_v31 = vrot.slane %v498_v30, 4 }
 0x1b6   : > { %v500_v32 = vadd.f32 %v499_v31, %v498_v30 }
 0x1b8   : > { %v501_v33 = vrot.slane %v500_v32, 2 }
 0x1ba   : > { %v502_v34 = vadd.f32 %v501_v33, %v500_v32 }
 0x1bc   : > { %v503_v35 = vrot.slane %v502_v34, 1 }
 0x1be   : > { %v504_v36 = vadd.f32 %v503_v35, %v502_v34 }
 0x1c0   : > { %v505_v37 = vmul.f32 %v504_v36, %v486_v19 }
 0x1c2   : > { %v506_v38 = vadd.f32 1e-05, %v505_v37 }
 0x1c4   : > { %689 = vrsqrt.f32 %v506_v38  ;;  %vm513_vm8 = vweird.f32 %v506_v38 }
 0x1ca   : > { %v690_v39 = vpop.eup %689 }
 0x1cb   : > { %v508_v40 = vmul.f32 %v690_v39, %v506_v38  ;;  %vm514_vm7 = vweird.f32 %v690_v39 }
 0x1cc   : > { %vm515_vm9 = vmor %vm513_vm8, %vm514_vm7 }
 0x1cd   : > { %v509_v41 = vmul.f32 %v690_v39, %v508_v40 }
 0x1cf   : > { %v510_v42 = vmul.f32 0.5, %v509_v41 }
 0x1d1   : > { %v511_v43 = vsub.f32 1.5, %v510_v42 }
 0x1d3   : > { %v512_v44 = vmul.f32 %v690_v39, %v511_v43 }
 0x1d5   : > { %v516_v46 = vsel %vm515_vm9, %v690_v39, %v512_v44 }
 0x1d6   : > { %v517_v48 = vmul.f32 %v516_v46, %v488_v22  ;;  %v518_v49 = vmul.f32 %v516_v46, %v489_v25 }
 0x1d8   : > { %v523_v50 = vmul.f32 %v685_v45, %v517_v48  ;;  %v524_v51 = vmul.f32 %v685_v45, %v518_v49 }
 0x1da   : > { %v529_v52 = vadd.f32 %v686_v47, %v523_v50  ;;  %v530_v53 = vadd.f32 %v686_v47, %v524_v51 }
 0x1dc   : > { %v533_v54 = vmul.f32 0.044715, %v529_v52  ;;  %v534_v55 = vmul.f32 0.044715, %v530_v53  ;;  %v531_v2 = vmul.f32 0.5, %v529_v52  ;;  %v532_v5 = vmul.f32 0.5, %v530_v53 }
 0x1de   : > { %v535_v56 = vmul.f32 %v533_v54, %v529_v52  ;;  %v536_v57 = vmul.f32 %v534_v55, %v530_v53 }
 0x1e0   : > { %v537_v58 = vmul.f32 %v535_v56, %v529_v52  ;;  %v538_v59 = vmul.f32 %v536_v57, %v530_v53 }
 0x1e2   : > { %v539_v60 = vadd.f32 %v537_v58, %v529_v52  ;;  %v540_v61 = vadd.f32 %v538_v59, %v530_v53 }
 0x1e4   : > { %v541_v62 = vmul.f32 0.7978846, %v539_v60  ;;  %v542_v63 = vmul.f32 0.7978846, %v540_v61 }
 0x1e6   : > { %691 = vtanh.f32 %v541_v62 }
 0x1e7   : > { %693 = vtanh.f32 %v542_v63 }
 0x1ec   : > { %v692_v0 = vpop.eup %691 }
 0x1ed   : > { %v694_v1 = vpop.eup %693  ;;  %v545_v3 = vadd.f32 1.0, %v692_v0 }
 0x1ee   : > { %v546_v6 = vadd.f32 1.0, %v694_v1 }
 0x1ef   : > { %v547_v8 = vmul.f32 %v545_v3, %v531_v2 }
 0x1f0   : > { %v548_v9 = vmul.f32 %v546_v6, %v532_v5 }
 0x1f1   : > { %v551_v10 = vadd.f32 %v549_v4, %v547_v8 }
 0x1f2   : > { %v552_v11 = vadd.f32 %v550_v7, %v548_v9 }
 0x1f3   : > { %553 = vst.msk [vmem:[%s271_s13] sm:$0xff] %vm466_vm5, %v551_v10 }
 0x1f4   : > { %554 = vst.msk [vmem:[%s271_s13 + $0x8] sm:$0xff] %vm466_vm5, %v552_v11 }
 0x1f5 PF: > { %s16_s21 = sadd.s32 1, %s701_s21  }
 0x1f6   : > { %p13_p4 = scmp.ge.s32.totalorder %s16_s21, 4  }
 0x1f8   :  { %15 = sbr.rel (!%p13_p4) target bundleno = 1 (0x1), region = 81 }

// kernel: hybrid_conv_unet.34
= control target key start
LH: loop header
LB: loop body
LE: loop exit
PB: predicated region body
PF: predicated region fallthrough
CT: control target
= control target key end

     0   :  { %s314_s9 = smov 0   ;;  %s334_s0 = inlined_call_operand.vmem [shape: f32[6,2,16], index: 0, kind: input, shape index: {}]   ;;  %s335_s1 = inlined_call_operand.vmem [shape: bf16[6,16,16], index: 1, kind: input, shape index: {}]   ;;  %s336_s2 = inlined_call_operand.vmem [shape: f32[6,2,16], index: 2, kind: output, shape index: {}]  }
   0x1 LB: > { %s263_s10 = sadd.s32 4294967295, %s297_s9   ;;  %p267_p0 = scmp.ge.s32.totalorder %s297_s9, 1  ;;  %s297_s9 = sphi %s314_s9, %s12_s9  }
   0x2   : > { %p121_p1 = scmp.lt.s32.totalorder %s297_s9, 7 }
   0x4   : > { %p122_p2 = pnand %p267_p0, %p121_p1 }
   0x5   : > { %p146_p3 = scmp.lt.s32.totalorder (!%p122_p2), %s263_s10, 5 }
   0x6   : > { %125 = sbr.rel (%p122_p2) target bundleno = 166 (0xa6), region = 28 }
   0xb   : > { %s338_s10 = smov (!%p146_p3, %s263_s10), 5  ;;  %vm170_vm0 = vcmask 130048   ;;  %vm196_vm1 = vcmask 123904  }
   0xc   : > { %s279_s11 = sshll.u32 %s338_s10, 3  ;;  %s268_s12 = sshll.u32 %s338_s10, 1 }
   0xd   : > { %s154_s15 = scalar_lea.vmem %s335_s1, %s279_s11  ;;  %s149_s18 = scalar_lea.vmem %s334_s0, %s268_s12 }
   0xe   : > { %v280_v0 = vld [vmem:[%s154_s15] sm:$0xff]  ;;  %s158_s21 = scalar_lea.vmem %s336_s2, %s268_s12 }
   0xf   : > { %v160_v1 = vld [vmem:[%s149_s18] sm:$0x3]  ;;  %181 = vmatpush.bf16.msra.mxu0 %v280_v0 }
  0x10   : > { %v161_v2 = vpack.c.bf16 %v160_v1, %v160_v1 }
  0x12   : > { %276 = vmatmul.msk.bf16.vlgmr.msra.gmra.mxu0 %vm170_vm0, %v161_v2 }
  0x8f   : > { %v183_v3 = vpop.f32.mrf.mxu0 }
  0x90   : > { %v188_v4 = vmul.f32 0.044715, %v183_v3  ;;  %v187_v11 = vmul.f32 0.5, %v183_v3 }
  0x92   : > { %v189_v5 = vmul.f32 %v188_v4, %v183_v3 }
  0x94   : > { %v190_v6 = vmul.f32 %v189_v5, %v183_v3 }
  0x96   : > { %v191_v7 = vadd.f32 %v190_v6, %v183_v3 }
  0x97   : > { %v185_v8 = vpop.f32.mrf.mxu0 }
  0x98   : > { %v192_v9 = vmul.f32 0.7978846, %v191_v7 }
  0x9a   : > { %289 = vtanh.f32 %v192_v9 }
  0xa0   : > { %v290_v10 = vpop.eup %289 }
  0xa1   : > { %v194_v12 = vadd.f32 1.0, %v290_v10 }
  0xa3   : > { %v195_v13 = vmul.f32 %v194_v12, %v187_v11 }
  0xa5   : > { %197 = vst.msk [vmem:[%s158_s21] sm:$0x3] %vm196_vm1, %v195_v13 }
  0xa6 PF: > { %s12_s9 = sadd.s32 1, %s297_s9  }
  0xa7   : > { %p9_p4 = scmp.ge.s32.totalorder %s12_s9, 8  }
  0xa9   :  { %11 = sbr.rel (!%p9_p4) target bundleno = 1 (0x1), region = 61 }

// kernel: hybrid_conv_unet.35
= control target key start
LH: loop header
LB: loop body
LE: loop exit
PB: predicated region body
PF: predicated region fallthrough
CT: control target
= control target key end

     0   :  { %vm33_vm0 = vcmask 1042432   ;;  %vm26_vm1 = vcmask 48128   ;;  %s124_s1 = inlined_call_operand.vmem [shape: bf16[6,6], index: 1, kind: input, shape index: {}]   ;;  %s125_s0 = inlined_call_operand.vmem [shape: f32[32,6], index: 0, kind: input, shape index: {}]   ;;  %s126_s2 = inlined_call_operand.vmem [shape: f32[1,6], index: 2, kind: input, shape index: {}]   ;;  %s127_s3 = inlined_call_operand.vmem [shape: f32[32,6], index: 3, kind: output, shape index: {}]  }
   0x1   :  { %v21_v0 = vld [vmem:[%s124_s1] sm:$0x7]  ;;  %v16_v2 = vld [vmem:[%s125_s0 + $0x8] sm:$0xff]  ;;  %v17_v5 = vld [vmem:[%s125_s0 + $0x10] sm:$0xff] }
   0x2   :  { %v15_v1 = vld [vmem:[%s125_s0] sm:$0xff]  ;;  %v35_v3 = vsel %vm33_vm0, %v21_v0, 0  ;;  %v18_v6 = vld [vmem:[%s125_s0 + $0x18] sm:$0xff] }
   0x3   :  { %v19_v4 = vpack.c.bf16 %v16_v2, %v15_v1  ;;  %44 = vmatpush.bf16.msra.mxu0 %v35_v3  ;;  %66 = vmatpush.bf16.msra.mxu1 %v35_v3  ;;  %v20_v7 = vpack.c.bf16 %v18_v6, %v17_v5  ;;  %v67_v8 = vld [vmem:[%s126_s2] ss:$0 sm:$0xff] }
   0x6   :  { %64 = vmatmul.msk.bf16.vlgmr.msra.gmra.mxu0 %vm26_vm1, %v19_v4  ;;  %65 = vmatmul.msk.bf16.vlgmr.msra.gmra.mxu1 %vm26_vm1, %v20_v7 }
  0x83   :  { %v46_v9 = vpop.f32.mrf.mxu0  ;;  %v51_v10 = vpop.f32.mrf.mxu1 }
  0x84   :  { %v47_v11 = vadd.f32 %v67_v8, %v46_v9  ;;  %v52_v12 = vadd.f32 %v67_v8, %v51_v10 }
  0x86   :  { %56 = vst.msk [vmem:[%s127_s3] sm:$0xff] %vm26_vm1, %v47_v11 }
  0x87   :  { %58 = vst.msk [vmem:[%s127_s3 + $0x10] sm:$0xff] %vm26_vm1, %v52_v12 }
  0x8b   :  { %v48_v13 = vpop.f32.mrf.mxu0  ;;  %v53_v14 = vpop.f32.mrf.mxu1 }
  0x8c   :  { %v49_v15 = vadd.f32 %v67_v8, %v48_v13  ;;  %v54_v16 = vadd.f32 %v67_v8, %v53_v14 }
  0x8e   :  { %57 = vst.msk [vmem:[%s127_s3 + $0x8] sm:$0xff] %vm26_vm1, %v49_v15 }
  0x8f   :  { %59 = vst.msk [vmem:[%s127_s3 + $0x18] sm:$0xff] %vm26_vm1, %v54_v16 }

// kernel: hybrid_conv_unet.36
= control target key start
LH: loop header
LB: loop body
LE: loop exit
PB: predicated region body
PF: predicated region fallthrough
CT: control target
= control target key end

     0   :  { %vm33_vm0 = vcmask 1042432   ;;  %vm26_vm1 = vcmask 48128   ;;  %s168_s1 = inlined_call_operand.vmem [shape: bf16[6,6], index: 1, kind: input, shape index: {}]   ;;  %s169_s0 = inlined_call_operand.vmem [shape: f32[32,6], index: 0, kind: input, shape index: {}]   ;;  %s170_s2 = inlined_call_operand.vmem [shape: f32[1,6], index: 2, kind: input, shape index: {}]   ;;  %s171_s3 = inlined_call_operand.vmem [shape: f32[32,6], index: 3, kind: output, shape index: {}]  }
   0x1   :  { %v21_v0 = vld [vmem:[%s168_s1] sm:$0x7]  ;;  %v16_v2 = vld [vmem:[%s169_s0 + $0x8] sm:$0xff]  ;;  %v17_v5 = vld [vmem:[%s169_s0 + $0x10] sm:$0xff] }
   0x2   :  { %v15_v1 = vld [vmem:[%s169_s0] sm:$0xff]  ;;  %v35_v3 = vsel %vm33_vm0, %v21_v0, 0  ;;  %v18_v6 = vld [vmem:[%s169_s0 + $0x18] sm:$0xff] }
   0x3   :  { %v19_v4 = vpack.c.bf16 %v16_v2, %v15_v1  ;;  %44 = vmatpush.bf16.msra.mxu0 %v35_v3  ;;  %102 = vmatpush.bf16.msra.mxu1 %v35_v3  ;;  %v20_v7 = vpack.c.bf16 %v18_v6, %v17_v5  ;;  %v103_v8 = vld [vmem:[%s170_s2] ss:$0 sm:$0xff] }
   0x6   :  { %100 = vmatmul.msk.bf16.vlgmr.msra.gmra.mxu0 %vm26_vm1, %v19_v4  ;;  %101 = vmatmul.msk.bf16.vlgmr.msra.gmra.mxu1 %vm26_vm1, %v20_v7 }
  0x83   :  { %v46_v9 = vpop.f32.mrf.mxu0  ;;  %v51_v10 = vpop.f32.mrf.mxu1 }
  0x84   :  { %v47_v11 = vadd.f32 %v103_v8, %v46_v9  ;;  %v52_v12 = vadd.f32 %v103_v8, %v51_v10 }
  0x86   :  { %v60_v13 = vmul.f32 0.044715, %v47_v11  ;;  %v62_v14 = vmul.f32 0.044715, %v52_v12  ;;  %v56_v37 = vmul.f32 0.5, %v47_v11  ;;  %v58_v41 = vmul.f32 0.5, %v52_v12 }
  0x88   :  { %v64_v15 = vmul.f32 %v60_v13, %v47_v11  ;;  %v66_v16 = vmul.f32 %v62_v14, %v52_v12 }
  0x8a   :  { %v68_v17 = vmul.f32 %v64_v15, %v47_v11  ;;  %v70_v18 = vmul.f32 %v66_v16, %v52_v12 }
  0x8b   :  { %v48_v19 = vpop.f32.mrf.mxu0  ;;  %v53_v20 = vpop.f32.mrf.mxu1 }
  0x8c   :  { %v72_v21 = vadd.f32 %v68_v17, %v47_v11  ;;  %v74_v22 = vadd.f32 %v70_v18, %v52_v12  ;;  %v49_v23 = vadd.f32 %v103_v8, %v48_v19  ;;  %v54_v24 = vadd.f32 %v103_v8, %v53_v20 }
  0x8e   :  { %v76_v25 = vmul.f32 0.7978846, %v72_v21  ;;  %v78_v26 = vmul.f32 0.7978846, %v74_v22  ;;  %v61_v27 = vmul.f32 0.044715, %v49_v23 }
  0x8f   :  { %v63_v28 = vmul.f32 0.044715, %v54_v24  ;;  %v57_v47 = vmul.f32 0.5, %v49_v23  ;;  %v59_v49 = vmul.f32 0.5, %v54_v24 }
  0x90   :  { %104 = vtanh.f32 %v76_v25  ;;  %v65_v29 = vmul.f32 %v61_v27, %v49_v23 }
  0x91   :  { %106 = vtanh.f32 %v78_v26  ;;  %v67_v30 = vmul.f32 %v63_v28, %v54_v24 }
  0x92   :  { %v69_v31 = vmul.f32 %v65_v29, %v49_v23 }
  0x93   :  { %v71_v32 = vmul.f32 %v67_v30, %v54_v24 }
  0x94   :  { %v73_v33 = vadd.f32 %v69_v31, %v49_v23 }
  0x95   :  { %v75_v34 = vadd.f32 %v71_v32, %v54_v24 }
  0x96   :  { %v105_v35 = vpop.eup %104  ;;  %v77_v39 = vmul.f32 0.7978846, %v73_v33 }
  0x97   :  { %v107_v36 = vpop.eup %106  ;;  %v84_v38 = vadd.f32 1.0, %v105_v35  ;;  %v79_v40 = vmul.f32 0.7978846, %v75_v34 }
  0x98   :  { %v86_v42 = vadd.f32 1.0, %v107_v36  ;;  %108 = vtanh.f32 %v77_v39 }
  0x99   :  { %v88_v43 = vmul.f32 %v84_v38, %v56_v37  ;;  %110 = vtanh.f32 %v79_v40 }
  0x9a   :  { %v90_v44 = vmul.f32 %v86_v42, %v58_v41 }
  0x9b   :  { %92 = vst.msk [vmem:[%s171_s3] sm:$0xff] %vm26_vm1, %v88_v43 }
  0x9c   :  { %94 = vst.msk [vmem:[%s171_s3 + $0x10] sm:$0xff] %vm26_vm1, %v90_v44 }
  0x9e   :  { %v109_v45 = vpop.eup %108 }
  0x9f   :  { %v111_v46 = vpop.eup %110  ;;  %v85_v48 = vadd.f32 1.0, %v109_v45 }
  0xa0   :  { %v87_v50 = vadd.f32 1.0, %v111_v46 }
  0xa1   :  { %v89_v51 = vmul.f32 %v85_v48, %v57_v47 }
  0xa2   :  { %v91_v52 = vmul.f32 %v87_v50, %v59_v49 }
  0xa3   :  { %93 = vst.msk [vmem:[%s171_s3 + $0x8] sm:$0xff] %vm26_vm1, %v89_v51 }
  0xa4   :  { %95 = vst.msk [vmem:[%s171_s3 + $0x18] sm:$0xff] %vm26_vm1, %v91_v52 }

// kernel: hybrid_conv_unet.37
= control target key start
LH: loop header
LB: loop body
LE: loop exit
PB: predicated region body
PF: predicated region fallthrough
CT: control target
= control target key end

     0   :  { %vm29_vm0 = vcmask 48128   ;;  %v162_v16 = vmov 6.0   ;;  %s262_s0 = inlined_call_operand.vmem [shape: f32[32,6], index: 0, kind: input, shape index: {}]   ;;  %s263_s1 = inlined_call_operand.vmem [shape: f32[32,6], index: 1, kind: input, shape index: {}]   ;;  %s264_s2 = inlined_call_operand.vmem [shape: f32[1,6], index: 2, kind: input, shape index: {}]   ;;  %s265_s3 = inlined_call_operand.vmem [shape: f32[1,6], index: 3, kind: input, shape index: {}]   ;;  %s266_s4 = inlined_call_operand.vmem [shape: f32[32,6], index: 4, kind: output, shape index: {}]  }
   0x1   :  { %v19_v0 = vld [vmem:[%s262_s0 + $0x10] sm:$0xff]  ;;  %v17_v2 = vld [vmem:[%s262_s0] sm:$0xff]  ;;  %v20_v6 = vld [vmem:[%s262_s0 + $0x18] sm:$0xff]  ;;  %152 = vrcp.f32 %v162_v16 }
   0x2   :  { %v23_v1 = vld [vmem:[%s263_s1 + $0x10] sm:$0xff]  ;;  %v21_v4 = vld [vmem:[%s263_s1] sm:$0xff]  ;;  %v24_v7 = vld [vmem:[%s263_s1 + $0x18] sm:$0xff] }
   0x3   :  { %v27_v3 = vadd.f32 %v23_v1, %v19_v0  ;;  %v25_v5 = vadd.f32 %v21_v4, %v17_v2  ;;  %v18_v9 = vld [vmem:[%s262_s0 + $0x8] sm:$0xff]  ;;  %v28_v12 = vadd.f32 %v24_v7, %v20_v6 }
   0x4   :  { %v22_v10 = vld [vmem:[%s263_s1 + $0x8] sm:$0xff] }
   0x5   :  { %v36_v8 = vsel %vm29_vm0, %v27_v3, 0.0  ;;  %v30_v11 = vsel %vm29_vm0, %v25_v5, 0.0  ;;  %v26_v13 = vadd.f32 %v22_v10, %v18_v9  ;;  %v39_v14 = vsel %vm29_vm0, %v28_v12, 0.0  ;;  %v151_v10 = vld [vmem:[%s265_s3] ss:$0 sm:$0xff] }
   0x6   :  { %37 = vadd.xlane.f32.xlu1 %v36_v8  ;;  %31 = vadd.xlane.f32.xlu0 %v30_v11 }
   0x7   :  { %v33_v15 = vsel %vm29_vm0, %v26_v13, 0.0  ;;  %v153_v17 = vpop.eup %152 }
   0x8   :  { %v43_v18 = vmul.f32 6.0, %v153_v17  ;;  %vm47_vm1 = vweird.f32 %v153_v17 }
   0xa   :  { %v44_v19 = vsub.f32 1.0, %v43_v18 }
   0xc   :  { %v45_v20 = vmul.f32 %v153_v17, %v44_v19 }
   0xe   :  { %40 = vadd.xlane.f32.xlu1 %v39_v14  ;;  %34 = vadd.xlane.f32.xlu0 %v33_v15  ;;  %v46_v21 = vadd.f32 %v153_v17, %v45_v20 }
  0x10   :  { %v48_v22 = vsel %vm47_vm1, %v153_v17, %v46_v21 }
  0x79   :  { %v38_v23 = vpop.xlane.xlu1 %37  ;;  %v32_v25 = vpop.xlane.xlu0 %31 }
  0x7a   :  { %v51_v24 = vmul.f32 %v48_v22, %v38_v23  ;;  %v49_v26 = vmul.f32 %v48_v22, %v32_v25 }
  0x7c   :  { %v216_v27 = vsub.f32 %v27_v3, %v51_v24  ;;  %v218_v28 = vsub.f32 %v25_v5, %v49_v26  ;;  %v150_v5 = vld [vmem:[%s264_s2] ss:$0 sm:$0xff] }
  0x7e   :  { %v59_v29 = vmul.f32 %v216_v27, %v216_v27  ;;  %v57_v30 = vmul.f32 %v218_v28, %v218_v28 }
  0x80   :  { %v67_v31 = vsel %vm29_vm0, %v59_v29, 0.0  ;;  %v61_v33 = vsel %vm29_vm0, %v57_v30, 0.0 }
  0x81   :  { %v41_v32 = vpop.xlane.xlu1 %40  ;;  %68 = vadd.xlane.f32.xlu0 %v67_v31  ;;  %62 = vadd.xlane.f32.xlu2 %v61_v33  ;;  %v35_v35 = vpop.xlane.xlu0 %34 }
  0x82   :  { %v52_v34 = vmul.f32 %v48_v22, %v41_v32  ;;  %v50_v36 = vmul.f32 %v48_v22, %v35_v35 }
  0x84   :  { %v226_v37 = vsub.f32 %v28_v12, %v52_v34  ;;  %v228_v38 = vsub.f32 %v26_v13, %v50_v36 }
  0x86   :  { %v60_v39 = vmul.f32 %v226_v37, %v226_v37  ;;  %v58_v40 = vmul.f32 %v228_v38, %v228_v38 }
  0x88   :  { %v70_v41 = vsel %vm29_vm0, %v60_v39, 0.0  ;;  %v64_v42 = vsel %vm29_vm0, %v58_v40, 0.0 }
  0x89   :  { %71 = vadd.xlane.f32.xlu1 %v70_v41  ;;  %65 = vadd.xlane.f32.xlu2 %v64_v42 }
  0xf4   :  { %v69_v43 = vpop.xlane.xlu0 %68  ;;  %v63_v44 = vpop.xlane.xlu2 %62 }
  0xf5   :  { %v75_v45 = vmul.f32 %v69_v43, %v48_v22  ;;  %v73_v46 = vmul.f32 %v63_v44, %v48_v22 }
  0xf7   :  { %v79_v47 = vadd.f32 1e-05, %v75_v45  ;;  %v77_v48 = vadd.f32 1e-05, %v73_v46 }
  0xf9   :  { %154 = vrsqrt.f32 %v79_v47  ;;  %vm107_vm4 = vweird.f32 %v79_v47  ;;  %vm87_vm5 = vweird.f32 %v77_v48 }
  0xfa   :  { %156 = vrsqrt.f32 %v77_v48 }
  0xfc   :  { %v72_v49 = vpop.xlane.xlu1 %71  ;;  %v66_v51 = vpop.xlane.xlu2 %65 }
  0xfd   :  { %v76_v50 = vmul.f32 %v72_v49, %v48_v22  ;;  %v74_v52 = vmul.f32 %v66_v51, %v48_v22 }
  0xff   :  { %v155_v53 = vpop.eup %154  ;;  %v80_v54 = vadd.f32 1e-05, %v76_v50  ;;  %v78_v57 = vadd.f32 1e-05, %v74_v52 }
 0x100   :  { %v157_v55 = vpop.eup %156  ;;  %v102_v56 = vmul.f32 %v155_v53, %v79_v47  ;;  %vm108_vm2 = vweird.f32 %v155_v53 }
 0x101   :  { %v82_v58 = vmul.f32 %v157_v55, %v77_v48  ;;  %158 = vrsqrt.f32 %v80_v54  ;;  %vm88_vm3 = vweird.f32 %v157_v55  ;;  %vm109_vm6 = vmor %vm107_vm4, %vm108_vm2  ;;  %vm117_vm10 = vweird.f32 %v80_v54 }
 0x102   :  { %v103_v59 = vmul.f32 %v155_v53, %v102_v56  ;;  %160 = vrsqrt.f32 %v78_v57  ;;  %vm89_vm7 = vmor %vm87_vm5, %vm88_vm3  ;;  %vm97_vm12 = vweird.f32 %v78_v57 }
 0x103   :  { %v83_v60 = vmul.f32 %v157_v55, %v82_v58 }
 0x104   :  { %v104_v61 = vmul.f32 0.5, %v103_v59 }
 0x105   :  { %v84_v62 = vmul.f32 0.5, %v83_v60 }
 0x106   :  { %v105_v63 = vsub.f32 1.5, %v104_v61 }
 0x107   :  { %v159_v0 = vpop.eup %158  ;;  %v85_v1 = vsub.f32 1.5, %v84_v62 }
 0x108   :  { %v161_v2 = vpop.eup %160  ;;  %v106_v3 = vmul.f32 %v155_v53, %v105_v63  ;;  %v112_v4 = vmul.f32 %v159_v0, %v80_v54  ;;  %vm118_vm8 = vweird.f32 %v159_v0 }
 0x109   :  { %v86_v6 = vmul.f32 %v157_v55, %v85_v1  ;;  %v92_v7 = vmul.f32 %v161_v2, %v78_v57  ;;  %vm98_vm9 = vweird.f32 %v161_v2  ;;  %vm119_vm11 = vmor %vm117_vm10, %vm118_vm8 }
 0x10a   :  { %v110_v8 = vsel %vm109_vm6, %v155_v53, %v106_v3  ;;  %v113_v9 = vmul.f32 %v159_v0, %v112_v4  ;;  %vm99_vm13 = vmor %vm97_vm12, %vm98_vm9 }
 0x10b   :  { %v90_v11 = vsel %vm89_vm7, %v157_v55, %v86_v6  ;;  %v123_v12 = vmul.f32 %v110_v8, %v216_v27  ;;  %v93_v13 = vmul.f32 %v161_v2, %v92_v7 }
 0x10c   :  { %v121_v14 = vmul.f32 %v90_v11, %v218_v28  ;;  %v114_v15 = vmul.f32 0.5, %v113_v9 }
 0x10d   :  { %v131_v16 = vmul.f32 %v150_v5, %v123_v12  ;;  %v94_v17 = vmul.f32 0.5, %v93_v13 }
 0x10e   :  { %v129_v18 = vmul.f32 %v150_v5, %v121_v14  ;;  %v115_v19 = vsub.f32 1.5, %v114_v15 }
 0x10f   :  { %v139_v20 = vadd.f32 %v151_v10, %v131_v16  ;;  %v95_v21 = vsub.f32 1.5, %v94_v17 }
 0x110   :  { %v137_v22 = vadd.f32 %v151_v10, %v129_v18  ;;  %v116_v23 = vmul.f32 %v159_v0, %v115_v19 }
 0x111   :  { %143 = vst.msk [vmem:[%s266_s4 + $0x10] sm:$0xff] %vm29_vm0, %v139_v20  ;;  %v96_v24 = vmul.f32 %v161_v2, %v95_v21 }
 0x112   :  { %141 = vst.msk [vmem:[%s266_s4] sm:$0xff] %vm29_vm0, %v137_v22  ;;  %v120_v25 = vsel %vm119_vm11, %v159_v0, %v116_v23 }
 0x113   :  { %v124_v26 = vmul.f32 %v120_v25, %v226_v37  ;;  %v100_v27 = vsel %vm99_vm13, %v161_v2, %v96_v24 }
 0x114   :  { %v122_v28 = vmul.f32 %v100_v27, %v228_v38 }
 0x115   :  { %v132_v29 = vmul.f32 %v150_v5, %v124_v26 }
 0x116   :  { %v130_v30 = vmul.f32 %v150_v5, %v122_v28 }
 0x117   :  { %v140_v31 = vadd.f32 %v151_v10, %v132_v29 }
 0x118   :  { %v138_v32 = vadd.f32 %v151_v10, %v130_v30 }
 0x119   :  { %144 = vst.msk [vmem:[%s266_s4 + $0x18] sm:$0xff] %vm29_vm0, %v140_v31 }
 0x11a   :  { %142 = vst.msk [vmem:[%s266_s4 + $0x8] sm:$0xff] %vm29_vm0, %v138_v32 }

// kernel: hybrid_conv_unet.38
= control target key start
LH: loop header
LB: loop body
LE: loop exit
PB: predicated region body
PF: predicated region fallthrough
CT: control target
= control target key end

     0   :  { %vm51_vm0 = vcmask 1045504   ;;  %vm38_vm1 = vcmask 97280   ;;  %vm84_vm2 = vcmask 31744   ;;  %s195_s1 = inlined_call_operand.vmem [shape: bf16[12,4], index: 1, kind: input, shape index: {}]   ;;  %s196_s0 = inlined_call_operand.vmem [shape: f32[64,12], index: 0, kind: input, shape index: {}]   ;;  %s197_s2 = inlined_call_operand.vmem [shape: f32[1,4], index: 2, kind: input, shape index: {}]   ;;  %s198_s3 = inlined_call_operand.vmem [shape: f32[64,4], index: 3, kind: output, shape index: {}]  }
   0x1   :  { %v99_v0 = vld [vmem:[%s195_s1] sm:$0xf]  ;;  %v105_v1 = vld [vmem:[%s195_s1] sm:$0x30]  ;;  %v16_v4 = vld [vmem:[%s196_s0 + $0x8] sm:$0xff] }
   0x2   :  { %v15_v2 = vld [vmem:[%s196_s0] sm:$0xff]  ;;  %v100_v3 = vor.u32 %v105_v1, %v99_v0  ;;  %v17_v5 = vld [vmem:[%s196_s0 + $0x10] sm:$0xff]  ;;  %v18_v6 = vld [vmem:[%s196_s0 + $0x18] sm:$0xff] }
   0x3   :  { %v19_v7 = vld [vmem:[%s196_s0 + $0x20] sm:$0xff]  ;;  %v20_v8 = vld [vmem:[%s196_s0 + $0x28] sm:$0xff]  ;;  %v21_v9 = vld [vmem:[%s196_s0 + $0x30] sm:$0xff]  ;;  %v23_v11 = vpack.c.bf16 %v16_v4, %v15_v2  ;;  %v24_v12 = vpack.c.bf16 %v18_v6, %v17_v5 }
   0x4   :  { %v53_v10 = vsel %vm51_vm0, %v100_v3, 0  ;;  %v22_v13 = vld [vmem:[%s196_s0 + $0x38] sm:$0xff]  ;;  %v25_v14 = vpack.c.bf16 %v20_v8, %v19_v7  ;;  %v109_v16 = vld [vmem:[%s197_s2] ss:$0 sm:$0xff] }
   0x5   :  { %62 = vmatpush.bf16.msra.mxu0 %v53_v10  ;;  %106 = vmatpush.bf16.msra.mxu1 %v53_v10  ;;  %v26_v15 = vpack.c.bf16 %v22_v13, %v21_v9 }
   0x6   :  { %107 = vmatpush.bf16.msra.mxu2 %v53_v10  ;;  %108 = vmatpush.bf16.msra.mxu3 %v53_v10 }
   0x8   :  { %101 = vmatmul.msk.bf16.vlgmr.msra.gmra.mxu0 %vm38_vm1, %v23_v11  ;;  %102 = vmatmul.msk.bf16.vlgmr.msra.gmra.mxu1 %vm38_vm1, %v24_v12 }
   0x9   :  { %103 = vmatmul.msk.bf16.vlgmr.msra.gmra.mxu2 %vm38_vm1, %v25_v14  ;;  %104 = vmatmul.msk.bf16.vlgmr.msra.gmra.mxu3 %vm38_vm1, %v26_v15 }
  0x85   :  { %v64_v17 = vpop.f32.mrf.mxu0  ;;  %v69_v18 = vpop.f32.mrf.mxu1 }
  0x86   :  { %v65_v19 = vadd.f32 %v109_v16, %v64_v17  ;;  %v70_v20 = vadd.f32 %v109_v16, %v69_v18 }
  0x88   :  { %85 = vst.msk [vmem:[%s198_s3] sm:$0xff] %vm84_vm2, %v65_v19 }
  0x89   :  { %87 = vst.msk [vmem:[%s198_s3 + $0x10] sm:$0xff] %vm84_vm2, %v70_v20 }
  0x8c   :  { %v74_v21 = vpop.f32.mrf.mxu2  ;;  %v79_v22 = vpop.f32.mrf.mxu3 }
  0x8d   :  { %v75_v23 = vadd.f32 %v109_v16, %v74_v21  ;;  %v80_v24 = vadd.f32 %v109_v16, %v79_v22  ;;  %v66_v25 = vpop.f32.mrf.mxu0  ;;  %v71_v26 = vpop.f32.mrf.mxu1 }
  0x8e   :  { %v67_v27 = vadd.f32 %v109_v16, %v66_v25  ;;  %v72_v28 = vadd.f32 %v109_v16, %v71_v26 }
  0x8f   :  { %89 = vst.msk [vmem:[%s198_s3 + $0x20] sm:$0xff] %vm84_vm2, %v75_v23 }
  0x90   :  { %91 = vst.msk [vmem:[%s198_s3 + $0x30] sm:$0xff] %vm84_vm2, %v80_v24 }
  0x91   :  { %86 = vst.msk [vmem:[%s198_s3 + $0x8] sm:$0xff] %vm84_vm2, %v67_v27 }
  0x92   :  { %88 = vst.msk [vmem:[%s198_s3 + $0x18] sm:$0xff] %vm84_vm2, %v72_v28 }
  0x94   :  { %v76_v29 = vpop.f32.mrf.mxu2  ;;  %v81_v30 = vpop.f32.mrf.mxu3 }
  0x95   :  { %v77_v31 = vadd.f32 %v109_v16, %v76_v29  ;;  %v82_v32 = vadd.f32 %v109_v16, %v81_v30 }
  0x97   :  { %90 = vst.msk [vmem:[%s198_s3 + $0x28] sm:$0xff] %vm84_vm2, %v77_v31 }
  0x98   :  { %92 = vst.msk [vmem:[%s198_s3 + $0x38] sm:$0xff] %vm84_vm2, %v82_v32 }

// kernel: hybrid_conv_unet.39
= control target key start
LH: loop header
LB: loop body
LE: loop exit
PB: predicated region body
PF: predicated region fallthrough
CT: control target
= control target key end

     0   :  { %s793_s18 = smov 0   ;;  %s888_s0 = inlined_call_operand.vmem [shape: f32[2,36,12], index: 0, kind: input, shape index: {}]   ;;  %s889_s1 = inlined_call_operand.vmem [shape: bf16[5,12,24], index: 1, kind: input, shape index: {}]   ;;  %s890_s2 = inlined_call_operand.vmem [shape: f32[1,24], index: 2, kind: input, shape index: {}]   ;;  %s891_s3 = inlined_call_operand.vmem [shape: f32[1,24], index: 3, kind: input, shape index: {}]   ;;  %s892_s4 = inlined_call_operand.vmem [shape: f32[1,24], index: 4, kind: input, shape index: {}]   ;;  %s893_s5 = inlined_call_operand.vmem [shape: f32[2,32,24], index: 5, kind: output, shape index: {}]  }
   0x1 LB: > { %s674_s19 = sadd.s32 4294967295, %s760_s18   ;;  %p678_p0 = scmp.ge.s32.totalorder %s760_s18, 1  ;;  %s760_s18 = sphi %s793_s18, %s15_s18  }
   0x2   : > { %p187_p1 = scmp.lt.s32.totalorder %s760_s18, 3 }
   0x4   : > { %p188_p2 = pnand %p678_p0, %p187_p1 }
   0x5   : > { %p215_p3 = scmp.lt.s32.totalorder (!%p188_p2), %s674_s19, 1 }
   0x6   : > { %191 = sbr.rel (%p188_p2) target bundleno = 529 (0x211), region = 40 }
   0xb   : > { %v684_v0 = vld [vmem:[%s889_s1] sm:$0xf]  ;;  %v723_v1 = vld [vmem:[%s889_s1] sm:$0x30]  ;;  %vm252_vm0 = vcmask 1045504   ;;  %s895_s19 = smov (!%p215_p3, %s674_s19), 1 }
   0xc   : > { %v685_v2 = vor.u32 %v723_v1, %v684_v0  ;;  %v692_v3 = vld [vmem:[%s889_s1 + $0x8] sm:$0xf]  ;;  %v724_v4 = vld [vmem:[%s889_s1 + $0x8] sm:$0x30]  ;;  %v700_v6 = vld [vmem:[%s889_s1 + $0x10] sm:$0xf] }
   0xd   : > { %v693_v5 = vor.u32 %v724_v4, %v692_v3  ;;  %v725_v7 = vld [vmem:[%s889_s1 + $0x10] sm:$0x30]  ;;  %v708_v10 = vld [vmem:[%s889_s1 + $0x18] sm:$0xf]  ;;  %v726_v11 = vld [vmem:[%s889_s1 + $0x18] sm:$0x30] }
   0xe   : > { %v254_v8 = vsel %vm252_vm0, %v685_v2, 0  ;;  %v701_v9 = vor.u32 %v725_v7, %v700_v6  ;;  %s729_s11 = smul.u32 40, %s895_s19  ;;  %v709_v13 = vor.u32 %v726_v11, %v708_v10  ;;  %v716_v14 = vld [vmem:[%s889_s1 + $0x20] sm:$0xf]  ;;  %v727_v16 = vld [vmem:[%s889_s1 + $0x20] sm:$0x30] }
   0xf   : > { %263 = vmatpush.bf16.msra.mxu0 %v254_v8  ;;  %728 = vmatpush.bf16.msra.mxu1 %v254_v8  ;;  %v314_v12 = vsel %vm252_vm0, %v693_v5, 0  ;;  %v717_v18 = vor.u32 %v727_v16, %v716_v14  ;;  %vm245_vm1 = vcmask 97280   ;;  %vm345_vm2 = vcmask 1046528   ;;  %v739_v3 = vld [vmem:[%s890_s2] ss:$0 sm:$0xff]  ;;  %s722_s27 = sshll.u32 %s895_s19, 5 }
  0x10   : > { %v363_v15 = vsel %vm252_vm0, %v701_v9, 0  ;;  %s219_s20 = scalar_lea.vmem %s888_s0, %s729_s11  ;;  %v417_v17 = vsel %vm252_vm0, %v709_v13, 0  ;;  %vm391_vm3 = vsmask.f32 6400  ;;  %vm283_vm4 = vsmask.f32 7424  ;;  %s224_s30 = scalar_lea.vmem %s893_s5, %s722_s27 }
  0x11   : > { %372 = vmatpush.bf16.msra.mxu2 %v363_v15  ;;  %v226_v19 = vld [vmem:[%s219_s20] sm:$0xff]  ;;  %v227_v20 = vld [vmem:[%s219_s20 + $0x8] sm:$0xff]  ;;  %v228_v21 = vld [vmem:[%s219_s20 + $0x10] sm:$0xff]  ;;  %426 = vmatpush.bf16.msra.mxu3 %v417_v17  ;;  %v463_v24 = vsel %vm252_vm0, %v717_v18, 0  ;;  %vm488_vm5 = vcmask 195584  }
  0x12   : > { %v236_v22 = vpack.c.bf16 %v227_v20, %v226_v19  ;;  %v229_v23 = vld [vmem:[%s219_s20 + $0x18] sm:$0xff]  ;;  %v230_v34 = vld [vmem:[%s219_s20 + $0x20] sm:$0xf] }
  0x13   : > { %323 = vmatpush.bf16.msrb.mxu1 %v314_v12  ;;  %v237_v25 = vpack.c.bf16 %v229_v23, %v228_v21  ;;  %472 = vmatpush.bf16.msrb.mxu0 %v463_v24  ;;  %v279_v40 = vpack.c.bf16 %v230_v34, %v230_v34 }
  0x14   : > { %686 = vmatmul.msk.bf16.vlgmr.msra.gmra.mxu0 %vm245_vm1, %v236_v22  ;;  %v346_v26 = vrot.slane %v236_v22, 1  ;;  %v284_v27 = vshrl.u32 %v236_v22, 16  ;;  %v286_v28 = vshll.u32 %v236_v22, 16  ;;  %v446_v43 = vrot.slane %v236_v22, 2 }
  0x15   : > { %687 = vmatmul.msk.bf16.vlgmr.msra.gmra.mxu1 %vm245_vm1, %v237_v25  ;;  %v347_v29 = vrot.slane %v237_v25, 1  ;;  %v290_v30 = vshll.u32 %v237_v25, 16  ;;  %v294_v31 = vshrl.u32 %v237_v25, 16  ;;  %v447_v44 = vrot.slane %v237_v25, 2 }
  0x16   : > { %v392_v32 = vrot.slane %v284_v27, 1  ;;  %v393_v33 = vrot.slane %v286_v28, 2  ;;  %v288_v41 = vrot.slane %v286_v28, 1  ;;  %v298_v45 = vshll.u32 %v279_v40, 16 }
  0x17   : > { %v348_v35 = vsel %vm345_vm2, %v346_v26, %v347_v29  ;;  %v395_v36 = vrot.slane %v294_v31, 1  ;;  %v396_v37 = vrot.slane %v290_v30, 2  ;;  %v399_v46 = vshrl.u32 %v279_v40, 16 }
  0x18   : > { %702 = vmatmul.msk.bf16.vlgmr.msra.gmra.mxu2 %vm245_vm1, %v348_v35  ;;  %v394_v38 = vor.u32 %v393_v33, %v392_v32  ;;  %v289_v47 = vor.u32 %v288_v41, %v284_v27  ;;  %v292_v48 = vrot.slane %v290_v30, 1  ;;  %v448_v49 = vsel %vm252_vm0, %v446_v43, %v447_v44 }
  0x19   : > { %v397_v39 = vor.u32 %v396_v37, %v395_v36  ;;  %v349_v50 = vrot.slane %v279_v40, 1  ;;  %v401_v51 = vrot.slane %v399_v46, 1  ;;  %v402_v52 = vrot.slane %v298_v45, 2 }
  0x1a   : > { %v293_v53 = vsel %vm283_vm4, %v289_v47, %v292_v48  ;;  %v449_v57 = vrot.slane %v279_v40, 2  ;;  %v296_v58 = vor.u32 %v294_v31, %v292_v48  ;;  %v300_v59 = vrot.slane %v298_v45, 1 }
  0x1b   : > { %v398_v42 = vsel %vm391_vm3, %v394_v38, %v397_v39  ;;  %v350_v54 = vsel %vm345_vm2, %v347_v29, %v349_v50  ;;  %v403_v55 = vor.u32 %v402_v52, %v401_v51 }
  0x1c   : > { %710 = vmatmul.msk.bf16.vlgmr.msra.gmra.mxu3 %vm245_vm1, %v398_v42  ;;  %v450_v60 = vsel %vm252_vm0, %v447_v44, %v449_v57  ;;  %v301_v61 = vsel %vm283_vm4, %v296_v58, %v300_v59  ;;  %v762_v44 = vmov 768.0  }
  0x1d   : > { %v404_v56 = vsel %vm391_vm3, %v397_v39, %v403_v55  ;;  %742 = vrcp.f32 %v762_v44 }
  0x23   : > { %v743_v46 = vpop.eup %742 }
  0x24   : > { %718 = vmatmul.msk.bf16.vlgmr.msrb.gmra.mxu0 %vm245_vm1, %v448_v49  ;;  %v511_v48 = vmul.f32 768.0, %v743_v46  ;;  %vm515_vm6 = vweird.f32 %v743_v46 }
  0x25   : > { %694 = vmatmul.msk.bf16.vlgmr.msrb.gmra.mxu1 %vm245_vm1, %v293_v53 }
  0x26   : > { %v512_v51 = vsub.f32 1.0, %v511_v48 }
  0x28   : > { %703 = vmatmul.msk.bf16.gmra.mxu2 %vm245_vm1, %v350_v54  ;;  %v513_v55 = vmul.f32 %v743_v46, %v512_v51 }
  0x2a   : > { %v514_v58 = vadd.f32 %v743_v46, %v513_v55 }
  0x2c   : > { %711 = vmatmul.msk.bf16.gmra.mxu3 %vm245_vm1, %v404_v56 }
  0x34   : > { %719 = vmatmul.msk.bf16.gmra.mxu0 %vm245_vm1, %v450_v60 }
  0x35   : > { %695 = vmatmul.msk.bf16.gmra.mxu1 %vm245_vm1, %v301_v61  ;;  %v516_v61 = vsel %vm515_vm6, %v743_v46, %v514_v58 }
  0x91   : > { %v265_v62 = vpop.f32.mrf.mxu0 }
  0x92   : > { %v270_v63 = vpop.f32.mrf.mxu1  ;;  %v275_v5 = vadd.f32 %v739_v3, %v265_v62 }
  0x93   : > { %v277_v21 = vadd.f32 %v739_v3, %v270_v63 }
  0x99   : > { %v267_v0 = vpop.f32.mrf.mxu0 }
  0x9a   : > { %v272_v1 = vpop.f32.mrf.mxu1  ;;  %v276_v12 = vadd.f32 %v739_v3, %v267_v0 }
  0x9b   : > { %v374_v2 = vpop.f32.mrf.mxu2  ;;  %v278_v31 = vadd.f32 %v739_v3, %v272_v1 }
  0x9f   : > { %v428_v4 = vpop.f32.mrf.mxu3 }
  0xa1   : > { %v474_v7 = vpop.f32.mrf.mxu0 }
  0xa2   : > { %v325_v6 = vpop.f32.mrf.mxu1 }
  0xa3   : > { %v335_v8 = vadd.f32 %v325_v6, %v275_v5  ;;  %v376_v11 = vpop.f32.mrf.mxu2 }
  0xa5   : > { %v384_v9 = vadd.f32 %v374_v2, %v335_v8 }
  0xa7   : > { %v438_v10 = vadd.f32 %v428_v4, %v384_v9  ;;  %v430_v14 = vpop.f32.mrf.mxu3 }
  0xa9   : > { %v484_v13 = vadd.f32 %v474_v7, %v438_v10  ;;  %v476_v18 = vpop.f32.mrf.mxu0 }
  0xaa   : > { %v327_v15 = vpop.f32.mrf.mxu1 }
  0xab   : > { %v336_v16 = vadd.f32 %v327_v15, %v276_v12  ;;  %v489_v17 = vsel %vm488_vm5, %v484_v13, 0.0  ;;  %v379_v23 = vpop.f32.mrf.mxu2 }
  0xac   : > { %490 = vadd.xlane.f32.xlu0 %v489_v17 }
  0xad   : > { %v385_v19 = vadd.f32 %v376_v11, %v336_v16 }
  0xaf   : > { %v439_v20 = vadd.f32 %v430_v14, %v385_v19  ;;  %v433_v27 = vpop.f32.mrf.mxu3 }
  0xb1   : > { %v485_v22 = vadd.f32 %v476_v18, %v439_v20  ;;  %v479_v29 = vpop.f32.mrf.mxu0 }
  0xb2   : > { %v330_v24 = vpop.f32.mrf.mxu1 }
  0xb3   : > { %v337_v25 = vadd.f32 %v330_v24, %v277_v21  ;;  %v492_v26 = vsel %vm488_vm5, %v485_v22, 0.0  ;;  %v381_v36 = vpop.f32.mrf.mxu2 }
  0xb4   : > { %493 = vadd.xlane.f32.xlu0 %v492_v26 }
  0xb5   : > { %v386_v28 = vadd.f32 %v379_v23, %v337_v25 }
  0xb7   : > { %v440_v30 = vadd.f32 %v433_v27, %v386_v28  ;;  %v435_v38 = vpop.f32.mrf.mxu3 }
  0xb9   : > { %v486_v32 = vadd.f32 %v479_v29, %v440_v30  ;;  %v481_v40 = vpop.f32.mrf.mxu0 }
  0xba   : > { %v332_v33 = vpop.f32.mrf.mxu1 }
  0xbb   : > { %v338_v34 = vadd.f32 %v332_v33, %v278_v31  ;;  %v495_v35 = vsel %vm488_vm5, %v486_v32, 0.0  ;;  %v740_v33 = vld [vmem:[%s891_s3] ss:$0 sm:$0xff] }
  0xbc   : > { %496 = vadd.xlane.f32.xlu1 %v495_v35  ;;  %v741_v35 = vld [vmem:[%s892_s4] ss:$0 sm:$0xff] }
  0xbd   : > { %v387_v37 = vadd.f32 %v381_v36, %v338_v34 }
  0xbf   : > { %v441_v39 = vadd.f32 %v435_v38, %v387_v37 }
  0xc1   : > { %v487_v41 = vadd.f32 %v481_v40, %v441_v39 }
  0xc3   : > { %v498_v42 = vsel %vm488_vm5, %v487_v41, 0.0 }
  0xc4   : > { %499 = vadd.xlane.f32.xlu1 %v498_v42 }
 0x11f   : > { %v491_v43 = vpop.xlane.xlu0 %490 }
 0x127   : > { %v494_v47 = vpop.xlane.xlu0 %493 }
 0x128   : > { %v501_v49 = vadd.f32 %v494_v47, %v491_v43 }
 0x12f   : > { %v497_v45 = vpop.xlane.xlu1 %496 }
 0x130   : > { %v502_v50 = vadd.f32 %v501_v49, %v497_v45 }
 0x137   : > { %v500_v52 = vpop.xlane.xlu1 %499 }
 0x138   : > { %v503_v53 = vadd.f32 %v502_v50, %v500_v52 }
 0x13a   : > { %v504_v54 = vrot.slane %v503_v53, 4 }
 0x13c   : > { %v505_v56 = vadd.f32 %v504_v54, %v503_v53 }
 0x13e   : > { %v506_v57 = vrot.slane %v505_v56, 2 }
 0x140   : > { %v507_v59 = vadd.f32 %v506_v57, %v505_v56 }
 0x142   : > { %v508_v60 = vrot.slane %v507_v59, 1 }
 0x144   : > { %v509_v62 = vadd.f32 %v508_v60, %v507_v59 }
 0x146   : > { %v517_v63 = vmul.f32 %v516_v61, %v509_v62 }
 0x148   : > { %v521_v0 = vsub.f32 %v487_v41, %v517_v63  ;;  %v520_v1 = vsub.f32 %v486_v32, %v517_v63  ;;  %v518_v2 = vsub.f32 %v484_v13, %v517_v63  ;;  %v519_v9 = vsub.f32 %v485_v22, %v517_v63 }
 0x14a   : > { %v525_v3 = vmul.f32 %v521_v0, %v521_v0  ;;  %v524_v4 = vmul.f32 %v520_v1, %v520_v1  ;;  %v522_v5 = vmul.f32 %v518_v2, %v518_v2  ;;  %v523_v10 = vmul.f32 %v519_v9, %v519_v9 }
 0x14c   : > { %v535_v6 = vsel %vm488_vm5, %v525_v3, 0.0  ;;  %v532_v7 = vsel %vm488_vm5, %v524_v4, 0.0  ;;  %v526_v8 = vsel %vm488_vm5, %v522_v5, 0.0  ;;  %v529_v11 = vsel %vm488_vm5, %v523_v10, 0.0 }
 0x14d   : > { %536 = vadd.xlane.f32.xlu1 %v535_v6  ;;  %533 = vadd.xlane.f32.xlu0 %v532_v7 }
 0x14e   : > { %527 = vadd.xlane.f32.xlu2 %v526_v8 }
 0x156   : > { %530 = vadd.xlane.f32.xlu2 %v529_v11 }
 0x1c0   : > { %v534_v15 = vpop.xlane.xlu0 %533  ;;  %v537_v17 = vpop.xlane.xlu1 %536 }
 0x1c1   : > { %v528_v12 = vpop.xlane.xlu2 %527 }
 0x1c9   : > { %v531_v14 = vpop.xlane.xlu2 %530 }
 0x1ca   : > { %v538_v13 = vadd.f32 %v531_v14, %v528_v12 }
 0x1cc   : > { %v539_v16 = vadd.f32 %v538_v13, %v534_v15 }
 0x1ce   : > { %v540_v18 = vadd.f32 %v539_v16, %v537_v17 }
 0x1d0   : > { %v541_v19 = vrot.slane %v540_v18, 4 }
 0x1d2   : > { %v542_v20 = vadd.f32 %v541_v19, %v540_v18 }
 0x1d4   : > { %v543_v21 = vrot.slane %v542_v20, 2 }
 0x1d6   : > { %v544_v23 = vadd.f32 %v543_v21, %v542_v20 }
 0x1d8   : > { %v545_v24 = vrot.slane %v544_v23, 1 }
 0x1da   : > { %v546_v25 = vadd.f32 %v545_v24, %v544_v23 }
 0x1dc   : > { %v547_v26 = vmul.f32 %v546_v25, %v516_v61 }
 0x1de   : > { %v548_v22 = vadd.f32 1e-05, %v547_v26 }
 0x1e0   : > { %744 = vrsqrt.f32 %v548_v22  ;;  %vm555_vm8 = vweird.f32 %v548_v22 }
 0x1e6   : > { %v745_v27 = vpop.eup %744 }
 0x1e7   : > { %v550_v28 = vmul.f32 %v745_v27, %v548_v22  ;;  %vm556_vm7 = vweird.f32 %v745_v27 }
 0x1e8   : > { %vm557_vm9 = vmor %vm555_vm8, %vm556_vm7 }
 0x1e9   : > { %v551_v29 = vmul.f32 %v745_v27, %v550_v28 }
 0x1eb   : > { %v552_v30 = vmul.f32 0.5, %v551_v29 }
 0x1ed   : > { %v553_v31 = vsub.f32 1.5, %v552_v30 }
 0x1ef   : > { %v554_v32 = vmul.f32 %v745_v27, %v553_v31 }
 0x1f1   : > { %v558_v34 = vsel %vm557_vm9, %v745_v27, %v554_v32 }
 0x1f2   : > { %v559_v36 = vmul.f32 %v558_v34, %v518_v2  ;;  %v560_v37 = vmul.f32 %v558_v34, %v519_v9  ;;  %v561_v38 = vmul.f32 %v558_v34, %v520_v1  ;;  %v562_v39 = vmul.f32 %v558_v34, %v521_v0 }
 0x1f4   : > { %v567_v40 = vmul.f32 %v740_v33, %v559_v36  ;;  %v568_v41 = vmul.f32 %v740_v33, %v560_v37  ;;  %v569_v42 = vmul.f32 %v740_v33, %v561_v38  ;;  %v570_v43 = vmul.f32 %v740_v33, %v562_v39 }
 0x1f6   : > { %v575_v44 = vadd.f32 %v741_v35, %v567_v40  ;;  %v576_v45 = vadd.f32 %v741_v35, %v568_v41  ;;  %v577_v46 = vadd.f32 %v741_v35, %v569_v42  ;;  %v578_v47 = vadd.f32 %v741_v35, %v570_v43 }
 0x1f8   : > { %v583_v48 = vmul.f32 0.044715, %v575_v44  ;;  %v584_v49 = vmul.f32 0.044715, %v576_v45  ;;  %v585_v50 = vmul.f32 0.044715, %v577_v46 }
 0x1f9   : > { %v586_v51 = vmul.f32 0.044715, %v578_v47  ;;  %v579_v6 = vmul.f32 0.5, %v575_v44  ;;  %v580_v9 = vmul.f32 0.5, %v576_v45  ;;  %v581_v12 = vmul.f32 0.5, %v577_v46 }
 0x1fa   : > { %v587_v52 = vmul.f32 %v583_v48, %v575_v44  ;;  %v588_v53 = vmul.f32 %v584_v49, %v576_v45  ;;  %v589_v54 = vmul.f32 %v585_v50, %v577_v46  ;;  %v582_v15 = vmul.f32 0.5, %v578_v47 }
 0x1fb   : > { %v590_v55 = vmul.f32 %v586_v51, %v578_v47 }
 0x1fc   : > { %v591_v56 = vmul.f32 %v587_v52, %v575_v44  ;;  %v592_v57 = vmul.f32 %v588_v53, %v576_v45  ;;  %v593_v58 = vmul.f32 %v589_v54, %v577_v46 }
 0x1fd   : > { %v594_v59 = vmul.f32 %v590_v55, %v578_v47 }
 0x1fe   : > { %v595_v60 = vadd.f32 %v591_v56, %v575_v44  ;;  %v596_v61 = vadd.f32 %v592_v57, %v576_v45  ;;  %v597_v62 = vadd.f32 %v593_v58, %v577_v46 }
 0x1ff   : > { %v598_v63 = vadd.f32 %v594_v59, %v578_v47 }
 0x200   : > { %v599_v0 = vmul.f32 0.7978846, %v595_v60  ;;  %v600_v1 = vmul.f32 0.7978846, %v596_v61  ;;  %v601_v2 = vmul.f32 0.7978846, %v597_v62 }
 0x201   : > { %v602_v3 = vmul.f32 0.7978846, %v598_v63 }
 0x202   : > { %746 = vtanh.f32 %v599_v0 }
 0x203   : > { %748 = vtanh.f32 %v600_v1 }
 0x204   : > { %750 = vtanh.f32 %v601_v2 }
 0x205   : > { %752 = vtanh.f32 %v602_v3 }
 0x208   : > { %v747_v4 = vpop.eup %746 }
 0x209   : > { %v749_v5 = vpop.eup %748  ;;  %v607_v7 = vadd.f32 1.0, %v747_v4 }
 0x20a   : > { %v751_v8 = vpop.eup %750  ;;  %v608_v10 = vadd.f32 1.0, %v749_v5 }
 0x20b   : > { %v753_v11 = vpop.eup %752  ;;  %v609_v14 = vadd.f32 1.0, %v751_v8  ;;  %v611_v13 = vmul.f32 %v607_v7, %v579_v6 }
 0x20c   : > { %v610_v16 = vadd.f32 1.0, %v753_v11  ;;  %v612_v17 = vmul.f32 %v608_v10, %v580_v9 }
 0x20d   : > { %v613_v18 = vmul.f32 %v609_v14, %v581_v12  ;;  %615 = vst.msk [vmem:[%s224_s30] sm:$0xff] %vm488_vm5, %v611_v13 }
 0x20e   : > { %v614_v19 = vmul.f32 %v610_v16, %v582_v15  ;;  %616 = vst.msk [vmem:[%s224_s30 + $0x8] sm:$0xff] %vm488_vm5, %v612_v17 }
 0x20f   : > { %617 = vst.msk [vmem:[%s224_s30 + $0x10] sm:$0xff] %vm488_vm5, %v613_v18 }
 0x210   : > { %618 = vst.msk [vmem:[%s224_s30 + $0x18] sm:$0xff] %vm488_vm5, %v614_v19 }
 0x211 PF: > { %s15_s18 = sadd.s32 1, %s760_s18  }
 0x212   : > { %p12_p4 = scmp.ge.s32.totalorder %s15_s18, 4  }
 0x214   :  { %14 = sbr.rel (!%p12_p4) target bundleno = 1 (0x1), region = 74 }

// kernel: hybrid_conv_unet.41
= control target key start
LH: loop header
LB: loop body
LE: loop exit
PB: predicated region body
PF: predicated region fallthrough
CT: control target
= control target key end

     0   :  { %vm51_vm0 = vcmask 1041408   ;;  %vm38_vm1 = vcmask 31744   ;;  %s547_s2 = inlined_call_operand.vmem [shape: bf16[4,4], index: 2, kind: input, shape index: {}]   ;;  %s548_s0 = inlined_call_operand.vmem [shape: f32[64,4], index: 0, kind: input, shape index: {}]   ;;  %s549_s1 = inlined_call_operand.vmem [shape: bf16[4,4], index: 1, kind: input, shape index: {}]   ;;  %s550_s4 = inlined_call_operand.vmem [shape: f32[1,4], index: 4, kind: input, shape index: {}]   ;;  %s551_s3 = inlined_call_operand.vmem [shape: f32[1,4], index: 3, kind: input, shape index: {}]   ;;  %s552_s5 = inlined_call_operand.vmem [shape: f32[64,4], index: 5, kind: output, shape index: {}]  }
   0x1   :  { %v84_v0 = vld [vmem:[%s547_s2] sm:$0x3]  ;;  %v22_v2 = vld [vmem:[%s548_s0 + $0x8] sm:$0xff]  ;;  %v23_v10 = vld [vmem:[%s548_s0 + $0x10] sm:$0xff] }
   0x2   :  { %v21_v1 = vld [vmem:[%s548_s0] sm:$0xff]  ;;  %v90_v3 = vsel %vm51_vm0, %v84_v0, 0  ;;  %v26_v6 = vld [vmem:[%s548_s0 + $0x28] sm:$0xff]  ;;  %v24_v11 = vld [vmem:[%s548_s0 + $0x18] sm:$0xff] }
   0x3   :  { %v29_v4 = vpack.c.bf16 %v22_v2, %v21_v1  ;;  %v25_v5 = vld [vmem:[%s548_s0 + $0x20] sm:$0xff]  ;;  %99 = vmatpush.bf16.msra.mxu1 %v90_v3  ;;  %310 = vmatpush.bf16.msra.mxu3 %v90_v3  ;;  %v27_v12 = vld [vmem:[%s548_s0 + $0x30] sm:$0xff]  ;;  %v28_v13 = vld [vmem:[%s548_s0 + $0x38] sm:$0xff]  ;;  %v30_v14 = vpack.c.bf16 %v24_v11, %v23_v10 }
   0x4   :  { %v31_v7 = vpack.c.bf16 %v26_v6, %v25_v5  ;;  %v33_v8 = vld [vmem:[%s549_s1] sm:$0x3]  ;;  %v32_v15 = vpack.c.bf16 %v28_v13, %v27_v12 }
   0x5   :  { %v53_v9 = vsel %vm51_vm0, %v33_v8, 0  ;;  %v418_v16 = vld [vmem:[%s550_s4] ss:$0 sm:$0xff] }
   0x6   :  { %297 = vmatmul.msk.bf16.vlgmr.msra.gmra.mxu1 %vm38_vm1, %v29_v4  ;;  %299 = vmatmul.msk.bf16.vlgmr.msra.gmra.mxu3 %vm38_vm1, %v31_v7  ;;  %v433_v40 = vld [vmem:[%s551_s3] ss:$0 sm:$0xff] }
   0x7   :  { %309 = vmatpush.bf16.msra.mxu2 %v53_v9  ;;  %62 = vmatpush.bf16.msra.mxu0 %v53_v9 }
   0xa   :  { %295 = vmatmul.msk.bf16.vlgmr.msra.gmra.mxu2 %vm38_vm1, %v31_v7  ;;  %293 = vmatmul.msk.bf16.vlgmr.msra.gmra.mxu0 %vm38_vm1, %v29_v4 }
  0x16   :  { %298 = vmatmul.msk.bf16.gmra.mxu1 %vm38_vm1, %v30_v14  ;;  %300 = vmatmul.msk.bf16.gmra.mxu3 %vm38_vm1, %v32_v15 }
  0x1a   :  { %296 = vmatmul.msk.bf16.gmra.mxu2 %vm38_vm1, %v32_v15  ;;  %294 = vmatmul.msk.bf16.gmra.mxu0 %vm38_vm1, %v30_v14 }
  0x83   :  { %v101_v17 = vpop.f32.mrf.mxu1 }
  0x84   :  { %v102_v18 = vadd.f32 %v418_v16, %v101_v17 }
  0x86   :  { %v301_v19 = vmul.f32 -1.442695, %v102_v18 }
  0x87   :  { %v64_v37 = vpop.f32.mrf.mxu0 }
  0x88   :  { %313 = vpow2.f32 %v301_v19  ;;  %v65_v48 = vadd.f32 %v433_v40, %v64_v37 }
  0x89   :  { %v111_v20 = vpop.f32.mrf.mxu3 }
  0x8a   :  { %v112_v21 = vadd.f32 %v418_v16, %v111_v20 }
  0x8b   :  { %v103_v22 = vpop.f32.mrf.mxu1 }
  0x8c   :  { %v305_v23 = vmul.f32 -1.442695, %v112_v21  ;;  %v104_v24 = vadd.f32 %v418_v16, %v103_v22 }
  0x8d   :  { %v74_v53 = vpop.f32.mrf.mxu2 }
  0x8e   :  { %v314_v25 = vpop.eup %313  ;;  %315 = vpow2.f32 %v305_v23  ;;  %v302_v26 = vmul.f32 -1.442695, %v104_v24  ;;  %v75_v58 = vadd.f32 %v433_v40, %v74_v53 }
  0x8f   :  { %v145_v27 = vadd.f32 1.0, %v314_v25  ;;  %v66_v5 = vpop.f32.mrf.mxu0 }
  0x90   :  { %317 = vpow2.f32 %v302_v26  ;;  %v67_v15 = vadd.f32 %v433_v40, %v66_v5 }
  0x91   :  { %319 = vrcp.f32 %v145_v27  ;;  %v113_v28 = vpop.f32.mrf.mxu3  ;;  %v162_v43 = vand.u32 2147483647, %v145_v27  ;;  %v164_v44 = vand.u32 2147483648, %v145_v27  ;;  %vm158_vm2 = vweird.f32 %v145_v27 }
  0x92   :  { %v114_v29 = vadd.f32 %v418_v16, %v113_v28 }
  0x93   :  { %v106_v30 = vpop.f32.mrf.mxu1  ;;  %vm441_vm4 = vcmp.eq.f32.partialorder %v162_v43, 8.507059e+37  ;;  %v165_v57 = vor.u32 1.1754944e-38, %v164_v44 }
  0x94   :  { %v316_v31 = vpop.eup %315  ;;  %v306_v32 = vmul.f32 -1.442695, %v114_v29  ;;  %v107_v33 = vadd.f32 %v418_v16, %v106_v30 }
  0x95   :  { %v425_v34 = vadd.f32 1.0, %v316_v31 }
  0x96   :  { %v318_v35 = vpop.eup %317  ;;  %321 = vpow2.f32 %v306_v32  ;;  %v303_v36 = vmul.f32 -1.442695, %v107_v33  ;;  %v76_v33 = vpop.f32.mrf.mxu2 }
  0x97   :  { %v320_v38 = vpop.eup %319  ;;  %323 = vrcp.f32 %v425_v34  ;;  %v428_v39 = vadd.f32 1.0, %v318_v35  ;;  %v222_v1 = vand.u32 2147483647, %v425_v34  ;;  %v224_v2 = vand.u32 2147483648, %v425_v34  ;;  %v69_v44 = vpop.f32.mrf.mxu0 }
  0x98   :  { %325 = vpow2.f32 %v303_v36  ;;  %v154_v41 = vmul.f32 %v320_v38, %v145_v27  ;;  %vm159_vm3 = vweird.f32 %v320_v38  ;;  %vm218_vm7 = vweird.f32 %v425_v34 }
  0x99   :  { %327 = vrcp.f32 %v428_v39  ;;  %v116_v42 = vpop.f32.mrf.mxu3  ;;  %vm160_vm5 = vmor %vm158_vm2, %vm159_vm3  ;;  %v177_v9 = vand.u32 2147483647, %v428_v39  ;;  %vm461_vm8 = vcmp.eq.f32.partialorder %v222_v1, 8.507059e+37  ;;  %v179_v17 = vand.u32 2147483648, %v428_v39 }
  0x9a   :  { %v117_v45 = vadd.f32 %v418_v16, %v116_v42  ;;  %v155_v46 = vsub.f32 1.0, %v154_v41  ;;  %v225_v23 = vor.u32 1.1754944e-38, %v224_v2  ;;  %vm173_vm11 = vweird.f32 %v428_v39 }
  0x9b   :  { %v108_v47 = vpop.f32.mrf.mxu1  ;;  %vm475_vm12 = vcmp.eq.f32.partialorder %v177_v9, 8.507059e+37  ;;  %v180_v32 = vor.u32 1.1754944e-38, %v179_v17  ;;  %v77_v53 = vadd.f32 %v433_v40, %v76_v33 }
  0x9c   :  { %v322_v49 = vpop.eup %321  ;;  %v307_v50 = vmul.f32 -1.442695, %v117_v45  ;;  %v109_v51 = vadd.f32 %v418_v16, %v108_v47  ;;  %v156_v52 = vmul.f32 %v320_v38, %v155_v46 }
  0x9d   :  { %v324_v54 = vpop.eup %323  ;;  %v439_v55 = vadd.f32 1.0, %v322_v49 }
  0x9e   :  { %v326_v59 = vpop.eup %325  ;;  %329 = vpow2.f32 %v307_v50  ;;  %v304_v60 = vmul.f32 -1.442695, %v109_v51  ;;  %v157_v61 = vadd.f32 %v320_v38, %v156_v52  ;;  %v214_v62 = vmul.f32 %v324_v54, %v425_v34 }
  0x9f   :  { %v328_v63 = vpop.eup %327  ;;  %331 = vrcp.f32 %v439_v55  ;;  %v448_v0 = vadd.f32 1.0, %v326_v59  ;;  %vm219_vm6 = vweird.f32 %v324_v54  ;;  %v239_v41 = vand.u32 2147483648, %v439_v55 }
  0xa0   :  { %333 = vpow2.f32 %v304_v60  ;;  %v161_v3 = vsel %vm160_vm5, %v320_v38, %v157_v61  ;;  %v215_v4 = vsub.f32 1.0, %v214_v62  ;;  %v169_v6 = vmul.f32 %v328_v63, %v428_v39  ;;  %vm220_vm10 = vmor %vm218_vm7, %vm219_vm6 }
  0xa1   :  { %335 = vrcp.f32 %v448_v0  ;;  %v166_v7 = vsel %vm441_vm4, %v165_v57, %v161_v3  ;;  %v118_v8 = vpop.f32.mrf.mxu3  ;;  %vm174_vm9 = vweird.f32 %v328_v63  ;;  %v237_v39 = vand.u32 2147483647, %v439_v55 }
  0xa2   :  { %v273_v10 = vmul.f32 %v166_v7, %v65_v48  ;;  %v216_v11 = vmul.f32 %v324_v54, %v215_v4  ;;  %v119_v12 = vadd.f32 %v418_v16, %v118_v8  ;;  %v170_v13 = vsub.f32 1.0, %v169_v6  ;;  %vm175_vm13 = vmor %vm173_vm11, %vm174_vm9  ;;  %v79_v4 = vpop.f32.mrf.mxu2 }
  0xa3   :  { %vm233_vm15 = vweird.f32 %v439_v55  ;;  %v192_v46 = vand.u32 2147483647, %v448_v0  ;;  %v194_v47 = vand.u32 2147483648, %v448_v0  ;;  %vm188_vm0 = vweird.f32 %v448_v0 }
  0xa4   :  { %v330_v18 = vpop.eup %329  ;;  %281 = vst.msk [vmem:[%s552_s5] sm:$0xff] %vm38_vm1, %v273_v10  ;;  %v217_v19 = vadd.f32 %v324_v54, %v216_v11  ;;  %v308_v20 = vmul.f32 -1.442695, %v119_v12  ;;  %v171_v16 = vmul.f32 %v328_v63, %v170_v13  ;;  %vm238_vm4 = vcmp.eq.f32.partialorder %v237_v39, 8.507059e+37  ;;  %v71_v12 = vpop.f32.mrf.mxu0 }
  0xa5   :  { %v332_v21 = vpop.eup %331  ;;  %v471_v22 = vadd.f32 1.0, %v330_v18  ;;  %vm193_vm6 = vcmp.eq.f32.partialorder %v192_v46, 8.507059e+37  ;;  %v195_v61 = vor.u32 1.1754944e-38, %v194_v47  ;;  %v80_v9 = vadd.f32 %v433_v40, %v79_v4 }
  0xa6   :  { %v334_v25 = vpop.eup %333  ;;  %v221_v26 = vsel %vm220_vm10, %v324_v54, %v217_v19  ;;  %337 = vpow2.f32 %v308_v20  ;;  %v172_v27 = vadd.f32 %v328_v63, %v171_v16  ;;  %v229_v28 = vmul.f32 %v332_v21, %v439_v55 }
  0xa7   :  { %v336_v29 = vpop.eup %335  ;;  %339 = vrcp.f32 %v471_v22  ;;  %v481_v30 = vadd.f32 1.0, %v334_v25  ;;  %v226_v31 = vsel %vm461_vm8, %v225_v23, %v221_v26  ;;  %vm234_vm14 = vweird.f32 %v332_v21 }
  0xa8   :  { %v277_v34 = vmul.f32 %v226_v31, %v75_v58  ;;  %v176_v35 = vsel %vm175_vm13, %v328_v63, %v172_v27  ;;  %v230_v36 = vsub.f32 1.0, %v229_v28  ;;  %v184_v37 = vmul.f32 %v336_v29, %v448_v0  ;;  %vm235_vm3 = vmor %vm233_vm15, %vm234_vm14 }
  0xa9   :  { %341 = vrcp.f32 %v481_v30  ;;  %v181_v38 = vsel %vm475_vm12, %v180_v32, %v176_v35  ;;  %vm189_vm2 = vweird.f32 %v336_v29  ;;  %v240_v54 = vor.u32 1.1754944e-38, %v239_v41 }
  0xaa   :  { %285 = vst.msk [vmem:[%s552_s5 + $0x20] sm:$0xff] %vm38_vm1, %v277_v34  ;;  %v274_v42 = vmul.f32 %v181_v38, %v67_v15  ;;  %v231_v43 = vmul.f32 %v332_v21, %v230_v36  ;;  %v185_v45 = vsub.f32 1.0, %v184_v37  ;;  %v70_v55 = vadd.f32 %v433_v40, %v69_v44  ;;  %vm190_vm5 = vmor %vm188_vm0, %vm189_vm2  ;;  %v81_v31 = vpop.f32.mrf.mxu2 }
  0xab   :  { %v252_v5 = vand.u32 2147483647, %v471_v22  ;;  %v254_v6 = vand.u32 2147483648, %v471_v22  ;;  %vm248_vm8 = vweird.f32 %v471_v22  ;;  %v209_v10 = vand.u32 2147483648, %v481_v30 }
  0xac   :  { %v338_v48 = vpop.eup %337  ;;  %282 = vst.msk [vmem:[%s552_s5 + $0x8] sm:$0xff] %vm38_vm1, %v274_v42  ;;  %v232_v49 = vadd.f32 %v332_v21, %v231_v43  ;;  %v186_v50 = vmul.f32 %v336_v29, %v185_v45  ;;  %v207_v14 = vand.u32 2147483647, %v481_v30  ;;  %vm203_vm11 = vweird.f32 %v481_v30 }
  0xad   :  { %v340_v51 = vpop.eup %339  ;;  %v504_v52 = vadd.f32 1.0, %v338_v48  ;;  %v255_v17 = vor.u32 1.1754944e-38, %v254_v6  ;;  %vm253_vm12 = vcmp.eq.f32.partialorder %v252_v5, 8.507059e+37  ;;  %v82_v34 = vadd.f32 %v433_v40, %v81_v31 }
  0xae   :  { %v236_v56 = vsel %vm235_vm3, %v332_v21, %v232_v49  ;;  %v187_v57 = vadd.f32 %v336_v29, %v186_v50  ;;  %v244_v58 = vmul.f32 %v340_v51, %v471_v22  ;;  %vm249_vm7 = vweird.f32 %v340_v51 }
  0xaf   :  { %v342_v59 = vpop.eup %341  ;;  %343 = vrcp.f32 %v504_v52  ;;  %v241_v60 = vsel %vm238_vm4, %v240_v54, %v236_v56  ;;  %vm250_vm10 = vmor %vm248_vm8, %vm249_vm7  ;;  %v72_v21 = vadd.f32 %v433_v40, %v71_v12  ;;  %v210_v22 = vor.u32 1.1754944e-38, %v209_v10 }
  0xb0   :  { %v278_v62 = vmul.f32 %v241_v60, %v77_v53  ;;  %v191_v63 = vsel %vm190_vm5, %v336_v29, %v187_v57  ;;  %v245_v1 = vsub.f32 1.0, %v244_v58  ;;  %v199_v2 = vmul.f32 %v342_v59, %v481_v30 }
  0xb1   :  { %v196_v3 = vsel %vm193_vm6, %v195_v61, %v191_v63  ;;  %vm204_vm9 = vweird.f32 %v342_v59  ;;  %vm208_vm14 = vcmp.eq.f32.partialorder %v207_v14, 8.507059e+37  ;;  %v269_v27 = vand.u32 2147483648, %v504_v52 }
  0xb2   :  { %286 = vst.msk [vmem:[%s552_s5 + $0x28] sm:$0xff] %vm38_vm1, %v278_v62  ;;  %v275_v0 = vmul.f32 %v196_v3, %v70_v55  ;;  %v246_v7 = vmul.f32 %v340_v51, %v245_v1  ;;  %v200_v8 = vsub.f32 1.0, %v199_v2  ;;  %vm205_vm13 = vmor %vm203_vm11, %vm204_vm9  ;;  %v267_v30 = vand.u32 2147483647, %v504_v52 }
  0xb3   :  { %vm263_vm0 = vweird.f32 %v504_v52  ;;  %v270_v33 = vor.u32 1.1754944e-38, %v269_v27 }
  0xb4   :  { %283 = vst.msk [vmem:[%s552_s5 + $0x10] sm:$0xff] %vm38_vm1, %v275_v0  ;;  %v247_v11 = vadd.f32 %v340_v51, %v246_v7  ;;  %v201_v13 = vmul.f32 %v342_v59, %v200_v8  ;;  %vm268_vm3 = vcmp.eq.f32.partialorder %v267_v30, 8.507059e+37 }
  0xb5   :  { %v344_v15 = vpop.eup %343 }
  0xb6   :  { %v251_v18 = vsel %vm250_vm10, %v340_v51, %v247_v11  ;;  %v202_v19 = vadd.f32 %v342_v59, %v201_v13  ;;  %v259_v20 = vmul.f32 %v344_v15, %v504_v52  ;;  %vm264_vm15 = vweird.f32 %v344_v15 }
  0xb7   :  { %v256_v16 = vsel %vm253_vm12, %v255_v17, %v251_v18  ;;  %vm265_vm2 = vmor %vm263_vm0, %vm264_vm15 }
  0xb8   :  { %v279_v23 = vmul.f32 %v256_v16, %v80_v9  ;;  %v206_v24 = vsel %vm205_vm13, %v342_v59, %v202_v19  ;;  %v260_v25 = vsub.f32 1.0, %v259_v20 }
  0xb9   :  { %v211_v26 = vsel %vm208_vm14, %v210_v22, %v206_v24 }
  0xba   :  { %287 = vst.msk [vmem:[%s552_s5 + $0x30] sm:$0xff] %vm38_vm1, %v279_v23  ;;  %v276_v28 = vmul.f32 %v211_v26, %v72_v21  ;;  %v261_v29 = vmul.f32 %v344_v15, %v260_v25 }
  0xbc   :  { %284 = vst.msk [vmem:[%s552_s5 + $0x18] sm:$0xff] %vm38_vm1, %v276_v28  ;;  %v262_v32 = vadd.f32 %v344_v15, %v261_v29 }
  0xbe   :  { %v266_v35 = vsel %vm265_vm2, %v344_v15, %v262_v32 }
  0xbf   :  { %v271_v36 = vsel %vm268_vm3, %v270_v33, %v266_v35 }
  0xc0   :  { %v280_v37 = vmul.f32 %v271_v36, %v82_v34 }
  0xc2   :  { %288 = vst.msk [vmem:[%s552_s5 + $0x38] sm:$0xff] %vm38_vm1, %v280_v37 }

// kernel: hybrid_conv_unet.40
= control target key start
LH: loop header
LB: loop body
LE: loop exit
PB: predicated region body
PF: predicated region fallthrough
CT: control target
= control target key end

     0   :  { %s898_s21 = smov 0   ;;  %s1003_s0 = inlined_call_operand.vmem [shape: f32[2,36,24], index: 0, kind: input, shape index: {}]   ;;  %s1004_s1 = inlined_call_operand.vmem [shape: bf16[5,24,4], index: 1, kind: input, shape index: {}]   ;;  %s1005_s2 = inlined_call_operand.vmem [shape: f32[1,4], index: 2, kind: input, shape index: {}]   ;;  %s1006_s3 = inlined_call_operand.vmem [shape: f32[1,4], index: 3, kind: input, shape index: {}]   ;;  %s1007_s4 = inlined_call_operand.vmem [shape: f32[1,4], index: 4, kind: input, shape index: {}]   ;;  %s1008_s5 = inlined_call_operand.vmem [shape: f32[2,32,4], index: 5, kind: input, shape index: {}]   ;;  %s1009_s6 = inlined_call_operand.vmem [shape: f32[2,32,4], index: 6, kind: output, shape index: {}]  }
   0x1 LB: > { %s766_s22 = sadd.s32 4294967295, %s860_s21   ;;  %p770_p0 = scmp.ge.s32.totalorder %s860_s21, 1  ;;  %s860_s21 = sphi %s898_s21, %s16_s21  }
   0x2   : > { %p222_p1 = scmp.lt.s32.totalorder %s860_s21, 3 }
   0x4   : > { %p223_p2 = pnand %p770_p0, %p222_p1 }
   0x5   : > { %p257_p3 = scmp.lt.s32.totalorder (!%p223_p2), %s766_s22, 1 }
   0x6   : > { %226 = sbr.rel (%p223_p2) target bundleno = 534 (0x216), region = 44 }
   0xb   : > { %v287_v0 = vld [vmem:[%s1004_s1 + $0x8] sm:$0xf]  ;;  %v793_v1 = vld [vmem:[%s1004_s1 + $0x20] sm:$0xf]  ;;  %v802_v4 = vld [vmem:[%s1004_s1 + $0x2c] sm:$0xf] }
   0xc   : > { %v293_v2 = vunpack.c.l.b16 %v287_v0  ;;  %v414_v3 = vunpack.c.l.b16 %v793_v1  ;;  %v784_v5 = vld [vmem:[%s1004_s1 + $0x14] sm:$0xf]  ;;  %vm304_vm0 = vcmask 1043456   ;;  %v473_v6 = vunpack.c.l.b16 %v802_v4  ;;  %s1011_s22 = smov (!%p257_p3, %s766_s22), 1  ;;  %v811_v10 = vld [vmem:[%s1004_s1 + $0x38] sm:$0xf] }
   0xd   : > { %v360_v7 = vunpack.c.l.b16 %v784_v5  ;;  %v524_v13 = vunpack.c.l.b16 %v811_v10  ;;  %s829_s9 = smul.u32 40, %s1011_s22  ;;  %v822_v16 = vld [vmem:[%s1004_s1] sm:$0xff]  ;;  %v824_v19 = vld [vmem:[%s1004_s1 + $0x18] sm:$0xff]  ;;  %vm297_vm1 = vcmask 195584   ;;  %vm403_vm2 = vcmask 1046528   ;;  %v823_v32 = vld [vmem:[%s1004_s1 + $0xc] sm:$0xff] }
   0xe   : > { %v295_v8 = vpack.c.b16 %v293_v2, %v293_v2  ;;  %v416_v9 = vpack.c.b16 %v414_v3, %v414_v3  ;;  %v475_v11 = vpack.c.b16 %v473_v6, %v473_v6  ;;  %v825_v23 = vld [vmem:[%s1004_s1 + $0x24] sm:$0xff]  ;;  %v826_v36 = vld [vmem:[%s1004_s1 + $0x30] sm:$0xff]  ;;  %vm454_vm3 = vsmask.f32 6400  ;;  %s820_s7 = sshll.u32 %s1011_s22, 5 }
   0xf   : > { %v362_v12 = vpack.c.b16 %v360_v7, %v360_v7  ;;  %v526_v18 = vpack.c.b16 %v524_v13, %v524_v13  ;;  %s933_s14 = scalar_lea.vmem %s1003_s0, %s829_s9  ;;  %vm336_vm4 = vsmask.f32 7424  ;;  %vm513_vm5 = vcmask 1045504   ;;  %s266_s10 = scalar_lea.vmem %s1008_s5, %s820_s7 }
  0x10   : > { %v306_v14 = vsel %vm304_vm0, %v295_v8, 0  ;;  %v425_v15 = vsel %vm304_vm0, %v416_v9, 0  ;;  %v484_v17 = vsel %vm304_vm0, %v475_v11, 0  ;;  %v273_v20 = vld [vmem:[%s933_s14] sm:$0xff]  ;;  %v274_v21 = vld [vmem:[%s933_s14 + $0x8] sm:$0xff]  ;;  %v275_v25 = vld [vmem:[%s933_s14 + $0x10] sm:$0xff]  ;;  %s271_s12 = scalar_lea.vmem %s1009_s6, %s820_s7 }
  0x11   : > { %314 = vmatpush.bf16.msra.mxu0 %v306_v14  ;;  %827 = vmatpush.bf16.msra.mxu1 %v306_v14  ;;  %v371_v22 = vsel %vm304_vm0, %v362_v12, 0  ;;  %v283_v24 = vpack.c.bf16 %v274_v21, %v273_v20  ;;  %v276_v26 = vld [vmem:[%s933_s14 + $0x18] sm:$0xff]  ;;  %v535_v27 = vsel %vm304_vm0, %v526_v18, 0  ;;  %v277_v39 = vld [vmem:[%s933_s14 + $0x20] sm:$0xf]  ;;  %vm560_vm6 = vcmask 31744  }
  0x12   : > { %433 = vmatpush.bf16.msra.mxu2 %v425_v15  ;;  %492 = vmatpush.bf16.msra.mxu3 %v484_v17  ;;  %v284_v28 = vpack.c.bf16 %v276_v26, %v275_v25  ;;  %v331_v45 = vpack.c.bf16 %v277_v39, %v277_v39  ;;  %v839_v8 = vld [vmem:[%s1005_s2] ss:$0 sm:$0xff] }
  0x13   : > { %v404_v29 = vrot.slane %v283_v24, 1  ;;  %v337_v30 = vshrl.u32 %v283_v24, 16  ;;  %v339_v31 = vshll.u32 %v283_v24, 16  ;;  %v514_v52 = vrot.slane %v283_v24, 2 }
  0x14   : > { %v405_v33 = vrot.slane %v284_v28, 1  ;;  %v343_v34 = vshll.u32 %v284_v28, 16  ;;  %v347_v35 = vshrl.u32 %v284_v28, 16  ;;  %v351_v48 = vshll.u32 %v331_v45, 16 }
  0x15   : > { %315 = vmatpush.bf16.msra.mxu0 %v822_v16  ;;  %828 = vmatpush.bf16.msra.mxu1 %v822_v16  ;;  %v455_v37 = vrot.slane %v337_v30, 1  ;;  %v456_v38 = vrot.slane %v339_v31, 2  ;;  %v341_v47 = vrot.slane %v339_v31, 1  ;;  %v462_v49 = vshrl.u32 %v331_v45, 16 }
  0x16   : > { %434 = vmatpush.bf16.msra.mxu2 %v824_v19  ;;  %493 = vmatpush.bf16.msra.mxu3 %v825_v23  ;;  %v406_v40 = vsel %vm403_vm2, %v404_v29, %v405_v33  ;;  %v458_v41 = vrot.slane %v347_v35, 1  ;;  %v459_v42 = vrot.slane %v343_v34, 2  ;;  %v345_v51 = vrot.slane %v343_v34, 1 }
  0x17   : > { %v457_v43 = vor.u32 %v456_v38, %v455_v37  ;;  %v342_v50 = vor.u32 %v341_v47, %v337_v30  ;;  %v515_v53 = vrot.slane %v284_v28, 2  ;;  %v407_v54 = vrot.slane %v331_v45, 1 }
  0x18   : > { %780 = vmatmul.msk.bf16.vlgmr.msra.gmra.mxu0 %vm297_vm1, %v283_v24  ;;  %781 = vmatmul.msk.bf16.vlgmr.msra.gmra.mxu1 %vm297_vm1, %v284_v28  ;;  %v460_v44 = vor.u32 %v459_v42, %v458_v41  ;;  %v464_v55 = vrot.slane %v462_v49, 1  ;;  %v465_v56 = vrot.slane %v351_v48, 2  ;;  %v349_v62 = vor.u32 %v347_v35, %v345_v51 }
  0x19   : > { %379 = vmatpush.bf16.msrb.mxu1 %v371_v22  ;;  %543 = vmatpush.bf16.msrb.mxu0 %v535_v27  ;;  %v346_v57 = vsel %vm336_vm4, %v342_v50, %v345_v51  ;;  %v516_v58 = vsel %vm513_vm5, %v514_v52, %v515_v53  ;;  %v408_v59 = vsel %vm403_vm2, %v405_v33, %v407_v54  ;;  %v353_v63 = vrot.slane %v351_v48, 1 }
  0x1a   : > { %798 = vmatmul.msk.bf16.vlgmr.msra.gmra.mxu2 %vm297_vm1, %v406_v40  ;;  %v461_v46 = vsel %vm454_vm3, %v457_v43, %v460_v44  ;;  %v466_v60 = vor.u32 %v465_v56, %v464_v55  ;;  %v517_v0 = vrot.slane %v331_v45, 2  ;;  %v862_v49 = vmov 128.0  }
  0x1b   : > { %807 = vmatmul.msk.bf16.vlgmr.msra.gmra.mxu3 %vm297_vm1, %v461_v46  ;;  %v354_v1 = vsel %vm336_vm4, %v349_v62, %v353_v63  ;;  %842 = vrcp.f32 %v862_v49 }
  0x1c   : > { %v467_v61 = vsel %vm454_vm3, %v460_v44, %v466_v60  ;;  %v518_v2 = vsel %vm513_vm5, %v515_v53, %v517_v0 }
  0x1d   : > { %380 = vmatpush.bf16.msrb.mxu1 %v823_v32  ;;  %544 = vmatpush.bf16.msrb.mxu0 %v826_v36 }
  0x21   : > { %v843_v51 = vpop.eup %842 }
  0x22   : > { %v583_v53 = vmul.f32 128.0, %v843_v51  ;;  %vm587_vm7 = vweird.f32 %v843_v51 }
  0x24   : > { %v584_v56 = vsub.f32 1.0, %v583_v53 }
  0x26   : > { %v585_v60 = vmul.f32 %v843_v51, %v584_v56 }
  0x28   : > { %789 = vmatmul.msk.bf16.vlgmr.msrb.gmra.mxu1 %vm297_vm1, %v346_v57  ;;  %816 = vmatmul.msk.bf16.vlgmr.msrb.gmra.mxu0 %vm297_vm1, %v516_v58  ;;  %v586_v63 = vadd.f32 %v843_v51, %v585_v60 }
  0x2a   : > { %799 = vmatmul.msk.bf16.gmra.mxu2 %vm297_vm1, %v408_v59 }
  0x2b   : > { %808 = vmatmul.msk.bf16.gmra.mxu3 %vm297_vm1, %v467_v61 }
  0x38   : > { %790 = vmatmul.msk.bf16.gmra.mxu1 %vm297_vm1, %v354_v1  ;;  %817 = vmatmul.msk.bf16.gmra.mxu0 %vm297_vm1, %v518_v2  ;;  %v588_v2 = vsel %vm587_vm7, %v843_v51, %v586_v63 }
  0x95   : > { %v317_v3 = vpop.f32.mrf.mxu0  ;;  %v322_v4 = vpop.f32.mrf.mxu1 }
  0x96   : > { %v327_v10 = vadd.f32 %v839_v8, %v317_v3  ;;  %v329_v26 = vadd.f32 %v839_v8, %v322_v4 }
  0x9d   : > { %v319_v5 = vpop.f32.mrf.mxu0  ;;  %v324_v6 = vpop.f32.mrf.mxu1 }
  0x9e   : > { %v436_v7 = vpop.f32.mrf.mxu2  ;;  %v495_v9 = vpop.f32.mrf.mxu3  ;;  %v328_v17 = vadd.f32 %v839_v8, %v319_v5  ;;  %v330_v36 = vadd.f32 %v839_v8, %v324_v6 }
  0xa5   : > { %v382_v11 = vpop.f32.mrf.mxu1  ;;  %v546_v12 = vpop.f32.mrf.mxu0 }
  0xa6   : > { %v392_v13 = vadd.f32 %v382_v11, %v327_v10  ;;  %v438_v16 = vpop.f32.mrf.mxu2  ;;  %v497_v19 = vpop.f32.mrf.mxu3 }
  0xa8   : > { %v446_v14 = vadd.f32 %v436_v7, %v392_v13 }
  0xaa   : > { %v505_v15 = vadd.f32 %v495_v9, %v446_v14 }
  0xac   : > { %v556_v18 = vadd.f32 %v546_v12, %v505_v15 }
  0xad   : > { %v384_v20 = vpop.f32.mrf.mxu1  ;;  %v548_v23 = vpop.f32.mrf.mxu0 }
  0xae   : > { %v393_v21 = vadd.f32 %v384_v20, %v328_v17  ;;  %v561_v22 = vsel %vm560_vm6, %v556_v18, 0.0  ;;  %v441_v28 = vpop.f32.mrf.mxu2  ;;  %v500_v32 = vpop.f32.mrf.mxu3 }
  0xaf   : > { %562 = vadd.xlane.f32.xlu0 %v561_v22 }
  0xb0   : > { %v447_v24 = vadd.f32 %v438_v16, %v393_v21 }
  0xb2   : > { %v506_v25 = vadd.f32 %v497_v19, %v447_v24 }
  0xb4   : > { %v557_v27 = vadd.f32 %v548_v23, %v506_v25 }
  0xb5   : > { %v387_v29 = vpop.f32.mrf.mxu1  ;;  %v551_v34 = vpop.f32.mrf.mxu0 }
  0xb6   : > { %v394_v30 = vadd.f32 %v387_v29, %v329_v26  ;;  %v564_v31 = vsel %vm560_vm6, %v557_v27, 0.0  ;;  %v443_v41 = vpop.f32.mrf.mxu2  ;;  %v502_v43 = vpop.f32.mrf.mxu3 }
  0xb7   : > { %565 = vadd.xlane.f32.xlu0 %v564_v31 }
  0xb8   : > { %v448_v33 = vadd.f32 %v441_v28, %v394_v30 }
  0xba   : > { %v507_v35 = vadd.f32 %v500_v32, %v448_v33 }
  0xbc   : > { %v558_v37 = vadd.f32 %v551_v34, %v507_v35 }
  0xbd   : > { %v389_v38 = vpop.f32.mrf.mxu1  ;;  %v553_v45 = vpop.f32.mrf.mxu0 }
  0xbe   : > { %v395_v39 = vadd.f32 %v389_v38, %v330_v36  ;;  %v567_v40 = vsel %vm560_vm6, %v558_v37, 0.0  ;;  %v840_v38 = vld [vmem:[%s1006_s3] ss:$0 sm:$0xff] }
  0xbf   : > { %568 = vadd.xlane.f32.xlu1 %v567_v40  ;;  %v841_v40 = vld [vmem:[%s1007_s4] ss:$0 sm:$0xff] }
  0xc0   : > { %v449_v42 = vadd.f32 %v443_v41, %v395_v39 }
  0xc2   : > { %v508_v44 = vadd.f32 %v502_v43, %v449_v42 }
  0xc4   : > { %v559_v46 = vadd.f32 %v553_v45, %v508_v44 }
  0xc6   : > { %v570_v47 = vsel %vm560_vm6, %v559_v46, 0.0 }
  0xc7   : > { %571 = vadd.xlane.f32.xlu1 %v570_v47 }
 0x122   : > { %v563_v48 = vpop.xlane.xlu0 %562 }
 0x12a   : > { %v566_v52 = vpop.xlane.xlu0 %565 }
 0x12b   : > { %v573_v54 = vadd.f32 %v566_v52, %v563_v48 }
 0x132   : > { %v569_v50 = vpop.xlane.xlu1 %568 }
 0x133   : > { %v574_v55 = vadd.f32 %v573_v54, %v569_v50 }
 0x13a   : > { %v572_v57 = vpop.xlane.xlu1 %571 }
 0x13b   : > { %v575_v58 = vadd.f32 %v574_v55, %v572_v57 }
 0x13d   : > { %v576_v59 = vrot.slane %v575_v58, 4 }
 0x13f   : > { %v577_v61 = vadd.f32 %v576_v59, %v575_v58 }
 0x141   : > { %v578_v62 = vrot.slane %v577_v61, 2 }
 0x143   : > { %v579_v0 = vadd.f32 %v578_v62, %v577_v61 }
 0x145   : > { %v580_v1 = vrot.slane %v579_v0, 1 }
 0x147   : > { %v581_v3 = vadd.f32 %v580_v1, %v579_v0 }
 0x149   : > { %v589_v4 = vmul.f32 %v588_v2, %v581_v3 }
 0x14b   : > { %v593_v5 = vsub.f32 %v559_v46, %v589_v4  ;;  %v592_v6 = vsub.f32 %v558_v37, %v589_v4  ;;  %v590_v7 = vsub.f32 %v556_v18, %v589_v4  ;;  %v591_v14 = vsub.f32 %v557_v27, %v589_v4 }
 0x14d   : > { %v597_v8 = vmul.f32 %v593_v5, %v593_v5  ;;  %v596_v9 = vmul.f32 %v592_v6, %v592_v6  ;;  %v594_v10 = vmul.f32 %v590_v7, %v590_v7  ;;  %v595_v15 = vmul.f32 %v591_v14, %v591_v14 }
 0x14f   : > { %v607_v11 = vsel %vm560_vm6, %v597_v8, 0.0  ;;  %v604_v12 = vsel %vm560_vm6, %v596_v9, 0.0  ;;  %v598_v13 = vsel %vm560_vm6, %v594_v10, 0.0  ;;  %v601_v16 = vsel %vm560_vm6, %v595_v15, 0.0 }
 0x150   : > { %608 = vadd.xlane.f32.xlu1 %v607_v11  ;;  %605 = vadd.xlane.f32.xlu0 %v604_v12 }
 0x151   : > { %599 = vadd.xlane.f32.xlu2 %v598_v13 }
 0x159   : > { %602 = vadd.xlane.f32.xlu2 %v601_v16 }
 0x1c3   : > { %v606_v20 = vpop.xlane.xlu0 %605  ;;  %v609_v22 = vpop.xlane.xlu1 %608 }
 0x1c4   : > { %v600_v17 = vpop.xlane.xlu2 %599 }
 0x1cc   : > { %v603_v19 = vpop.xlane.xlu2 %602 }
 0x1cd   : > { %v610_v18 = vadd.f32 %v603_v19, %v600_v17  ;;  %v688_v19 = vld [vmem:[%s266_s10 + $0x8] sm:$0xff] }
 0x1cf   : > { %v611_v21 = vadd.f32 %v610_v18, %v606_v20 }
 0x1d1   : > { %v612_v23 = vadd.f32 %v611_v21, %v609_v22  ;;  %v689_v22 = vld [vmem:[%s266_s10 + $0x10] sm:$0xff] }
 0x1d3   : > { %v613_v24 = vrot.slane %v612_v23, 4 }
 0x1d5   : > { %v614_v25 = vadd.f32 %v613_v24, %v612_v23 }
 0x1d7   : > { %v615_v26 = vrot.slane %v614_v25, 2 }
 0x1d9   : > { %v616_v28 = vadd.f32 %v615_v26, %v614_v25  ;;  %v690_v26 = vld [vmem:[%s266_s10 + $0x18] sm:$0xff] }
 0x1db   : > { %v617_v29 = vrot.slane %v616_v28, 1 }
 0x1dd   : > { %v618_v30 = vadd.f32 %v617_v29, %v616_v28 }
 0x1df   : > { %v619_v31 = vmul.f32 %v618_v30, %v588_v2 }
 0x1e1   : > { %v620_v27 = vadd.f32 1e-05, %v619_v31 }
 0x1e3   : > { %844 = vrsqrt.f32 %v620_v27  ;;  %vm627_vm9 = vweird.f32 %v620_v27 }
 0x1e9   : > { %v845_v32 = vpop.eup %844 }
 0x1ea   : > { %v622_v33 = vmul.f32 %v845_v32, %v620_v27  ;;  %vm628_vm8 = vweird.f32 %v845_v32 }
 0x1eb   : > { %vm629_vm10 = vmor %vm627_vm9, %vm628_vm8 }
 0x1ec   : > { %v623_v34 = vmul.f32 %v845_v32, %v622_v33 }
 0x1ee   : > { %v624_v35 = vmul.f32 0.5, %v623_v34 }
 0x1f0   : > { %v625_v36 = vsub.f32 1.5, %v624_v35 }
 0x1f2   : > { %v626_v37 = vmul.f32 %v845_v32, %v625_v36 }
 0x1f4   : > { %v630_v39 = vsel %vm629_vm10, %v845_v32, %v626_v37 }
 0x1f5   : > { %v631_v41 = vmul.f32 %v630_v39, %v590_v7  ;;  %v632_v42 = vmul.f32 %v630_v39, %v591_v14  ;;  %v633_v43 = vmul.f32 %v630_v39, %v592_v6  ;;  %v634_v44 = vmul.f32 %v630_v39, %v593_v5  ;;  %v687_v14 = vld [vmem:[%s266_s10] sm:$0xff] }
 0x1f7   : > { %v639_v45 = vmul.f32 %v840_v38, %v631_v41  ;;  %v640_v46 = vmul.f32 %v840_v38, %v632_v42  ;;  %v641_v47 = vmul.f32 %v840_v38, %v633_v43  ;;  %v642_v48 = vmul.f32 %v840_v38, %v634_v44 }
 0x1f9   : > { %v647_v49 = vadd.f32 %v841_v40, %v639_v45  ;;  %v648_v50 = vadd.f32 %v841_v40, %v640_v46  ;;  %v649_v51 = vadd.f32 %v841_v40, %v641_v47  ;;  %v650_v52 = vadd.f32 %v841_v40, %v642_v48 }
 0x1fb   : > { %v655_v53 = vmul.f32 0.044715, %v647_v49  ;;  %v656_v54 = vmul.f32 0.044715, %v648_v50  ;;  %v657_v55 = vmul.f32 0.044715, %v649_v51 }
 0x1fc   : > { %v658_v56 = vmul.f32 0.044715, %v650_v52  ;;  %v651_v11 = vmul.f32 0.5, %v647_v49  ;;  %v652_v15 = vmul.f32 0.5, %v648_v50  ;;  %v653_v18 = vmul.f32 0.5, %v649_v51 }
 0x1fd   : > { %v659_v57 = vmul.f32 %v655_v53, %v647_v49  ;;  %v660_v58 = vmul.f32 %v656_v54, %v648_v50  ;;  %v661_v59 = vmul.f32 %v657_v55, %v649_v51  ;;  %v654_v23 = vmul.f32 0.5, %v650_v52 }
 0x1fe   : > { %v662_v60 = vmul.f32 %v658_v56, %v650_v52 }
 0x1ff   : > { %v663_v61 = vmul.f32 %v659_v57, %v647_v49  ;;  %v664_v62 = vmul.f32 %v660_v58, %v648_v50  ;;  %v665_v63 = vmul.f32 %v661_v59, %v649_v51 }
 0x200   : > { %v666_v0 = vmul.f32 %v662_v60, %v650_v52 }
 0x201   : > { %v667_v1 = vadd.f32 %v663_v61, %v647_v49  ;;  %v668_v2 = vadd.f32 %v664_v62, %v648_v50  ;;  %v669_v3 = vadd.f32 %v665_v63, %v649_v51 }
 0x202   : > { %v670_v4 = vadd.f32 %v666_v0, %v650_v52 }
 0x203   : > { %v671_v5 = vmul.f32 0.7978846, %v667_v1  ;;  %v672_v6 = vmul.f32 0.7978846, %v668_v2  ;;  %v673_v7 = vmul.f32 0.7978846, %v669_v3 }
 0x204   : > { %v674_v8 = vmul.f32 0.7978846, %v670_v4 }
 0x205   : > { %846 = vtanh.f32 %v671_v5 }
 0x206   : > { %848 = vtanh.f32 %v672_v6 }
 0x207   : > { %850 = vtanh.f32 %v673_v7 }
 0x208   : > { %852 = vtanh.f32 %v674_v8 }
 0x20b   : > { %v847_v9 = vpop.eup %846 }
 0x20c   : > { %v849_v10 = vpop.eup %848  ;;  %v679_v12 = vadd.f32 1.0, %v847_v9 }
 0x20d   : > { %v851_v13 = vpop.eup %850  ;;  %v680_v16 = vadd.f32 1.0, %v849_v10 }
 0x20e   : > { %v853_v17 = vpop.eup %852  ;;  %v681_v20 = vadd.f32 1.0, %v851_v13  ;;  %v683_v21 = vmul.f32 %v679_v12, %v651_v11 }
 0x20f   : > { %v682_v24 = vadd.f32 1.0, %v853_v17  ;;  %v684_v25 = vmul.f32 %v680_v16, %v652_v15 }
 0x210   : > { %v685_v28 = vmul.f32 %v681_v20, %v653_v18  ;;  %v691_v29 = vadd.f32 %v687_v14, %v683_v21 }
 0x211   : > { %v686_v30 = vmul.f32 %v682_v24, %v654_v23  ;;  %v692_v31 = vadd.f32 %v688_v19, %v684_v25 }
 0x212   : > { %v693_v27 = vadd.f32 %v689_v22, %v685_v28  ;;  %695 = vst.msk [vmem:[%s271_s12] sm:$0xff] %vm560_vm6, %v691_v29 }
 0x213   : > { %v694_v32 = vadd.f32 %v690_v26, %v686_v30  ;;  %696 = vst.msk [vmem:[%s271_s12 + $0x8] sm:$0xff] %vm560_vm6, %v692_v31 }
 0x214   : > { %697 = vst.msk [vmem:[%s271_s12 + $0x10] sm:$0xff] %vm560_vm6, %v693_v27 }
 0x215   : > { %698 = vst.msk [vmem:[%s271_s12 + $0x18] sm:$0xff] %vm560_vm6, %v694_v32 }
 0x216 PF: > { %s16_s21 = sadd.s32 1, %s860_s21  }
 0x217   : > { %p13_p4 = scmp.ge.s32.totalorder %s16_s21, 4  }
 0x219   :  { %15 = sbr.rel (!%p13_p4) target bundleno = 1 (0x1), region = 81 }

// kernel: hybrid_conv_unet.42
= control target key start
LH: loop header
LB: loop body
LE: loop exit
PB: predicated region body
PF: predicated region fallthrough
CT: control target
= control target key end

     0   :  { %s327_s9 = smov 0   ;;  %s347_s0 = inlined_call_operand.vmem [shape: f32[4,2,32], index: 0, kind: input, shape index: {}]   ;;  %s348_s1 = inlined_call_operand.vmem [shape: bf16[4,32,32], index: 1, kind: input, shape index: {}]   ;;  %s349_s2 = inlined_call_operand.vmem [shape: f32[4,2,32], index: 2, kind: output, shape index: {}]  }
   0x1 LB: > { %s271_s10 = sadd.s32 4294967295, %s310_s9   ;;  %p275_p0 = scmp.ge.s32.totalorder %s310_s9, 1  ;;  %s310_s9 = sphi %s327_s9, %s12_s9  }
   0x2   : > { %p121_p1 = scmp.lt.s32.totalorder %s310_s9, 5 }
   0x4   : > { %p122_p2 = pnand %p275_p0, %p121_p1 }
   0x5   : > { %p146_p3 = scmp.lt.s32.totalorder (!%p122_p2), %s271_s10, 3 }
   0x6   : > { %125 = sbr.rel (%p122_p2) target bundleno = 170 (0xaa), region = 28 }
   0xb   : > { %s351_s10 = smov (!%p146_p3, %s271_s10), 3  ;;  %vm178_vm0 = vcmask 261120   ;;  %vm204_vm1 = vcmask 254976  }
   0xc   : > { %s291_s11 = sshll.u32 %s351_s10, 4  ;;  %s276_s12 = sshll.u32 %s351_s10, 1 }
   0xd   : > { %s154_s15 = scalar_lea.vmem %s348_s1, %s291_s11  ;;  %s149_s18 = scalar_lea.vmem %s347_s0, %s276_s12 }
   0xe   : > { %v293_v0 = vld [vmem:[%s154_s15 + $0x8] sm:$0xff]  ;;  %v292_v1 = vld [vmem:[%s154_s15] sm:$0xff]  ;;  %s158_s21 = scalar_lea.vmem %s349_s2, %s276_s12 }
   0xf   : > { %188 = vmatpush.bf16.msra.mxu0 %v293_v0  ;;  %v160_v2 = vld [vmem:[%s149_s18] sm:$0x3] }
  0x10   : > { %v161_v3 = vpack.c.bf16 %v160_v2, %v160_v2 }
  0x13   : > { %189 = vmatpush.bf16.msra.mxu0 %v292_v1 }
  0x16   : > { %288 = vmatmul.msk.bf16.vlgmr.msra.gmra.mxu0 %vm178_vm0, %v161_v3 }
  0x93   : > { %v191_v4 = vpop.f32.mrf.mxu0 }
  0x94   : > { %v196_v5 = vmul.f32 0.044715, %v191_v4  ;;  %v195_v12 = vmul.f32 0.5, %v191_v4 }
  0x96   : > { %v197_v6 = vmul.f32 %v196_v5, %v191_v4 }
  0x98   : > { %v198_v7 = vmul.f32 %v197_v6, %v191_v4 }
  0x9a   : > { %v199_v8 = vadd.f32 %v198_v7, %v191_v4 }
  0x9b   : > { %v193_v9 = vpop.f32.mrf.mxu0 }
  0x9c   : > { %v200_v10 = vmul.f32 0.7978846, %v199_v8 }
  0x9e   : > { %302 = vtanh.f32 %v200_v10 }
  0xa4   : > { %v303_v11 = vpop.eup %302 }
  0xa5   : > { %v202_v13 = vadd.f32 1.0, %v303_v11 }
  0xa7   : > { %v203_v14 = vmul.f32 %v202_v13, %v195_v12 }
  0xa9   : > { %205 = vst.msk [vmem:[%s158_s21] sm:$0x3] %vm204_vm1, %v203_v14 }
  0xaa PF: > { %s12_s9 = sadd.s32 1, %s310_s9  }
  0xab   : > { %p9_p4 = scmp.ge.s32.totalorder %s12_s9, 6  }
  0xad   :  { %11 = sbr.rel (!%p9_p4) target bundleno = 1 (0x1), region = 61 }

// kernel: hybrid_conv_unet.43
= control target key start
LH: loop header
LB: loop body
LE: loop exit
PB: predicated region body
PF: predicated region fallthrough
CT: control target
= control target key end

     0   :  { %vm45_vm0 = vcmask 1041408   ;;  %vm32_vm1 = vcmask 31744   ;;  %s184_s1 = inlined_call_operand.vmem [shape: bf16[4,4], index: 1, kind: input, shape index: {}]   ;;  %s185_s0 = inlined_call_operand.vmem [shape: f32[64,4], index: 0, kind: input, shape index: {}]   ;;  %s186_s2 = inlined_call_operand.vmem [shape: f32[1,4], index: 2, kind: input, shape index: {}]   ;;  %s187_s3 = inlined_call_operand.vmem [shape: f32[64,4], index: 3, kind: output, shape index: {}]  }
   0x1   :  { %v27_v0 = vld [vmem:[%s184_s1] sm:$0x3]  ;;  %v16_v2 = vld [vmem:[%s185_s0 + $0x8] sm:$0xff]  ;;  %v17_v5 = vld [vmem:[%s185_s0 + $0x10] sm:$0xff] }
   0x2   :  { %v15_v1 = vld [vmem:[%s185_s0] sm:$0xff]  ;;  %v47_v3 = vsel %vm45_vm0, %v27_v0, 0  ;;  %v18_v6 = vld [vmem:[%s185_s0 + $0x18] sm:$0xff]  ;;  %v20_v9 = vld [vmem:[%s185_s0 + $0x28] sm:$0xff] }
   0x3   :  { %v23_v4 = vpack.c.bf16 %v16_v2, %v15_v1  ;;  %v19_v7 = vld [vmem:[%s185_s0 + $0x20] sm:$0xff]  ;;  %56 = vmatpush.bf16.msra.mxu0 %v47_v3  ;;  %94 = vmatpush.bf16.msra.mxu1 %v47_v3  ;;  %v24_v8 = vpack.c.bf16 %v18_v6, %v17_v5  ;;  %v21_v10 = vld [vmem:[%s185_s0 + $0x30] sm:$0xff]  ;;  %v22_v11 = vld [vmem:[%s185_s0 + $0x38] sm:$0xff] }
   0x4   :  { %95 = vmatpush.bf16.msra.mxu2 %v47_v3  ;;  %96 = vmatpush.bf16.msra.mxu3 %v47_v3  ;;  %v25_v12 = vpack.c.bf16 %v20_v9, %v19_v7  ;;  %v26_v13 = vpack.c.bf16 %v22_v11, %v21_v10  ;;  %v97_v14 = vld [vmem:[%s186_s2] ss:$0 sm:$0xff] }
   0x6   :  { %90 = vmatmul.msk.bf16.vlgmr.msra.gmra.mxu0 %vm32_vm1, %v23_v4  ;;  %91 = vmatmul.msk.bf16.vlgmr.msra.gmra.mxu1 %vm32_vm1, %v24_v8 }
   0x7   :  { %92 = vmatmul.msk.bf16.vlgmr.msra.gmra.mxu2 %vm32_vm1, %v25_v12  ;;  %93 = vmatmul.msk.bf16.vlgmr.msra.gmra.mxu3 %vm32_vm1, %v26_v13 }
  0x83   :  { %v58_v15 = vpop.f32.mrf.mxu0  ;;  %v63_v16 = vpop.f32.mrf.mxu1 }
  0x84   :  { %v59_v17 = vadd.f32 %v97_v14, %v58_v15  ;;  %v64_v18 = vadd.f32 %v97_v14, %v63_v16 }
  0x86   :  { %78 = vst.msk [vmem:[%s187_s3] sm:$0xff] %vm32_vm1, %v59_v17 }
  0x87   :  { %80 = vst.msk [vmem:[%s187_s3 + $0x10] sm:$0xff] %vm32_vm1, %v64_v18 }
  0x8a   :  { %v68_v19 = vpop.f32.mrf.mxu2  ;;  %v73_v20 = vpop.f32.mrf.mxu3 }
  0x8b   :  { %v69_v21 = vadd.f32 %v97_v14, %v68_v19  ;;  %v74_v22 = vadd.f32 %v97_v14, %v73_v20  ;;  %v60_v23 = vpop.f32.mrf.mxu0  ;;  %v65_v24 = vpop.f32.mrf.mxu1 }
  0x8c   :  { %v61_v25 = vadd.f32 %v97_v14, %v60_v23  ;;  %v66_v26 = vadd.f32 %v97_v14, %v65_v24 }
  0x8d   :  { %82 = vst.msk [vmem:[%s187_s3 + $0x20] sm:$0xff] %vm32_vm1, %v69_v21 }
  0x8e   :  { %84 = vst.msk [vmem:[%s187_s3 + $0x30] sm:$0xff] %vm32_vm1, %v74_v22 }
  0x8f   :  { %79 = vst.msk [vmem:[%s187_s3 + $0x8] sm:$0xff] %vm32_vm1, %v61_v25 }
  0x90   :  { %81 = vst.msk [vmem:[%s187_s3 + $0x18] sm:$0xff] %vm32_vm1, %v66_v26 }
  0x92   :  { %v70_v27 = vpop.f32.mrf.mxu2  ;;  %v75_v28 = vpop.f32.mrf.mxu3 }
  0x93   :  { %v71_v29 = vadd.f32 %v97_v14, %v70_v27  ;;  %v76_v30 = vadd.f32 %v97_v14, %v75_v28 }
  0x95   :  { %83 = vst.msk [vmem:[%s187_s3 + $0x28] sm:$0xff] %vm32_vm1, %v71_v29 }
  0x96   :  { %85 = vst.msk [vmem:[%s187_s3 + $0x38] sm:$0xff] %vm32_vm1, %v76_v30 }

// kernel: hybrid_conv_unet.44
= control target key start
LH: loop header
LB: loop body
LE: loop exit
PB: predicated region body
PF: predicated region fallthrough
CT: control target
= control target key end

     0   :  { %vm45_vm0 = vcmask 1041408   ;;  %vm32_vm1 = vcmask 31744   ;;  %s293_s1 = inlined_call_operand.vmem [shape: bf16[4,4], index: 1, kind: input, shape index: {}]   ;;  %s294_s0 = inlined_call_operand.vmem [shape: f32[64,4], index: 0, kind: input, shape index: {}]   ;;  %s295_s2 = inlined_call_operand.vmem [shape: f32[1,4], index: 2, kind: input, shape index: {}]   ;;  %s296_s3 = inlined_call_operand.vmem [shape: f32[64,4], index: 3, kind: output, shape index: {}]  }
   0x1   :  { %v27_v0 = vld [vmem:[%s293_s1] sm:$0x3]  ;;  %v16_v2 = vld [vmem:[%s294_s0 + $0x8] sm:$0xff]  ;;  %v17_v5 = vld [vmem:[%s294_s0 + $0x10] sm:$0xff] }
   0x2   :  { %v15_v1 = vld [vmem:[%s294_s0] sm:$0xff]  ;;  %v47_v3 = vsel %vm45_vm0, %v27_v0, 0  ;;  %v18_v6 = vld [vmem:[%s294_s0 + $0x18] sm:$0xff]  ;;  %v20_v9 = vld [vmem:[%s294_s0 + $0x28] sm:$0xff] }
   0x3   :  { %v23_v4 = vpack.c.bf16 %v16_v2, %v15_v1  ;;  %v19_v7 = vld [vmem:[%s294_s0 + $0x20] sm:$0xff]  ;;  %56 = vmatpush.bf16.msra.mxu0 %v47_v3  ;;  %166 = vmatpush.bf16.msra.mxu1 %v47_v3  ;;  %v24_v8 = vpack.c.bf16 %v18_v6, %v17_v5  ;;  %v21_v10 = vld [vmem:[%s294_s0 + $0x30] sm:$0xff]  ;;  %v22_v11 = vld [vmem:[%s294_s0 + $0x38] sm:$0xff] }
   0x4   :  { %167 = vmatpush.bf16.msra.mxu2 %v47_v3  ;;  %168 = vmatpush.bf16.msra.mxu3 %v47_v3  ;;  %v25_v12 = vpack.c.bf16 %v20_v9, %v19_v7  ;;  %v26_v13 = vpack.c.bf16 %v22_v11, %v21_v10  ;;  %v169_v14 = vld [vmem:[%s295_s2] ss:$0 sm:$0xff] }
   0x6   :  { %162 = vmatmul.msk.bf16.vlgmr.msra.gmra.mxu0 %vm32_vm1, %v23_v4  ;;  %163 = vmatmul.msk.bf16.vlgmr.msra.gmra.mxu1 %vm32_vm1, %v24_v8 }
   0x7   :  { %164 = vmatmul.msk.bf16.vlgmr.msra.gmra.mxu2 %vm32_vm1, %v25_v12  ;;  %165 = vmatmul.msk.bf16.vlgmr.msra.gmra.mxu3 %vm32_vm1, %v26_v13 }
  0x83   :  { %v58_v15 = vpop.f32.mrf.mxu0  ;;  %v63_v16 = vpop.f32.mrf.mxu1 }
  0x84   :  { %v59_v17 = vadd.f32 %v169_v14, %v58_v15  ;;  %v64_v18 = vadd.f32 %v169_v14, %v63_v16 }
  0x86   :  { %v86_v19 = vmul.f32 0.044715, %v59_v17  ;;  %v88_v20 = vmul.f32 0.044715, %v64_v18  ;;  %v78_v59 = vmul.f32 0.5, %v59_v17  ;;  %v80_v1 = vmul.f32 0.5, %v64_v18 }
  0x88   :  { %v94_v21 = vmul.f32 %v86_v19, %v59_v17  ;;  %v96_v22 = vmul.f32 %v88_v20, %v64_v18 }
  0x8a   :  { %v102_v23 = vmul.f32 %v94_v21, %v59_v17  ;;  %v104_v24 = vmul.f32 %v96_v22, %v64_v18  ;;  %v68_v25 = vpop.f32.mrf.mxu2  ;;  %v73_v26 = vpop.f32.mrf.mxu3 }
  0x8b   :  { %v69_v27 = vadd.f32 %v169_v14, %v68_v25  ;;  %v240_v28 = vadd.f32 %v169_v14, %v73_v26  ;;  %v60_v29 = vpop.f32.mrf.mxu0  ;;  %v65_v30 = vpop.f32.mrf.mxu1 }
  0x8c   :  { %v110_v31 = vadd.f32 %v102_v23, %v59_v17  ;;  %v112_v32 = vadd.f32 %v104_v24, %v64_v18  ;;  %v242_v33 = vadd.f32 %v169_v14, %v60_v29  ;;  %v244_v34 = vadd.f32 %v169_v14, %v65_v30 }
  0x8d   :  { %v90_v35 = vmul.f32 0.044715, %v69_v27  ;;  %v92_v36 = vmul.f32 0.044715, %v240_v28  ;;  %v82_v15 = vmul.f32 0.5, %v69_v27  ;;  %v84_v19 = vmul.f32 0.5, %v240_v28 }
  0x8e   :  { %v118_v37 = vmul.f32 0.7978846, %v110_v31  ;;  %v120_v38 = vmul.f32 0.7978846, %v112_v32  ;;  %v87_v41 = vmul.f32 0.044715, %v242_v33 }
  0x8f   :  { %v98_v39 = vmul.f32 %v90_v35, %v69_v27  ;;  %v100_v40 = vmul.f32 %v92_v36, %v240_v28  ;;  %v89_v42 = vmul.f32 0.044715, %v244_v34  ;;  %v79_v24 = vmul.f32 0.5, %v242_v33 }
  0x90   :  { %170 = vtanh.f32 %v118_v37  ;;  %v95_v45 = vmul.f32 %v87_v41, %v242_v33  ;;  %v81_v29 = vmul.f32 0.5, %v244_v34 }
  0x91   :  { %172 = vtanh.f32 %v120_v38  ;;  %v106_v43 = vmul.f32 %v98_v39, %v69_v27  ;;  %v108_v44 = vmul.f32 %v100_v40, %v240_v28  ;;  %v97_v46 = vmul.f32 %v89_v42, %v244_v34 }
  0x92   :  { %v70_v47 = vpop.f32.mrf.mxu2  ;;  %v75_v48 = vpop.f32.mrf.mxu3  ;;  %v103_v51 = vmul.f32 %v95_v45, %v242_v33 }
  0x93   :  { %v114_v49 = vadd.f32 %v106_v43, %v69_v27  ;;  %v116_v50 = vadd.f32 %v108_v44, %v240_v28  ;;  %v71_v52 = vadd.f32 %v169_v14, %v70_v47  ;;  %v105_v53 = vmul.f32 %v97_v46, %v244_v34 }
  0x94   :  { %v76_v54 = vadd.f32 %v169_v14, %v75_v48  ;;  %v111_v57 = vadd.f32 %v103_v51, %v242_v33 }
  0x95   :  { %v122_v55 = vmul.f32 0.7978846, %v114_v49  ;;  %v124_v56 = vmul.f32 0.7978846, %v116_v50  ;;  %v113_v60 = vadd.f32 %v105_v53, %v244_v34  ;;  %v91_v61 = vmul.f32 0.044715, %v71_v52 }
  0x96   :  { %v171_v58 = vpop.eup %170  ;;  %v93_v62 = vmul.f32 0.044715, %v76_v54  ;;  %v119_v2 = vmul.f32 0.7978846, %v111_v57  ;;  %v83_v33 = vmul.f32 0.5, %v71_v52  ;;  %v85_v35 = vmul.f32 0.5, %v76_v54 }
  0x97   :  { %v173_v63 = vpop.eup %172  ;;  %v134_v0 = vadd.f32 1.0, %v171_v58  ;;  %174 = vtanh.f32 %v122_v55  ;;  %v121_v4 = vmul.f32 0.7978846, %v113_v60  ;;  %v99_v5 = vmul.f32 %v91_v61, %v71_v52 }
  0x98   :  { %v136_v3 = vadd.f32 1.0, %v173_v63  ;;  %176 = vtanh.f32 %v124_v56  ;;  %v101_v7 = vmul.f32 %v93_v62, %v76_v54 }
  0x99   :  { %v142_v6 = vmul.f32 %v134_v0, %v78_v59  ;;  %178 = vtanh.f32 %v119_v2  ;;  %v107_v9 = vmul.f32 %v99_v5, %v71_v52 }
  0x9a   :  { %v144_v8 = vmul.f32 %v136_v3, %v80_v1  ;;  %180 = vtanh.f32 %v121_v4  ;;  %v109_v10 = vmul.f32 %v101_v7, %v76_v54 }
  0x9b   :  { %150 = vst.msk [vmem:[%s296_s3] sm:$0xff] %vm32_vm1, %v142_v6  ;;  %v115_v11 = vadd.f32 %v107_v9, %v71_v52 }
  0x9c   :  { %152 = vst.msk [vmem:[%s296_s3 + $0x10] sm:$0xff] %vm32_vm1, %v144_v8  ;;  %v117_v13 = vadd.f32 %v109_v10, %v76_v54 }
  0x9d   :  { %v175_v12 = vpop.eup %174  ;;  %v123_v17 = vmul.f32 0.7978846, %v115_v11 }
  0x9e   :  { %v177_v14 = vpop.eup %176  ;;  %v138_v16 = vadd.f32 1.0, %v175_v12  ;;  %v125_v21 = vmul.f32 0.7978846, %v117_v13 }
  0x9f   :  { %v179_v18 = vpop.eup %178  ;;  %v140_v20 = vadd.f32 1.0, %v177_v14  ;;  %182 = vtanh.f32 %v123_v17 }
  0xa0   :  { %v181_v22 = vpop.eup %180  ;;  %v146_v23 = vmul.f32 %v138_v16, %v82_v15  ;;  %v135_v25 = vadd.f32 1.0, %v179_v18  ;;  %184 = vtanh.f32 %v125_v21 }
  0xa1   :  { %v148_v26 = vmul.f32 %v140_v20, %v84_v19  ;;  %v137_v30 = vadd.f32 1.0, %v181_v22 }
  0xa2   :  { %154 = vst.msk [vmem:[%s296_s3 + $0x20] sm:$0xff] %vm32_vm1, %v146_v23  ;;  %v143_v27 = vmul.f32 %v135_v25, %v79_v24 }
  0xa3   :  { %156 = vst.msk [vmem:[%s296_s3 + $0x30] sm:$0xff] %vm32_vm1, %v148_v26  ;;  %v145_v28 = vmul.f32 %v137_v30, %v81_v29 }
  0xa4   :  { %151 = vst.msk [vmem:[%s296_s3 + $0x8] sm:$0xff] %vm32_vm1, %v143_v27 }
  0xa5   :  { %153 = vst.msk [vmem:[%s296_s3 + $0x18] sm:$0xff] %vm32_vm1, %v145_v28  ;;  %v183_v31 = vpop.eup %182 }
  0xa6   :  { %v185_v32 = vpop.eup %184  ;;  %v139_v34 = vadd.f32 1.0, %v183_v31 }
  0xa7   :  { %v141_v36 = vadd.f32 1.0, %v185_v32 }
  0xa8   :  { %v147_v37 = vmul.f32 %v139_v34, %v83_v33 }
  0xa9   :  { %v149_v38 = vmul.f32 %v141_v36, %v85_v35 }
  0xaa   :  { %155 = vst.msk [vmem:[%s296_s3 + $0x28] sm:$0xff] %vm32_vm1, %v147_v37 }
  0xab   :  { %157 = vst.msk [vmem:[%s296_s3 + $0x38] sm:$0xff] %vm32_vm1, %v149_v38 }

// kernel: hybrid_conv_unet.45
= control target key start
LH: loop header
LB: loop body
LE: loop exit
PB: predicated region body
PF: predicated region fallthrough
CT: control target
= control target key end

     0   :  { %vm41_vm0 = vcmask 31744   ;;  %v282_v32 = vmov 4.0   ;;  %s523_s0 = inlined_call_operand.vmem [shape: f32[64,4], index: 0, kind: input, shape index: {}]   ;;  %s524_s1 = inlined_call_operand.vmem [shape: f32[64,4], index: 1, kind: input, shape index: {}]   ;;  %s525_s2 = inlined_call_operand.vmem [shape: f32[1,4], index: 2, kind: input, shape index: {}]   ;;  %s526_s3 = inlined_call_operand.vmem [shape: f32[1,4], index: 3, kind: input, shape index: {}]   ;;  %s527_s4 = inlined_call_operand.vmem [shape: f32[64,4], index: 4, kind: output, shape index: {}]  }
   0x1   :  { %v21_v0 = vld [vmem:[%s523_s0 + $0x20] sm:$0xff]  ;;  %v19_v2 = vld [vmem:[%s523_s0 + $0x10] sm:$0xff]  ;;  %v22_v9 = vld [vmem:[%s523_s0 + $0x28] sm:$0xff]  ;;  %264 = vrcp.f32 %v282_v32 }
   0x2   :  { %v29_v1 = vld [vmem:[%s524_s1 + $0x20] sm:$0xff]  ;;  %v27_v4 = vld [vmem:[%s524_s1 + $0x10] sm:$0xff]  ;;  %v30_v10 = vld [vmem:[%s524_s1 + $0x28] sm:$0xff] }
   0x3   :  { %v317_v3 = vadd.f32 %v29_v1, %v21_v0  ;;  %v17_v5 = vld [vmem:[%s523_s0] sm:$0xff]  ;;  %v35_v7 = vadd.f32 %v27_v4, %v19_v2  ;;  %v20_v11 = vld [vmem:[%s523_s0 + $0x18] sm:$0xff]  ;;  %v18_v14 = vld [vmem:[%s523_s0 + $0x8] sm:$0xff]  ;;  %v38_v18 = vadd.f32 %v30_v10, %v22_v9 }
   0x4   :  { %v25_v6 = vld [vmem:[%s524_s1] sm:$0xff]  ;;  %v28_v13 = vld [vmem:[%s524_s1 + $0x18] sm:$0xff]  ;;  %v26_v15 = vld [vmem:[%s524_s1 + $0x8] sm:$0xff] }
   0x5   :  { %v33_v8 = vadd.f32 %v25_v6, %v17_v5  ;;  %v54_v12 = vsel %vm41_vm0, %v317_v3, 0.0  ;;  %v48_v16 = vsel %vm41_vm0, %v35_v7, 0.0  ;;  %v36_v19 = vadd.f32 %v28_v13, %v20_v11  ;;  %v23_v24 = vld [vmem:[%s523_s0 + $0x30] sm:$0xff]  ;;  %v24_v26 = vld [vmem:[%s523_s0 + $0x38] sm:$0xff] }
   0x6   :  { %55 = vadd.xlane.f32.xlu2 %v54_v12  ;;  %49 = vadd.xlane.f32.xlu1 %v48_v16  ;;  %v34_v20 = vadd.f32 %v26_v15, %v18_v14  ;;  %v57_v21 = vsel %vm41_vm0, %v38_v18, 0.0  ;;  %v31_v25 = vld [vmem:[%s524_s1 + $0x30] sm:$0xff]  ;;  %v32_v27 = vld [vmem:[%s524_s1 + $0x38] sm:$0xff] }
   0x7   :  { %v42_v17 = vsel %vm41_vm0, %v33_v8, 0.0  ;;  %v51_v22 = vsel %vm41_vm0, %v36_v19, 0.0  ;;  %v39_v28 = vadd.f32 %v31_v25, %v23_v24  ;;  %v40_v29 = vadd.f32 %v32_v27, %v24_v26  ;;  %v265_v33 = vpop.eup %264 }
   0x8   :  { %43 = vadd.xlane.f32.xlu0 %v42_v17  ;;  %v45_v23 = vsel %vm41_vm0, %v34_v20, 0.0  ;;  %v67_v34 = vmul.f32 4.0, %v265_v33  ;;  %vm71_vm1 = vweird.f32 %v265_v33 }
   0x9   :  { %v60_v30 = vsel %vm41_vm0, %v39_v28, 0.0  ;;  %v63_v31 = vsel %vm41_vm0, %v40_v29, 0.0 }
   0xa   :  { %v68_v35 = vsub.f32 1.0, %v67_v34 }
   0xc   :  { %v69_v36 = vmul.f32 %v265_v33, %v68_v35 }
   0xe   :  { %58 = vadd.xlane.f32.xlu2 %v57_v21  ;;  %52 = vadd.xlane.f32.xlu1 %v51_v22  ;;  %v70_v37 = vadd.f32 %v265_v33, %v69_v36 }
  0x10   :  { %46 = vadd.xlane.f32.xlu0 %v45_v23  ;;  %v367_v38 = vsel %vm71_vm1, %v265_v33, %v70_v37 }
  0x16   :  { %64 = vadd.xlane.f32.xlu1 %v63_v31 }
  0x18   :  { %61 = vadd.xlane.f32.xlu0 %v60_v30 }
  0x79   :  { %v56_v39 = vpop.xlane.xlu2 %55  ;;  %v50_v40 = vpop.xlane.xlu1 %49 }
  0x7a   :  { %v75_v42 = vmul.f32 %v367_v38, %v50_v40  ;;  %v77_v56 = vmul.f32 %v367_v38, %v56_v39 }
  0x7b   :  { %v44_v41 = vpop.xlane.xlu0 %43 }
  0x7c   :  { %v73_v43 = vmul.f32 %v367_v38, %v44_v41  ;;  %v371_v44 = vsub.f32 %v35_v7, %v75_v42  ;;  %v398_v63 = vsub.f32 %v317_v3, %v77_v56 }
  0x7e   :  { %v373_v45 = vsub.f32 %v33_v8, %v73_v43  ;;  %v91_v46 = vmul.f32 %v371_v44, %v371_v44  ;;  %v93_v8 = vmul.f32 %v398_v63, %v398_v63 }
  0x80   :  { %v89_v47 = vmul.f32 %v373_v45, %v373_v45  ;;  %v103_v49 = vsel %vm41_vm0, %v91_v46, 0.0  ;;  %v109_v11 = vsel %vm41_vm0, %v93_v8, 0.0 }
  0x81   :  { %v59_v48 = vpop.xlane.xlu2 %58  ;;  %104 = vadd.xlane.f32.xlu1 %v103_v49  ;;  %v53_v52 = vpop.xlane.xlu1 %52 }
  0x82   :  { %v97_v50 = vsel %vm41_vm0, %v89_v47, 0.0  ;;  %v78_v51 = vmul.f32 %v367_v38, %v59_v48  ;;  %v76_v54 = vmul.f32 %v367_v38, %v53_v52 }
  0x83   :  { %98 = vadd.xlane.f32.xlu2 %v97_v50  ;;  %v47_v53 = vpop.xlane.xlu0 %46 }
  0x84   :  { %v74_v55 = vmul.f32 %v367_v38, %v47_v53  ;;  %v385_v57 = vsub.f32 %v38_v18, %v78_v51  ;;  %v387_v58 = vsub.f32 %v36_v19, %v76_v54  ;;  %v438_v54 = vld [vmem:[%s525_s2] ss:$0 sm:$0xff] }
  0x86   :  { %v389_v59 = vsub.f32 %v34_v20, %v74_v55  ;;  %v94_v60 = vmul.f32 %v385_v57, %v385_v57  ;;  %v92_v61 = vmul.f32 %v387_v58, %v387_v58 }
  0x88   :  { %v90_v62 = vmul.f32 %v389_v59, %v389_v59  ;;  %v112_v0 = vsel %vm41_vm0, %v94_v60, 0.0  ;;  %v106_v1 = vsel %vm41_vm0, %v92_v61, 0.0 }
  0x89   :  { %113 = vadd.xlane.f32.xlu1 %v112_v0  ;;  %v65_v5 = vpop.xlane.xlu1 %64  ;;  %v446_v0 = vld [vmem:[%s526_s3] ss:$0 sm:$0xff] }
  0x8a   :  { %v100_v2 = vsel %vm41_vm0, %v90_v62, 0.0  ;;  %v80_v7 = vmul.f32 %v367_v38, %v65_v5 }
  0x8b   :  { %107 = vadd.xlane.f32.xlu2 %v106_v1  ;;  %v62_v4 = vpop.xlane.xlu0 %61  ;;  %101 = vadd.xlane.f32.xlu0 %v100_v2 }
  0x8c   :  { %v79_v6 = vmul.f32 %v367_v38, %v62_v4  ;;  %v411_v10 = vsub.f32 %v40_v29, %v80_v7 }
  0x8e   :  { %v407_v3 = vsub.f32 %v39_v28, %v79_v6  ;;  %v96_v13 = vmul.f32 %v411_v10, %v411_v10 }
  0x90   :  { %v95_v9 = vmul.f32 %v407_v3, %v407_v3  ;;  %v118_v14 = vsel %vm41_vm0, %v96_v13, 0.0 }
  0x92   :  { %v115_v12 = vsel %vm41_vm0, %v95_v9, 0.0 }
  0x93   :  { %116 = vadd.xlane.f32.xlu2 %v115_v12  ;;  %110 = vadd.xlane.f32.xlu0 %v109_v11 }
  0x9b   :  { %119 = vadd.xlane.f32.xlu0 %v118_v14 }
  0xf4   :  { %v105_v15 = vpop.xlane.xlu1 %104 }
  0xf5   :  { %v123_v17 = vmul.f32 %v105_v15, %v367_v38 }
  0xf6   :  { %v99_v16 = vpop.xlane.xlu2 %98 }
  0xf7   :  { %v121_v18 = vmul.f32 %v99_v16, %v367_v38  ;;  %v131_v19 = vadd.f32 1e-05, %v123_v17 }
  0xf9   :  { %v129_v20 = vadd.f32 1e-05, %v121_v18  ;;  %266 = vrsqrt.f32 %v131_v19  ;;  %vm163_vm2 = vweird.f32 %v131_v19 }
  0xfb   :  { %268 = vrsqrt.f32 %v129_v20  ;;  %vm143_vm6 = vweird.f32 %v129_v20 }
  0xfc   :  { %v114_v21 = vpop.xlane.xlu1 %113 }
  0xfd   :  { %v126_v23 = vmul.f32 %v114_v21, %v367_v38 }
  0xfe   :  { %v108_v22 = vpop.xlane.xlu2 %107  ;;  %v102_v25 = vpop.xlane.xlu0 %101 }
  0xff   :  { %v124_v24 = vmul.f32 %v108_v22, %v367_v38  ;;  %v122_v26 = vmul.f32 %v102_v25, %v367_v38  ;;  %v267_v27 = vpop.eup %266  ;;  %v134_v28 = vadd.f32 1e-05, %v126_v23 }
 0x100   :  { %v158_v31 = vmul.f32 %v267_v27, %v131_v19  ;;  %vm164_vm3 = vweird.f32 %v267_v27 }
 0x101   :  { %v423_v29 = vadd.f32 1e-05, %v124_v24  ;;  %v269_v30 = vpop.eup %268  ;;  %v425_v32 = vadd.f32 1e-05, %v122_v26  ;;  %270 = vrsqrt.f32 %v134_v28  ;;  %vm165_vm5 = vmor %vm163_vm2, %vm164_vm3  ;;  %vm193_vm8 = vweird.f32 %v134_v28 }
 0x102   :  { %v138_v33 = vmul.f32 %v269_v30, %v129_v20  ;;  %v159_v34 = vmul.f32 %v267_v27, %v158_v31  ;;  %vm144_vm4 = vweird.f32 %v269_v30 }
 0x103   :  { %272 = vrsqrt.f32 %v423_v29  ;;  %vm145_vm7 = vmor %vm143_vm6, %vm144_vm4  ;;  %vm173_vm10 = vweird.f32 %v423_v29  ;;  %vm153_vm15 = vweird.f32 %v425_v32 }
 0x104   :  { %v139_v35 = vmul.f32 %v269_v30, %v138_v33  ;;  %274 = vrsqrt.f32 %v425_v32  ;;  %v160_v36 = vmul.f32 0.5, %v159_v34 }
 0x106   :  { %v117_v37 = vpop.xlane.xlu2 %116  ;;  %v140_v39 = vmul.f32 0.5, %v139_v35  ;;  %v111_v41 = vpop.xlane.xlu0 %110  ;;  %v161_v42 = vsub.f32 1.5, %v160_v36 }
 0x107   :  { %v127_v40 = vmul.f32 %v117_v37, %v367_v38  ;;  %v125_v43 = vmul.f32 %v111_v41, %v367_v38  ;;  %v271_v46 = vpop.eup %270 }
 0x108   :  { %v141_v47 = vsub.f32 1.5, %v140_v39  ;;  %v162_v50 = vmul.f32 %v267_v27, %v161_v42  ;;  %v188_v51 = vmul.f32 %v271_v46, %v134_v28  ;;  %vm194_vm9 = vweird.f32 %v271_v46 }
 0x109   :  { %v431_v48 = vadd.f32 1e-05, %v127_v40  ;;  %v273_v49 = vpop.eup %272  ;;  %v433_v52 = vadd.f32 1e-05, %v125_v43  ;;  %vm458_vm11 = vmor %vm193_vm8, %vm194_vm9 }
 0x10a   :  { %v275_v53 = vpop.eup %274  ;;  %v142_v55 = vmul.f32 %v269_v30, %v141_v47  ;;  %v168_v56 = vmul.f32 %v273_v49, %v423_v29  ;;  %v166_v60 = vsel %vm165_vm5, %v267_v27, %v162_v50  ;;  %v189_v61 = vmul.f32 %v271_v46, %v188_v51 }
 0x10b   :  { %276 = vrsqrt.f32 %v431_v48  ;;  %v148_v62 = vmul.f32 %v275_v53, %v425_v32  ;;  %v219_v1 = vmul.f32 %v166_v60, %v371_v44  ;;  %vm174_vm12 = vweird.f32 %v273_v49 }
 0x10c   :  { %v146_v2 = vsel %vm145_vm7, %v269_v30, %v142_v55  ;;  %v169_v4 = vmul.f32 %v273_v49, %v168_v56  ;;  %v190_v6 = vmul.f32 0.5, %v189_v61  ;;  %278 = vrsqrt.f32 %v433_v52  ;;  %vm175_vm14 = vmor %vm173_vm10, %vm174_vm12 }
 0x10d   :  { %v217_v5 = vmul.f32 %v146_v2, %v373_v45  ;;  %v149_v7 = vmul.f32 %v275_v53, %v148_v62  ;;  %v231_v8 = vmul.f32 %v438_v54, %v219_v1  ;;  %vm154_vm13 = vweird.f32 %v275_v53 }
 0x10e   :  { %v170_v9 = vmul.f32 0.5, %v169_v4  ;;  %v120_v11 = vpop.xlane.xlu0 %119  ;;  %v191_v13 = vsub.f32 1.5, %v190_v6  ;;  %vm155_vm1 = vmor %vm153_vm15, %vm154_vm13  ;;  %vm203_vm2 = vweird.f32 %v431_v48  ;;  %vm183_vm6 = vweird.f32 %v433_v52 }
 0x10f   :  { %v229_v12 = vmul.f32 %v438_v54, %v217_v5  ;;  %v150_v14 = vmul.f32 0.5, %v149_v7  ;;  %v128_v44 = vmul.f32 %v120_v11, %v367_v38  ;;  %v243_v16 = vadd.f32 %v446_v0, %v231_v8 }
 0x110   :  { %v171_v17 = vsub.f32 1.5, %v170_v9  ;;  %v192_v19 = vmul.f32 %v271_v46, %v191_v13 }
 0x111   :  { %v277_v15 = vpop.eup %276  ;;  %v241_v18 = vadd.f32 %v446_v0, %v229_v12  ;;  %v151_v20 = vsub.f32 1.5, %v150_v14  ;;  %251 = vst.msk [vmem:[%s527_s4 + $0x10] sm:$0xff] %vm41_vm0, %v243_v16  ;;  %v136_v22 = vadd.f32 1e-05, %v128_v44 }
 0x112   :  { %v198_v21 = vmul.f32 %v277_v15, %v431_v48  ;;  %v172_v38 = vmul.f32 %v273_v49, %v171_v17  ;;  %v279_v23 = vpop.eup %278  ;;  %v196_v24 = vsel %vm458_vm11, %v271_v46, %v192_v19  ;;  %vm204_vm3 = vweird.f32 %v277_v15 }
 0x113   :  { %249 = vst.msk [vmem:[%s527_s4] sm:$0xff] %vm41_vm0, %v241_v18  ;;  %v152_v25 = vmul.f32 %v275_v53, %v151_v20  ;;  %v222_v27 = vmul.f32 %v196_v24, %v385_v57  ;;  %v178_v30 = vmul.f32 %v279_v23, %v433_v52  ;;  %280 = vrsqrt.f32 %v136_v22  ;;  %vm205_vm4 = vmor %vm203_vm2, %vm204_vm3 }
 0x114   :  { %v199_v26 = vmul.f32 %v277_v15, %v198_v21  ;;  %v176_v28 = vsel %vm175_vm14, %v273_v49, %v172_v38  ;;  %vm184_vm5 = vweird.f32 %v279_v23  ;;  %vm213_vm9 = vweird.f32 %v136_v22 }
 0x115   :  { %v220_v31 = vmul.f32 %v176_v28, %v387_v58  ;;  %v156_v33 = vsel %vm155_vm1, %v275_v53, %v152_v25  ;;  %v234_v35 = vmul.f32 %v438_v54, %v222_v27  ;;  %v179_v36 = vmul.f32 %v279_v23, %v178_v30  ;;  %vm185_vm7 = vmor %vm183_vm6, %vm184_vm5 }
 0x116   :  { %v200_v34 = vmul.f32 0.5, %v199_v26  ;;  %v218_v29 = vmul.f32 %v156_v33, %v389_v59 }
 0x117   :  { %v232_v32 = vmul.f32 %v438_v54, %v220_v31  ;;  %v246_v57 = vadd.f32 %v446_v0, %v234_v35  ;;  %v180_v40 = vmul.f32 0.5, %v179_v36 }
 0x118   :  { %v201_v37 = vsub.f32 1.5, %v200_v34  ;;  %v230_v39 = vmul.f32 %v438_v54, %v218_v29 }
 0x119   :  { %v244_v58 = vadd.f32 %v446_v0, %v232_v32  ;;  %254 = vst.msk [vmem:[%s527_s4 + $0x28] sm:$0xff] %vm41_vm0, %v246_v57  ;;  %v181_v42 = vsub.f32 1.5, %v180_v40  ;;  %v281_v43 = vpop.eup %280 }
 0x11a   :  { %v202_v41 = vmul.f32 %v277_v15, %v201_v37  ;;  %v242_v59 = vadd.f32 %v446_v0, %v230_v39  ;;  %v208_v49 = vmul.f32 %v281_v43, %v136_v22  ;;  %vm214_vm8 = vweird.f32 %v281_v43 }
 0x11b   :  { %252 = vst.msk [vmem:[%s527_s4 + $0x18] sm:$0xff] %vm41_vm0, %v244_v58  ;;  %v182_v48 = vmul.f32 %v279_v23, %v181_v42  ;;  %vm215_vm10 = vmor %vm213_vm9, %vm214_vm8 }
 0x11c   :  { %v206_v46 = vsel %vm205_vm4, %v277_v15, %v202_v41  ;;  %250 = vst.msk [vmem:[%s527_s4 + $0x8] sm:$0xff] %vm41_vm0, %v242_v59  ;;  %v209_v53 = vmul.f32 %v281_v43, %v208_v49 }
 0x11d   :  { %v223_v47 = vmul.f32 %v206_v46, %v407_v3  ;;  %v186_v51 = vsel %vm185_vm7, %v279_v23, %v182_v48 }
 0x11e   :  { %v221_v55 = vmul.f32 %v186_v51, %v398_v63  ;;  %v210_v60 = vmul.f32 0.5, %v209_v53 }
 0x11f   :  { %v235_v50 = vmul.f32 %v438_v54, %v223_v47 }
 0x120   :  { %v233_v61 = vmul.f32 %v438_v54, %v221_v55  ;;  %v211_v3 = vsub.f32 1.5, %v210_v60 }
 0x121   :  { %v247_v56 = vadd.f32 %v446_v0, %v235_v50 }
 0x122   :  { %v245_v52 = vadd.f32 %v446_v0, %v233_v61  ;;  %v212_v62 = vmul.f32 %v281_v43, %v211_v3 }
 0x123   :  { %255 = vst.msk [vmem:[%s527_s4 + $0x30] sm:$0xff] %vm41_vm0, %v247_v56 }
 0x124   :  { %253 = vst.msk [vmem:[%s527_s4 + $0x20] sm:$0xff] %vm41_vm0, %v245_v52  ;;  %v216_v63 = vsel %vm215_vm10, %v281_v43, %v212_v62 }
 0x125   :  { %v224_v1 = vmul.f32 %v216_v63, %v411_v10 }
 0x127   :  { %v236_v2 = vmul.f32 %v438_v54, %v224_v1 }
 0x129   :  { %v248_v4 = vadd.f32 %v446_v0, %v236_v2 }
 0x12b   :  { %256 = vst.msk [vmem:[%s527_s4 + $0x38] sm:$0xff] %vm41_vm0, %v248_v4 }

</bundles_post_ra>
